<compile_context>
chip_gen: v7x
topology: tpu7x:2x2x1
jax: 0.10.0
libtpu: 0.0.40
codegen_flags: <defaults>
</compile_context>

<pallas_src>
import jax
import jax.numpy as jnp
from jax.experimental import pallas as pl
from jax.experimental.pallas import tpu as pltpu


# ---------------------------------------------------------------------------
# Encoder kernels: Conv1d(k=3, 'same') + bias + tanh + MaxPool1d(2, 2)
# (pool before tanh/bias: tanh monotone, per-channel bias commutes with max)
# ---------------------------------------------------------------------------
def _enc_mxu_kernel(x_ref, w_ref, b_ref, o_ref):
    # x_ref: (1, L, Cin) bf16 ; w_ref: (3*Cin, Cout) bf16 ; b_ref: (1, Cout) f32
    # o_ref: (1, L//2, Cout) bf16
    _, L, Cin = x_ref.shape
    Cout = w_ref.shape[-1]
    x = x_ref[0]                                       # (L, Cin)
    z = jnp.zeros((1, Cin), x.dtype)
    xm1 = jnp.concatenate([z, x[:L - 1]], axis=0)      # x[i-1] (zero halo)
    xp1 = jnp.concatenate([x[1:], z], axis=0)          # x[i+1] (zero halo)
    xs = jnp.concatenate([xm1, x, xp1], axis=1)        # im2col: (L, 3*Cin)
    acc = jnp.dot(xs, w_ref[...], preferred_element_type=jnp.float32)  # (L, Cout)
    pooled = jnp.max(acc.reshape(L // 2, 2, Cout), axis=1)             # MaxPool1d(2,2)
    o_ref[0] = jnp.tanh(pooled + b_ref[...]).astype(o_ref.dtype)


def _enc_vpu_kernel(x_ref, w_ref, b_ref, o_ref):
    # Cin == 1 layer: pure VPU broadcast multiply-add (a K=1 matmul would
    # waste the MXU).  x_ref: (1, L, 1) f32 ; w_ref: (3, Cout) f32
    _, L, _ = x_ref.shape
    Cout = w_ref.shape[-1]
    x = x_ref[0]                                       # (L, 1)
    z = jnp.zeros((1, 1), x.dtype)
    xm1 = jnp.concatenate([z, x[:L - 1]], axis=0)
    xp1 = jnp.concatenate([x[1:], z], axis=0)
    w0 = w_ref[0:1, :]
    w1 = w_ref[1:2, :]
    w2 = w_ref[2:3, :]
    acc = xm1 * w0 + x * w1 + xp1 * w2                 # (L, Cout) on the VPU
    pooled = jnp.max(acc.reshape(L // 2, 2, Cout), axis=1)
    o_ref[0] = jnp.tanh(pooled + b_ref[...]).astype(o_ref.dtype)


def enc_layer(x, w, b):
    # x: (B, L, Cin) ; w: (3, Cin, Cout) f32 ; b: (1, Cout) f32
    # returns (B, L//2, Cout) bf16
    B, L, Cin = x.shape
    Cout = w.shape[-1]
    Lh = L // 2
    if Cin == 1:
        kernel = _enc_vpu_kernel
        w_arg = w[:, 0, :]                                        # (3, Cout) f32
        x_arg = x.astype(jnp.float32)
    else:
        kernel = _enc_mxu_kernel
        w_arg = w.reshape(3 * Cin, Cout).astype(jnp.bfloat16)     # im2col weights
        x_arg = x.astype(jnp.bfloat16)
    return pl.pallas_call(
        kernel,
        out_shape=jax.ShapeDtypeStruct((B, Lh, Cout), jnp.bfloat16),
        grid=(B,),
        in_specs=[
            pl.BlockSpec((1, L, Cin), lambda i: (i, 0, 0)),
            pl.BlockSpec(w_arg.shape, lambda i: (0, 0)),
            pl.BlockSpec((1, Cout), lambda i: (0, 0)),
        ],
        out_specs=pl.BlockSpec((1, Lh, Cout), lambda i: (i, 0, 0)),
        compiler_params=pltpu.CompilerParams(
            dimension_semantics=("parallel",),
            vmem_limit_bytes=32 * 1024 * 1024,
        ),
        cost_estimate=pl.CostEstimate(
            flops=int(2 * B * L * 3 * Cin * Cout),
            transcendentals=int(B * Lh * Cout),
            bytes_accessed=int(x_arg.size * x_arg.dtype.itemsize
                               + w_arg.size * w_arg.dtype.itemsize
                               + b.size * 4 + B * Lh * Cout * 2),
        ),
    )(x_arg, w_arg, b)


# ---------------------------------------------------------------------------
# Decoder kernels: ConvTranspose1d(k=3, stride=2) + bias + tanh
#   Lout = 2*Lin + 1 ; out[2j] = x[j]@W0 + x[j-1]@W2 + b ; out[2j+1] = x[j]@W1 + b
# Even/odd interleave is done in-kernel so the output is written once in its
# final (B, Lout, Cout) layout (no wrapper scatters / concats).
# ---------------------------------------------------------------------------
def _dec_mxu_kernel(x_ref, w_ref, b_ref, o_ref):
    # x_ref: (1, Lin, Cin) bf16 ; w_ref: (Cin, 3*Cout) bf16 [w0|w1|w2]
    # b_ref: (1, Cout) f32 ; o_ref: (1, 2*Lin+1, Cout) bf16
    _, Lin, _ = x_ref.shape
    Cout = b_ref.shape[-1]
    x = x_ref[0]
    A = jnp.dot(x, w_ref[...], preferred_element_type=jnp.float32)    # (Lin, 3*Cout)
    a0 = A[:, 0:Cout]
    a1 = A[:, Cout:2 * Cout]
    a2 = A[:, 2 * Cout:3 * Cout]
    b = b_ref[...]
    z = jnp.zeros((1, Cout), jnp.float32)
    a2s = jnp.concatenate([z, a2[:Lin - 1]], axis=0)                   # a2[j-1]
    even = jnp.tanh(a0 + a2s + b)                                      # out[2j]
    odd = jnp.tanh(a1 + b)                                             # out[2j+1]
    last = jnp.tanh(a2[Lin - 1:Lin] + b)                               # out[2*Lin]
    inter = jnp.concatenate([even[:, None, :], odd[:, None, :]],
                            axis=1).reshape(2 * Lin, Cout)
    o_ref[0, 0:2 * Lin, :] = inter.astype(o_ref.dtype)
    o_ref[0, 2 * Lin:2 * Lin + 1, :] = last.astype(o_ref.dtype)


def _dec_vpu_kernel(x_ref, w_ref, b_ref, o_ref):
    # Cout == 1 layer: VPU multiply + lane reduction (an N=1 matmul would
    # waste the MXU).  x_ref: (1, Lin, Cin) bf16 ; w_ref: (3, Cin) f32
    # b_ref: (1, 1) f32 ; o_ref: (1, 2*Lin+1, 1) f32
    # NOTE: output stays (Lout, 1); the wrapper's NCL transpose only moves the
    # size-1 axis so it is free.
    _, Lin, _ = x_ref.shape
    x = x_ref[0].astype(jnp.float32)                                   # (Lin, Cin)
    a0 = jnp.sum(x * w_ref[0:1, :], axis=-1, keepdims=True)            # (Lin, 1)
    a1 = jnp.sum(x * w_ref[1:2, :], axis=-1, keepdims=True)
    a2 = jnp.sum(x * w_ref[2:3, :], axis=-1, keepdims=True)
    b = b_ref[...]
    z = jnp.zeros((1, 1), jnp.float32)
    a2s = jnp.concatenate([z, a2[:Lin - 1]], axis=0)
    even = jnp.tanh(a0 + a2s + b)
    odd = jnp.tanh(a1 + b)
    last = jnp.tanh(a2[Lin - 1:Lin] + b)
    inter = jnp.concatenate([even[:, None, :], odd[:, None, :]],
                            axis=1).reshape(2 * Lin, 1)
    o_ref[0, 0:2 * Lin, :] = inter
    o_ref[0, 2 * Lin:2 * Lin + 1, :] = last


def dec_layer(x, w, b):
    # x: (B, Lin, Cin) ; w: (3, Cin, Cout) f32 ; b: (1, Cout) f32
    # returns (B, 2*Lin+1, Cout)
    B, Lin, Cin = x.shape
    Cout = w.shape[-1]
    Lout = 2 * Lin + 1
    if Cout == 1:
        kernel = _dec_vpu_kernel
        w_arg = w[:, :, 0]                                             # (3, Cin) f32
        out_dtype = jnp.float32
    else:
        kernel = _dec_mxu_kernel
        # Pack the 3 taps along N so one matmul produces [a0 | a1 | a2].
        w_arg = jnp.transpose(w, (1, 0, 2)).reshape(Cin, 3 * Cout).astype(jnp.bfloat16)
        out_dtype = jnp.bfloat16
    x_arg = x.astype(jnp.bfloat16)
    return pl.pallas_call(
        kernel,
        out_shape=jax.ShapeDtypeStruct((B, Lout, Cout), out_dtype),
        grid=(B,),
        in_specs=[
            pl.BlockSpec((1, Lin, Cin), lambda i: (i, 0, 0)),
            pl.BlockSpec(w_arg.shape, lambda i: (0, 0)),
            pl.BlockSpec(b.shape, lambda i: (0, 0)),
        ],
        out_specs=pl.BlockSpec((1, Lout, Cout), lambda i: (i, 0, 0)),
        compiler_params=pltpu.CompilerParams(
            dimension_semantics=("parallel",),
            vmem_limit_bytes=32 * 1024 * 1024,
        ),
        cost_estimate=pl.CostEstimate(
            flops=int(2 * B * Lin * Cin * 3 * Cout),
            transcendentals=int(B * Lout * Cout),
            bytes_accessed=int(x_arg.size * x_arg.dtype.itemsize
                               + w_arg.size * w_arg.dtype.itemsize
                               + b.size * 4 + B * Lout * Cout * 2),
        ),
    )(x_arg, w_arg, b)


# ---------------------------------------------------------------------------
# Parameters (deterministic, PyTorch-default-style uniform init)
# ---------------------------------------------------------------------------
_ENC_CH = [(1, 32), (32, 64), (64, 128), (128, 256), (256, 512)]
_DEC_CH = [(512, 256), (256, 128), (128, 64), (64, 32), (32, 1)]


def init_params(key):
    params = {"enc": [], "dec": []}
    for name, chans in (("enc", _ENC_CH), ("dec", _DEC_CH)):
        for cin, cout in chans:
            key, kw, kb = jax.random.split(key, 3)
            bound = 1.0 / float(cin * 3) ** 0.5
            w = jax.random.uniform(kw, (3, cin, cout), jnp.float32, -bound, bound)
            b = jax.random.uniform(kb, (1, cout), jnp.float32, -bound, bound)
            params[name].append((w, b))
    return params


# ---------------------------------------------------------------------------
# Forward pass (mirrors CAE1D.forward)
# ---------------------------------------------------------------------------
def cae1d_forward(params, data_ncl):
    # data_ncl: (B, 1, L) PyTorch NCL layout.
    x = jnp.transpose(data_ncl, (0, 2, 1)).astype(jnp.float32)   # -> (B, L, 1) (free)
    # encoder: 5 x [conv(k3,'same') + tanh + maxpool(2,2)]
    for w, b in params["enc"]:
        x = enc_layer(x, w, b)
    # decoder: 5 x [conv_transpose(k3, stride2) + tanh]
    for w, b in params["dec"]:
        x = dec_layer(x, w, b)
    # Trim: x[:, :, :8000] in NCL == slice the length axis (clamping slice).
    x = x[:, :8000, :]
    return jnp.transpose(x, (0, 2, 1))                           # -> (B, 1, Lout) (free)


if __name__ == "__main__":
    key = jax.random.PRNGKey(0)
    pkey, dkey = jax.random.split(key)
    params = init_params(pkey)

    B, L = 2, 128                       # small stand-in for the 8000-sample signal
    data = jax.random.normal(dkey, (B, 1, L), jnp.float32)

    out = jax.jit(cae1d_forward)(params, data)
    out = jax.block_until_ready(out)

    # encoder: 128 -> 4 ; decoder: 4 -> 9 -> 19 -> 39 -> 79 -> 159 ; trim no-op
    assert out.shape == (B, 1, 159), out.shape
    assert bool(jnp.all(jnp.isfinite(out)))
    print("KERNEL_OK")
</pallas_src>

<mosaic_0001>
module attributes {stable_mosaic.version = 11 : i64} {
  func.func @_enc_vpu_kernel(%arg0: i32, %arg1: memref<1x128x1xf32, #tpu.memory_space<vmem>>, %arg2: memref<3x32xf32, #tpu.memory_space<vmem>>, %arg3: memref<1x32xf32, #tpu.memory_space<vmem>>, %arg4: memref<1x64x32xbf16, #tpu.memory_space<vmem>>) attributes {dimension_semantics = [#tpu.dimension_semantics<parallel>], iteration_bounds = array<i64: 2>, scalar_prefetch = 0 : i64, scratch_operands = 0 : i64, tpu.core_type = #tpu.core_type<tc>, window_params = [{transform_indices = @transform_0, window_bounds = array<i64: 1, 128, 1>}, {pipeline_mode = #tpu.pipeline_mode<synchronous>, transform_indices = @transform_1, window_bounds = array<i64: 3, 32>}, {pipeline_mode = #tpu.pipeline_mode<synchronous>, transform_indices = @transform_2, window_bounds = array<i64: 1, 32>}, {transform_indices = @transform_3, window_bounds = array<i64: 1, 64, 32>}]} {
    %c0 = arith.constant 0 : index
    %c0_0 = arith.constant 0 : index
    %c0_1 = arith.constant 0 : index
    %0 = vector.load %arg1[%c0, %c0_0, %c0_1] : memref<1x128x1xf32, #tpu.memory_space<vmem>>, vector<1x128x1xf32>
    %1 = vector.shape_cast %0 : vector<1x128x1xf32> to vector<128x1xf32>
    %cst = arith.constant 0.000000e+00 : f32
    %2 = vector.broadcast %cst : f32 to vector<1x1xf32>
    %3 = vector.extract_strided_slice %1 {offsets = [0, 0], sizes = [127, 1], strides = [1, 1]} : vector<128x1xf32> to vector<127x1xf32>
    %4 = tpu.concatenate %2, %3 in 0 : vector<1x1xf32>, vector<127x1xf32> -> vector<128x1xf32>
    %5 = vector.extract_strided_slice %1 {offsets = [1, 0], sizes = [127, 1], strides = [1, 1]} : vector<128x1xf32> to vector<127x1xf32>
    %6 = tpu.concatenate %5, %2 in 0 : vector<127x1xf32>, vector<1x1xf32> -> vector<128x1xf32>
    %c0_2 = arith.constant 0 : index
    %c0_3 = arith.constant 0 : index
    %7 = vector.load %arg2[%c0_2, %c0_3] : memref<3x32xf32, #tpu.memory_space<vmem>>, vector<1x32xf32>
    %c1 = arith.constant 1 : index
    %c0_4 = arith.constant 0 : index
    %8 = vector.load %arg2[%c1, %c0_4] : memref<3x32xf32, #tpu.memory_space<vmem>>, vector<1x32xf32>
    %c2 = arith.constant 2 : index
    %c0_5 = arith.constant 0 : index
    %9 = vector.load %arg2[%c2, %c0_5] : memref<3x32xf32, #tpu.memory_space<vmem>>, vector<1x32xf32>
    %10 = vector.broadcast %4 : vector<128x1xf32> to vector<128x32xf32>
    %11 = vector.broadcast %7 : vector<1x32xf32> to vector<128x32xf32>
    %12 = arith.mulf %10, %11 : vector<128x32xf32>
    %13 = vector.broadcast %1 : vector<128x1xf32> to vector<128x32xf32>
    %14 = vector.broadcast %8 : vector<1x32xf32> to vector<128x32xf32>
    %15 = arith.mulf %13, %14 : vector<128x32xf32>
    %16 = arith.addf %12, %15 : vector<128x32xf32>
    %17 = vector.broadcast %6 : vector<128x1xf32> to vector<128x32xf32>
    %18 = vector.broadcast %9 : vector<1x32xf32> to vector<128x32xf32>
    %19 = arith.mulf %17, %18 : vector<128x32xf32>
    %20 = arith.addf %16, %19 : vector<128x32xf32>
    %21 = vector.shape_cast %20 : vector<128x32xf32> to vector<64x2x32xf32>
    %cst_6 = arith.constant dense<0xFF800000> : vector<64x32xf32>
    %22 = vector.multi_reduction <maximumf>, %21, %cst_6 [1] : vector<64x2x32xf32> to vector<64x32xf32>
    %c0_7 = arith.constant 0 : index
    %c0_8 = arith.constant 0 : index
    %23 = vector.load %arg3[%c0_7, %c0_8] : memref<1x32xf32, #tpu.memory_space<vmem>>, vector<1x32xf32>
    %24 = vector.broadcast %23 : vector<1x32xf32> to vector<64x32xf32>
    %25 = arith.addf %22, %24 : vector<64x32xf32>
    %26 = math.tanh %25 : vector<64x32xf32>
    %27 = arith.truncf %26 : vector<64x32xf32> to vector<64x32xbf16>
    %c0_9 = arith.constant 0 : index
    %c0_10 = arith.constant 0 : index
    %c0_11 = arith.constant 0 : index
    %28 = vector.load %arg4[%c0_9, %c0_10, %c0_11] : memref<1x64x32xbf16, #tpu.memory_space<vmem>>, vector<1x64x32xbf16>
    %29 = vector.shape_cast %28 : vector<1x64x32xbf16> to vector<64x32xbf16>
    %30 = vector.shape_cast %27 : vector<64x32xbf16> to vector<1x64x32xbf16>
    tpu.vector_store %arg4[%c0_9, %c0_10, %c0_11], %30 {strides = array<i32>} : memref<1x64x32xbf16, #tpu.memory_space<vmem>>, vector<1x64x32xbf16>,
    return
  }
  func.func @transform_0(%arg0: i32) -> (i32, i32, i32) {
    %c0_i32 = arith.constant 0 : i32
    %c0_i32_0 = arith.constant 0 : i32
    %c0_i32_1 = arith.constant 0 : i32
    return %arg0, %c0_i32, %c0_i32_0 : i32, i32, i32
  }
  func.func @transform_1(%arg0: i32) -> (i32, i32) {
    %c0_i32 = arith.constant 0 : i32
    %c0_i32_0 = arith.constant 0 : i32
    %c0_i32_1 = arith.constant 0 : i32
    return %c0_i32, %c0_i32_0 : i32, i32
  }
  func.func @transform_2(%arg0: i32) -> (i32, i32) {
    %c0_i32 = arith.constant 0 : i32
    %c0_i32_0 = arith.constant 0 : i32
    %c0_i32_1 = arith.constant 0 : i32
    return %c0_i32, %c0_i32_0 : i32, i32
  }
  func.func @transform_3(%arg0: i32) -> (i32, i32, i32) {
    %c0_i32 = arith.constant 0 : i32
    %c0_i32_0 = arith.constant 0 : i32
    %c0_i32_1 = arith.constant 0 : i32
    return %arg0, %c0_i32, %c0_i32_0 : i32, i32, i32
  }
}

module attributes {stable_mosaic.version = 11 : i64} {
  func.func @_enc_mxu_kernel(%arg0: i32, %arg1: memref<1x32x64xbf16, #tpu.memory_space<vmem>>, %arg2: memref<192x128xbf16, #tpu.memory_space<vmem>>, %arg3: memref<1x128xf32, #tpu.memory_space<vmem>>, %arg4: memref<1x16x128xbf16, #tpu.memory_space<vmem>>) attributes {dimension_semantics = [#tpu.dimension_semantics<parallel>], iteration_bounds = array<i64: 2>, scalar_prefetch = 0 : i64, scratch_operands = 0 : i64, tpu.core_type = #tpu.core_type<tc>, window_params = [{transform_indices = @transform_0, window_bounds = array<i64: 1, 32, 64>}, {pipeline_mode = #tpu.pipeline_mode<synchronous>, transform_indices = @transform_1, window_bounds = array<i64: 192, 128>}, {pipeline_mode = #tpu.pipeline_mode<synchronous>, transform_indices = @transform_2, window_bounds = array<i64: 1, 128>}, {transform_indices = @transform_3, window_bounds = array<i64: 1, 16, 128>}]} {
    %c0 = arith.constant 0 : index
    %c0_0 = arith.constant 0 : index
    %c0_1 = arith.constant 0 : index
    %0 = vector.load %arg1[%c0, %c0_0, %c0_1] : memref<1x32x64xbf16, #tpu.memory_space<vmem>>, vector<1x32x64xbf16>
    %1 = vector.shape_cast %0 : vector<1x32x64xbf16> to vector<32x64xbf16>
    %cst = arith.constant 0.000000e+00 : bf16
    %2 = vector.broadcast %cst : bf16 to vector<1x64xbf16>
    %3 = vector.extract_strided_slice %1 {offsets = [0, 0], sizes = [31, 64], strides = [1, 1]} : vector<32x64xbf16> to vector<31x64xbf16>
    %4 = tpu.concatenate %2, %3 in 0 : vector<1x64xbf16>, vector<31x64xbf16> -> vector<32x64xbf16>
    %5 = vector.extract_strided_slice %1 {offsets = [1, 0], sizes = [31, 64], strides = [1, 1]} : vector<32x64xbf16> to vector<31x64xbf16>
    %6 = tpu.concatenate %5, %2 in 0 : vector<31x64xbf16>, vector<1x64xbf16> -> vector<32x64xbf16>
    %7 = tpu.concatenate %4, %1, %6 in 1 : vector<32x64xbf16>, vector<32x64xbf16>, vector<32x64xbf16> -> vector<32x192xbf16>
    %c0_2 = arith.constant 0 : index
    %c0_3 = arith.constant 0 : index
    %8 = vector.load %arg2[%c0_2, %c0_3] : memref<192x128xbf16, #tpu.memory_space<vmem>>, vector<192x128xbf16>
    %cst_4 = arith.constant dense<0.000000e+00> : vector<32x128xf32>
    %9 = tpu.matmul %7, %8, %cst_4 {dimension_numbers = #tpu.dot_dimension_numbers<[1], [0], [0], [1], [0, 0, 1, 1], [], []>} : vector<32x192xbf16>, vector<192x128xbf16>, vector<32x128xf32> -> vector<32x128xf32>
    %10 = vector.shape_cast %9 : vector<32x128xf32> to vector<16x2x128xf32>
    %cst_5 = arith.constant dense<0xFF800000> : vector<16x128xf32>
    %11 = vector.multi_reduction <maximumf>, %10, %cst_5 [1] : vector<16x2x128xf32> to vector<16x128xf32>
    %c0_6 = arith.constant 0 : index
    %c0_7 = arith.constant 0 : index
    %12 = vector.load %arg3[%c0_6, %c0_7] : memref<1x128xf32, #tpu.memory_space<vmem>>, vector<1x128xf32>
    %13 = vector.broadcast %12 : vector<1x128xf32> to vector<16x128xf32>
    %14 = arith.addf %11, %13 : vector<16x128xf32>
    %15 = math.tanh %14 : vector<16x128xf32>
    %16 = arith.truncf %15 : vector<16x128xf32> to vector<16x128xbf16>
    %c0_8 = arith.constant 0 : index
    %c0_9 = arith.constant 0 : index
    %c0_10 = arith.constant 0 : index
    %17 = vector.load %arg4[%c0_8, %c0_9, %c0_10] : memref<1x16x128xbf16, #tpu.memory_space<vmem>>, vector<1x16x128xbf16>
    %18 = vector.shape_cast %17 : vector<1x16x128xbf16> to vector<16x128xbf16>
    %19 = vector.shape_cast %16 : vector<16x128xbf16> to vector<1x16x128xbf16>
    tpu.vector_store %arg4[%c0_8, %c0_9, %c0_10], %19 {strides = array<i32>} : memref<1x16x128xbf16, #tpu.memory_space<vmem>>, vector<1x16x128xbf16>,
    return
  }
  func.func @transform_0(%arg0: i32) -> (i32, i32, i32) {
    %c0_i32 = arith.constant 0 : i32
    %c0_i32_0 = arith.constant 0 : i32
    %c0_i32_1 = arith.constant 0 : i32
    return %arg0, %c0_i32, %c0_i32_0 : i32, i32, i32
  }
  func.func @transform_1(%arg0: i32) -> (i32, i32) {
    %c0_i32 = arith.constant 0 : i32
    %c0_i32_0 = arith.constant 0 : i32
    %c0_i32_1 = arith.constant 0 : i32
    return %c0_i32, %c0_i32_0 : i32, i32
  }
  func.func @transform_2(%arg0: i32) -> (i32, i32) {
    %c0_i32 = arith.constant 0 : i32
    %c0_i32_0 = arith.constant 0 : i32
    %c0_i32_1 = arith.constant 0 : i32
    return %c0_i32, %c0_i32_0 : i32, i32
  }
  func.func @transform_3(%arg0: i32) -> (i32, i32, i32) {
    %c0_i32 = arith.constant 0 : i32
    %c0_i32_0 = arith.constant 0 : i32
    %c0_i32_1 = arith.constant 0 : i32
    return %arg0, %c0_i32, %c0_i32_0 : i32, i32, i32
  }
}

module attributes {stable_mosaic.version = 11 : i64} {
  func.func @_enc_mxu_kernel(%arg0: i32, %arg1: memref<1x64x32xbf16, #tpu.memory_space<vmem>>, %arg2: memref<96x64xbf16, #tpu.memory_space<vmem>>, %arg3: memref<1x64xf32, #tpu.memory_space<vmem>>, %arg4: memref<1x32x64xbf16, #tpu.memory_space<vmem>>) attributes {dimension_semantics = [#tpu.dimension_semantics<parallel>], iteration_bounds = array<i64: 2>, scalar_prefetch = 0 : i64, scratch_operands = 0 : i64, tpu.core_type = #tpu.core_type<tc>, window_params = [{transform_indices = @transform_0, window_bounds = array<i64: 1, 64, 32>}, {pipeline_mode = #tpu.pipeline_mode<synchronous>, transform_indices = @transform_1, window_bounds = array<i64: 96, 64>}, {pipeline_mode = #tpu.pipeline_mode<synchronous>, transform_indices = @transform_2, window_bounds = array<i64: 1, 64>}, {transform_indices = @transform_3, window_bounds = array<i64: 1, 32, 64>}]} {
    %c0 = arith.constant 0 : index
    %c0_0 = arith.constant 0 : index
    %c0_1 = arith.constant 0 : index
    %0 = vector.load %arg1[%c0, %c0_0, %c0_1] : memref<1x64x32xbf16, #tpu.memory_space<vmem>>, vector<1x64x32xbf16>
    %1 = vector.shape_cast %0 : vector<1x64x32xbf16> to vector<64x32xbf16>
    %cst = arith.constant 0.000000e+00 : bf16
    %2 = vector.broadcast %cst : bf16 to vector<1x32xbf16>
    %3 = vector.extract_strided_slice %1 {offsets = [0, 0], sizes = [63, 32], strides = [1, 1]} : vector<64x32xbf16> to vector<63x32xbf16>
    %4 = tpu.concatenate %2, %3 in 0 : vector<1x32xbf16>, vector<63x32xbf16> -> vector<64x32xbf16>
    %5 = vector.extract_strided_slice %1 {offsets = [1, 0], sizes = [63, 32], strides = [1, 1]} : vector<64x32xbf16> to vector<63x32xbf16>
    %6 = tpu.concatenate %5, %2 in 0 : vector<63x32xbf16>, vector<1x32xbf16> -> vector<64x32xbf16>
    %7 = tpu.concatenate %4, %1, %6 in 1 : vector<64x32xbf16>, vector<64x32xbf16>, vector<64x32xbf16> -> vector<64x96xbf16>
    %c0_2 = arith.constant 0 : index
    %c0_3 = arith.constant 0 : index
    %8 = vector.load %arg2[%c0_2, %c0_3] : memref<96x64xbf16, #tpu.memory_space<vmem>>, vector<96x64xbf16>
    %cst_4 = arith.constant dense<0.000000e+00> : vector<64x64xf32>
    %9 = tpu.matmul %7, %8, %cst_4 {dimension_numbers = #tpu.dot_dimension_numbers<[1], [0], [0], [1], [0, 0, 1, 1], [], []>} : vector<64x96xbf16>, vector<96x64xbf16>, vector<64x64xf32> -> vector<64x64xf32>
    %10 = vector.shape_cast %9 : vector<64x64xf32> to vector<32x2x64xf32>
    %cst_5 = arith.constant dense<0xFF800000> : vector<32x64xf32>
    %11 = vector.multi_reduction <maximumf>, %10, %cst_5 [1] : vector<32x2x64xf32> to vector<32x64xf32>
    %c0_6 = arith.constant 0 : index
    %c0_7 = arith.constant 0 : index
    %12 = vector.load %arg3[%c0_6, %c0_7] : memref<1x64xf32, #tpu.memory_space<vmem>>, vector<1x64xf32>
    %13 = vector.broadcast %12 : vector<1x64xf32> to vector<32x64xf32>
    %14 = arith.addf %11, %13 : vector<32x64xf32>
    %15 = math.tanh %14 : vector<32x64xf32>
    %16 = arith.truncf %15 : vector<32x64xf32> to vector<32x64xbf16>
    %c0_8 = arith.constant 0 : index
    %c0_9 = arith.constant 0 : index
    %c0_10 = arith.constant 0 : index
    %17 = vector.load %arg4[%c0_8, %c0_9, %c0_10] : memref<1x32x64xbf16, #tpu.memory_space<vmem>>, vector<1x32x64xbf16>
    %18 = vector.shape_cast %17 : vector<1x32x64xbf16> to vector<32x64xbf16>
    %19 = vector.shape_cast %16 : vector<32x64xbf16> to vector<1x32x64xbf16>
    tpu.vector_store %arg4[%c0_8, %c0_9, %c0_10], %19 {strides = array<i32>} : memref<1x32x64xbf16, #tpu.memory_space<vmem>>, vector<1x32x64xbf16>,
    return
  }
  func.func @transform_0(%arg0: i32) -> (i32, i32, i32) {
    %c0_i32 = arith.constant 0 : i32
    %c0_i32_0 = arith.constant 0 : i32
    %c0_i32_1 = arith.constant 0 : i32
    return %arg0, %c0_i32, %c0_i32_0 : i32, i32, i32
  }
  func.func @transform_1(%arg0: i32) -> (i32, i32) {
    %c0_i32 = arith.constant 0 : i32
    %c0_i32_0 = arith.constant 0 : i32
    %c0_i32_1 = arith.constant 0 : i32
    return %c0_i32, %c0_i32_0 : i32, i32
  }
  func.func @transform_2(%arg0: i32) -> (i32, i32) {
    %c0_i32 = arith.constant 0 : i32
    %c0_i32_0 = arith.constant 0 : i32
    %c0_i32_1 = arith.constant 0 : i32
    return %c0_i32, %c0_i32_0 : i32, i32
  }
  func.func @transform_3(%arg0: i32) -> (i32, i32, i32) {
    %c0_i32 = arith.constant 0 : i32
    %c0_i32_0 = arith.constant 0 : i32
    %c0_i32_1 = arith.constant 0 : i32
    return %arg0, %c0_i32, %c0_i32_0 : i32, i32, i32
  }
}

module attributes {stable_mosaic.version = 11 : i64} {
  func.func @_enc_mxu_kernel(%arg0: i32, %arg1: memref<1x16x128xbf16, #tpu.memory_space<vmem>>, %arg2: memref<384x256xbf16, #tpu.memory_space<vmem>>, %arg3: memref<1x256xf32, #tpu.memory_space<vmem>>, %arg4: memref<1x8x256xbf16, #tpu.memory_space<vmem>>) attributes {dimension_semantics = [#tpu.dimension_semantics<parallel>], iteration_bounds = array<i64: 2>, scalar_prefetch = 0 : i64, scratch_operands = 0 : i64, tpu.core_type = #tpu.core_type<tc>, window_params = [{transform_indices = @transform_0, window_bounds = array<i64: 1, 16, 128>}, {pipeline_mode = #tpu.pipeline_mode<synchronous>, transform_indices = @transform_1, window_bounds = array<i64: 384, 256>}, {pipeline_mode = #tpu.pipeline_mode<synchronous>, transform_indices = @transform_2, window_bounds = array<i64: 1, 256>}, {transform_indices = @transform_3, window_bounds = array<i64: 1, 8, 256>}]} {
    %c0 = arith.constant 0 : index
    %c0_0 = arith.constant 0 : index
    %c0_1 = arith.constant 0 : index
    %0 = vector.load %arg1[%c0, %c0_0, %c0_1] : memref<1x16x128xbf16, #tpu.memory_space<vmem>>, vector<1x16x128xbf16>
    %1 = vector.shape_cast %0 : vector<1x16x128xbf16> to vector<16x128xbf16>
    %cst = arith.constant 0.000000e+00 : bf16
    %2 = vector.broadcast %cst : bf16 to vector<1x128xbf16>
    %3 = vector.extract_strided_slice %1 {offsets = [0, 0], sizes = [15, 128], strides = [1, 1]} : vector<16x128xbf16> to vector<15x128xbf16>
    %4 = tpu.concatenate %2, %3 in 0 : vector<1x128xbf16>, vector<15x128xbf16> -> vector<16x128xbf16>
    %5 = vector.extract_strided_slice %1 {offsets = [1, 0], sizes = [15, 128], strides = [1, 1]} : vector<16x128xbf16> to vector<15x128xbf16>
    %6 = tpu.concatenate %5, %2 in 0 : vector<15x128xbf16>, vector<1x128xbf16> -> vector<16x128xbf16>
    %7 = tpu.concatenate %4, %1, %6 in 1 : vector<16x128xbf16>, vector<16x128xbf16>, vector<16x128xbf16> -> vector<16x384xbf16>
    %c0_2 = arith.constant 0 : index
    %c0_3 = arith.constant 0 : index
    %8 = vector.load %arg2[%c0_2, %c0_3] : memref<384x256xbf16, #tpu.memory_space<vmem>>, vector<384x256xbf16>
    %cst_4 = arith.constant dense<0.000000e+00> : vector<16x256xf32>
    %9 = tpu.matmul %7, %8, %cst_4 {dimension_numbers = #tpu.dot_dimension_numbers<[1], [0], [0], [1], [0, 0, 1, 1], [], []>} : vector<16x384xbf16>, vector<384x256xbf16>, vector<16x256xf32> -> vector<16x256xf32>
    %10 = vector.shape_cast %9 : vector<16x256xf32> to vector<8x2x256xf32>
    %cst_5 = arith.constant dense<0xFF800000> : vector<8x256xf32>
    %11 = vector.multi_reduction <maximumf>, %10, %cst_5 [1] : vector<8x2x256xf32> to vector<8x256xf32>
    %c0_6 = arith.constant 0 : index
    %c0_7 = arith.constant 0 : index
    %12 = vector.load %arg3[%c0_6, %c0_7] : memref<1x256xf32, #tpu.memory_space<vmem>>, vector<1x256xf32>
    %13 = vector.broadcast %12 : vector<1x256xf32> to vector<8x256xf32>
    %14 = arith.addf %11, %13 : vector<8x256xf32>
    %15 = math.tanh %14 : vector<8x256xf32>
    %16 = arith.truncf %15 : vector<8x256xf32> to vector<8x256xbf16>
    %c0_8 = arith.constant 0 : index
    %c0_9 = arith.constant 0 : index
    %c0_10 = arith.constant 0 : index
    %17 = vector.load %arg4[%c0_8, %c0_9, %c0_10] : memref<1x8x256xbf16, #tpu.memory_space<vmem>>, vector<1x8x256xbf16>
    %18 = vector.shape_cast %17 : vector<1x8x256xbf16> to vector<8x256xbf16>
    %19 = vector.shape_cast %16 : vector<8x256xbf16> to vector<1x8x256xbf16>
    tpu.vector_store %arg4[%c0_8, %c0_9, %c0_10], %19 {strides = array<i32>} : memref<1x8x256xbf16, #tpu.memory_space<vmem>>, vector<1x8x256xbf16>,
    return
  }
  func.func @transform_0(%arg0: i32) -> (i32, i32, i32) {
    %c0_i32 = arith.constant 0 : i32
    %c0_i32_0 = arith.constant 0 : i32
    %c0_i32_1 = arith.constant 0 : i32
    return %arg0, %c0_i32, %c0_i32_0 : i32, i32, i32
  }
  func.func @transform_1(%arg0: i32) -> (i32, i32) {
    %c0_i32 = arith.constant 0 : i32
    %c0_i32_0 = arith.constant 0 : i32
    %c0_i32_1 = arith.constant 0 : i32
    return %c0_i32, %c0_i32_0 : i32, i32
  }
  func.func @transform_2(%arg0: i32) -> (i32, i32) {
    %c0_i32 = arith.constant 0 : i32
    %c0_i32_0 = arith.constant 0 : i32
    %c0_i32_1 = arith.constant 0 : i32
    return %c0_i32, %c0_i32_0 : i32, i32
  }
  func.func @transform_3(%arg0: i32) -> (i32, i32, i32) {
    %c0_i32 = arith.constant 0 : i32
    %c0_i32_0 = arith.constant 0 : i32
    %c0_i32_1 = arith.constant 0 : i32
    return %arg0, %c0_i32, %c0_i32_0 : i32, i32, i32
  }
}

module attributes {stable_mosaic.version = 11 : i64} {
  func.func @_enc_mxu_kernel(%arg0: i32, %arg1: memref<1x8x256xbf16, #tpu.memory_space<vmem>>, %arg2: memref<768x512xbf16, #tpu.memory_space<vmem>>, %arg3: memref<1x512xf32, #tpu.memory_space<vmem>>, %arg4: memref<1x4x512xbf16, #tpu.memory_space<vmem>>) attributes {dimension_semantics = [#tpu.dimension_semantics<parallel>], iteration_bounds = array<i64: 2>, scalar_prefetch = 0 : i64, scratch_operands = 0 : i64, tpu.core_type = #tpu.core_type<tc>, window_params = [{transform_indices = @transform_0, window_bounds = array<i64: 1, 8, 256>}, {pipeline_mode = #tpu.pipeline_mode<synchronous>, transform_indices = @transform_1, window_bounds = array<i64: 768, 512>}, {pipeline_mode = #tpu.pipeline_mode<synchronous>, transform_indices = @transform_2, window_bounds = array<i64: 1, 512>}, {transform_indices = @transform_3, window_bounds = array<i64: 1, 4, 512>}]} {
    %c0 = arith.constant 0 : index
    %c0_0 = arith.constant 0 : index
    %c0_1 = arith.constant 0 : index
    %0 = vector.load %arg1[%c0, %c0_0, %c0_1] : memref<1x8x256xbf16, #tpu.memory_space<vmem>>, vector<1x8x256xbf16>
    %1 = vector.shape_cast %0 : vector<1x8x256xbf16> to vector<8x256xbf16>
    %cst = arith.constant 0.000000e+00 : bf16
    %2 = vector.broadcast %cst : bf16 to vector<1x256xbf16>
    %3 = vector.extract_strided_slice %1 {offsets = [0, 0], sizes = [7, 256], strides = [1, 1]} : vector<8x256xbf16> to vector<7x256xbf16>
    %4 = tpu.concatenate %2, %3 in 0 : vector<1x256xbf16>, vector<7x256xbf16> -> vector<8x256xbf16>
    %5 = vector.extract_strided_slice %1 {offsets = [1, 0], sizes = [7, 256], strides = [1, 1]} : vector<8x256xbf16> to vector<7x256xbf16>
    %6 = tpu.concatenate %5, %2 in 0 : vector<7x256xbf16>, vector<1x256xbf16> -> vector<8x256xbf16>
    %7 = tpu.concatenate %4, %1, %6 in 1 : vector<8x256xbf16>, vector<8x256xbf16>, vector<8x256xbf16> -> vector<8x768xbf16>
    %c0_2 = arith.constant 0 : index
    %c0_3 = arith.constant 0 : index
    %8 = vector.load %arg2[%c0_2, %c0_3] : memref<768x512xbf16, #tpu.memory_space<vmem>>, vector<768x512xbf16>
    %cst_4 = arith.constant dense<0.000000e+00> : vector<8x512xf32>
    %9 = tpu.matmul %7, %8, %cst_4 {dimension_numbers = #tpu.dot_dimension_numbers<[1], [0], [0], [1], [0, 0, 1, 1], [], []>} : vector<8x768xbf16>, vector<768x512xbf16>, vector<8x512xf32> -> vector<8x512xf32>
    %10 = vector.shape_cast %9 : vector<8x512xf32> to vector<4x2x512xf32>
    %cst_5 = arith.constant dense<0xFF800000> : vector<4x512xf32>
    %11 = vector.multi_reduction <maximumf>, %10, %cst_5 [1] : vector<4x2x512xf32> to vector<4x512xf32>
    %c0_6 = arith.constant 0 : index
    %c0_7 = arith.constant 0 : index
    %12 = vector.load %arg3[%c0_6, %c0_7] : memref<1x512xf32, #tpu.memory_space<vmem>>, vector<1x512xf32>
    %13 = vector.broadcast %12 : vector<1x512xf32> to vector<4x512xf32>
    %14 = arith.addf %11, %13 : vector<4x512xf32>
    %15 = math.tanh %14 : vector<4x512xf32>
    %16 = arith.truncf %15 : vector<4x512xf32> to vector<4x512xbf16>
    %c0_8 = arith.constant 0 : index
    %c0_9 = arith.constant 0 : index
    %c0_10 = arith.constant 0 : index
    %17 = vector.load %arg4[%c0_8, %c0_9, %c0_10] : memref<1x4x512xbf16, #tpu.memory_space<vmem>>, vector<1x4x512xbf16>
    %18 = vector.shape_cast %17 : vector<1x4x512xbf16> to vector<4x512xbf16>
    %19 = vector.shape_cast %16 : vector<4x512xbf16> to vector<1x4x512xbf16>
    tpu.vector_store %arg4[%c0_8, %c0_9, %c0_10], %19 {strides = array<i32>} : memref<1x4x512xbf16, #tpu.memory_space<vmem>>, vector<1x4x512xbf16>,
    return
  }
  func.func @transform_0(%arg0: i32) -> (i32, i32, i32) {
    %c0_i32 = arith.constant 0 : i32
    %c0_i32_0 = arith.constant 0 : i32
    %c0_i32_1 = arith.constant 0 : i32
    return %arg0, %c0_i32, %c0_i32_0 : i32, i32, i32
  }
  func.func @transform_1(%arg0: i32) -> (i32, i32) {
    %c0_i32 = arith.constant 0 : i32
    %c0_i32_0 = arith.constant 0 : i32
    %c0_i32_1 = arith.constant 0 : i32
    return %c0_i32, %c0_i32_0 : i32, i32
  }
  func.func @transform_2(%arg0: i32) -> (i32, i32) {
    %c0_i32 = arith.constant 0 : i32
    %c0_i32_0 = arith.constant 0 : i32
    %c0_i32_1 = arith.constant 0 : i32
    return %c0_i32, %c0_i32_0 : i32, i32
  }
  func.func @transform_3(%arg0: i32) -> (i32, i32, i32) {
    %c0_i32 = arith.constant 0 : i32
    %c0_i32_0 = arith.constant 0 : i32
    %c0_i32_1 = arith.constant 0 : i32
    return %arg0, %c0_i32, %c0_i32_0 : i32, i32, i32
  }
}

module attributes {stable_mosaic.version = 11 : i64} {
  func.func @_dec_mxu_kernel(%arg0: i32, %arg1: memref<1x4x512xbf16, #tpu.memory_space<vmem>>, %arg2: memref<512x768xbf16, #tpu.memory_space<vmem>>, %arg3: memref<1x256xf32, #tpu.memory_space<vmem>>, %arg4: memref<1x9x256xbf16, #tpu.memory_space<vmem>>) attributes {dimension_semantics = [#tpu.dimension_semantics<parallel>], iteration_bounds = array<i64: 2>, scalar_prefetch = 0 : i64, scratch_operands = 0 : i64, tpu.core_type = #tpu.core_type<tc>, window_params = [{transform_indices = @transform_0, window_bounds = array<i64: 1, 4, 512>}, {pipeline_mode = #tpu.pipeline_mode<synchronous>, transform_indices = @transform_1, window_bounds = array<i64: 512, 768>}, {pipeline_mode = #tpu.pipeline_mode<synchronous>, transform_indices = @transform_2, window_bounds = array<i64: 1, 256>}, {transform_indices = @transform_3, window_bounds = array<i64: 1, 9, 256>}]} {
    %c0 = arith.constant 0 : index
    %c0_0 = arith.constant 0 : index
    %c0_1 = arith.constant 0 : index
    %0 = vector.load %arg1[%c0, %c0_0, %c0_1] : memref<1x4x512xbf16, #tpu.memory_space<vmem>>, vector<1x4x512xbf16>
    %1 = vector.shape_cast %0 : vector<1x4x512xbf16> to vector<4x512xbf16>
    %c0_2 = arith.constant 0 : index
    %c0_3 = arith.constant 0 : index
    %2 = vector.load %arg2[%c0_2, %c0_3] : memref<512x768xbf16, #tpu.memory_space<vmem>>, vector<512x768xbf16>
    %cst = arith.constant dense<0.000000e+00> : vector<4x768xf32>
    %3 = tpu.matmul %1, %2, %cst {dimension_numbers = #tpu.dot_dimension_numbers<[1], [0], [0], [1], [0, 0, 1, 1], [], []>} : vector<4x512xbf16>, vector<512x768xbf16>, vector<4x768xf32> -> vector<4x768xf32>
    %4 = vector.extract_strided_slice %3 {offsets = [0, 0], sizes = [4, 256], strides = [1, 1]} : vector<4x768xf32> to vector<4x256xf32>
    %5 = vector.extract_strided_slice %3 {offsets = [0, 256], sizes = [4, 256], strides = [1, 1]} : vector<4x768xf32> to vector<4x256xf32>
    %6 = vector.extract_strided_slice %3 {offsets = [0, 512], sizes = [4, 256], strides = [1, 1]} : vector<4x768xf32> to vector<4x256xf32>
    %c0_4 = arith.constant 0 : index
    %c0_5 = arith.constant 0 : index
    %7 = vector.load %arg3[%c0_4, %c0_5] : memref<1x256xf32, #tpu.memory_space<vmem>>, vector<1x256xf32>
    %cst_6 = arith.constant 0.000000e+00 : f32
    %8 = vector.broadcast %cst_6 : f32 to vector<1x256xf32>
    %9 = vector.extract_strided_slice %6 {offsets = [0, 0], sizes = [3, 256], strides = [1, 1]} : vector<4x256xf32> to vector<3x256xf32>
    %10 = tpu.concatenate %8, %9 in 0 : vector<1x256xf32>, vector<3x256xf32> -> vector<4x256xf32>
    %11 = arith.addf %4, %10 : vector<4x256xf32>
    %12 = vector.broadcast %7 : vector<1x256xf32> to vector<4x256xf32>
    %13 = arith.addf %11, %12 : vector<4x256xf32>
    %14 = math.tanh %13 : vector<4x256xf32>
    %15 = vector.broadcast %7 : vector<1x256xf32> to vector<4x256xf32>
    %16 = arith.addf %5, %15 : vector<4x256xf32>
    %17 = math.tanh %16 : vector<4x256xf32>
    %18 = vector.extract_strided_slice %6 {offsets = [3, 0], sizes = [1, 256], strides = [1, 1]} : vector<4x256xf32> to vector<1x256xf32>
    %19 = arith.addf %18, %7 : vector<1x256xf32>
    %20 = math.tanh %19 : vector<1x256xf32>
    %21 = vector.shape_cast %14 : vector<4x256xf32> to vector<4x1x256xf32>
    %22 = vector.shape_cast %17 : vector<4x256xf32> to vector<4x1x256xf32>
    %23 = tpu.concatenate %21, %22 in 1 : vector<4x1x256xf32>, vector<4x1x256xf32> -> vector<4x2x256xf32>
    %24 = vector.shape_cast %23 : vector<4x2x256xf32> to vector<8x256xf32>
    %25 = arith.truncf %24 : vector<8x256xf32> to vector<8x256xbf16>
    %c0_7 = arith.constant 0 : index
    %c0_8 = arith.constant 0 : index
    %c0_9 = arith.constant 0 : index
    %26 = vector.load %arg4[%c0_7, %c0_8, %c0_9] : memref<1x9x256xbf16, #tpu.memory_space<vmem>>, vector<1x8x256xbf16>
    %27 = vector.shape_cast %26 : vector<1x8x256xbf16> to vector<8x256xbf16>
    %28 = vector.shape_cast %25 : vector<8x256xbf16> to vector<1x8x256xbf16>
    tpu.vector_store %arg4[%c0_7, %c0_8, %c0_9], %28 {strides = array<i32>} : memref<1x9x256xbf16, #tpu.memory_space<vmem>>, vector<1x8x256xbf16>,
    %29 = arith.truncf %20 : vector<1x256xf32> to vector<1x256xbf16>
    %c0_10 = arith.constant 0 : index
    %c8 = arith.constant 8 : index
    %c0_11 = arith.constant 0 : index
    %30 = vector.load %arg4[%c0_10, %c8, %c0_11] : memref<1x9x256xbf16, #tpu.memory_space<vmem>>, vector<1x1x256xbf16>
    %31 = vector.shape_cast %30 : vector<1x1x256xbf16> to vector<1x256xbf16>
    %32 = vector.shape_cast %29 : vector<1x256xbf16> to vector<1x1x256xbf16>
    tpu.vector_store %arg4[%c0_10, %c8, %c0_11], %32 {strides = array<i32>} : memref<1x9x256xbf16, #tpu.memory_space<vmem>>, vector<1x1x256xbf16>,
    return
  }
  func.func @transform_0(%arg0: i32) -> (i32, i32, i32) {
    %c0_i32 = arith.constant 0 : i32
    %c0_i32_0 = arith.constant 0 : i32
    %c0_i32_1 = arith.constant 0 : i32
    return %arg0, %c0_i32, %c0_i32_0 : i32, i32, i32
  }
  func.func @transform_1(%arg0: i32) -> (i32, i32) {
    %c0_i32 = arith.constant 0 : i32
    %c0_i32_0 = arith.constant 0 : i32
    %c0_i32_1 = arith.constant 0 : i32
    return %c0_i32, %c0_i32_0 : i32, i32
  }
  func.func @transform_2(%arg0: i32) -> (i32, i32) {
    %c0_i32 = arith.constant 0 : i32
    %c0_i32_0 = arith.constant 0 : i32
    %c0_i32_1 = arith.constant 0 : i32
    return %c0_i32, %c0_i32_0 : i32, i32
  }
  func.func @transform_3(%arg0: i32) -> (i32, i32, i32) {
    %c0_i32 = arith.constant 0 : i32
    %c0_i32_0 = arith.constant 0 : i32
    %c0_i32_1 = arith.constant 0 : i32
    return %arg0, %c0_i32, %c0_i32_0 : i32, i32, i32
  }
}

module attributes {stable_mosaic.version = 11 : i64} {
  func.func @_dec_mxu_kernel(%arg0: i32, %arg1: memref<1x9x256xbf16, #tpu.memory_space<vmem>>, %arg2: memref<256x384xbf16, #tpu.memory_space<vmem>>, %arg3: memref<1x128xf32, #tpu.memory_space<vmem>>, %arg4: memref<1x19x128xbf16, #tpu.memory_space<vmem>>) attributes {dimension_semantics = [#tpu.dimension_semantics<parallel>], iteration_bounds = array<i64: 2>, scalar_prefetch = 0 : i64, scratch_operands = 0 : i64, tpu.core_type = #tpu.core_type<tc>, window_params = [{transform_indices = @transform_0, window_bounds = array<i64: 1, 9, 256>}, {pipeline_mode = #tpu.pipeline_mode<synchronous>, transform_indices = @transform_1, window_bounds = array<i64: 256, 384>}, {pipeline_mode = #tpu.pipeline_mode<synchronous>, transform_indices = @transform_2, window_bounds = array<i64: 1, 128>}, {transform_indices = @transform_3, window_bounds = array<i64: 1, 19, 128>}]} {
    %c0 = arith.constant 0 : index
    %c0_0 = arith.constant 0 : index
    %c0_1 = arith.constant 0 : index
    %0 = vector.load %arg1[%c0, %c0_0, %c0_1] : memref<1x9x256xbf16, #tpu.memory_space<vmem>>, vector<1x9x256xbf16>
    %1 = vector.shape_cast %0 : vector<1x9x256xbf16> to vector<9x256xbf16>
    %c0_2 = arith.constant 0 : index
    %c0_3 = arith.constant 0 : index
    %2 = vector.load %arg2[%c0_2, %c0_3] : memref<256x384xbf16, #tpu.memory_space<vmem>>, vector<256x384xbf16>
    %cst = arith.constant dense<0.000000e+00> : vector<9x384xf32>
    %3 = tpu.matmul %1, %2, %cst {dimension_numbers = #tpu.dot_dimension_numbers<[1], [0], [0], [1], [0, 0, 1, 1], [], []>} : vector<9x256xbf16>, vector<256x384xbf16>, vector<9x384xf32> -> vector<9x384xf32>
    %4 = vector.extract_strided_slice %3 {offsets = [0, 0], sizes = [9, 128], strides = [1, 1]} : vector<9x384xf32> to vector<9x128xf32>
    %5 = vector.extract_strided_slice %3 {offsets = [0, 128], sizes = [9, 128], strides = [1, 1]} : vector<9x384xf32> to vector<9x128xf32>
    %6 = vector.extract_strided_slice %3 {offsets = [0, 256], sizes = [9, 128], strides = [1, 1]} : vector<9x384xf32> to vector<9x128xf32>
    %c0_4 = arith.constant 0 : index
    %c0_5 = arith.constant 0 : index
    %7 = vector.load %arg3[%c0_4, %c0_5] : memref<1x128xf32, #tpu.memory_space<vmem>>, vector<1x128xf32>
    %cst_6 = arith.constant 0.000000e+00 : f32
    %8 = vector.broadcast %cst_6 : f32 to vector<1x128xf32>
    %9 = vector.extract_strided_slice %6 {offsets = [0, 0], sizes = [8, 128], strides = [1, 1]} : vector<9x128xf32> to vector<8x128xf32>
    %10 = tpu.concatenate %8, %9 in 0 : vector<1x128xf32>, vector<8x128xf32> -> vector<9x128xf32>
    %11 = arith.addf %4, %10 : vector<9x128xf32>
    %12 = vector.broadcast %7 : vector<1x128xf32> to vector<9x128xf32>
    %13 = arith.addf %11, %12 : vector<9x128xf32>
    %14 = math.tanh %13 : vector<9x128xf32>
    %15 = vector.broadcast %7 : vector<1x128xf32> to vector<9x128xf32>
    %16 = arith.addf %5, %15 : vector<9x128xf32>
    %17 = math.tanh %16 : vector<9x128xf32>
    %18 = vector.extract_strided_slice %6 {offsets = [8, 0], sizes = [1, 128], strides = [1, 1]} : vector<9x128xf32> to vector<1x128xf32>
    %19 = arith.addf %18, %7 : vector<1x128xf32>
    %20 = math.tanh %19 : vector<1x128xf32>
    %21 = vector.shape_cast %14 : vector<9x128xf32> to vector<9x1x128xf32>
    %22 = vector.shape_cast %17 : vector<9x128xf32> to vector<9x1x128xf32>
    %23 = tpu.concatenate %21, %22 in 1 : vector<9x1x128xf32>, vector<9x1x128xf32> -> vector<9x2x128xf32>
    %24 = vector.shape_cast %23 : vector<9x2x128xf32> to vector<18x128xf32>
    %25 = arith.truncf %24 : vector<18x128xf32> to vector<18x128xbf16>
    %c0_7 = arith.constant 0 : index
    %c0_8 = arith.constant 0 : index
    %c0_9 = arith.constant 0 : index
    %26 = vector.load %arg4[%c0_7, %c0_8, %c0_9] : memref<1x19x128xbf16, #tpu.memory_space<vmem>>, vector<1x18x128xbf16>
    %27 = vector.shape_cast %26 : vector<1x18x128xbf16> to vector<18x128xbf16>
    %28 = vector.shape_cast %25 : vector<18x128xbf16> to vector<1x18x128xbf16>
    tpu.vector_store %arg4[%c0_7, %c0_8, %c0_9], %28 {strides = array<i32>} : memref<1x19x128xbf16, #tpu.memory_space<vmem>>, vector<1x18x128xbf16>,
    %29 = arith.truncf %20 : vector<1x128xf32> to vector<1x128xbf16>
    %c0_10 = arith.constant 0 : index
    %c18 = arith.constant 18 : index
    %c0_11 = arith.constant 0 : index
    %30 = vector.load %arg4[%c0_10, %c18, %c0_11] : memref<1x19x128xbf16, #tpu.memory_space<vmem>>, vector<1x1x128xbf16>
    %31 = vector.shape_cast %30 : vector<1x1x128xbf16> to vector<1x128xbf16>
    %32 = vector.shape_cast %29 : vector<1x128xbf16> to vector<1x1x128xbf16>
    tpu.vector_store %arg4[%c0_10, %c18, %c0_11], %32 {strides = array<i32>} : memref<1x19x128xbf16, #tpu.memory_space<vmem>>, vector<1x1x128xbf16>,
    return
  }
  func.func @transform_0(%arg0: i32) -> (i32, i32, i32) {
    %c0_i32 = arith.constant 0 : i32
    %c0_i32_0 = arith.constant 0 : i32
    %c0_i32_1 = arith.constant 0 : i32
    return %arg0, %c0_i32, %c0_i32_0 : i32, i32, i32
  }
  func.func @transform_1(%arg0: i32) -> (i32, i32) {
    %c0_i32 = arith.constant 0 : i32
    %c0_i32_0 = arith.constant 0 : i32
    %c0_i32_1 = arith.constant 0 : i32
    return %c0_i32, %c0_i32_0 : i32, i32
  }
  func.func @transform_2(%arg0: i32) -> (i32, i32) {
    %c0_i32 = arith.constant 0 : i32
    %c0_i32_0 = arith.constant 0 : i32
    %c0_i32_1 = arith.constant 0 : i32
    return %c0_i32, %c0_i32_0 : i32, i32
  }
  func.func @transform_3(%arg0: i32) -> (i32, i32, i32) {
    %c0_i32 = arith.constant 0 : i32
    %c0_i32_0 = arith.constant 0 : i32
    %c0_i32_1 = arith.constant 0 : i32
    return %arg0, %c0_i32, %c0_i32_0 : i32, i32, i32
  }
}

module attributes {stable_mosaic.version = 11 : i64} {
  func.func @_dec_mxu_kernel(%arg0: i32, %arg1: memref<1x39x64xbf16, #tpu.memory_space<vmem>>, %arg2: memref<64x96xbf16, #tpu.memory_space<vmem>>, %arg3: memref<1x32xf32, #tpu.memory_space<vmem>>, %arg4: memref<1x79x32xbf16, #tpu.memory_space<vmem>>) attributes {dimension_semantics = [#tpu.dimension_semantics<parallel>], iteration_bounds = array<i64: 2>, scalar_prefetch = 0 : i64, scratch_operands = 0 : i64, tpu.core_type = #tpu.core_type<tc>, window_params = [{transform_indices = @transform_0, window_bounds = array<i64: 1, 39, 64>}, {pipeline_mode = #tpu.pipeline_mode<synchronous>, transform_indices = @transform_1, window_bounds = array<i64: 64, 96>}, {pipeline_mode = #tpu.pipeline_mode<synchronous>, transform_indices = @transform_2, window_bounds = array<i64: 1, 32>}, {transform_indices = @transform_3, window_bounds = array<i64: 1, 79, 32>}]} {
    %c0 = arith.constant 0 : index
    %c0_0 = arith.constant 0 : index
    %c0_1 = arith.constant 0 : index
    %0 = vector.load %arg1[%c0, %c0_0, %c0_1] : memref<1x39x64xbf16, #tpu.memory_space<vmem>>, vector<1x39x64xbf16>
    %1 = vector.shape_cast %0 : vector<1x39x64xbf16> to vector<39x64xbf16>
    %c0_2 = arith.constant 0 : index
    %c0_3 = arith.constant 0 : index
    %2 = vector.load %arg2[%c0_2, %c0_3] : memref<64x96xbf16, #tpu.memory_space<vmem>>, vector<64x96xbf16>
    %cst = arith.constant dense<0.000000e+00> : vector<39x96xf32>
    %3 = tpu.matmul %1, %2, %cst {dimension_numbers = #tpu.dot_dimension_numbers<[1], [0], [0], [1], [0, 0, 1, 1], [], []>} : vector<39x64xbf16>, vector<64x96xbf16>, vector<39x96xf32> -> vector<39x96xf32>
    %4 = vector.extract_strided_slice %3 {offsets = [0, 0], sizes = [39, 32], strides = [1, 1]} : vector<39x96xf32> to vector<39x32xf32>
    %5 = vector.extract_strided_slice %3 {offsets = [0, 32], sizes = [39, 32], strides = [1, 1]} : vector<39x96xf32> to vector<39x32xf32>
    %6 = vector.extract_strided_slice %3 {offsets = [0, 64], sizes = [39, 32], strides = [1, 1]} : vector<39x96xf32> to vector<39x32xf32>
    %c0_4 = arith.constant 0 : index
    %c0_5 = arith.constant 0 : index
    %7 = vector.load %arg3[%c0_4, %c0_5] : memref<1x32xf32, #tpu.memory_space<vmem>>, vector<1x32xf32>
    %cst_6 = arith.constant 0.000000e+00 : f32
    %8 = vector.broadcast %cst_6 : f32 to vector<1x32xf32>
    %9 = vector.extract_strided_slice %6 {offsets = [0, 0], sizes = [38, 32], strides = [1, 1]} : vector<39x32xf32> to vector<38x32xf32>
    %10 = tpu.concatenate %8, %9 in 0 : vector<1x32xf32>, vector<38x32xf32> -> vector<39x32xf32>
    %11 = arith.addf %4, %10 : vector<39x32xf32>
    %12 = vector.broadcast %7 : vector<1x32xf32> to vector<39x32xf32>
    %13 = arith.addf %11, %12 : vector<39x32xf32>
    %14 = math.tanh %13 : vector<39x32xf32>
    %15 = vector.broadcast %7 : vector<1x32xf32> to vector<39x32xf32>
    %16 = arith.addf %5, %15 : vector<39x32xf32>
    %17 = math.tanh %16 : vector<39x32xf32>
    %18 = vector.extract_strided_slice %6 {offsets = [38, 0], sizes = [1, 32], strides = [1, 1]} : vector<39x32xf32> to vector<1x32xf32>
    %19 = arith.addf %18, %7 : vector<1x32xf32>
    %20 = math.tanh %19 : vector<1x32xf32>
    %21 = vector.shape_cast %14 : vector<39x32xf32> to vector<39x1x32xf32>
    %22 = vector.shape_cast %17 : vector<39x32xf32> to vector<39x1x32xf32>
    %23 = tpu.concatenate %21, %22 in 1 : vector<39x1x32xf32>, vector<39x1x32xf32> -> vector<39x2x32xf32>
    %24 = vector.shape_cast %23 : vector<39x2x32xf32> to vector<78x32xf32>
    %25 = arith.truncf %24 : vector<78x32xf32> to vector<78x32xbf16>
    %c0_7 = arith.constant 0 : index
    %c0_8 = arith.constant 0 : index
    %c0_9 = arith.constant 0 : index
    %26 = vector.load %arg4[%c0_7, %c0_8, %c0_9] : memref<1x79x32xbf16, #tpu.memory_space<vmem>>, vector<1x78x32xbf16>
    %27 = vector.shape_cast %26 : vector<1x78x32xbf16> to vector<78x32xbf16>
    %28 = vector.shape_cast %25 : vector<78x32xbf16> to vector<1x78x32xbf16>
    tpu.vector_store %arg4[%c0_7, %c0_8, %c0_9], %28 {strides = array<i32>} : memref<1x79x32xbf16, #tpu.memory_space<vmem>>, vector<1x78x32xbf16>,
    %29 = arith.truncf %20 : vector<1x32xf32> to vector<1x32xbf16>
    %c0_10 = arith.constant 0 : index
    %c78 = arith.constant 78 : index
    %c0_11 = arith.constant 0 : index
    %30 = vector.load %arg4[%c0_10, %c78, %c0_11] : memref<1x79x32xbf16, #tpu.memory_space<vmem>>, vector<1x1x32xbf16>
    %31 = vector.shape_cast %30 : vector<1x1x32xbf16> to vector<1x32xbf16>
    %32 = vector.shape_cast %29 : vector<1x32xbf16> to vector<1x1x32xbf16>
    tpu.vector_store %arg4[%c0_10, %c78, %c0_11], %32 {strides = array<i32>} : memref<1x79x32xbf16, #tpu.memory_space<vmem>>, vector<1x1x32xbf16>,
    return
  }
  func.func @transform_0(%arg0: i32) -> (i32, i32, i32) {
    %c0_i32 = arith.constant 0 : i32
    %c0_i32_0 = arith.constant 0 : i32
    %c0_i32_1 = arith.constant 0 : i32
    return %arg0, %c0_i32, %c0_i32_0 : i32, i32, i32
  }
  func.func @transform_1(%arg0: i32) -> (i32, i32) {
    %c0_i32 = arith.constant 0 : i32
    %c0_i32_0 = arith.constant 0 : i32
    %c0_i32_1 = arith.constant 0 : i32
    return %c0_i32, %c0_i32_0 : i32, i32
  }
  func.func @transform_2(%arg0: i32) -> (i32, i32) {
    %c0_i32 = arith.constant 0 : i32
    %c0_i32_0 = arith.constant 0 : i32
    %c0_i32_1 = arith.constant 0 : i32
    return %c0_i32, %c0_i32_0 : i32, i32
  }
  func.func @transform_3(%arg0: i32) -> (i32, i32, i32) {
    %c0_i32 = arith.constant 0 : i32
    %c0_i32_0 = arith.constant 0 : i32
    %c0_i32_1 = arith.constant 0 : i32
    return %arg0, %c0_i32, %c0_i32_0 : i32, i32, i32
  }
}

module attributes {stable_mosaic.version = 11 : i64} {
  func.func @_dec_mxu_kernel(%arg0: i32, %arg1: memref<1x19x128xbf16, #tpu.memory_space<vmem>>, %arg2: memref<128x192xbf16, #tpu.memory_space<vmem>>, %arg3: memref<1x64xf32, #tpu.memory_space<vmem>>, %arg4: memref<1x39x64xbf16, #tpu.memory_space<vmem>>) attributes {dimension_semantics = [#tpu.dimension_semantics<parallel>], iteration_bounds = array<i64: 2>, scalar_prefetch = 0 : i64, scratch_operands = 0 : i64, tpu.core_type = #tpu.core_type<tc>, window_params = [{transform_indices = @transform_0, window_bounds = array<i64: 1, 19, 128>}, {pipeline_mode = #tpu.pipeline_mode<synchronous>, transform_indices = @transform_1, window_bounds = array<i64: 128, 192>}, {pipeline_mode = #tpu.pipeline_mode<synchronous>, transform_indices = @transform_2, window_bounds = array<i64: 1, 64>}, {transform_indices = @transform_3, window_bounds = array<i64: 1, 39, 64>}]} {
    %c0 = arith.constant 0 : index
    %c0_0 = arith.constant 0 : index
    %c0_1 = arith.constant 0 : index
    %0 = vector.load %arg1[%c0, %c0_0, %c0_1] : memref<1x19x128xbf16, #tpu.memory_space<vmem>>, vector<1x19x128xbf16>
    %1 = vector.shape_cast %0 : vector<1x19x128xbf16> to vector<19x128xbf16>
    %c0_2 = arith.constant 0 : index
    %c0_3 = arith.constant 0 : index
    %2 = vector.load %arg2[%c0_2, %c0_3] : memref<128x192xbf16, #tpu.memory_space<vmem>>, vector<128x192xbf16>
    %cst = arith.constant dense<0.000000e+00> : vector<19x192xf32>
    %3 = tpu.matmul %1, %2, %cst {dimension_numbers = #tpu.dot_dimension_numbers<[1], [0], [0], [1], [0, 0, 1, 1], [], []>} : vector<19x128xbf16>, vector<128x192xbf16>, vector<19x192xf32> -> vector<19x192xf32>
    %4 = vector.extract_strided_slice %3 {offsets = [0, 0], sizes = [19, 64], strides = [1, 1]} : vector<19x192xf32> to vector<19x64xf32>
    %5 = vector.extract_strided_slice %3 {offsets = [0, 64], sizes = [19, 64], strides = [1, 1]} : vector<19x192xf32> to vector<19x64xf32>
    %6 = vector.extract_strided_slice %3 {offsets = [0, 128], sizes = [19, 64], strides = [1, 1]} : vector<19x192xf32> to vector<19x64xf32>
    %c0_4 = arith.constant 0 : index
    %c0_5 = arith.constant 0 : index
    %7 = vector.load %arg3[%c0_4, %c0_5] : memref<1x64xf32, #tpu.memory_space<vmem>>, vector<1x64xf32>
    %cst_6 = arith.constant 0.000000e+00 : f32
    %8 = vector.broadcast %cst_6 : f32 to vector<1x64xf32>
    %9 = vector.extract_strided_slice %6 {offsets = [0, 0], sizes = [18, 64], strides = [1, 1]} : vector<19x64xf32> to vector<18x64xf32>
    %10 = tpu.concatenate %8, %9 in 0 : vector<1x64xf32>, vector<18x64xf32> -> vector<19x64xf32>
    %11 = arith.addf %4, %10 : vector<19x64xf32>
    %12 = vector.broadcast %7 : vector<1x64xf32> to vector<19x64xf32>
    %13 = arith.addf %11, %12 : vector<19x64xf32>
    %14 = math.tanh %13 : vector<19x64xf32>
    %15 = vector.broadcast %7 : vector<1x64xf32> to vector<19x64xf32>
    %16 = arith.addf %5, %15 : vector<19x64xf32>
    %17 = math.tanh %16 : vector<19x64xf32>
    %18 = vector.extract_strided_slice %6 {offsets = [18, 0], sizes = [1, 64], strides = [1, 1]} : vector<19x64xf32> to vector<1x64xf32>
    %19 = arith.addf %18, %7 : vector<1x64xf32>
    %20 = math.tanh %19 : vector<1x64xf32>
    %21 = vector.shape_cast %14 : vector<19x64xf32> to vector<19x1x64xf32>
    %22 = vector.shape_cast %17 : vector<19x64xf32> to vector<19x1x64xf32>
    %23 = tpu.concatenate %21, %22 in 1 : vector<19x1x64xf32>, vector<19x1x64xf32> -> vector<19x2x64xf32>
    %24 = vector.shape_cast %23 : vector<19x2x64xf32> to vector<38x64xf32>
    %25 = arith.truncf %24 : vector<38x64xf32> to vector<38x64xbf16>
    %c0_7 = arith.constant 0 : index
    %c0_8 = arith.constant 0 : index
    %c0_9 = arith.constant 0 : index
    %26 = vector.load %arg4[%c0_7, %c0_8, %c0_9] : memref<1x39x64xbf16, #tpu.memory_space<vmem>>, vector<1x38x64xbf16>
    %27 = vector.shape_cast %26 : vector<1x38x64xbf16> to vector<38x64xbf16>
    %28 = vector.shape_cast %25 : vector<38x64xbf16> to vector<1x38x64xbf16>
    tpu.vector_store %arg4[%c0_7, %c0_8, %c0_9], %28 {strides = array<i32>} : memref<1x39x64xbf16, #tpu.memory_space<vmem>>, vector<1x38x64xbf16>,
    %29 = arith.truncf %20 : vector<1x64xf32> to vector<1x64xbf16>
    %c0_10 = arith.constant 0 : index
    %c38 = arith.constant 38 : index
    %c0_11 = arith.constant 0 : index
    %30 = vector.load %arg4[%c0_10, %c38, %c0_11] : memref<1x39x64xbf16, #tpu.memory_space<vmem>>, vector<1x1x64xbf16>
    %31 = vector.shape_cast %30 : vector<1x1x64xbf16> to vector<1x64xbf16>
    %32 = vector.shape_cast %29 : vector<1x64xbf16> to vector<1x1x64xbf16>
    tpu.vector_store %arg4[%c0_10, %c38, %c0_11], %32 {strides = array<i32>} : memref<1x39x64xbf16, #tpu.memory_space<vmem>>, vector<1x1x64xbf16>,
    return
  }
  func.func @transform_0(%arg0: i32) -> (i32, i32, i32) {
    %c0_i32 = arith.constant 0 : i32
    %c0_i32_0 = arith.constant 0 : i32
    %c0_i32_1 = arith.constant 0 : i32
    return %arg0, %c0_i32, %c0_i32_0 : i32, i32, i32
  }
  func.func @transform_1(%arg0: i32) -> (i32, i32) {
    %c0_i32 = arith.constant 0 : i32
    %c0_i32_0 = arith.constant 0 : i32
    %c0_i32_1 = arith.constant 0 : i32
    return %c0_i32, %c0_i32_0 : i32, i32
  }
  func.func @transform_2(%arg0: i32) -> (i32, i32) {
    %c0_i32 = arith.constant 0 : i32
    %c0_i32_0 = arith.constant 0 : i32
    %c0_i32_1 = arith.constant 0 : i32
    return %c0_i32, %c0_i32_0 : i32, i32
  }
  func.func @transform_3(%arg0: i32) -> (i32, i32, i32) {
    %c0_i32 = arith.constant 0 : i32
    %c0_i32_0 = arith.constant 0 : i32
    %c0_i32_1 = arith.constant 0 : i32
    return %arg0, %c0_i32, %c0_i32_0 : i32, i32, i32
  }
}

module attributes {stable_mosaic.version = 11 : i64} {
  func.func @_dec_vpu_kernel(%arg0: i32, %arg1: memref<1x79x32xbf16, #tpu.memory_space<vmem>>, %arg2: memref<3x32xf32, #tpu.memory_space<vmem>>, %arg3: memref<1x1xf32, #tpu.memory_space<vmem>>, %arg4: memref<1x159x1xf32, #tpu.memory_space<vmem>>) attributes {dimension_semantics = [#tpu.dimension_semantics<parallel>], iteration_bounds = array<i64: 2>, scalar_prefetch = 0 : i64, scratch_operands = 0 : i64, tpu.core_type = #tpu.core_type<tc>, window_params = [{transform_indices = @transform_0, window_bounds = array<i64: 1, 79, 32>}, {pipeline_mode = #tpu.pipeline_mode<synchronous>, transform_indices = @transform_1, window_bounds = array<i64: 3, 32>}, {pipeline_mode = #tpu.pipeline_mode<synchronous>, transform_indices = @transform_2, window_bounds = array<i64: 1, 1>}, {transform_indices = @transform_3, window_bounds = array<i64: 1, 159, 1>}]} {
    %c0 = arith.constant 0 : index
    %c0_0 = arith.constant 0 : index
    %c0_1 = arith.constant 0 : index
    %0 = vector.load %arg1[%c0, %c0_0, %c0_1] : memref<1x79x32xbf16, #tpu.memory_space<vmem>>, vector<1x79x32xbf16>
    %1 = vector.shape_cast %0 : vector<1x79x32xbf16> to vector<79x32xbf16>
    %2 = arith.extf %1 : vector<79x32xbf16> to vector<79x32xf32>
    %c0_2 = arith.constant 0 : index
    %c0_3 = arith.constant 0 : index
    %3 = vector.load %arg2[%c0_2, %c0_3] : memref<3x32xf32, #tpu.memory_space<vmem>>, vector<1x32xf32>
    %4 = vector.broadcast %3 : vector<1x32xf32> to vector<79x32xf32>
    %5 = arith.mulf %2, %4 : vector<79x32xf32>
    %cst = arith.constant dense<0.000000e+00> : vector<79xf32>
    %6 = vector.multi_reduction <add>, %5, %cst [1] : vector<79x32xf32> to vector<79xf32>
    %7 = vector.shape_cast %6 : vector<79xf32> to vector<79x1xf32>
    %c1 = arith.constant 1 : index
    %c0_4 = arith.constant 0 : index
    %8 = vector.load %arg2[%c1, %c0_4] : memref<3x32xf32, #tpu.memory_space<vmem>>, vector<1x32xf32>
    %9 = vector.broadcast %8 : vector<1x32xf32> to vector<79x32xf32>
    %10 = arith.mulf %2, %9 : vector<79x32xf32>
    %cst_5 = arith.constant dense<0.000000e+00> : vector<79xf32>
    %11 = vector.multi_reduction <add>, %10, %cst_5 [1] : vector<79x32xf32> to vector<79xf32>
    %12 = vector.shape_cast %11 : vector<79xf32> to vector<79x1xf32>
    %c2 = arith.constant 2 : index
    %c0_6 = arith.constant 0 : index
    %13 = vector.load %arg2[%c2, %c0_6] : memref<3x32xf32, #tpu.memory_space<vmem>>, vector<1x32xf32>
    %14 = vector.broadcast %13 : vector<1x32xf32> to vector<79x32xf32>
    %15 = arith.mulf %2, %14 : vector<79x32xf32>
    %cst_7 = arith.constant dense<0.000000e+00> : vector<79xf32>
    %16 = vector.multi_reduction <add>, %15, %cst_7 [1] : vector<79x32xf32> to vector<79xf32>
    %17 = vector.shape_cast %16 : vector<79xf32> to vector<79x1xf32>
    %c0_8 = arith.constant 0 : index
    %c0_9 = arith.constant 0 : index
    %18 = vector.load %arg3[%c0_8, %c0_9] : memref<1x1xf32, #tpu.memory_space<vmem>>, vector<1x1xf32>
    %cst_10 = arith.constant 0.000000e+00 : f32
    %19 = vector.broadcast %cst_10 : f32 to vector<1x1xf32>
    %20 = vector.extract_strided_slice %17 {offsets = [0, 0], sizes = [78, 1], strides = [1, 1]} : vector<79x1xf32> to vector<78x1xf32>
    %21 = tpu.concatenate %19, %20 in 0 : vector<1x1xf32>, vector<78x1xf32> -> vector<79x1xf32>
    %22 = arith.addf %7, %21 : vector<79x1xf32>
    %23 = vector.broadcast %18 : vector<1x1xf32> to vector<79x1xf32>
    %24 = arith.addf %22, %23 : vector<79x1xf32>
    %25 = math.tanh %24 : vector<79x1xf32>
    %26 = vector.broadcast %18 : vector<1x1xf32> to vector<79x1xf32>
    %27 = arith.addf %12, %26 : vector<79x1xf32>
    %28 = math.tanh %27 : vector<79x1xf32>
    %29 = vector.extract_strided_slice %17 {offsets = [78, 0], sizes = [1, 1], strides = [1, 1]} : vector<79x1xf32> to vector<1x1xf32>
    %30 = arith.addf %29, %18 : vector<1x1xf32>
    %31 = math.tanh %30 : vector<1x1xf32>
    %32 = vector.shape_cast %25 : vector<79x1xf32> to vector<79x1x1xf32>
    %33 = vector.shape_cast %28 : vector<79x1xf32> to vector<79x1x1xf32>
    %34 = tpu.concatenate %32, %33 in 1 : vector<79x1x1xf32>, vector<79x1x1xf32> -> vector<79x2x1xf32>
    %35 = vector.shape_cast %34 : vector<79x2x1xf32> to vector<158x1xf32>
    %c0_11 = arith.constant 0 : index
    %c0_12 = arith.constant 0 : index
    %c0_13 = arith.constant 0 : index
    %36 = vector.load %arg4[%c0_11, %c0_12, %c0_13] : memref<1x159x1xf32, #tpu.memory_space<vmem>>, vector<1x158x1xf32>
    %37 = vector.shape_cast %36 : vector<1x158x1xf32> to vector<158x1xf32>
    %38 = vector.shape_cast %35 : vector<158x1xf32> to vector<1x158x1xf32>
    tpu.vector_store %arg4[%c0_11, %c0_12, %c0_13], %38 {strides = array<i32>} : memref<1x159x1xf32, #tpu.memory_space<vmem>>, vector<1x158x1xf32>,
    %c0_14 = arith.constant 0 : index
    %c158 = arith.constant 158 : index
    %c0_15 = arith.constant 0 : index
    %39 = vector.load %arg4[%c0_14, %c158, %c0_15] : memref<1x159x1xf32, #tpu.memory_space<vmem>>, vector<1x1x1xf32>
    %40 = vector.shape_cast %39 : vector<1x1x1xf32> to vector<1x1xf32>
    %41 = vector.shape_cast %31 : vector<1x1xf32> to vector<1x1x1xf32>
    tpu.vector_store %arg4[%c0_14, %c158, %c0_15], %41 {strides = array<i32>} : memref<1x159x1xf32, #tpu.memory_space<vmem>>, vector<1x1x1xf32>,
    return
  }
  func.func @transform_0(%arg0: i32) -> (i32, i32, i32) {
    %c0_i32 = arith.constant 0 : i32
    %c0_i32_0 = arith.constant 0 : i32
    %c0_i32_1 = arith.constant 0 : i32
    return %arg0, %c0_i32, %c0_i32_0 : i32, i32, i32
  }
  func.func @transform_1(%arg0: i32) -> (i32, i32) {
    %c0_i32 = arith.constant 0 : i32
    %c0_i32_0 = arith.constant 0 : i32
    %c0_i32_1 = arith.constant 0 : i32
    return %c0_i32, %c0_i32_0 : i32, i32
  }
  func.func @transform_2(%arg0: i32) -> (i32, i32) {
    %c0_i32 = arith.constant 0 : i32
    %c0_i32_0 = arith.constant 0 : i32
    %c0_i32_1 = arith.constant 0 : i32
    return %c0_i32, %c0_i32_0 : i32, i32
  }
  func.func @transform_3(%arg0: i32) -> (i32, i32, i32) {
    %c0_i32 = arith.constant 0 : i32
    %c0_i32_0 = arith.constant 0 : i32
    %c0_i32_1 = arith.constant 0 : i32
    return %arg0, %c0_i32, %c0_i32_0 : i32, i32, i32
  }
}

</mosaic_0001>

<bundles_post_ra>
// kernel: cae1d_forward.12
= control target key start
LH: loop header
LB: loop body
LE: loop exit
PB: predicated region body
PF: predicated region fallthrough
CT: control target
= control target key end

     0   :  { %8 = vsyncpa [#allocation3], 0  ;;  %s1041_s12 = smov 0   ;;  %s1260_s0 = inlined_call_operand.vmem [shape: bf16[2,32,64], index: 0, kind: input, shape index: {}]   ;;  %s1261_s1 = inlined_call_operand.vmem [shape: bf16[192,128], index: 1, kind: input, shape index: {}]   ;;  %s1262_s2 = inlined_call_operand.hbm [shape: f32[1,128], index: 2, kind: input, shape index: {}]   ;;  %s1263_s3 = inlined_call_operand.vmem [shape: bf16[2,16,128], index: 3, kind: output, shape index: {}]  }
   0x1 LB: > { %s1047_s13 = sadd.s32 4294967295, %s1015_s12   ;;  %p823_p0 = scmp.ge.s32.totalorder %s1015_s12, 1  ;;  %s1015_s12 = sphi %s1041_s12, %s14_s12  }
   0x2   : > { %p113_p1 = scmp.lt.s32.totalorder %s1015_s12, 3  ;;  %p1264_p3 = scmp.eq.s32.totalorder %s1047_s13, 0 }
   0x3   : > { %s1017_s15 = smov [#allocation2]   ;;  %s977_s20 = scalar_lea.hbm %s1262_s2, 16 }
   0x4   : > { %p1051_p2 = pnand %p823_p0, %p113_p1  ;;  %s129_s16 = sshll.u32 %s1017_s15, 4  ;;  %s130_s16 = int_to_ptr.vmem [resolvable:$true] %s129_s16 }
   0x5   : > { %p978_p6 = scmp.ne.s32.totalorder %s1262_s2, %s977_s20  ;;  %p984_p10 = scmp.lt.u32.totalorder %s977_s20, %s1262_s2 }
   0x6   : > { %s1266_s14 = scalar_select %p1051_p2, 1, 0 }
   0x7   : > { %p913_p4 = pneg %p1051_p2 }
   0x9   : > { %p1060_p5 = pnand %p1264_p3, %p913_p4 }
   0xb   : > { %p979_p7 = pneg %p1060_p5 }
   0xd   : > { %p980_p8 = pnand %p979_p7, %p978_p6 }
   0xf   : > { %p981_p9 = pneg %p980_p8 }
  0x11   : > { %p986_p11 = pnand %p984_p10, %p981_p9 }
  0x13   : > { %989 = shalt.err (!%p986_p11)
}
  0x14   : > { %s990_s25 = scalar_lea.vmem %s130_s16, 16  ;;  %s997_s26 = scalar_lea.vmem %s130_s16, 32 }
  0x15   : > { %p991_p12 = scmp.ne.s32.totalorder %s130_s16, %s990_s25  ;;  %p998_p1 = scmp.lt.s32.totalorder %s130_s16, %s130_s16 }
  0x16   : > { %p999_p4 = scmp.lt.s32.totalorder %s997_s26, %s990_s25 }
  0x17   : > { %p993_p13 = pnand %p991_p12, %p979_p7 }
  0x18   : > { %p1000_p3 = por %p999_p4, %p998_p1 }
  0x19   : > { %p994_p0 = pneg %p993_p13 }
  0x1b   : > { %p1001_p2 = pnand %p1000_p3, %p994_p0 }
  0x1d   : > { %1004 = shalt.err (!%p1001_p2)
}
  0x1e   : > { %916 = dma.hbm_to_vmem [thread:$0]  (!%p1060_p5), %s1262_s2, 16, %s130_s16, [#allocation3]  }
  0x1f   : > { %p1268_p6 = scmp.ne.s32.totalorder %s1266_s14, 0 }
  0x20   : > { %p1269_p8 = scmp.eq.s32.totalorder (!%p1268_p6), %s1047_s13, 0 }
  0x21   : > { %150 = sbr.rel (%p1268_p6) target bundleno = 455 (0x1c7), region = 32 }
  0x28   : > { %1010 = dma.done.wait (%p1269_p8), [#allocation3], 16   ;;  %p1270_p7 = pmov %p1269_p8 }
  0x29   : > { %p174_p9 = scmp.lt.s32.totalorder %s1047_s13, 1  ;;  %v1018_v0 = vmov 0   ;;  %vm219_vm0 = vsmask.f32 7424  ;;  %s1019_s6 = smov 64   ;;  %v933_v4 = vld [vmem:[%s1261_s1] sm:$0xff]   ;;  %v401_v37 = vlaneseq }
  0x2a   : > { %1012 = vsyncadd (%p1270_p7), [#allocation3], 4294967280  ;;  %344 = vmatprep.subr.bf16.mxu0 %v1018_v0  ;;  %885 = vmatprep.subr.bf16.mxu1 %v1018_v0  ;;  %v934_v6 = vld [vmem:[%s1261_s1 + $0x8] sm:$0xff]   ;;  %vm226_vm1 = vcmask 1047552   ;;  %vm233_vm2 = vcmask 523264   ;;  %v935_v12 = vld [vmem:[%s1261_s1 + $0x10] sm:$0xff]  }
  0x2b   : > { %s1272_s13 = smov (!%p174_p9, %s1047_s13), 1  ;;  %345 = vmatpush1.bf16.msra.mxu0 %v933_v4  ;;  %897 = vmatpush1.bf16.msra.mxu1 %v933_v4  ;;  %vm227_vm3 = vmand %vm226_vm1, %vm219_vm0  ;;  %v936_v18 = vld [vmem:[%s1261_s1 + $0x18] sm:$0xff]   ;;  %vm199_vm4 = vsmask.f32 256  ;;  %v937_v22 = vld [vmem:[%s1261_s1 + $0x20] sm:$0xff]   ;;  %vm216_vm5 = vcmask 1040384  }
  0x2c   : > { %s867_s29 = sshll.u32 %s1272_s13, 4  ;;  %346 = vmatprep.subr.bf16.mxu0 %v1018_v0  ;;  %886 = vmatprep.subr.bf16.mxu1 %v1018_v0  ;;  %v938_v23 = vld [vmem:[%s1261_s1 + $0x28] sm:$0xff]   ;;  %v939_v24 = vld [vmem:[%s1261_s1 + $0x30] sm:$0xff]   ;;  %v940_v25 = vld [vmem:[%s1261_s1 + $0x38] sm:$0xff]   ;;  %v1020_v35 = vmov 1983009808  }
  0x2d   : > { %s178_s5 = scalar_lea.vmem %s1260_s0, %s867_s29  ;;  %v941_v26 = vld [vmem:[%s1261_s1 + $0x40] sm:$0xff]   ;;  %v942_v27 = vld [vmem:[%s1261_s1 + $0x48] sm:$0xff]   ;;  %v943_v28 = vld [vmem:[%s1261_s1 + $0x50] sm:$0xff]   ;;  %v399_v36 = vunpack.c.l.s4 %v1020_v35  ;;  %v402_v39 = vshrl.u32 %v401_v37, 7  ;;  %vm481_vm7 = vcmask 1041408   ;;  %vm714_vm8 = vcmask 1041409  }
  0x2e   : > { %v931_v1 = vld [vmem:[%s178_s5] sm:$0xff]   ;;  %v932_v2 = vld [vmem:[%s178_s5 + $0x8] sm:$0xff]   ;;  %v944_v29 = vld [vmem:[%s1261_s1 + $0x58] sm:$0xff]   ;;  %vm717_vm9 = vcmask 1042434   ;;  %vm720_vm10 = vcmask 1043459   ;;  %vm723_vm11 = vcmask 1044484  }
  0x2f   : > { %229 = vrot.lane.b32.xlu0 %v931_v1, %s1019_s6  ;;  %v204_v3 = vshll.u32 %v931_v1, 16  ;;  %v201_v5 = vshrl.u32 %v931_v1, 16  ;;  %v211_v7 = vshll.u32 %v932_v2, 16  ;;  %347 = vmatpush1.bf16.msra.mxu0 %v934_v6  ;;  %v208_v13 = vshrl.u32 %v932_v2, 16  ;;  %vm217_vm6 = vmand %vm216_vm5, %vm199_vm4 }
  0x30   : > { %898 = vmatpush1.bf16.msra.mxu1 %v934_v6  ;;  %348 = vmatprep.subr.bf16.mxu0 %v1018_v0  ;;  %v400_v38 = vunpack.c.0.s8 %v399_v36  ;;  %vm726_vm12 = vcmask 1045509   ;;  %vm729_vm13 = vcmask 1046534   ;;  %vm732_vm14 = vcmask 1047559  }
  0x31   : > { %v220_v8 = vrot.slane %v204_v3, 1  ;;  %v222_v9 = vrot.slane %v211_v7, 1  ;;  %v203_v11 = vrot.slane %v201_v5, 7  ;;  %887 = vmatprep.subr.bf16.mxu1 %v1018_v0  ;;  %v210_v16 = vrot.slane %v208_v13, 7 }
  0x32   : > { %v1165_v40 = vsub.s32 %v400_v38, %v402_v39 }
  0x33   : > { %231 = vrot.lane.b32.xlu0 %v932_v2, %s1019_s6  ;;  %v221_v10 = vor.u32 %v220_v8, %v201_v5  ;;  %v1110_v15 = vor.u32 %v204_v3, %v203_v11  ;;  %v224_v17 = vor.u32 %v222_v9, %v208_v13  ;;  %349 = vmatpush1.bf16.msra.mxu0 %v935_v12  ;;  %s868_s6 = sshll.u32 %s1272_s13, 3 }
  0x34   : > { %899 = vmatpush1.bf16.msra.mxu1 %v935_v12  ;;  %v213_v20 = vor.u32 %v211_v7, %v210_v16  ;;  %350 = vmatprep.subr.bf16.mxu0 %v1018_v0  ;;  %s1235_s8 = scalar_lea.vmem %s1263_s3, %s868_s6 }
  0x35   : > { %v223_v14 = vsel %vm219_vm0, %v221_v10, %v222_v9  ;;  %v228_v19 = vsel %vm227_vm3, %v224_v17, 0  ;;  %888 = vmatprep.subr.bf16.mxu1 %v1018_v0  ;;  %v218_v30 = vsel %vm217_vm6, 0, %v1110_v15 }
  0x36   : > { %846 = vmatprep.mubr.msk.bf16.mxu0 %vm233_vm2, %v223_v14  ;;  %847 = vmatprep.mubr.msk.bf16.mxu1 %vm233_vm2, %v228_v19  ;;  %v214_v21 = vsel %vm199_vm4, %v203_v11, %v213_v20 }
  0x37   : > { %351 = vmatpush1.bf16.msra.mxu0 %v936_v18 }
  0x38   : > { %900 = vmatpush1.bf16.msra.mxu1 %v936_v18  ;;  %352 = vmatprep.subr.bf16.mxu0 %v1018_v0 }
  0x39   : > { %889 = vmatprep.subr.bf16.mxu1 %v1018_v0 }
  0x3b   : > { %353 = vmatpush1.bf16.msra.mxu0 %v937_v22 }
  0x3c   : > { %901 = vmatpush1.bf16.msra.mxu1 %v937_v22  ;;  %354 = vmatprep.subr.bf16.mxu0 %v1018_v0 }
  0x3d   : > { %890 = vmatprep.subr.bf16.mxu1 %v1018_v0 }
  0x3f   : > { %355 = vmatpush1.bf16.msra.mxu0 %v938_v23 }
  0x40   : > { %902 = vmatpush1.bf16.msra.mxu1 %v938_v23  ;;  %356 = vmatprep.subr.bf16.mxu0 %v1018_v0 }
  0x41   : > { %891 = vmatprep.subr.bf16.mxu1 %v1018_v0 }
  0x43   : > { %357 = vmatpush1.bf16.msra.mxu0 %v939_v24 }
  0x44   : > { %903 = vmatpush1.bf16.msra.mxu1 %v939_v24  ;;  %358 = vmatprep.subr.bf16.mxu0 %v1018_v0 }
  0x45   : > { %892 = vmatprep.subr.bf16.mxu1 %v1018_v0 }
  0x47   : > { %359 = vmatpush1.bf16.msra.mxu0 %v940_v25 }
  0x48   : > { %904 = vmatpush1.bf16.msra.mxu1 %v940_v25  ;;  %360 = vmatprep.subr.bf16.mxu0 %v1018_v0  ;;  %v1183_v25 = vld [vmem:[#allocation2] ss:$0 sm:$0xff] }
  0x49   : > { %893 = vmatprep.subr.bf16.mxu1 %v1018_v0 }
  0x4b   : > { %361 = vmatpush1.bf16.msra.mxu0 %v941_v26 }
  0x4c   : > { %905 = vmatpush1.bf16.msra.mxu1 %v941_v26  ;;  %362 = vmatprep.subr.bf16.mxu0 %v1018_v0 }
  0x4d   : > { %894 = vmatprep.subr.bf16.mxu1 %v1018_v0 }
  0x4f   : > { %363 = vmatpush1.bf16.msra.mxu0 %v942_v27 }
  0x50   : > { %906 = vmatpush1.bf16.msra.mxu1 %v942_v27  ;;  %364 = vmatprep.subr.bf16.mxu0 %v1018_v0 }
  0x51   : > { %895 = vmatprep.subr.bf16.mxu1 %v1018_v0 }
  0x53   : > { %365 = vmatpush1.bf16.msra.mxu0 %v943_v28 }
  0x54   : > { %907 = vmatpush1.bf16.msra.mxu1 %v943_v28  ;;  %366 = vmatprep.subr.bf16.mxu0 %v1018_v0 }
  0x55   : > { %896 = vmatprep.subr.bf16.mxu1 %v1018_v0 }
  0x57   : > { %367 = vmatpush1.bf16.msra.mxu0 %v944_v29 }
  0x58   : > { %908 = vmatpush1.bf16.msra.mxu1 %v944_v29 }
  0xa1   : > { %v230_v31 = vpop.permute.xlu0 %229 }
  0xa2   : > { %v236_v32 = vsel %vm233_vm2, %v218_v30, %v230_v31 }
  0xa3   : > { %377 = vmatmul.mubr.bf16.vlgmr.msra.gmra.mrb[0].mxu0 %v236_v32 }
  0xa5   : > { %v232_v33 = vpop.permute.xlu0 %231 }
  0xa6   : > { %v240_v34 = vsel %vm233_vm2, %v214_v21, %v232_v33 }
  0xa7   : > { %385 = vmatmul.mubr.bf16.vlgmr.msra.gmra.mrb[0].mxu1 %v240_v34 }
 0x176   : > { %v378_v41 = vpop.f32.mrb[0].mxu0 }
 0x177   : > { %v397_v42 = vcombine.high %v378_v41, %v378_v41  ;;  %v404_v43 = vrot.slane %v378_v41, %v1165_v40  ;;  %v380_v44 = vpop.f32.mrb[1].mxu0 }
 0x178   : > { %v381_v45 = vpop.f32.mrb[2].mxu0 }
 0x179   : > { %v411_v46 = vrot.slane %v397_v42, %v1165_v40  ;;  %v412_v47 = vcombine.high %v404_v43, %v404_v43  ;;  %v482_v48 = vsel %vm481_vm7, %v404_v43, -inf  ;;  %v414_v49 = vcombine.high %v381_v45, %v381_v45  ;;  %v383_v50 = vpop.f32.mrb[3].mxu0 }
 0x17a   : > { %v483_v51 = vrot.slane %v482_v48, 4  ;;  %v421_v52 = vrot.slane %v381_v45, %v1165_v40  ;;  %v1171_v53 = vpop.f32.mrb[0].mxu1 }
 0x17b   : > { %v413_v54 = vcombine.high %v411_v46, %v411_v46  ;;  %v489_v55 = vsel %vm481_vm7, %v412_v47, -inf  ;;  %v496_v56 = vsel %vm481_vm7, %v411_v46, -inf  ;;  %v428_v57 = vrot.slane %v414_v49, %v1165_v40  ;;  %v388_v58 = vpop.f32.mrb[1].mxu1 }
 0x17c   : > { %v484_v59 = vmax.f32 %v482_v48, %v483_v51  ;;  %v490_v60 = vrot.slane %v489_v55, 4  ;;  %v497_v61 = vrot.slane %v496_v56, 4  ;;  %v429_v62 = vcombine.high %v421_v52, %v421_v52  ;;  %v1176_v63 = vpop.f32.mrb[2].mxu1 }
 0x17d   : > { %v503_v0 = vsel %vm481_vm7, %v413_v54, -inf  ;;  %v430_v1 = vcombine.high %v428_v57, %v428_v57  ;;  %v510_v2 = vsel %vm481_vm7, %v421_v52, -inf  ;;  %v524_v3 = vsel %vm481_vm7, %v428_v57, -inf  ;;  %v391_v4 = vpop.f32.mrb[3].mxu1 }
 0x17e   : > { %v485_v5 = vrot.slane %v484_v59, 2  ;;  %v491_v6 = vmax.f32 %v489_v55, %v490_v60  ;;  %v498_v7 = vmax.f32 %v496_v56, %v497_v61  ;;  %v504_v8 = vrot.slane %v503_v0, 4 }
 0x17f   : > { %v511_v9 = vrot.slane %v510_v2, 4  ;;  %v517_v10 = vsel %vm481_vm7, %v429_v62, -inf  ;;  %v525_v11 = vrot.slane %v524_v3, 4  ;;  %v531_v12 = vsel %vm481_vm7, %v430_v1, -inf }
 0x180   : > { %v486_v13 = vmax.f32 %v484_v59, %v485_v5  ;;  %v492_v14 = vrot.slane %v491_v6, 2  ;;  %v499_v15 = vrot.slane %v498_v7, 2  ;;  %v505_v16 = vmax.f32 %v503_v0, %v504_v8 }
 0x181   : > { %v512_v17 = vmax.f32 %v510_v2, %v511_v9  ;;  %v518_v18 = vrot.slane %v517_v10, 4  ;;  %v526_v19 = vmax.f32 %v524_v3, %v525_v11  ;;  %v532_v20 = vrot.slane %v531_v12, 4 }
 0x182   : > { %v487_v21 = vrot.slane %v486_v13, 1  ;;  %v493_v22 = vmax.f32 %v491_v6, %v492_v14  ;;  %v500_v23 = vmax.f32 %v498_v7, %v499_v15  ;;  %v506_v24 = vrot.slane %v505_v16, 2 }
 0x183   : > { %v513_v26 = vrot.slane %v512_v17, 2  ;;  %v519_v27 = vmax.f32 %v517_v10, %v518_v18  ;;  %v527_v28 = vrot.slane %v526_v19, 2  ;;  %v533_v29 = vmax.f32 %v531_v12, %v532_v20 }
 0x184   : > { %v488_v30 = vmax.f32 %v486_v13, %v487_v21  ;;  %v494_v31 = vrot.slane %v493_v22, 1  ;;  %v501_v32 = vrot.slane %v500_v23, 1  ;;  %v507_v33 = vmax.f32 %v505_v16, %v506_v24 }
 0x185   : > { %v514_v34 = vmax.f32 %v512_v17, %v513_v26  ;;  %v520_v35 = vrot.slane %v519_v27, 2  ;;  %v528_v36 = vmax.f32 %v526_v19, %v527_v28  ;;  %v534_v37 = vrot.slane %v533_v29, 2 }
 0x186   : > { %v495_v38 = vmax.f32 %v493_v22, %v494_v31  ;;  %v502_v39 = vmax.f32 %v500_v23, %v501_v32  ;;  %v508_v41 = vrot.slane %v507_v33, 1  ;;  %v601_v42 = vadd.f32 %v1183_v25, %v488_v30 }
 0x187   : > { %v515_v43 = vrot.slane %v514_v34, 1  ;;  %v521_v44 = vmax.f32 %v519_v27, %v520_v35  ;;  %v529_v45 = vrot.slane %v528_v36, 1  ;;  %v535_v46 = vmax.f32 %v533_v29, %v534_v37 }
 0x188   : > { %v509_v47 = vmax.f32 %v507_v33, %v508_v41  ;;  %v602_v48 = vadd.f32 %v1183_v25, %v495_v38  ;;  %v603_v49 = vadd.f32 %v1183_v25, %v502_v39  ;;  %945 = vtanh.f32 %v601_v42 }
 0x189   : > { %v516_v50 = vmax.f32 %v514_v34, %v515_v43  ;;  %v522_v51 = vrot.slane %v521_v44, 1  ;;  %v530_v52 = vmax.f32 %v528_v36, %v529_v45  ;;  %v536_v54 = vrot.slane %v535_v46, 1 }
 0x18a   : > { %v604_v55 = vadd.f32 %v1183_v25, %v509_v47  ;;  %947 = vtanh.f32 %v602_v48  ;;  %v431_v56 = vcombine.high %v1171_v53, %v1171_v53  ;;  %v438_v57 = vrot.slane %v1171_v53, %v1165_v40 }
 0x18b   : > { %949 = vtanh.f32 %v603_v49  ;;  %v523_v58 = vmax.f32 %v521_v44, %v522_v51  ;;  %v537_v59 = vmax.f32 %v535_v46, %v536_v54  ;;  %v605_v60 = vadd.f32 %v1183_v25, %v516_v50 }
 0x18c   : > { %951 = vtanh.f32 %v604_v55  ;;  %v607_v61 = vadd.f32 %v1183_v25, %v530_v52  ;;  %v445_v62 = vrot.slane %v431_v56, %v1165_v40  ;;  %v446_v0 = vcombine.high %v438_v57, %v438_v57 }
 0x18d   : > { %v606_v1 = vadd.f32 %v1183_v25, %v523_v58  ;;  %v608_v2 = vadd.f32 %v1183_v25, %v537_v59  ;;  %953 = vtanh.f32 %v605_v60  ;;  %v538_v3 = vsel %vm481_vm7, %v438_v57, -inf }
 0x18e   : > { %955 = vtanh.f32 %v607_v61  ;;  %v447_v53 = vcombine.high %v445_v62, %v445_v62  ;;  %v539_v4 = vrot.slane %v538_v3, 4  ;;  %v545_v5 = vsel %vm481_vm7, %v446_v0, -inf }
 0x18f   : > { %957 = vtanh.f32 %v606_v1  ;;  %v546_v6 = vrot.slane %v545_v5, 4  ;;  %v552_v7 = vsel %vm481_vm7, %v445_v62, -inf  ;;  %v448_v8 = vcombine.high %v1176_v63, %v1176_v63 }
 0x190   : > { %959 = vtanh.f32 %v608_v2  ;;  %v540_v9 = vmax.f32 %v538_v3, %v539_v4  ;;  %v553_v10 = vrot.slane %v552_v7, 4  ;;  %v559_v11 = vsel %vm481_vm7, %v447_v53, -inf }
 0x191   : > { %v547_v12 = vmax.f32 %v545_v5, %v546_v6  ;;  %v560_v13 = vrot.slane %v559_v11, 4  ;;  %v1206_v14 = vrot.slane %v1176_v63, %v1165_v40  ;;  %v1209_v15 = vrot.slane %v448_v8, %v1165_v40 }
 0x192   : > { %v946_v16 = vpop.eup %945  ;;  %v541_v17 = vrot.slane %v540_v9, 2  ;;  %v554_v18 = vmax.f32 %v552_v7, %v553_v10 }
 0x193   : > { %v869_v19 = vpack.c.bf16 %v946_v16, %v946_v16  ;;  %v548_v20 = vrot.slane %v547_v12, 2  ;;  %v561_v21 = vmax.f32 %v559_v11, %v560_v13  ;;  %v463_v22 = vcombine.high %v1206_v14, %v1206_v14 }
 0x194   : > { %v948_v23 = vpop.eup %947  ;;  %v542_v24 = vmax.f32 %v540_v9, %v541_v17  ;;  %v555_v26 = vrot.slane %v554_v18, 2  ;;  %v464_v63 = vcombine.high %v1209_v15, %v1209_v15  ;;  %v566_v40 = vsel %vm481_vm7, %v1206_v14, -inf }
 0x195   : > { %v950_v27 = vpop.eup %949  ;;  %v870_v28 = vpack.c.bf16 %v948_v23, %v948_v23  ;;  %v697_v29 = vunpack.c.l.b16 %v869_v19  ;;  %v549_v30 = vmax.f32 %v547_v12, %v548_v20  ;;  %v562_v31 = vrot.slane %v561_v21, 2 }
 0x196   : > { %v952_v32 = vpop.eup %951  ;;  %v871_v33 = vpack.c.bf16 %v950_v27, %v950_v27  ;;  %v543_v34 = vrot.slane %v542_v24, 1  ;;  %v556_v35 = vmax.f32 %v554_v18, %v555_v26  ;;  %v567_v36 = vrot.slane %v566_v40, 4 }
 0x197   : > { %v954_v37 = vpop.eup %953  ;;  %v872_v38 = vpack.c.bf16 %v952_v32, %v952_v32  ;;  %v698_v39 = vunpack.c.l.b16 %v870_v28  ;;  %v550_v41 = vrot.slane %v549_v30, 1  ;;  %v563_v42 = vmax.f32 %v561_v21, %v562_v31 }
 0x198   : > { %v956_v43 = vpop.eup %955  ;;  %v699_v44 = vunpack.c.l.b16 %v871_v33  ;;  %v873_v45 = vpack.c.bf16 %v954_v37, %v954_v37  ;;  %v544_v46 = vmax.f32 %v542_v24, %v543_v34  ;;  %v557_v47 = vrot.slane %v556_v35, 1 }
 0x199   : > { %v958_v48 = vpop.eup %957  ;;  %v700_v49 = vunpack.c.l.b16 %v872_v38  ;;  %v713_v50 = vrot.slane %v698_v39, 7  ;;  %v875_v51 = vpack.c.bf16 %v956_v43, %v956_v43  ;;  %v551_v52 = vmax.f32 %v549_v30, %v550_v41 }
 0x19a   : > { %v960_v54 = vpop.eup %959  ;;  %v716_v55 = vrot.slane %v699_v44, 6  ;;  %v874_v56 = vpack.c.bf16 %v958_v48, %v958_v48  ;;  %v701_v57 = vunpack.c.l.b16 %v873_v45  ;;  %v558_v58 = vmax.f32 %v556_v35, %v557_v47 }
 0x19b   : > { %v715_v59 = vsel %vm714_vm8, %v713_v50, %v697_v29  ;;  %v719_v60 = vrot.slane %v700_v49, 5  ;;  %v876_v61 = vpack.c.bf16 %v960_v54, %v960_v54  ;;  %v703_v62 = vunpack.c.l.b16 %v875_v51 }
 0x19c   : > { %v718_v0 = vsel %vm717_vm9, %v716_v55, %v715_v59  ;;  %v702_v1 = vunpack.c.l.b16 %v874_v56  ;;  %v722_v2 = vrot.slane %v701_v57, 4  ;;  %v564_v3 = vrot.slane %v563_v42, 1 }
 0x19d   : > { %v704_v53 = vunpack.c.l.b16 %v876_v61  ;;  %v721_v4 = vsel %vm720_vm10, %v719_v60, %v718_v0  ;;  %v728_v5 = vrot.slane %v703_v62, 2  ;;  %v609_v6 = vadd.f32 %v1183_v25, %v544_v46 }
 0x19e   : > { %v724_v7 = vsel %vm723_vm11, %v722_v2, %v721_v4  ;;  %v725_v8 = vrot.slane %v702_v1, 3  ;;  %v565_v9 = vmax.f32 %v563_v42, %v564_v3  ;;  %v610_v10 = vadd.f32 %v1183_v25, %v551_v52 }
 0x19f   : > { %v731_v11 = vrot.slane %v704_v53, 1  ;;  %v611_v12 = vadd.f32 %v1183_v25, %v558_v58  ;;  %961 = vtanh.f32 %v609_v6  ;;  %v568_v13 = vmax.f32 %v566_v40, %v567_v36 }
 0x1a0   : > { %v727_v16 = vsel %vm726_vm12, %v725_v8, %v724_v7  ;;  %v612_v17 = vadd.f32 %v1183_v25, %v565_v9  ;;  %963 = vtanh.f32 %v610_v10  ;;  %v573_v18 = vsel %vm481_vm7, %v463_v22, -inf }
 0x1a1   : > { %v730_v19 = vsel %vm729_vm13, %v728_v5, %v727_v16  ;;  %965 = vtanh.f32 %v611_v12  ;;  %v569_v20 = vrot.slane %v568_v13, 2  ;;  %v574_v21 = vrot.slane %v573_v18, 4 }
 0x1a2   : > { %v733_v23 = vsel %vm732_vm14, %v731_v11, %v730_v19  ;;  %967 = vtanh.f32 %v612_v17  ;;  %v580_v24 = vsel %vm481_vm7, %v1209_v15, -inf  ;;  %v587_v14 = vsel %vm481_vm7, %v464_v63, -inf }
 0x1a3   : > { %v748_v22 = vpack.c.b16 %v733_v23, %v733_v23  ;;  %v570_v26 = vmax.f32 %v568_v13, %v569_v20  ;;  %v575_v40 = vmax.f32 %v573_v18, %v574_v21  ;;  %v581_v27 = vrot.slane %v580_v24, 4 }
 0x1a4   : > { %v588_v28 = vrot.slane %v587_v14, 4 }
 0x1a5   : > { %752 = vst [vmem:[%s1235_s8] sm:$0xf] %v748_v22  ;;  %v571_v29 = vrot.slane %v570_v26, 1  ;;  %v576_v30 = vrot.slane %v575_v40, 2  ;;  %v582_v31 = vmax.f32 %v580_v24, %v581_v27 }
 0x1a6   : > { %v589_v32 = vmax.f32 %v587_v14, %v588_v28 }
 0x1a7   : > { %v572_v33 = vmax.f32 %v570_v26, %v571_v29  ;;  %v577_v34 = vmax.f32 %v575_v40, %v576_v30  ;;  %v583_v35 = vrot.slane %v582_v31, 2 }
 0x1a8   : > { %v590_v36 = vrot.slane %v589_v32, 2 }
 0x1a9   : > { %v962_v37 = vpop.eup %961  ;;  %v578_v38 = vrot.slane %v577_v34, 1  ;;  %v584_v39 = vmax.f32 %v582_v31, %v583_v35  ;;  %v613_v15 = vadd.f32 %v1183_v25, %v572_v33 }
 0x1aa   : > { %v964_v63 = vpop.eup %963  ;;  %v591_v41 = vmax.f32 %v589_v32, %v590_v36  ;;  %v877_v47 = vpack.c.bf16 %v962_v37, %v962_v37 }
 0x1ab   : > { %v966_v42 = vpop.eup %965  ;;  %v878_v43 = vpack.c.bf16 %v964_v63, %v964_v63  ;;  %v579_v44 = vmax.f32 %v577_v34, %v578_v38  ;;  %v585_v45 = vrot.slane %v584_v39, 1  ;;  %969 = vtanh.f32 %v613_v15 }
 0x1ac   : > { %v968_v46 = vpop.eup %967  ;;  %v879_v48 = vpack.c.bf16 %v966_v42, %v966_v42  ;;  %v592_v49 = vrot.slane %v591_v41, 1  ;;  %v705_v60 = vunpack.c.l.b16 %v877_v47 }
 0x1ad   : > { %v880_v50 = vpack.c.bf16 %v968_v46, %v968_v46  ;;  %v706_v51 = vunpack.c.l.b16 %v878_v43  ;;  %v586_v52 = vmax.f32 %v584_v39, %v585_v45  ;;  %v614_v54 = vadd.f32 %v1183_v25, %v579_v44 }
 0x1ae   : > { %v707_v55 = vunpack.c.l.b16 %v879_v48  ;;  %v593_v56 = vmax.f32 %v591_v41, %v592_v49 }
 0x1af   : > { %v734_v57 = vrot.slane %v706_v51, 7  ;;  %v615_v58 = vadd.f32 %v1183_v25, %v586_v52  ;;  %971 = vtanh.f32 %v614_v54  ;;  %v708_v61 = vunpack.c.l.b16 %v880_v50 }
 0x1b0   : > { %v616_v59 = vadd.f32 %v1183_v25, %v593_v56  ;;  %v736_v62 = vrot.slane %v707_v55, 6 }
 0x1b1   : > { %973 = vtanh.f32 %v615_v58  ;;  %v735_v0 = vsel %vm714_vm8, %v734_v57, %v705_v60  ;;  %v738_v2 = vrot.slane %v708_v61, 5 }
 0x1b2   : > { %975 = vtanh.f32 %v616_v59  ;;  %v737_v3 = vsel %vm717_vm9, %v736_v62, %v735_v0 }
 0x1b3   : > { %v739_v6 = vsel %vm720_vm10, %v738_v2, %v737_v3 }
 0x1b5   : > { %v970_v1 = vpop.eup %969 }
 0x1b6   : > { %v881_v53 = vpack.c.bf16 %v970_v1, %v970_v1 }
 0x1b8   : > { %v709_v4 = vunpack.c.l.b16 %v881_v53 }
 0x1b9   : > { %v972_v5 = vpop.eup %971 }
 0x1ba   : > { %v882_v7 = vpack.c.bf16 %v972_v5, %v972_v5  ;;  %v740_v8 = vrot.slane %v709_v4, 4 }
 0x1bb   : > { %v974_v25 = vpop.eup %973 }
 0x1bc   : > { %v976_v9 = vpop.eup %975  ;;  %v883_v10 = vpack.c.bf16 %v974_v25, %v974_v25  ;;  %v710_v11 = vunpack.c.l.b16 %v882_v7  ;;  %v741_v12 = vsel %vm723_vm11, %v740_v8, %v739_v6 }
 0x1bd   : > { %v884_v13 = vpack.c.bf16 %v976_v9, %v976_v9 }
 0x1be   : > { %v711_v16 = vunpack.c.l.b16 %v883_v10  ;;  %v742_v17 = vrot.slane %v710_v11, 3 }
 0x1bf   : > { %v712_v18 = vunpack.c.l.b16 %v884_v13 }
 0x1c0   : > { %v743_v19 = vsel %vm726_vm12, %v742_v17, %v741_v12  ;;  %v744_v20 = vrot.slane %v711_v16, 2 }
 0x1c1   : > { %v746_v21 = vrot.slane %v712_v18, 1 }
 0x1c2   : > { %v745_v23 = vsel %vm729_vm13, %v744_v20, %v743_v19 }
 0x1c3   : > { %v747_v24 = vsel %vm732_vm14, %v746_v21, %v745_v23 }
 0x1c4   : > { %v749_v14 = vpack.c.b16 %v747_v24, %v747_v24 }
 0x1c6   : > { %753 = vst [vmem:[%s1235_s8 + $0x4] sm:$0xf] %v749_v14 }
 0x1c7 PF: > { %s14_s12 = sadd.s32 1, %s1015_s12  }
 0x1c8   : > { %p11_p2 = scmp.ge.s32.totalorder %s14_s12, 4  }
 0x1ca   :  { %13 = sbr.rel (!%p11_p2) target bundleno = 1 (0x1), region = 67 }
 0x1d1   :  { %775 = vsyncpa [#allocation3], 1 }
 0x1d2   :  { %777 = vsyncpa [#allocation3 + $0x1], 1 }

// kernel: cae1d_forward.11
= control target key start
LH: loop header
LB: loop body
LE: loop exit
PB: predicated region body
PF: predicated region fallthrough
CT: control target
= control target key end

     0   :  { %8 = vsyncpa [#allocation3], 0  ;;  %s1497_s12 = smov 0   ;;  %s1814_s0 = inlined_call_operand.vmem [shape: bf16[2,64,32], index: 0, kind: input, shape index: {}]   ;;  %s1815_s1 = inlined_call_operand.vmem [shape: bf16[96,64], index: 1, kind: input, shape index: {}]   ;;  %s1816_s2 = inlined_call_operand.hbm [shape: f32[1,64], index: 2, kind: input, shape index: {}]   ;;  %s1817_s3 = inlined_call_operand.vmem [shape: bf16[2,32,64], index: 3, kind: output, shape index: {}]  }
   0x1 LB: > { %s1503_s13 = sadd.s32 4294967295, %s1471_s12   ;;  %p1203_p0 = scmp.ge.s32.totalorder %s1471_s12, 1  ;;  %s1471_s12 = sphi %s1497_s12, %s14_s12  }
   0x2   : > { %p113_p1 = scmp.lt.s32.totalorder %s1471_s12, 3  ;;  %p1818_p3 = scmp.eq.s32.totalorder %s1503_s13, 0 }
   0x3   : > { %s1473_s15 = smov [#allocation2]   ;;  %s1433_s20 = scalar_lea.hbm %s1816_s2, 16 }
   0x4   : > { %p1507_p2 = pnand %p1203_p0, %p113_p1  ;;  %s129_s16 = sshll.u32 %s1473_s15, 4  ;;  %s130_s16 = int_to_ptr.vmem [resolvable:$true] %s129_s16 }
   0x5   : > { %p1434_p6 = scmp.ne.s32.totalorder %s1816_s2, %s1433_s20  ;;  %p1440_p10 = scmp.lt.u32.totalorder %s1433_s20, %s1816_s2 }
   0x6   : > { %s1820_s14 = scalar_select %p1507_p2, 1, 0 }
   0x7   : > { %p1341_p4 = pneg %p1507_p2 }
   0x9   : > { %p1516_p5 = pnand %p1818_p3, %p1341_p4 }
   0xb   : > { %p1435_p7 = pneg %p1516_p5 }
   0xd   : > { %p1436_p8 = pnand %p1435_p7, %p1434_p6 }
   0xf   : > { %p1437_p9 = pneg %p1436_p8 }
  0x11   : > { %p1442_p11 = pnand %p1440_p10, %p1437_p9 }
  0x13   : > { %1445 = shalt.err (!%p1442_p11)
}
  0x14   : > { %s1446_s25 = scalar_lea.vmem %s130_s16, 16  ;;  %s1453_s26 = scalar_lea.vmem %s130_s16, 32 }
  0x15   : > { %p1447_p12 = scmp.ne.s32.totalorder %s130_s16, %s1446_s25  ;;  %p1454_p1 = scmp.lt.s32.totalorder %s130_s16, %s130_s16 }
  0x16   : > { %p1455_p4 = scmp.lt.s32.totalorder %s1453_s26, %s1446_s25 }
  0x17   : > { %p1449_p13 = pnand %p1447_p12, %p1435_p7 }
  0x18   : > { %p1456_p3 = por %p1455_p4, %p1454_p1 }
  0x19   : > { %p1450_p0 = pneg %p1449_p13 }
  0x1b   : > { %p1457_p2 = pnand %p1456_p3, %p1450_p0 }
  0x1d   : > { %1460 = shalt.err (!%p1457_p2)
}
  0x1e   : > { %1344 = dma.hbm_to_vmem [thread:$0]  (!%p1516_p5), %s1816_s2, 16, %s130_s16, [#allocation3]  }
  0x1f   : > { %p1822_p6 = scmp.ne.s32.totalorder %s1820_s14, 0 }
  0x20   : > { %p1823_p8 = scmp.eq.s32.totalorder (!%p1822_p6), %s1503_s13, 0 }
  0x21   : > { %150 = sbr.rel (%p1822_p6) target bundleno = 518 (0x206), region = 32 }
  0x28   : > { %1466 = dma.done.wait (%p1823_p8), [#allocation3], 16   ;;  %p1824_p7 = pmov %p1823_p8 }
  0x29   : > { %p174_p9 = scmp.lt.s32.totalorder %s1503_s13, 1  ;;  %vm249_vm0 = vsmask.f32 7424  ;;  %vm262_vm1 = vcmask 1047552   ;;  %vm213_vm2 = vsmask.f32 256  ;;  %v438_v61 = vlaneseq }
  0x2a   : > { %1468 = vsyncadd (%p1824_p7), [#allocation3], 4294967280  ;;  %s1474_s6 = smov 32   ;;  %v1363_v16 = vld [vmem:[%s1815_s1] sm:$0xff]   ;;  %v1364_v17 = vld [vmem:[%s1815_s1 + $0x8] sm:$0xff]   ;;  %s1475_s15 = smov 64  }
  0x2b   : > { %s1828_s13 = smov (!%p174_p9, %s1503_s13), 1  ;;  %1305 = vmatprep.subr.bf16.mxu0 %v1363_v16  ;;  %1325 = vmatprep.subr.bf16.mxu1 %v1363_v16  ;;  %vm1559_vm3 = vmand %vm262_vm1, %vm249_vm0  ;;  %v1365_v29 = vld [vmem:[%s1815_s1 + $0x10] sm:$0xff]   ;;  %v1366_v39 = vld [vmem:[%s1815_s1 + $0x18] sm:$0xff]   ;;  %vm246_vm4 = vcmask 1040384   ;;  %vm282_vm6 = vcmask 261120   ;;  %vm295_vm7 = vcmask 523264  }
  0x2c   : > { %s1261_s29 = sshll.u32 %s1828_s13, 5  ;;  %1306 = vmatpush3.bf16.msra.mxu0 %v1363_v16  ;;  %1331 = vmatpush3.bf16.msra.mxu1 %v1363_v16  ;;  %v1367_v40 = vld [vmem:[%s1815_s1 + $0x20] sm:$0xff]   ;;  %v1368_v41 = vld [vmem:[%s1815_s1 + $0x28] sm:$0xff]   ;;  %vm247_vm5 = vmand %vm246_vm4, %vm213_vm2  ;;  %vm352_vm8 = vcmask 785408   ;;  %v1476_v59 = vmov 1983009808  }
  0x2d   : > { %s178_s5 = scalar_lea.vmem %s1814_s0, %s1261_s29  ;;  %1307 = vmatprep.subr.bf16.mxu0 %v1364_v17  ;;  %1326 = vmatprep.subr.bf16.mxu1 %v1364_v17  ;;  %v436_v60 = vunpack.c.l.s4 %v1476_v59  ;;  %v439_v63 = vshrl.u32 %v438_v61, 7  ;;  %vm602_vm9 = vcmask 517120   ;;  %vm1059_vm10 = vcmask 1041409   ;;  %s1262_s22 = sshll.u32 %s1828_s13, 4 }
  0x2e   : > { %v1359_v0 = vld [vmem:[%s178_s5 + $0x8] sm:$0xff]   ;;  %v1360_v1 = vld [vmem:[%s178_s5] sm:$0xff]   ;;  %v1361_v2 = vld [vmem:[%s178_s5 + $0x18] sm:$0xff]   ;;  %vm1062_vm11 = vcmask 1042434   ;;  %vm1065_vm12 = vcmask 1043459   ;;  %vm1068_vm13 = vcmask 1044484   ;;  %s1753_s24 = scalar_lea.vmem %s1817_s3, %s1262_s22 }
  0x2f   : > { %267 = vrot.lane.b32.xlu1 %v1359_v0, %s1474_s6  ;;  %v225_v3 = vshll.u32 %v1359_v0, 16  ;;  %265 = vrot.lane.b32.xlu0 %v1360_v1, %s1474_s6  ;;  %v218_v4 = vshll.u32 %v1360_v1, 16  ;;  %v1362_v5 = vld [vmem:[%s178_s5 + $0x10] sm:$0xff]   ;;  %v241_v6 = vshll.u32 %v1361_v2, 16  ;;  %v215_v7 = vshrl.u32 %v1360_v1, 16 }
  0x30   : > { %v238_v9 = vshrl.u32 %v1361_v2, 16  ;;  %v233_v10 = vshll.u32 %v1362_v5, 16  ;;  %v230_v11 = vshrl.u32 %v1362_v5, 16  ;;  %v222_v13 = vshrl.u32 %v1359_v0, 16  ;;  %1308 = vmatpush3.bf16.msra.mxu0 %v1364_v17  ;;  %1332 = vmatpush3.bf16.msra.mxu1 %v1364_v17 }
  0x31   : > { %v252_v8 = vrot.slane %v225_v3, 1  ;;  %v250_v12 = vrot.slane %v218_v4, 1  ;;  %v258_v14 = vrot.slane %v241_v6, 1  ;;  %v217_v22 = vrot.slane %v215_v7, 7  ;;  %1309 = vmatprep.subr.bf16.mxu0 %v1365_v29  ;;  %1327 = vmatprep.subr.bf16.mxu1 %v1365_v29 }
  0x32   : > { %v240_v15 = vrot.slane %v238_v9, 7  ;;  %v255_v18 = vrot.slane %v233_v10, 1  ;;  %v224_v20 = vrot.slane %v222_v13, 7  ;;  %v232_v28 = vrot.slane %v230_v11, 7 }
  0x33   : > { %271 = vrot.lane.b32.xlu1 %v1361_v2, %s1474_s6  ;;  %269 = vrot.lane.b32.xlu0 %v1362_v5, %s1474_s6  ;;  %v251_v19 = vor.u32 %v250_v12, %v215_v7  ;;  %v254_v21 = vor.u32 %v252_v8, %v222_v13  ;;  %v260_v26 = vor.u32 %v258_v14, %v238_v9  ;;  %v437_v62 = vunpack.c.0.s8 %v436_v60 }
  0x34   : > { %v243_v23 = vor.u32 %v241_v6, %v240_v15  ;;  %v257_v24 = vor.u32 %v255_v18, %v230_v11  ;;  %v227_v30 = vor.u32 %v225_v3, %v224_v20  ;;  %v220_v31 = vor.u32 %v218_v4, %v217_v22  ;;  %1310 = vmatpush3.bf16.msra.mxu0 %v1365_v29 }
  0x35   : > { %v253_v25 = vsel %vm249_vm0, %v251_v19, %v252_v8  ;;  %v235_v34 = vor.u32 %v233_v10, %v232_v28  ;;  %v256_v35 = vsel %vm249_vm0, %v254_v21, %v255_v18  ;;  %v264_v37 = vsel %vm1559_vm3, %v260_v26, 0  ;;  %1333 = vmatpush3.bf16.msra.mxu1 %v1365_v29  ;;  %1311 = vmatprep.subr.bf16.mxu0 %v1366_v39 }
  0x36   : > { %v259_v32 = vsel %vm249_vm0, %v257_v24, %v258_v14  ;;  %v244_v33 = vsel %vm213_vm2, %v232_v28, %v243_v23  ;;  %v228_v36 = vsel %vm213_vm2, %v217_v22, %v227_v30  ;;  %1328 = vmatprep.subr.bf16.mxu1 %v1366_v39  ;;  %v248_v46 = vsel %vm247_vm5, 0, %v220_v31 }
  0x37   : > { %274 = vrot.lane.b32.xlu0 %v253_v25, %s1475_s15  ;;  %278 = vrot.lane.b32.xlu1 %v259_v32, %s1475_s15  ;;  %v236_v38 = vsel %vm213_vm2, %v224_v20, %v235_v34  ;;  %v1587_v0 = vsub.s32 %v437_v62, %v439_v63  ;;  %vm1071_vm14 = vcmask 1045509   ;;  %vm1074_vm15 = vcmask 1046534  }
  0x38   : > { %1312 = vmatpush3.bf16.msra.mxu0 %v1366_v39  ;;  %vm1077_vm0 = vcmask 1047559   ;;  %vm1129_vm1 = vcmask 519168  }
  0x39   : > { %1334 = vmatpush3.bf16.msra.mxu1 %v1366_v39  ;;  %1313 = vmatprep.subr.bf16.mxu0 %v1367_v40 }
  0x3a   : > { %1329 = vmatprep.subr.bf16.mxu1 %v1367_v40 }
  0x3b   : > { %276 = vrot.lane.b32.xlu0 %v256_v35, %s1475_s15  ;;  %280 = vrot.lane.b32.xlu1 %v264_v37, %s1475_s15 }
  0x3c   : > { %1314 = vmatpush3.bf16.msra.mxu0 %v1367_v40 }
  0x3d   : > { %1335 = vmatpush3.bf16.msra.mxu1 %v1367_v40  ;;  %1315 = vmatprep.subr.bf16.mxu0 %v1368_v41 }
  0x3e   : > { %1330 = vmatprep.subr.bf16.mxu1 %v1368_v41 }
  0x40   : > { %1316 = vmatpush3.bf16.msra.mxu0 %v1368_v41 }
  0x41   : > { %1336 = vmatpush3.bf16.msra.mxu1 %v1368_v41 }
  0xa1   : > { %v268_v42 = vpop.permute.xlu1 %267  ;;  %v266_v43 = vpop.permute.xlu0 %265 }
  0xa2   : > { %v285_v47 = vsel %vm282_vm6, %v248_v46, %v266_v43  ;;  %v288_v53 = vsel %vm282_vm6, %v228_v36, %v268_v42 }
  0xa5   : > { %v272_v44 = vpop.permute.xlu1 %271  ;;  %v270_v45 = vpop.permute.xlu0 %269 }
  0xa6   : > { %v291_v49 = vsel %vm282_vm6, %v236_v38, %v270_v45  ;;  %v294_v55 = vsel %vm282_vm6, %v244_v33, %v272_v44 }
  0xa9   : > { %v275_v48 = vpop.permute.xlu0 %274  ;;  %v279_v50 = vpop.permute.xlu1 %278 }
  0xaa   : > { %v297_v51 = vsel %vm295_vm7, %v285_v47, %v275_v48  ;;  %v301_v52 = vsel %vm295_vm7, %v291_v49, %v279_v50 }
  0xab   : > { %1317 = vmatprep.mubr.msk.bf16.mxu0 %vm352_vm8, %v297_v51  ;;  %1321 = vmatprep.mubr.msk.bf16.mxu1 %vm352_vm8, %v301_v52 }
  0xad   : > { %v277_v54 = vpop.permute.xlu0 %276  ;;  %v281_v56 = vpop.permute.xlu1 %280 }
  0xae   : > { %v299_v57 = vsel %vm295_vm7, %v288_v53, %v277_v54  ;;  %v303_v58 = vsel %vm295_vm7, %v294_v55, %v281_v56  ;;  %v1619_v54 = vld [vmem:[#allocation2] ss:$0 sm:$0xff] }
  0xaf   : > { %1318 = vmatmul.mubr.msk.bf16.vlgmr.msra.gmra.mrb[0].mxu0 %vm352_vm8, %v299_v57  ;;  %1322 = vmatmul.mubr.msk.bf16.vlgmr.msra.gmra.mrb[0].mxu1 %vm352_vm8, %v303_v58 }
 0x182   : > { %v1319_v1 = vpop.f32.mrb[0].mxu0  ;;  %v1323_v4 = vpop.f32.mrb[0].mxu1 }
 0x183   : > { %v468_v2 = vcombine.high %v1319_v1, %v1319_v1  ;;  %v475_v3 = vrot.slane %v1319_v1, %v1587_v0  ;;  %v1590_v5 = vpop.f32.mrb[1].mxu0  ;;  %v536_v6 = vcombine.high %v1323_v4, %v1323_v4  ;;  %v543_v7 = vrot.slane %v1323_v4, %v1587_v0  ;;  %v1595_v9 = vpop.f32.mrb[1].mxu1 }
 0x184   : > { %v434_v8 = vcombine.high %v1590_v5, %v1590_v5  ;;  %v1597_v10 = vpop.f32.mrb[2].mxu0  ;;  %v1603_v14 = vrot.slane %v1590_v5, %v1587_v0  ;;  %v1605_v15 = vpop.f32.mrb[2].mxu1 }
 0x185   : > { %v482_v11 = vrot.slane %v468_v2, %v1587_v0  ;;  %v483_v12 = vcombine.high %v475_v3, %v475_v3  ;;  %v659_v13 = vsel %vm602_vm9, %v475_v3, -inf  ;;  %v1607_v16 = vpop.f32.mrb[3].mxu0  ;;  %v550_v18 = vrot.slane %v536_v6, %v1587_v0  ;;  %v1611_v21 = vpop.f32.mrb[3].mxu1 }
 0x186   : > { %v660_v17 = vrot.slane %v659_v13, 4  ;;  %v551_v19 = vcombine.high %v543_v7, %v543_v7  ;;  %v771_v20 = vsel %vm602_vm9, %v543_v7, -inf }
 0x187   : > { %v484_v22 = vcombine.high %v482_v11, %v482_v11  ;;  %v666_v23 = vsel %vm602_vm9, %v483_v12, -inf  ;;  %v673_v24 = vsel %vm602_vm9, %v482_v11, -inf  ;;  %v772_v25 = vrot.slane %v771_v20, 4 }
 0x188   : > { %v661_v26 = vmax.f32 %v659_v13, %v660_v17  ;;  %v667_v27 = vrot.slane %v666_v23, 4  ;;  %v674_v28 = vrot.slane %v673_v24, 4  ;;  %v552_v29 = vcombine.high %v550_v18, %v550_v18 }
 0x189   : > { %v680_v30 = vsel %vm602_vm9, %v484_v22, -inf  ;;  %v773_v31 = vmax.f32 %v771_v20, %v772_v25  ;;  %v778_v32 = vsel %vm602_vm9, %v551_v19, -inf  ;;  %v785_v33 = vsel %vm602_vm9, %v550_v18, -inf }
 0x18a   : > { %v662_v34 = vrot.slane %v661_v26, 2  ;;  %v668_v35 = vmax.f32 %v666_v23, %v667_v27  ;;  %v675_v36 = vmax.f32 %v673_v24, %v674_v28  ;;  %v681_v37 = vrot.slane %v680_v30, 4 }
 0x18b   : > { %v774_v38 = vrot.slane %v773_v31, 2  ;;  %v779_v39 = vrot.slane %v778_v32, 4  ;;  %v786_v40 = vrot.slane %v785_v33, 4  ;;  %v792_v41 = vsel %vm602_vm9, %v552_v29, -inf }
 0x18c   : > { %v663_v42 = vmax.f32 %v661_v26, %v662_v34  ;;  %v669_v43 = vrot.slane %v668_v35, 2  ;;  %v676_v44 = vrot.slane %v675_v36, 2  ;;  %v682_v45 = vmax.f32 %v680_v30, %v681_v37 }
 0x18d   : > { %v775_v46 = vmax.f32 %v773_v31, %v774_v38  ;;  %v780_v47 = vmax.f32 %v778_v32, %v779_v39  ;;  %v787_v48 = vmax.f32 %v785_v33, %v786_v40  ;;  %v793_v49 = vrot.slane %v792_v41, 4 }
 0x18e   : > { %v664_v50 = vrot.slane %v663_v42, 1  ;;  %v670_v51 = vmax.f32 %v668_v35, %v669_v43  ;;  %v677_v52 = vmax.f32 %v675_v36, %v676_v44  ;;  %v683_v53 = vrot.slane %v682_v45, 2 }
 0x18f   : > { %v776_v55 = vrot.slane %v775_v46, 1  ;;  %v781_v56 = vrot.slane %v780_v47, 2  ;;  %v788_v57 = vrot.slane %v787_v48, 2  ;;  %v794_v58 = vmax.f32 %v792_v41, %v793_v49 }
 0x190   : > { %v665_v59 = vmax.f32 %v663_v42, %v664_v50  ;;  %v671_v60 = vrot.slane %v670_v51, 1  ;;  %v678_v61 = vrot.slane %v677_v52, 1  ;;  %v684_v62 = vmax.f32 %v682_v45, %v683_v53 }
 0x191   : > { %v777_v63 = vmax.f32 %v775_v46, %v776_v55  ;;  %v782_v1 = vmax.f32 %v780_v47, %v781_v56  ;;  %v789_v2 = vmax.f32 %v787_v48, %v788_v57  ;;  %v795_v3 = vrot.slane %v794_v58, 2 }
 0x192   : > { %v672_v4 = vmax.f32 %v670_v51, %v671_v60  ;;  %v679_v6 = vmax.f32 %v677_v52, %v678_v61  ;;  %v685_v7 = vrot.slane %v684_v62, 1  ;;  %v842_v11 = vadd.f32 %v1619_v54, %v665_v59 }
 0x193   : > { %v783_v12 = vrot.slane %v782_v1, 1  ;;  %v790_v13 = vrot.slane %v789_v2, 1  ;;  %v796_v17 = vmax.f32 %v794_v58, %v795_v3  ;;  %v858_v18 = vadd.f32 %v1619_v54, %v777_v63 }
 0x194   : > { %v686_v19 = vmax.f32 %v684_v62, %v685_v7  ;;  %v843_v20 = vadd.f32 %v1619_v54, %v672_v4  ;;  %v844_v22 = vadd.f32 %v1619_v54, %v679_v6  ;;  %1369 = vtanh.f32 %v842_v11 }
 0x195   : > { %v784_v23 = vmax.f32 %v782_v1, %v783_v12  ;;  %v791_v24 = vmax.f32 %v789_v2, %v790_v13  ;;  %v797_v25 = vrot.slane %v796_v17, 1  ;;  %1371 = vtanh.f32 %v858_v18 }
 0x196   : > { %v845_v26 = vadd.f32 %v1619_v54, %v686_v19  ;;  %1373 = vtanh.f32 %v843_v20  ;;  %v448_v27 = vrot.slane %v434_v8, %v1587_v0  ;;  %v449_v28 = vcombine.high %v1603_v14, %v1603_v14 }
 0x197   : > { %1375 = vtanh.f32 %v844_v22  ;;  %v798_v29 = vmax.f32 %v796_v17, %v797_v25  ;;  %v859_v30 = vadd.f32 %v1619_v54, %v784_v23  ;;  %v603_v32 = vsel %vm602_vm9, %v1603_v14, -inf }
 0x198   : > { %1377 = vtanh.f32 %v845_v26  ;;  %v450_v31 = vcombine.high %v448_v27, %v448_v27  ;;  %v610_v33 = vsel %vm602_vm9, %v449_v28, -inf  ;;  %v860_v34 = vadd.f32 %v1619_v54, %v791_v24 }
 0x199   : > { %1379 = vtanh.f32 %v859_v30  ;;  %v604_v35 = vrot.slane %v603_v32, 4  ;;  %v611_v5 = vrot.slane %v610_v33, 4  ;;  %v617_v8 = vsel %vm602_vm9, %v448_v27, -inf }
 0x19a   : > { %v624_v36 = vsel %vm602_vm9, %v450_v31, -inf  ;;  %v509_v37 = vrot.slane %v1595_v9, %v1587_v0  ;;  %v618_v40 = vrot.slane %v617_v8, 4  ;;  %v861_v41 = vadd.f32 %v1619_v54, %v798_v29 }
 0x19b   : > { %v605_v38 = vmax.f32 %v603_v32, %v604_v35  ;;  %v612_v39 = vmax.f32 %v610_v33, %v611_v5  ;;  %v625_v14 = vrot.slane %v624_v36, 4  ;;  %1381 = vtanh.f32 %v860_v34 }
 0x19c   : > { %v619_v44 = vmax.f32 %v617_v8, %v618_v40  ;;  %v502_v47 = vcombine.high %v1595_v9, %v1595_v9  ;;  %v517_v48 = vcombine.high %v509_v37, %v509_v37  ;;  %v715_v53 = vsel %vm602_vm9, %v509_v37, -inf }
 0x19d   : > { %v606_v42 = vrot.slane %v605_v38, 2  ;;  %v613_v43 = vrot.slane %v612_v39, 2  ;;  %v626_v46 = vmax.f32 %v624_v36, %v625_v14  ;;  %1383 = vtanh.f32 %v861_v41 }
 0x19e   : > { %v1370_v45 = vpop.eup %1369  ;;  %v620_v52 = vrot.slane %v619_v44, 2  ;;  %v716_v1 = vrot.slane %v715_v53, 4  ;;  %v516_v3 = vrot.slane %v502_v47, %v1587_v0  ;;  %v722_v4 = vsel %vm602_vm9, %v517_v48, -inf }
 0x19f   : > { %v1372_v49 = vpop.eup %1371  ;;  %v607_v50 = vmax.f32 %v605_v38, %v606_v42  ;;  %v614_v51 = vmax.f32 %v612_v39, %v613_v43  ;;  %v627_v56 = vrot.slane %v626_v46, 2  ;;  %v1271_v6 = vpack.c.bf16 %v1370_v45, %v1370_v45 }
 0x1a0   : > { %v1374_v55 = vpop.eup %1373  ;;  %v621_v62 = vmax.f32 %v619_v44, %v620_v52  ;;  %v1287_v19 = vpack.c.bf16 %v1372_v49, %v1372_v49  ;;  %v717_v23 = vmax.f32 %v715_v53, %v716_v1  ;;  %v723_v27 = vrot.slane %v722_v4, 4 }
 0x1a1   : > { %v1376_v57 = vpop.eup %1375  ;;  %v1272_v58 = vpack.c.bf16 %v1374_v55, %v1374_v55  ;;  %v608_v59 = vrot.slane %v607_v50, 1  ;;  %v615_v60 = vrot.slane %v614_v51, 1  ;;  %v628_v63 = vmax.f32 %v626_v46, %v627_v56 }
 0x1a2   : > { %v1378_v61 = vpop.eup %1377  ;;  %v622_v11 = vrot.slane %v621_v62, 1  ;;  %v1273_v13 = vpack.c.bf16 %v1376_v57, %v1376_v57  ;;  %v1034_v28 = vunpack.c.l.b16 %v1271_v6  ;;  %v518_v30 = vcombine.high %v516_v3, %v516_v3 }
 0x1a3   : > { %v1380_v2 = vpop.eup %1379  ;;  %v609_v9 = vmax.f32 %v607_v50, %v608_v59  ;;  %v616_v7 = vmax.f32 %v614_v51, %v615_v60  ;;  %v629_v12 = vrot.slane %v628_v63, 1  ;;  %v1274_v17 = vpack.c.bf16 %v1378_v61, %v1378_v61 }
 0x1a4   : > { %v1035_v18 = vunpack.c.l.b16 %v1272_v58  ;;  %v1288_v20 = vpack.c.bf16 %v1380_v2, %v1380_v2  ;;  %v623_v22 = vmax.f32 %v621_v62, %v622_v11  ;;  %v729_v31 = vsel %vm602_vm9, %v516_v3, -inf }
 0x1a5   : > { %v1382_v24 = vpop.eup %1381  ;;  %v630_v25 = vmax.f32 %v628_v63, %v629_v12  ;;  %v834_v26 = vadd.f32 %v1619_v54, %v609_v9  ;;  %v835_v29 = vadd.f32 %v1619_v54, %v616_v7  ;;  %v1036_v32 = vunpack.c.l.b16 %v1273_v13 }
 0x1a6   : > { %v1650_v33 = vunpack.c.l.b16 %v1274_v17  ;;  %v1079_v34 = vrot.slane %v1035_v18, 7  ;;  %v1050_v35 = vunpack.c.l.b16 %v1287_v19  ;;  %v1289_v5 = vpack.c.bf16 %v1382_v24, %v1382_v24 }
 0x1a7   : > { %v1051_v8 = vunpack.c.l.b16 %v1288_v20  ;;  %v836_v36 = vadd.f32 %v1619_v54, %v623_v22  ;;  %v718_v37 = vrot.slane %v717_v23, 2  ;;  %v1384_v38 = vpop.eup %1383  ;;  %v837_v39 = vadd.f32 %v1619_v54, %v630_v25 }
 0x1a8   : > { %1385 = vtanh.f32 %v834_v26  ;;  %v724_v40 = vmax.f32 %v722_v4, %v723_v27  ;;  %v730_v41 = vrot.slane %v729_v31, 4  ;;  %v736_v42 = vsel %vm602_vm9, %v518_v30, -inf }
 0x1a9   : > { %1387 = vtanh.f32 %v835_v29  ;;  %v719_v14 = vmax.f32 %v717_v23, %v718_v37  ;;  %v485_v43 = vcombine.high %v1597_v10, %v1597_v10  ;;  %v737_v46 = vrot.slane %v736_v42, 4 }
 0x1aa   : > { %v725_v44 = vrot.slane %v724_v40, 2  ;;  %v731_v45 = vmax.f32 %v729_v31, %v730_v41  ;;  %v492_v47 = vrot.slane %v1597_v10, %v1587_v0  ;;  %v1290_v48 = vpack.c.bf16 %v1384_v38, %v1384_v38 }
 0x1ab   : > { %1389 = vtanh.f32 %v836_v36  ;;  %v720_v49 = vrot.slane %v719_v14, 1  ;;  %v499_v50 = vrot.slane %v485_v43, %v1587_v0  ;;  %v738_v53 = vmax.f32 %v736_v42, %v737_v46 }
 0x1ac   : > { %v726_v51 = vmax.f32 %v724_v40, %v725_v44  ;;  %v732_v52 = vrot.slane %v731_v45, 2  ;;  %v500_v55 = vcombine.high %v492_v47, %v492_v47  ;;  %v1081_v56 = vrot.slane %v1036_v32, 6 }
 0x1ad   : > { %v1052_v57 = vunpack.c.l.b16 %v1289_v5  ;;  %v687_v58 = vsel %vm602_vm9, %v492_v47, -inf  ;;  %v701_v59 = vsel %vm602_vm9, %v499_v50, -inf  ;;  %v1107_v60 = vrot.slane %v1051_v8, 7 }
 0x1ae   : > { %1391 = vtanh.f32 %v837_v39  ;;  %v721_v61 = vmax.f32 %v719_v14, %v720_v49  ;;  %v688_v62 = vrot.slane %v687_v58, 4  ;;  %v1080_v10 = vsel %vm1059_vm10, %v1079_v34, %v1034_v28 }
 0x1af   : > { %v1663_v63 = vunpack.c.l.b16 %v1290_v48  ;;  %v694_v1 = vsel %vm602_vm9, %v500_v55, -inf  ;;  %v702_v2 = vrot.slane %v701_v59, 4  ;;  %v727_v9 = vrot.slane %v726_v51, 1 }
 0x1b0   : > { %v733_v3 = vmax.f32 %v731_v45, %v732_v52  ;;  %v739_v4 = vrot.slane %v738_v53, 2  ;;  %v689_v6 = vmax.f32 %v687_v58, %v688_v62  ;;  %v1109_v7 = vrot.slane %v1052_v57, 6 }
 0x1b1   : > { %v501_v11 = vcombine.high %v499_v50, %v499_v50  ;;  %v695_v12 = vrot.slane %v694_v1, 4  ;;  %v1083_v17 = vrot.slane %v1650_v33, 5  ;;  %v1108_v18 = vsel %vm1059_vm10, %v1107_v60, %v1050_v35 }
 0x1b2   : > { %v1386_v13 = vpop.eup %1385  ;;  %v850_v19 = vadd.f32 %v1619_v54, %v721_v61  ;;  %v1082_v22 = vsel %vm1062_vm11, %v1081_v56, %v1080_v10  ;;  %v690_v23 = vrot.slane %v689_v6, 2  ;;  %v703_v25 = vmax.f32 %v701_v59, %v702_v2 }
 0x1b3   : > { %v1388_v20 = vpop.eup %1387  ;;  %v696_v24 = vmax.f32 %v694_v1, %v695_v12  ;;  %v1111_v26 = vrot.slane %v1663_v63, 5  ;;  %v728_v27 = vmax.f32 %v726_v51, %v727_v9  ;;  %v734_v28 = vrot.slane %v733_v3, 1 }
 0x1b4   : > { %v740_v29 = vmax.f32 %v738_v53, %v739_v4  ;;  %v1672_v31 = vsel %vm1062_vm11, %v1109_v7, %v1108_v18  ;;  %v691_v32 = vmax.f32 %v689_v6, %v690_v23  ;;  %v708_v34 = vsel %vm602_vm9, %v501_v11, -inf }
 0x1b5   : > { %v1390_v30 = vpop.eup %1389  ;;  %v697_v33 = vrot.slane %v696_v24, 2  ;;  %v1263_v35 = vpack.c.bf16 %v1386_v13, %v1386_v13  ;;  %1393 = vtanh.f32 %v850_v19  ;;  %v1676_v5 = vsel %vm1065_vm12, %v1083_v17, %v1082_v22 }
 0x1b6   : > { %v553_v8 = vcombine.high %v1605_v15, %v1605_v15  ;;  %v1264_v36 = vpack.c.bf16 %v1388_v20, %v1388_v20  ;;  %v692_v37 = vrot.slane %v691_v32, 1  ;;  %v704_v39 = vrot.slane %v703_v25, 2 }
 0x1b7   : > { %v698_v38 = vmax.f32 %v696_v24, %v697_v33  ;;  %v735_v41 = vmax.f32 %v733_v3, %v734_v28  ;;  %v741_v14 = vrot.slane %v740_v29, 1  ;;  %v851_v42 = vadd.f32 %v1619_v54, %v728_v27 }
 0x1b8   : > { %v1392_v40 = vpop.eup %1391  ;;  %v709_v43 = vrot.slane %v708_v34, 4  ;;  %v1265_v44 = vpack.c.bf16 %v1390_v30, %v1390_v30  ;;  %v693_v45 = vmax.f32 %v691_v32, %v692_v37  ;;  %v705_v47 = vmax.f32 %v703_v25, %v704_v39 }
 0x1b9   : > { %v699_v46 = vrot.slane %v698_v38, 1  ;;  %v1681_v48 = vunpack.c.l.b16 %v1263_v35  ;;  %v560_v50 = vrot.slane %v1605_v15, %v1587_v0  ;;  %v567_v51 = vrot.slane %v553_v8, %v1587_v0 }
 0x1ba   : > { %v710_v49 = vmax.f32 %v708_v34, %v709_v43  ;;  %v1266_v52 = vpack.c.bf16 %v1392_v40, %v1392_v40  ;;  %v706_v55 = vrot.slane %v705_v47, 1  ;;  %v846_v56 = vadd.f32 %v1619_v54, %v693_v45 }
 0x1bb   : > { %v700_v53 = vmax.f32 %v698_v38, %v699_v46  ;;  %1395 = vtanh.f32 %v851_v42  ;;  %v568_v58 = vcombine.high %v560_v50, %v560_v50  ;;  %v569_v59 = vcombine.high %v567_v51, %v567_v51 }
 0x1bc   : > { %v711_v57 = vrot.slane %v710_v49, 2  ;;  %v707_v60 = vmax.f32 %v705_v47, %v706_v55  ;;  %1397 = vtanh.f32 %v846_v56  ;;  %v799_v62 = vsel %vm602_vm9, %v560_v50, -inf }
 0x1bd   : > { %v847_v61 = vadd.f32 %v1619_v54, %v700_v53  ;;  %v742_v10 = vmax.f32 %v740_v29, %v741_v14  ;;  %v800_v15 = vrot.slane %v799_v62, 4  ;;  %v806_v2 = vsel %vm602_vm9, %v568_v58, -inf }
 0x1be   : > { %v712_v1 = vmax.f32 %v710_v49, %v711_v57  ;;  %v848_v9 = vadd.f32 %v1619_v54, %v707_v60  ;;  %v807_v3 = vrot.slane %v806_v2, 4  ;;  %v813_v4 = vsel %vm602_vm9, %v567_v51, -inf }
 0x1bf   : > { %1399 = vtanh.f32 %v847_v61  ;;  %v1692_v6 = vpop.eup %1393  ;;  %v1694_v7 = vunpack.c.l.b16 %v1264_v36  ;;  %v801_v12 = vmax.f32 %v799_v62, %v800_v15  ;;  %v814_v13 = vrot.slane %v813_v4, 4 }
 0x1c0   : > { %v713_v11 = vrot.slane %v712_v1, 1  ;;  %v852_v17 = vadd.f32 %v1619_v54, %v735_v41  ;;  %1401 = vtanh.f32 %v848_v9  ;;  %v808_v18 = vmax.f32 %v806_v2, %v807_v3 }
 0x1c1   : > { %v820_v19 = vsel %vm602_vm9, %v569_v59, -inf  ;;  %v1698_v20 = vunpack.c.l.b16 %v1265_v44  ;;  %v802_v23 = vrot.slane %v801_v12, 2  ;;  %v815_v24 = vmax.f32 %v813_v4, %v814_v13 }
 0x1c2   : > { %v714_v22 = vmax.f32 %v712_v1, %v713_v11  ;;  %v1700_v25 = vunpack.c.l.b16 %v1266_v52  ;;  %v853_v27 = vadd.f32 %v1619_v54, %v742_v10  ;;  %v809_v28 = vrot.slane %v808_v18, 2 }
 0x1c3   : > { %v821_v29 = vrot.slane %v820_v19, 4  ;;  %v1058_v30 = vrot.slane %v1694_v7, 7  ;;  %v803_v33 = vmax.f32 %v801_v12, %v802_v23  ;;  %v816_v34 = vrot.slane %v815_v24, 2 }
 0x1c4   : > { %v849_v32 = vadd.f32 %v1619_v54, %v714_v22  ;;  %1403 = vtanh.f32 %v852_v17  ;;  %v810_v35 = vmax.f32 %v808_v18, %v809_v28  ;;  %v451_v36 = vcombine.high %v1607_v16, %v1607_v16 }
 0x1c5   : > { %v822_v8 = vmax.f32 %v820_v19, %v821_v29  ;;  %v1707_v37 = vpop.eup %1395  ;;  %v1061_v38 = vrot.slane %v1698_v20, 6  ;;  %v804_v39 = vrot.slane %v803_v33, 1  ;;  %v817_v40 = vmax.f32 %v815_v24, %v816_v34 }
 0x1c6   : > { %1405 = vtanh.f32 %v849_v32  ;;  %v1398_v41 = vpop.eup %1397  ;;  %v811_v14 = vrot.slane %v810_v35, 1  ;;  %v1714_v43 = vsel %vm1065_vm12, %v1111_v26, %v1672_v31  ;;  %v458_v47 = vrot.slane %v1607_v16, %v1587_v0 }
 0x1c7   : > { %1407 = vtanh.f32 %v853_v27  ;;  %v823_v42 = vrot.slane %v822_v8, 2  ;;  %v1275_v44 = vpack.c.bf16 %v1398_v41, %v1398_v41  ;;  %v805_v45 = vmax.f32 %v803_v33, %v804_v39 }
 0x1c8   : > { %v818_v46 = vrot.slane %v817_v40, 1  ;;  %v1280_v50 = vpack.c.bf16 %v1707_v37, %v1707_v37  ;;  %v812_v51 = vmax.f32 %v810_v35, %v811_v14  ;;  %v465_v53 = vrot.slane %v451_v36, %v1587_v0 }
 0x1c9   : > { %v1400_v49 = vpop.eup %1399  ;;  %v824_v52 = vmax.f32 %v822_v8, %v823_v42  ;;  %v1038_v56 = vunpack.c.l.b16 %v1275_v44  ;;  %v862_v26 = vadd.f32 %v1619_v54, %v805_v45  ;;  %v466_v59 = vcombine.high %v458_v47, %v458_v47 }
 0x1ca   : > { %v1276_v55 = vpack.c.bf16 %v1400_v49, %v1400_v49  ;;  %v819_v63 = vmax.f32 %v817_v40, %v818_v46  ;;  %v1402_v31 = vpop.eup %1401  ;;  %v863_v58 = vadd.f32 %v1619_v54, %v812_v51  ;;  %v467_v60 = vcombine.high %v465_v53, %v465_v53 }
 0x1cb   : > { %v825_v57 = vrot.slane %v824_v52, 1  ;;  %v1277_v16 = vpack.c.bf16 %v1402_v31, %v1402_v31  ;;  %v1085_v62 = vrot.slane %v1038_v56, 4  ;;  %1409 = vtanh.f32 %v862_v26 }
 0x1cc   : > { %v1039_v61 = vunpack.c.l.b16 %v1276_v55  ;;  %v864_v10 = vadd.f32 %v1619_v54, %v819_v63  ;;  %v631_v15 = vsel %vm602_vm9, %v458_v47, -inf  ;;  %v638_v2 = vsel %vm602_vm9, %v466_v59, -inf }
 0x1cd   : > { %v826_v1 = vmax.f32 %v824_v52, %v825_v57  ;;  %v1040_v9 = vunpack.c.l.b16 %v1277_v16  ;;  %v1086_v3 = vsel %vm1068_vm13, %v1085_v62, %v1676_v5  ;;  %1411 = vtanh.f32 %v863_v58 }
 0x1ce   : > { %v1087_v4 = vrot.slane %v1039_v61, 3  ;;  %v1728_v11 = vpop.eup %1403  ;;  %1413 = vtanh.f32 %v864_v10  ;;  %v632_v13 = vrot.slane %v631_v15, 4  ;;  %v639_v17 = vrot.slane %v638_v2, 4 }
 0x1cf   : > { %v865_v12 = vadd.f32 %v1619_v54, %v826_v1  ;;  %v1089_v22 = vrot.slane %v1040_v9, 2  ;;  %v645_v23 = vsel %vm602_vm9, %v465_v53, -inf  ;;  %v652_v24 = vsel %vm602_vm9, %v467_v60, -inf }
 0x1d0   : > { %v1406_v18 = vpop.eup %1405  ;;  %v1088_v19 = vsel %vm1071_vm14, %v1087_v4, %v1086_v3  ;;  %v633_v28 = vmax.f32 %v631_v15, %v632_v13  ;;  %v640_v29 = vmax.f32 %v638_v2, %v639_v17  ;;  %v646_v33 = vrot.slane %v645_v23, 4 }
 0x1d1   : > { %v1734_v5 = vpop.eup %1407  ;;  %v1278_v27 = vpack.c.bf16 %v1406_v18, %v1406_v18  ;;  %1415 = vtanh.f32 %v865_v12  ;;  %v1090_v32 = vsel %vm1074_vm15, %v1089_v22, %v1088_v19  ;;  %v653_v34 = vrot.slane %v652_v24, 4 }
 0x1d2   : > { %v519_v35 = vcombine.high %v1611_v21, %v1611_v21  ;;  %v634_v36 = vrot.slane %v633_v28, 2  ;;  %v641_v39 = vrot.slane %v640_v29, 2  ;;  %v526_v40 = vrot.slane %v1611_v21, %v1587_v0 }
 0x1d3   : > { %v1041_v8 = vunpack.c.l.b16 %v1278_v27  ;;  %v1281_v41 = vpack.c.bf16 %v1728_v11, %v1728_v11  ;;  %v647_v14 = vmax.f32 %v645_v23, %v646_v33  ;;  %v654_v42 = vmax.f32 %v652_v24, %v653_v34 }
 0x1d4   : > { %v1745_v44 = vrot.slane %v519_v35, %v1587_v0  ;;  %v635_v46 = vmax.f32 %v633_v28, %v634_v36  ;;  %v642_v47 = vmax.f32 %v640_v29, %v641_v39  ;;  %v534_v49 = vcombine.high %v526_v40, %v526_v40 }
 0x1d5   : > { %v1091_v45 = vrot.slane %v1041_v8, 1  ;;  %v648_v51 = vrot.slane %v647_v14, 2  ;;  %v655_v52 = vrot.slane %v654_v42, 2  ;;  %v743_v21 = vsel %vm602_vm9, %v526_v40, -inf  ;;  %v1410_v55 = vpop.eup %1409 }
 0x1d6   : > { %v535_v53 = vcombine.high %v1745_v44, %v1745_v44  ;;  %v636_v56 = vrot.slane %v635_v46, 1  ;;  %v643_v63 = vrot.slane %v642_v47, 1  ;;  %v744_v26 = vrot.slane %v743_v21, 4 }
 0x1d7   : > { %v1092_v0 = vsel %vm1077_vm0, %v1091_v45, %v1090_v32  ;;  %v1412_v31 = vpop.eup %1411  ;;  %v1291_v58 = vpack.c.bf16 %v1410_v55, %v1410_v55  ;;  %v649_v59 = vmax.f32 %v647_v14, %v648_v51  ;;  %v656_v60 = vmax.f32 %v654_v42, %v655_v52 }
 0x1d8   : > { %v1122_v57 = vpack.c.b16 %v1092_v0, %v1092_v0  ;;  %v1414_v16 = vpop.eup %1413  ;;  %v1292_v61 = vpack.c.bf16 %v1412_v31, %v1412_v31  ;;  %v637_v62 = vmax.f32 %v635_v46, %v636_v56  ;;  %v644_v10 = vmax.f32 %v642_v47, %v643_v63 }
 0x1d9   : > { %v745_v1 = vmax.f32 %v743_v21, %v744_v26  ;;  %v1293_v15 = vpack.c.bf16 %v1414_v16, %v1414_v16  ;;  %v1054_v2 = vunpack.c.l.b16 %v1291_v58  ;;  %v650_v9 = vrot.slane %v649_v59, 1 }
 0x1da   : > { %1131 = vst.msk [vmem:[%s1753_s24 + $0x4] sm:$0xf] %vm1129_vm1, %v1122_v57  ;;  %v657_v3 = vrot.slane %v656_v60, 1  ;;  %v1055_v12 = vunpack.c.l.b16 %v1292_v61  ;;  %v838_v13 = vadd.f32 %v1619_v54, %v637_v62  ;;  %v839_v17 = vadd.f32 %v1619_v54, %v644_v10 }
 0x1db   : > { %v1416_v4 = vpop.eup %1415  ;;  %v746_v18 = vrot.slane %v745_v1, 2  ;;  %v1056_v22 = vunpack.c.l.b16 %v1293_v15  ;;  %v1113_v23 = vrot.slane %v1054_v2, 4  ;;  %v651_v24 = vmax.f32 %v649_v59, %v650_v9 }
 0x1dc   : > { %v1294_v19 = vpack.c.bf16 %v1416_v4, %v1416_v4  ;;  %v1115_v27 = vrot.slane %v1055_v12, 3  ;;  %v658_v28 = vmax.f32 %v656_v60, %v657_v3  ;;  %1417 = vtanh.f32 %v838_v13 }
 0x1dd   : > { %v747_v29 = vmax.f32 %v745_v1, %v746_v18  ;;  %v1114_v33 = vsel %vm1068_vm13, %v1113_v23, %v1714_v43  ;;  %v1117_v34 = vrot.slane %v1056_v22, 2  ;;  %v840_v35 = vadd.f32 %v1619_v54, %v651_v24 }
 0x1de   : > { %v1057_v32 = vunpack.c.l.b16 %v1294_v19  ;;  %v1116_v8 = vsel %vm1071_vm14, %v1115_v27, %v1114_v33  ;;  %v841_v36 = vadd.f32 %v1619_v54, %v658_v28  ;;  %1419 = vtanh.f32 %v839_v17 }
 0x1df   : > { %v748_v39 = vrot.slane %v747_v29, 1  ;;  %v1118_v40 = vsel %vm1074_vm15, %v1117_v34, %v1116_v8  ;;  %1421 = vtanh.f32 %v840_v35  ;;  %v750_v42 = vsel %vm602_vm9, %v534_v49, -inf }
 0x1e0   : > { %v1119_v14 = vrot.slane %v1057_v32, 1  ;;  %1423 = vtanh.f32 %v841_v36  ;;  %v751_v46 = vrot.slane %v750_v42, 4  ;;  %v757_v43 = vsel %vm602_vm9, %v1745_v44, -inf }
 0x1e1   : > { %v749_v45 = vmax.f32 %v747_v29, %v748_v39  ;;  %v1043_v47 = vunpack.c.l.b16 %v1280_v50  ;;  %v758_v52 = vrot.slane %v757_v43, 4  ;;  %v764_v21 = vsel %vm602_vm9, %v535_v53, -inf }
 0x1e2   : > { %v1120_v51 = vsel %vm1077_vm0, %v1119_v14, %v1118_v40  ;;  %v752_v0 = vmax.f32 %v750_v42, %v751_v46  ;;  %v765_v56 = vrot.slane %v764_v21, 4  ;;  %v1060_v63 = vsel %vm1059_vm10, %v1058_v30, %v1681_v48 }
 0x1e3   : > { %v1124_v55 = vpack.c.b16 %v1120_v51, %v1120_v51  ;;  %v854_v49 = vadd.f32 %v1619_v54, %v749_v45  ;;  %v1279_v44 = vpack.c.bf16 %v1692_v6, %v1692_v6  ;;  %v1282_v37 = vpack.c.bf16 %v1734_v5, %v1734_v5 }
 0x1e4   : > { %v759_v50 = vmax.f32 %v757_v43, %v758_v52  ;;  %v1044_v53 = vunpack.c.l.b16 %v1281_v41  ;;  %v753_v26 = vrot.slane %v752_v0, 2  ;;  %v766_v31 = vmax.f32 %v764_v21, %v765_v56 }
 0x1e5   : > { %1133 = vst.msk [vmem:[%s1753_s24 + $0xc] sm:$0xf] %vm1129_vm1, %v1124_v55  ;;  %1425 = vtanh.f32 %v854_v49  ;;  %v1093_v57 = vrot.slane %v1043_v47, 7  ;;  %v1064_v48 = vrot.slane %v1700_v25, 5  ;;  %v1063_v5 = vsel %vm1062_vm11, %v1061_v38, %v1060_v63 }
 0x1e6   : > { %v760_v7 = vrot.slane %v759_v50, 2  ;;  %v1418_v58 = vpop.eup %1417  ;;  %v754_v30 = vmax.f32 %v752_v0, %v753_v26  ;;  %v767_v6 = vrot.slane %v766_v31, 2  ;;  %v1042_v59 = vunpack.c.l.b16 %v1279_v44 }
 0x1e7   : > { %v1267_v60 = vpack.c.bf16 %v1418_v58, %v1418_v58  ;;  %v1045_v16 = vunpack.c.l.b16 %v1282_v37  ;;  %v1095_v61 = vrot.slane %v1044_v53, 6  ;;  %v1066_v20 = vsel %vm1065_vm12, %v1064_v48, %v1063_v5 }
 0x1e8   : > { %v761_v11 = vmax.f32 %v759_v50, %v760_v7  ;;  %v1420_v41 = vpop.eup %1419  ;;  %v755_v62 = vrot.slane %v754_v30, 1  ;;  %v768_v10 = vmax.f32 %v766_v31, %v767_v6  ;;  %v1094_v15 = vsel %vm1059_vm10, %v1093_v57, %v1042_v59 }
 0x1e9   : > { %v1422_v1 = vpop.eup %1421  ;;  %v1268_v2 = vpack.c.bf16 %v1420_v41, %v1420_v41  ;;  %v1030_v9 = vunpack.c.l.b16 %v1267_v60  ;;  %v1096_v22 = vsel %vm1062_vm11, %v1095_v61, %v1094_v15  ;;  %v1097_v35 = vrot.slane %v1045_v16, 5 }
 0x1ea   : > { %v762_v25 = vrot.slane %v761_v11, 1  ;;  %v1424_v3 = vpop.eup %1423  ;;  %v1269_v4 = vpack.c.bf16 %v1422_v1, %v1422_v1  ;;  %v756_v12 = vmax.f32 %v754_v30, %v755_v62  ;;  %v769_v38 = vrot.slane %v768_v10, 1 }
 0x1eb   : > { %v1270_v13 = vpack.c.bf16 %v1424_v3, %v1424_v3  ;;  %v1031_v17 = vunpack.c.l.b16 %v1268_v2  ;;  %v1067_v18 = vrot.slane %v1030_v9, 4  ;;  %v1098_v47 = vsel %vm1065_vm12, %v1097_v35, %v1096_v22 }
 0x1ec   : > { %v763_v19 = vmax.f32 %v761_v11, %v762_v25  ;;  %v1032_v23 = vunpack.c.l.b16 %v1269_v4  ;;  %v770_v24 = vmax.f32 %v768_v10, %v769_v38  ;;  %v855_v27 = vadd.f32 %v1619_v54, %v756_v12 }
 0x1ed   : > { %v1033_v28 = vunpack.c.l.b16 %v1270_v13  ;;  %v1069_v29 = vsel %vm1068_vm13, %v1067_v18, %v1066_v20  ;;  %v1070_v32 = vrot.slane %v1031_v17, 3 }
 0x1ee   : > { %v856_v33 = vadd.f32 %v1619_v54, %v763_v19  ;;  %v1073_v8 = vrot.slane %v1032_v23, 2  ;;  %v857_v36 = vadd.f32 %v1619_v54, %v770_v24  ;;  %1427 = vtanh.f32 %v855_v27 }
 0x1ef   : > { %v1426_v34 = vpop.eup %1425  ;;  %v1072_v39 = vsel %vm1071_vm14, %v1070_v32, %v1069_v29  ;;  %v1076_v40 = vrot.slane %v1033_v28, 1 }
 0x1f0   : > { %1429 = vtanh.f32 %v856_v33  ;;  %v1283_v14 = vpack.c.bf16 %v1426_v34, %v1426_v34  ;;  %v1075_v42 = vsel %vm1074_vm15, %v1073_v8, %v1072_v39 }
 0x1f1   : > { %1431 = vtanh.f32 %v857_v36  ;;  %v1078_v45 = vsel %vm1077_vm0, %v1076_v40, %v1075_v42 }
 0x1f2   : > { %v1046_v46 = vunpack.c.l.b16 %v1283_v14  ;;  %v1121_v43 = vpack.c.b16 %v1078_v45, %v1078_v45 }
 0x1f4   : > { %v1099_v51 = vrot.slane %v1046_v46, 4  ;;  %1130 = vst.msk [vmem:[%s1753_s24] sm:$0xf] %vm1129_vm1, %v1121_v43 }
 0x1f6   : > { %v1100_v54 = vsel %vm1068_vm13, %v1099_v51, %v1098_v47 }
 0x1f8   : > { %v1428_v52 = vpop.eup %1427 }
 0x1f9   : > { %v1284_v55 = vpack.c.bf16 %v1428_v52, %v1428_v52 }
 0x1fa   : > { %v1430_v21 = vpop.eup %1429 }
 0x1fb   : > { %v1432_v0 = vpop.eup %1431  ;;  %v1285_v56 = vpack.c.bf16 %v1430_v21, %v1430_v21  ;;  %v1047_v63 = vunpack.c.l.b16 %v1284_v55 }
 0x1fc   : > { %v1286_v49 = vpack.c.bf16 %v1432_v0, %v1432_v0 }
 0x1fd   : > { %v1048_v44 = vunpack.c.l.b16 %v1285_v56  ;;  %v1101_v50 = vrot.slane %v1047_v63, 3 }
 0x1fe   : > { %v1049_v37 = vunpack.c.l.b16 %v1286_v49 }
 0x1ff   : > { %v1103_v53 = vrot.slane %v1048_v44, 2  ;;  %v1102_v26 = vsel %vm1071_vm14, %v1101_v50, %v1100_v54 }
 0x200   : > { %v1105_v31 = vrot.slane %v1049_v37, 1 }
 0x201   : > { %v1104_v57 = vsel %vm1074_vm15, %v1103_v53, %v1102_v26 }
 0x202   : > { %v1106_v7 = vsel %vm1077_vm0, %v1105_v31, %v1104_v57 }
 0x203   : > { %v1123_v58 = vpack.c.b16 %v1106_v7, %v1106_v7 }
 0x205   : > { %1132 = vst.msk [vmem:[%s1753_s24 + $0x8] sm:$0xf] %vm1129_vm1, %v1123_v58 }
 0x206 PF: > { %s14_s12 = sadd.s32 1, %s1471_s12  }
 0x207   : > { %p11_p2 = scmp.ge.s32.totalorder %s14_s12, 4  }
 0x209   :  { %13 = sbr.rel (!%p11_p2) target bundleno = 1 (0x1), region = 67 }
 0x210   :  { %1155 = vsyncpa [#allocation3], 1 }
 0x211   :  { %1157 = vsyncpa [#allocation3 + $0x1], 1 }

// kernel: cae1d_forward.10
= control target key start
LH: loop header
LB: loop body
LE: loop exit
PB: predicated region body
PF: predicated region fallthrough
CT: control target
= control target key end

     0   :  { %8 = vsyncpa [#allocation3], 0  ;;  %s2403_s12 = smov 0   ;;  %s3138_s0 = inlined_call_operand.vmem [shape: f32[2,128,1], index: 0, kind: input, shape index: {}]   ;;  %s3139_s1 = inlined_call_operand.vmem [shape: f32[3,32], index: 1, kind: input, shape index: {}]   ;;  %s3140_s2 = inlined_call_operand.hbm [shape: f32[1,32], index: 2, kind: input, shape index: {}]   ;;  %s3141_s3 = inlined_call_operand.vmem [shape: bf16[2,64,32], index: 3, kind: output, shape index: {}]  }
   0x1 LB: > { %s2409_s13 = sadd.s32 4294967295, %s2378_s12   ;;  %p2042_p0 = scmp.ge.s32.totalorder %s2378_s12, 1  ;;  %s2378_s12 = sphi %s2403_s12, %s14_s12  }
   0x2   : > { %p113_p1 = scmp.lt.s32.totalorder %s2378_s12, 3  ;;  %p3142_p3 = scmp.eq.s32.totalorder %s2409_s13, 0 }
   0x3   : > { %s2380_s15 = smov [#allocation2]   ;;  %s2340_s20 = scalar_lea.hbm %s3140_s2, 16 }
   0x4   : > { %p2413_p2 = pnand %p2042_p0, %p113_p1  ;;  %s129_s16 = sshll.u32 %s2380_s15, 4  ;;  %s130_s16 = int_to_ptr.vmem [resolvable:$true] %s129_s16 }
   0x5   : > { %p2341_p6 = scmp.ne.s32.totalorder %s3140_s2, %s2340_s20  ;;  %p2347_p10 = scmp.lt.u32.totalorder %s2340_s20, %s3140_s2 }
   0x6   : > { %s3144_s14 = scalar_select %p2413_p2, 1, 0 }
   0x7   : > { %p2191_p4 = pneg %p2413_p2 }
   0x9   : > { %p2422_p5 = pnand %p3142_p3, %p2191_p4 }
   0xb   : > { %p2342_p7 = pneg %p2422_p5 }
   0xd   : > { %p2343_p8 = pnand %p2342_p7, %p2341_p6 }
   0xf   : > { %p2344_p9 = pneg %p2343_p8 }
  0x11   : > { %p2349_p11 = pnand %p2347_p10, %p2344_p9 }
  0x13   : > { %2352 = shalt.err (!%p2349_p11)
}
  0x14   : > { %s2353_s25 = scalar_lea.vmem %s130_s16, 16  ;;  %s2360_s26 = scalar_lea.vmem %s130_s16, 32 }
  0x15   : > { %p2354_p12 = scmp.ne.s32.totalorder %s130_s16, %s2353_s25  ;;  %p2361_p1 = scmp.lt.s32.totalorder %s130_s16, %s130_s16 }
  0x16   : > { %p2362_p4 = scmp.lt.s32.totalorder %s2360_s26, %s2353_s25 }
  0x17   : > { %p2356_p13 = pnand %p2354_p12, %p2342_p7 }
  0x18   : > { %p2363_p3 = por %p2362_p4, %p2361_p1 }
  0x19   : > { %p2357_p0 = pneg %p2356_p13 }
  0x1b   : > { %p2364_p2 = pnand %p2363_p3, %p2357_p0 }
  0x1d   : > { %2367 = shalt.err (!%p2364_p2)
}
  0x1e   : > { %2194 = dma.hbm_to_vmem [thread:$0]  (!%p2422_p5), %s3140_s2, 16, %s130_s16, [#allocation3]  }
  0x1f   : > { %p3146_p6 = scmp.ne.s32.totalorder %s3144_s14, 0 }
  0x20   : > { %p3147_p8 = scmp.eq.s32.totalorder (!%p3146_p6), %s2409_s13, 0 }
  0x21   : > { %150 = sbr.rel (%p3146_p6) target bundleno = 487 (0x1e7), region = 32 }
  0x28   : > { %2373 = dma.done.wait (%p3147_p8), [#allocation3], 16   ;;  %p3148_p7 = pmov %p3147_p8 }
  0x29   : > { %p174_p9 = scmp.lt.s32.totalorder %s2409_s13, 1  ;;  %v2381_v0 = vmov 0   ;;  %vm216_vm0 = vcmask 1040384   ;;  %vm250_vm1 = vcmask 1046528   ;;  %vm925_vm2 = vcmask 254976  }
  0x2a   : > { %2375 = vsyncadd (%p3148_p7), [#allocation3], 4294967280  ;;  %2209 = vset.pattern.permute.xlu1 %v2381_v0  ;;  %2208 = vset.pattern.permute.xlu0 %v2381_v0  ;;  %vm1830_vm3 = vcmask 1041409   ;;  %vm1833_vm4 = vcmask 1042434   ;;  %vm1836_vm5 = vcmask 1043459   ;;  %vm1839_vm6 = vcmask 1044484  }
  0x2b   : > { %s3150_s13 = smov (!%p174_p9, %s2409_s13), 1  ;;  %vm1842_vm7 = vcmask 1045509   ;;  %vm1845_vm8 = vcmask 1046534   ;;  %vm1848_vm9 = vcmask 1047559   ;;  %vm1964_vm10 = vcmask 257024  }
  0x2c   : > { %s2121_s29 = sshll.u32 %s3150_s13, 7  ;;  %s2122_s16 = sshll.u32 %s3150_s13, 5 }
  0x2d   : > { %s2456_s5 = scalar_lea.vmem %s3138_s0, %s2121_s29  ;;  %s2950_s18 = scalar_lea.vmem %s3141_s3, %s2122_s16 }
  0x2e   : > { %v2459_v1 = vld [vmem:[%s2456_s5 + $0x8] sm:$0xff]  ;;  %v2462_v2 = vld [vmem:[%s2456_s5 + $0x10] sm:$0xff]  ;;  %v2465_v3 = vld [vmem:[%s2456_s5] sm:$0xff] }
  0x2f   : > { %v218_v4 = vrot.slane %v2459_v1, 7  ;;  %v220_v5 = vrot.slane %v2462_v2, 7  ;;  %v217_v6 = vrot.slane %v2465_v3, 7  ;;  %v2471_v7 = vld [vmem:[%s2456_s5 + $0x18] sm:$0xff]  ;;  %v2475_v9 = vld [vmem:[%s2456_s5 + $0x20] sm:$0xff]  ;;  %v2478_v10 = vld [vmem:[%s2456_s5 + $0x28] sm:$0xff] }
  0x30   : > { %v222_v8 = vrot.slane %v2471_v7, 7  ;;  %v224_v15 = vrot.slane %v2475_v9, 7  ;;  %v226_v16 = vrot.slane %v2478_v10, 7  ;;  %v2487_v17 = vld [vmem:[%s2456_s5 + $0x30] sm:$0xff]  ;;  %v2490_v18 = vld [vmem:[%s2456_s5 + $0x38] sm:$0xff]  ;;  %v2497_v23 = vld [vmem:[%s2456_s5 + $0x40] sm:$0xff] }
  0x31   : > { %v221_v11 = vsel %vm216_vm0, %v218_v4, %v220_v5  ;;  %v249_v12 = vsel %vm216_vm0, 0.0, %v217_v6  ;;  %v219_v14 = vsel %vm216_vm0, %v217_v6, %v218_v4  ;;  %v228_v21 = vrot.slane %v2487_v17, 7  ;;  %v2500_v24 = vld [vmem:[%s2456_s5 + $0x48] sm:$0xff]  ;;  %v2507_v29 = vld [vmem:[%s2456_s5 + $0x50] sm:$0xff]  ;;  %v2510_v30 = vld [vmem:[%s2456_s5 + $0x58] sm:$0xff] }
  0x32   : > { %297 = vperm.xlu1 %2209, %v221_v11   ;;  %289 = vperm.xlu0 %2208, %v249_v12   ;;  %v223_v13 = vsel %vm216_vm0, %v220_v5, %v222_v8  ;;  %v227_v19 = vsel %vm216_vm0, %v224_v15, %v226_v16  ;;  %v225_v20 = vsel %vm216_vm0, %v222_v8, %v224_v15  ;;  %v230_v22 = vrot.slane %v2490_v18, 7  ;;  %v2517_v35 = vld [vmem:[%s2456_s5 + $0x60] sm:$0xff]  ;;  %v2520_v36 = vld [vmem:[%s2456_s5 + $0x68] sm:$0xff]  ;;  %v2527_v41 = vld [vmem:[%s2456_s5 + $0x70] sm:$0xff] }
  0x33   : > { %v229_v26 = vsel %vm216_vm0, %v226_v16, %v228_v21  ;;  %v232_v27 = vrot.slane %v2497_v23, 7  ;;  %v234_v28 = vrot.slane %v2500_v24, 7  ;;  %v236_v33 = vrot.slane %v2507_v29, 7  ;;  %v2530_v42 = vld [vmem:[%s2456_s5 + $0x78] sm:$0xff] }
  0x34   : > { %v231_v25 = vsel %vm216_vm0, %v228_v21, %v230_v22  ;;  %v238_v34 = vrot.slane %v2510_v30, 7  ;;  %v240_v39 = vrot.slane %v2517_v35, 7  ;;  %v242_v40 = vrot.slane %v2520_v36, 7 }
  0x35   : > { %v235_v31 = vsel %vm216_vm0, %v232_v27, %v234_v28  ;;  %v233_v32 = vsel %vm216_vm0, %v230_v22, %v232_v27  ;;  %v237_v38 = vsel %vm216_vm0, %v234_v28, %v236_v33  ;;  %v244_v45 = vrot.slane %v2527_v41, 7 }
  0x36   : > { %301 = vperm.xlu1 %2209, %v223_v13   ;;  %293 = vperm.xlu0 %2208, %v219_v14   ;;  %v239_v37 = vsel %vm216_vm0, %v236_v33, %v238_v34  ;;  %v243_v43 = vsel %vm216_vm0, %v240_v39, %v242_v40  ;;  %v241_v44 = vsel %vm216_vm0, %v238_v34, %v240_v39  ;;  %v246_v46 = vrot.slane %v2530_v42, 7 }
  0x37   : > { %v245_v48 = vsel %vm216_vm0, %v242_v40, %v244_v45  ;;  %v251_v49 = vrot.slane %v2465_v3, 1  ;;  %v252_v50 = vrot.slane %v2459_v1, 1  ;;  %v258_v51 = vrot.slane %v2475_v9, 1 }
  0x38   : > { %v247_v47 = vsel %vm216_vm0, %v244_v45, %v246_v46  ;;  %v260_v53 = vrot.slane %v2478_v10, 1  ;;  %v254_v54 = vrot.slane %v2462_v2, 1  ;;  %v256_v55 = vrot.slane %v2471_v7, 1 }
  0x39   : > { %v253_v52 = vsel %vm250_vm1, %v251_v49, %v252_v50  ;;  %v266_v56 = vrot.slane %v2497_v23, 1  ;;  %v268_v57 = vrot.slane %v2500_v24, 1  ;;  %v262_v60 = vrot.slane %v2487_v17, 1 }
  0x3a   : > { %309 = vperm.xlu1 %2209, %v227_v19   ;;  %305 = vperm.xlu0 %2208, %v225_v20   ;;  %v261_v58 = vsel %vm250_vm1, %v258_v51, %v260_v53  ;;  %v257_v59 = vsel %vm250_vm1, %v254_v54, %v256_v55  ;;  %v264_v61 = vrot.slane %v2490_v18, 1  ;;  %v274_v63 = vrot.slane %v2517_v35, 1 }
  0x3b   : > { %v269_v62 = vsel %vm250_vm1, %v266_v56, %v268_v57  ;;  %v278_v6 = vrot.slane %v2527_v41, 1  ;;  %v280_v8 = vrot.slane %v2530_v42, 1  ;;  %v259_v11 = vsel %vm250_vm1, %v256_v55, %v258_v51 }
  0x3c   : > { %v265_v0 = vsel %vm250_vm1, %v262_v60, %v264_v61  ;;  %v255_v12 = vsel %vm250_vm1, %v252_v50, %v254_v54  ;;  %v263_v13 = vsel %vm250_vm1, %v260_v53, %v262_v60  ;;  %v2382_v50 = vmov 1983009808  }
  0x3d   : > { %v283_v15 = vsel %vm250_vm1, %v280_v8, 0.0  ;;  %v591_v51 = vunpack.c.l.s4 %v2382_v50 }
  0x3e   : > { %317 = vperm.xlu1 %2209, %v231_v25   ;;  %313 = vperm.xlu0 %2208, %v229_v26   ;;  %v2601_v25 = vld [vmem:[%s3139_s1] ss:$0 sm:$0xff] }
  0x42   : > { %325 = vperm.xlu1 %2209, %v235_v31   ;;  %321 = vperm.xlu0 %2208, %v233_v32  }
  0x46   : > { %333 = vperm.xlu1 %2209, %v239_v37   ;;  %329 = vperm.xlu0 %2208, %v237_v38  }
  0x4a   : > { %341 = vperm.xlu1 %2209, %v243_v43   ;;  %337 = vperm.xlu0 %2208, %v241_v44  }
  0x4e   : > { %349 = vperm.xlu1 %2209, %v247_v47   ;;  %345 = vperm.xlu0 %2208, %v245_v48  }
  0x52   : > { %377 = vperm.xlu1 %2209, %v2459_v1   ;;  %373 = vperm.xlu0 %2208, %v2465_v3   ;;  %v276_v1 = vrot.slane %v2520_v36, 1  ;;  %v272_v3 = vrot.slane %v2510_v30, 1 }
  0x54   : > { %v277_v4 = vsel %vm250_vm1, %v274_v63, %v276_v1  ;;  %v279_v16 = vsel %vm250_vm1, %v276_v1, %v278_v6 }
  0x56   : > { %389 = vperm.xlu1 %2209, %v2475_v9   ;;  %381 = vperm.xlu0 %2208, %v2462_v2   ;;  %v270_v2 = vrot.slane %v2507_v29, 1  ;;  %v281_v9 = vsel %vm250_vm1, %v278_v6, %v280_v8 }
  0x58   : > { %v273_v5 = vsel %vm250_vm1, %v270_v2, %v272_v3  ;;  %v271_v14 = vsel %vm250_vm1, %v268_v57, %v270_v2  ;;  %v592_v57 = vunpack.c.0.s8 %v591_v51 }
  0x5a   : > { %405 = vperm.xlu1 %2209, %v2497_v23   ;;  %397 = vperm.xlu0 %2208, %v2487_v17  }
  0x5e   : > { %421 = vperm.xlu1 %2209, %v2517_v35   ;;  %413 = vperm.xlu0 %2208, %v2507_v29  }
  0x62   : > { %473 = vperm.xlu1 %2209, %v253_v52   ;;  %429 = vperm.xlu0 %2208, %v2527_v41   ;;  %v593_v52 = vlaneseq }
  0x66   : > { %489 = vperm.xlu1 %2209, %v261_v58   ;;  %481 = vperm.xlu0 %2208, %v257_v59   ;;  %v594_v58 = vshrl.u32 %v593_v52, 7 }
  0x68   : > { %v2645_v6 = vsub.s32 %v592_v57, %v594_v58 }
  0x6a   : > { %505 = vperm.xlu1 %2209, %v269_v62   ;;  %497 = vperm.xlu0 %2208, %v265_v0  }
  0x6e   : > { %521 = vperm.xlu1 %2209, %v277_v4   ;;  %513 = vperm.xlu0 %2208, %v273_v5  }
  0x72   : > { %385 = vperm.xlu1 %2209, %v2471_v7   ;;  %529 = vperm.xlu0 %2208, %v281_v9   ;;  %v267_v7 = vsel %vm250_vm1, %v264_v61, %v266_v56 }
  0x76   : > { %401 = vperm.xlu1 %2209, %v2490_v18   ;;  %393 = vperm.xlu0 %2208, %v2478_v10   ;;  %v275_v10 = vsel %vm250_vm1, %v272_v3, %v274_v63  ;;  %v2638_v63 = vld [vmem:[%s3139_s1 + $0x2] ss:$0 sm:$0xff] }
  0x7a   : > { %417 = vperm.xlu1 %2209, %v2510_v30   ;;  %409 = vperm.xlu0 %2208, %v2500_v24  }
  0x7e   : > { %433 = vperm.xlu1 %2209, %v2530_v42   ;;  %425 = vperm.xlu0 %2208, %v2520_v36   ;;  %v2622_v42 = vld [vmem:[%s3139_s1 + $0x1] ss:$0 sm:$0xff] }
  0x82   : > { %485 = vperm.xlu1 %2209, %v259_v11   ;;  %477 = vperm.xlu0 %2208, %v255_v12  }
  0x86   : > { %501 = vperm.xlu1 %2209, %v267_v7   ;;  %493 = vperm.xlu0 %2208, %v263_v13  }
  0x8a   : > { %517 = vperm.xlu1 %2209, %v275_v10   ;;  %509 = vperm.xlu0 %2208, %v271_v14  }
  0x8e   : > { %534 = vperm.xlu1 %2209, %v283_v15   ;;  %525 = vperm.xlu0 %2208, %v279_v16  }
  0xb1   : > { %v2586_v17 = vpop.permute.xlu1 %297  ;;  %v290_v18 = vpop.permute.xlu0 %289 }
  0xb2   : > { %v356_v0 = vmul.f32 %v2601_v25, %v290_v18  ;;  %v358_v18 = vmul.f32 %v2601_v25, %v2586_v17 }
  0xb5   : > { %v2588_v19 = vpop.permute.xlu1 %301  ;;  %v2590_v20 = vpop.permute.xlu0 %293 }
  0xb9   : > { %v2592_v21 = vpop.permute.xlu1 %309  ;;  %v306_v22 = vpop.permute.xlu0 %305 }
  0xba   : > { %v360_v45 = vmul.f32 %v2601_v25, %v306_v22 }
  0xbd   : > { %v2594_v23 = vpop.permute.xlu1 %317  ;;  %v2596_v24 = vpop.permute.xlu0 %313 }
  0xc1   : > { %v326_v26 = vpop.permute.xlu1 %325  ;;  %v322_v27 = vpop.permute.xlu0 %321 }
  0xc2   : > { %v2604_v28 = vmul.f32 %v2601_v25, %v326_v26  ;;  %v364_v29 = vmul.f32 %v2601_v25, %v322_v27 }
  0xc5   : > { %v2607_v30 = vpop.permute.xlu1 %333  ;;  %v330_v31 = vpop.permute.xlu0 %329 }
  0xc6   : > { %v366_v59 = vmul.f32 %v2601_v25, %v330_v31 }
  0xc9   : > { %v342_v32 = vpop.permute.xlu1 %341  ;;  %v338_v33 = vpop.permute.xlu0 %337 }
  0xca   : > { %v2610_v34 = vmul.f32 %v2601_v25, %v342_v32  ;;  %v368_v35 = vmul.f32 %v2601_v25, %v338_v33 }
  0xcd   : > { %v350_v36 = vpop.permute.xlu1 %349  ;;  %v346_v37 = vpop.permute.xlu0 %345 }
  0xce   : > { %v2614_v38 = vmul.f32 %v2601_v25, %v350_v36  ;;  %v370_v39 = vmul.f32 %v2601_v25, %v346_v37 }
  0xd1   : > { %v2617_v40 = vpop.permute.xlu1 %377  ;;  %v374_v41 = vpop.permute.xlu0 %373 }
  0xd2   : > { %v440_v60 = vmul.f32 %v2622_v42, %v374_v41 }
  0xd4   : > { %v456_v5 = vadd.f32 %v440_v60, %v356_v0 }
  0xd5   : > { %v390_v43 = vpop.permute.xlu1 %389  ;;  %v382_v44 = vpop.permute.xlu0 %381 }
  0xd6   : > { %v444_v46 = vmul.f32 %v2622_v42, %v390_v43  ;;  %v442_v7 = vmul.f32 %v2622_v42, %v382_v44 }
  0xd8   : > { %v460_v47 = vadd.f32 %v444_v46, %v360_v45  ;;  %v458_v32 = vadd.f32 %v442_v7, %v358_v18 }
  0xd9   : > { %v406_v48 = vpop.permute.xlu1 %405  ;;  %v2626_v49 = vpop.permute.xlu0 %397 }
  0xda   : > { %v448_v53 = vmul.f32 %v2622_v42, %v406_v48 }
  0xdc   : > { %v2629_v54 = vadd.f32 %v448_v53, %v364_v29 }
  0xdd   : > { %v422_v55 = vpop.permute.xlu1 %421  ;;  %v414_v56 = vpop.permute.xlu0 %413 }
  0xde   : > { %v452_v61 = vmul.f32 %v2622_v42, %v422_v55  ;;  %v450_v62 = vmul.f32 %v2622_v42, %v414_v56 }
  0xe0   : > { %v2641_v1 = vadd.f32 %v452_v61, %v368_v35  ;;  %v2643_v2 = vadd.f32 %v450_v62, %v366_v59 }
  0xe1   : > { %v474_v3 = vpop.permute.xlu1 %473  ;;  %v430_v4 = vpop.permute.xlu0 %429 }
  0xe2   : > { %v541_v8 = vmul.f32 %v2638_v63, %v474_v3  ;;  %v454_v9 = vmul.f32 %v2622_v42, %v430_v4 }
  0xe4   : > { %v557_v11 = vadd.f32 %v541_v8, %v456_v5  ;;  %v2649_v12 = vadd.f32 %v454_v9, %v370_v39 }
  0xe5   : > { %v490_v13 = vpop.permute.xlu1 %489  ;;  %v482_v10 = vpop.permute.xlu0 %481 }
  0xe6   : > { %v589_v14 = vcombine.high %v557_v11, %v557_v11  ;;  %v596_v15 = vrot.slane %v557_v11, %v2645_v6  ;;  %v545_v16 = vmul.f32 %v2638_v63, %v490_v13  ;;  %v543_v22 = vmul.f32 %v2638_v63, %v482_v10 }
  0xe8   : > { %v603_v26 = vrot.slane %v589_v14, %v2645_v6  ;;  %v604_v27 = vcombine.high %v596_v15, %v596_v15  ;;  %v926_v29 = vsel %vm925_vm2, %v596_v15, -inf  ;;  %v561_v31 = vadd.f32 %v545_v16, %v460_v47 }
  0xe9   : > { %v927_v33 = vrot.slane %v926_v29, 4  ;;  %v559_v48 = vadd.f32 %v543_v22, %v458_v32 }
  0xea   : > { %v605_v35 = vcombine.high %v603_v26, %v603_v26  ;;  %v933_v36 = vsel %vm925_vm2, %v604_v27, -inf  ;;  %v940_v37 = vsel %vm925_vm2, %v603_v26, -inf  ;;  %v657_v39 = vcombine.high %v561_v31, %v561_v31  ;;  %v2668_v26 = vld [vmem:[#allocation2] ss:$0 sm:$0xff] }
  0xeb   : > { %v928_v41 = vmax.f32 %v926_v29, %v927_v33  ;;  %v934_v43 = vrot.slane %v933_v36, 4  ;;  %v941_v44 = vrot.slane %v940_v37, 4  ;;  %v664_v17 = vrot.slane %v561_v31, %v2645_v6 }
  0xec   : > { %v947_v45 = vsel %vm925_vm2, %v605_v35, -inf  ;;  %v671_v46 = vrot.slane %v657_v39, %v2645_v6  ;;  %v623_v35 = vcombine.high %v559_v48, %v559_v48 }
  0xed   : > { %v929_v50 = vrot.slane %v928_v41, 2  ;;  %v935_v47 = vmax.f32 %v933_v36, %v934_v43  ;;  %v942_v51 = vmax.f32 %v940_v37, %v941_v44  ;;  %v948_v52 = vrot.slane %v947_v45, 4 }
  0xee   : > { %v672_v53 = vcombine.high %v664_v17, %v664_v17  ;;  %v673_v55 = vcombine.high %v671_v46, %v671_v46  ;;  %v1038_v56 = vsel %vm925_vm2, %v664_v17, -inf  ;;  %v1052_v57 = vsel %vm925_vm2, %v671_v46, -inf }
  0xef   : > { %v930_v58 = vmax.f32 %v928_v41, %v929_v50  ;;  %v936_v59 = vrot.slane %v935_v47, 2  ;;  %v943_v60 = vrot.slane %v942_v51, 2  ;;  %v949_v61 = vmax.f32 %v947_v45, %v948_v52 }
  0xf0   : > { %v1039_v62 = vrot.slane %v1038_v56, 4  ;;  %v1045_v0 = vsel %vm925_vm2, %v672_v53, -inf  ;;  %v1053_v3 = vrot.slane %v1052_v57, 4  ;;  %v1059_v4 = vsel %vm925_vm2, %v673_v55, -inf }
  0xf1   : > { %v931_v5 = vrot.slane %v930_v58, 1  ;;  %v937_v8 = vmax.f32 %v935_v47, %v936_v59  ;;  %v944_v9 = vmax.f32 %v942_v51, %v943_v60  ;;  %v950_v11 = vrot.slane %v949_v61, 2 }
  0xf2   : > { %v1040_v7 = vmax.f32 %v1038_v56, %v1039_v62  ;;  %v1046_v13 = vrot.slane %v1045_v0, 4  ;;  %v1054_v10 = vmax.f32 %v1052_v57, %v1053_v3  ;;  %v1060_v14 = vrot.slane %v1059_v4, 4 }
  0xf3   : > { %v932_v15 = vmax.f32 %v930_v58, %v931_v5  ;;  %v938_v16 = vrot.slane %v937_v8, 1  ;;  %v945_v18 = vrot.slane %v944_v9, 1  ;;  %v951_v22 = vmax.f32 %v949_v61, %v950_v11 }
  0xf4   : > { %v1041_v27 = vrot.slane %v1040_v7, 2  ;;  %v1047_v29 = vmax.f32 %v1045_v0, %v1046_v13  ;;  %v1061_v31 = vmax.f32 %v1059_v4, %v1060_v14  ;;  %v630_v36 = vrot.slane %v559_v48, %v2645_v6  ;;  %v506_v0 = vpop.permute.xlu1 %505 }
  0xf5   : > { %v939_v32 = vmax.f32 %v937_v8, %v938_v16  ;;  %v952_v33 = vrot.slane %v951_v22, 1  ;;  %v946_v37 = vmax.f32 %v944_v9, %v945_v18  ;;  %v1055_v39 = vrot.slane %v1054_v10, 2 }
  0xf6   : > { %v1381_v41 = vadd.f32 %v2668_v26, %v932_v15  ;;  %v1048_v43 = vrot.slane %v1047_v29, 2  ;;  %v1042_v17 = vmax.f32 %v1040_v7, %v1041_v27  ;;  %v1062_v45 = vrot.slane %v1061_v31, 2 }
  0xf7   : > { %v953_v44 = vmax.f32 %v951_v22, %v952_v33  ;;  %v1382_v46 = vadd.f32 %v2668_v26, %v939_v32  ;;  %v637_v50 = vrot.slane %v623_v35, %v2645_v6  ;;  %v638_v47 = vcombine.high %v630_v36, %v630_v36 }
  0xf8   : > { %v1383_v51 = vadd.f32 %v2668_v26, %v946_v37  ;;  %v1056_v52 = vmax.f32 %v1054_v10, %v1055_v39  ;;  %2210 = vtanh.f32 %v1381_v41  ;;  %v1049_v53 = vmax.f32 %v1047_v29, %v1048_v43 }
  0xf9   : > { %v639_v55 = vcombine.high %v637_v50, %v637_v50  ;;  %v982_v48 = vsel %vm925_vm2, %v630_v36, -inf  ;;  %v1384_v56 = vadd.f32 %v2668_v26, %v953_v44  ;;  %v1043_v57 = vrot.slane %v1042_v17, 1 }
  0xfa   : > { %v1063_v58 = vmax.f32 %v1061_v31, %v1062_v45  ;;  %v983_v59 = vrot.slane %v982_v48, 4  ;;  %2212 = vtanh.f32 %v1382_v46  ;;  %v989_v60 = vsel %vm925_vm2, %v638_v47, -inf }
  0xfb   : > { %v996_v61 = vsel %vm925_vm2, %v637_v50, -inf  ;;  %v1003_v62 = vsel %vm925_vm2, %v639_v55, -inf  ;;  %2214 = vtanh.f32 %v1383_v51  ;;  %v1057_v3 = vrot.slane %v1056_v52, 1 }
  0xfc   : > { %v990_v4 = vrot.slane %v989_v60, 4  ;;  %v1050_v5 = vrot.slane %v1049_v53, 1  ;;  %v984_v8 = vmax.f32 %v982_v48, %v983_v59  ;;  %v997_v9 = vrot.slane %v996_v61, 4 }
  0xfd   : > { %v1004_v11 = vrot.slane %v1003_v62, 4  ;;  %v1044_v7 = vmax.f32 %v1042_v17, %v1043_v57  ;;  %v1064_v13 = vrot.slane %v1063_v58, 1  ;;  %v549_v14 = vmul.f32 %v2638_v63, %v506_v0  ;;  %v498_v17 = vpop.permute.xlu0 %497 }
  0xfe   : > { %v991_v10 = vmax.f32 %v989_v60, %v990_v4  ;;  %2216 = vtanh.f32 %v1384_v56  ;;  %v998_v15 = vmax.f32 %v996_v61, %v997_v9  ;;  %v1058_v18 = vmax.f32 %v1056_v52, %v1057_v3 }
  0xff   : > { %v1005_v16 = vmax.f32 %v1003_v62, %v1004_v11  ;;  %v565_v27 = vadd.f32 %v549_v14, %v2629_v54  ;;  %v1051_v29 = vmax.f32 %v1049_v53, %v1050_v5  ;;  %v985_v31 = vrot.slane %v984_v8, 2 }
 0x100   : > { %v992_v22 = vrot.slane %v991_v10, 2  ;;  %v999_v32 = vrot.slane %v998_v15, 2  ;;  %v2684_v33 = vmul.f32 %v2601_v25, %v2588_v19  ;;  %v1065_v35 = vmax.f32 %v1063_v58, %v1064_v13  ;;  %v522_v58 = vpop.permute.xlu1 %521 }
 0x101   : > { %v1397_v36 = vadd.f32 %v2668_v26, %v1044_v7  ;;  %v357_v41 = vmul.f32 %v2601_v25, %v2590_v20  ;;  %v2691_v43 = vmul.f32 %v2601_v25, %v2592_v21  ;;  %v2695_v54 = vmul.f32 %v2601_v25, %v2594_v23 }
 0x102   : > { %v993_v37 = vmax.f32 %v991_v10, %v992_v22  ;;  %v2211_v39 = vpop.eup %2210  ;;  %v1006_v44 = vrot.slane %v1005_v16, 2  ;;  %v446_v19 = vmul.f32 %v2622_v42, %v2626_v49  ;;  %v1399_v45 = vadd.f32 %v2668_v26, %v1058_v18 }
 0x103   : > { %v1000_v50 = vmax.f32 %v998_v15, %v999_v32  ;;  %v362_v20 = vmul.f32 %v2601_v25, %v2596_v24  ;;  %v441_v21 = vmul.f32 %v2622_v42, %v2617_v40  ;;  %v1398_v51 = vadd.f32 %v2668_v26, %v1051_v29 }
 0x104   : > { %v994_v46 = vrot.slane %v993_v37, 1  ;;  %v2213_v47 = vpop.eup %2212  ;;  %v986_v23 = vmax.f32 %v984_v8, %v985_v31  ;;  %v2707_v53 = vmul.f32 %v2601_v25, %v2607_v30  ;;  %v1400_v49 = vadd.f32 %v2668_v26, %v1065_v35 }
 0x105   : > { %v2215_v52 = vpop.eup %2214  ;;  %2218 = vtanh.f32 %v1397_v36  ;;  %v547_v55 = vmul.f32 %v2638_v63, %v498_v17  ;;  %v2123_v48 = vpack.c.bf16 %v2211_v39, %v2211_v39  ;;  %v1007_v56 = vmax.f32 %v1005_v16, %v1006_v44 }
 0x106   : > { %v725_v57 = vcombine.high %v565_v27, %v565_v27  ;;  %v732_v24 = vrot.slane %v565_v27, %v2645_v6  ;;  %v462_v40 = vadd.f32 %v446_v19, %v362_v20  ;;  %2220 = vtanh.f32 %v1399_v45 }
 0x107   : > { %v995_v59 = vmax.f32 %v993_v37, %v994_v46  ;;  %v1001_v60 = vrot.slane %v1000_v50, 1  ;;  %v2712_v62 = vadd.f32 %v441_v21, %v357_v41  ;;  %v2124_v25 = vpack.c.bf16 %v2213_v47, %v2213_v47 }
 0x108   : > { %v2217_v61 = vpop.eup %2216  ;;  %2222 = vtanh.f32 %v1398_v51  ;;  %v987_v30 = vrot.slane %v986_v23, 1  ;;  %v2125_v0 = vpack.c.bf16 %v2215_v52, %v2215_v52  ;;  %v563_v3 = vadd.f32 %v547_v55, %v462_v40 }
 0x109   : > { %2224 = vtanh.f32 %v1400_v49  ;;  %v2715_v4 = vmul.f32 %v2638_v63, %v522_v58  ;;  %v2717_v5 = vunpack.c.l.b16 %v2123_v48  ;;  %v1008_v8 = vrot.slane %v1007_v56, 1 }
 0x10a   : > { %v739_v9 = vrot.slane %v725_v57, %v2645_v6  ;;  %v740_v11 = vcombine.high %v732_v24, %v732_v24  ;;  %v2126_v7 = vpack.c.bf16 %v2217_v61, %v2217_v61  ;;  %v1002_v13 = vmax.f32 %v1000_v50, %v1001_v60 }
 0x10b   : > { %v1390_v10 = vadd.f32 %v2668_v26, %v995_v59  ;;  %v1150_v14 = vsel %vm925_vm2, %v732_v24, -inf  ;;  %v2722_v15 = vunpack.c.l.b16 %v2124_v25  ;;  %v988_v16 = vmax.f32 %v986_v23, %v987_v30 }
 0x10c   : > { %v741_v18 = vcombine.high %v739_v9, %v739_v9  ;;  %v1151_v22 = vrot.slane %v1150_v14, 4  ;;  %v2724_v27 = vunpack.c.l.b16 %v2125_v0  ;;  %v1157_v29 = vsel %vm925_vm2, %v740_v11, -inf }
 0x10d   : > { %v1164_v31 = vsel %vm925_vm2, %v739_v9, -inf  ;;  %v691_v32 = vcombine.high %v563_v3, %v563_v3  ;;  %v1009_v35 = vmax.f32 %v1007_v56, %v1008_v8  ;;  %v1158_v37 = vrot.slane %v1157_v29, 4 }
 0x10e   : > { %v1152_v36 = vmax.f32 %v1150_v14, %v1151_v22  ;;  %v1165_v39 = vrot.slane %v1164_v31, 4  ;;  %v1391_v44 = vadd.f32 %v2668_v26, %v1002_v13  ;;  %2226 = vtanh.f32 %v1390_v10 }
 0x10f   : > { %v2728_v41 = vpop.eup %2218  ;;  %v1171_v17 = vsel %vm925_vm2, %v741_v18, -inf  ;;  %v698_v19 = vrot.slane %v563_v3, %v2645_v6  ;;  %v1159_v46 = vmax.f32 %v1157_v29, %v1158_v37  ;;  %v1389_v21 = vadd.f32 %v2668_v26, %v988_v16 }
 0x110   : > { %v1153_v45 = vrot.slane %v1152_v36, 2  ;;  %v1166_v50 = vmax.f32 %v1164_v31, %v1165_v39  ;;  %v1172_v47 = vrot.slane %v1171_v17, 4  ;;  %v2733_v20 = vpop.eup %2220  ;;  %v705_v51 = vrot.slane %v691_v32, %v2645_v6 }
 0x111   : > { %v706_v23 = vcombine.high %v698_v19, %v698_v19  ;;  %v1094_v52 = vsel %vm925_vm2, %v698_v19, -inf  ;;  %v1160_v48 = vrot.slane %v1159_v46, 2  ;;  %v2738_v58 = vunpack.c.l.b16 %v2126_v7 }
 0x112   : > { %v2223_v49 = vpop.eup %2222  ;;  %v1154_v55 = vmax.f32 %v1152_v36, %v1153_v45  ;;  %v1167_v56 = vrot.slane %v1166_v50, 2  ;;  %v1173_v57 = vmax.f32 %v1171_v17, %v1172_v47  ;;  %v1392_v40 = vadd.f32 %v2668_v26, %v1009_v35 }
 0x113   : > { %v2225_v24 = vpop.eup %2224  ;;  %2228 = vtanh.f32 %v1391_v44  ;;  %v1095_v59 = vrot.slane %v1094_v52, 4  ;;  %v1829_v60 = vrot.slane %v2722_v15, 7  ;;  %v1161_v25 = vmax.f32 %v1159_v46, %v1160_v48 }
 0x114   : > { %v1155_v61 = vrot.slane %v1154_v55, 1  ;;  %v1168_v30 = vmax.f32 %v1166_v50, %v1167_v56  ;;  %2230 = vtanh.f32 %v1389_v21  ;;  %v1174_v0 = vrot.slane %v1173_v57, 2 }
 0x115   : > { %v1096_v3 = vmax.f32 %v1094_v52, %v1095_v59  ;;  %v1101_v8 = vsel %vm925_vm2, %v706_v23, -inf  ;;  %v1162_v11 = vrot.slane %v1161_v25, 1  ;;  %v707_v13 = vcombine.high %v705_v51, %v705_v51 }
 0x116   : > { %v1156_v9 = vmax.f32 %v1154_v55, %v1155_v61  ;;  %v1108_v7 = vsel %vm925_vm2, %v705_v51, -inf  ;;  %v1832_v10 = vrot.slane %v2724_v27, 6  ;;  %2232 = vtanh.f32 %v1392_v40 }
 0x117   : > { %v1169_v14 = vrot.slane %v1168_v30, 1  ;;  %v1175_v16 = vmax.f32 %v1173_v57, %v1174_v0  ;;  %v2140_v15 = vpack.c.bf16 %v2223_v49, %v2223_v49  ;;  %v1163_v18 = vmax.f32 %v1161_v25, %v1162_v11 }
 0x118   : > { %v1097_v22 = vrot.slane %v1096_v3, 2  ;;  %v1102_v29 = vrot.slane %v1101_v8, 4  ;;  %v2227_v31 = vpop.eup %2226  ;;  %v2139_v32 = vpack.c.bf16 %v2728_v41, %v2728_v41  ;;  %v1109_v37 = vrot.slane %v1108_v7, 4 }
 0x119   : > { %v1170_v35 = vmax.f32 %v1168_v30, %v1169_v14  ;;  %v1176_v36 = vrot.slane %v1175_v16, 1  ;;  %v1413_v39 = vadd.f32 %v2668_v26, %v1156_v9  ;;  %v1414_v44 = vadd.f32 %v2668_v26, %v1163_v18 }
 0x11a   : > { %v1098_v17 = vmax.f32 %v1096_v3, %v1097_v22  ;;  %v1115_v27 = vsel %vm925_vm2, %v707_v13, -inf  ;;  %v1831_v19 = vsel %vm1830_vm3, %v1829_v60, %v2717_v5  ;;  %v1835_v45 = vrot.slane %v2738_v58, 5 }
 0x11b   : > { %v1177_v46 = vmax.f32 %v1175_v16, %v1176_v36  ;;  %v1415_v50 = vadd.f32 %v2668_v26, %v1170_v35  ;;  %v2141_v41 = vpack.c.bf16 %v2733_v20, %v2733_v20  ;;  %v2142_v47 = vpack.c.bf16 %v2225_v24, %v2225_v24 }
 0x11c   : > { %v1782_v21 = vunpack.c.l.b16 %v2140_v15  ;;  %v1103_v51 = vmax.f32 %v1101_v8, %v1102_v29  ;;  %v2132_v52 = vpack.c.bf16 %v2227_v31, %v2227_v31  ;;  %2234 = vtanh.f32 %v1414_v44 }
 0x11d   : > { %v2229_v23 = vpop.eup %2228  ;;  %v1110_v49 = vmax.f32 %v1108_v7, %v1109_v37  ;;  %v1116_v55 = vrot.slane %v1115_v27, 4  ;;  %2236 = vtanh.f32 %v1413_v39  ;;  %v1099_v48 = vrot.slane %v1098_v17, 1  ;;  %v514_v7 = vpop.permute.xlu0 %513 }
 0x11e   : > { %v1104_v56 = vrot.slane %v1103_v51, 2  ;;  %v569_v5 = vadd.f32 %v2715_v4, %v2641_v1  ;;  %v2231_v57 = vpop.eup %2230  ;;  %v1416_v40 = vadd.f32 %v2668_v26, %v1177_v46  ;;  %2238 = vtanh.f32 %v1415_v50 }
 0x11f   : > { %v1111_v59 = vrot.slane %v1110_v49, 2  ;;  %v1117_v20 = vmax.f32 %v1115_v27, %v1116_v55  ;;  %v2760_v24 = vsel %vm1833_vm4, %v1832_v10, %v1831_v19  ;;  %v1783_v60 = vunpack.c.l.b16 %v2141_v41  ;;  %v386_v19 = vpop.permute.xlu1 %385 }
 0x120   : > { %v2133_v61 = vpack.c.bf16 %v2229_v23, %v2229_v23  ;;  %v800_v25 = vrot.slane %v569_v5, %v2645_v6  ;;  %v2233_v30 = vpop.eup %2232  ;;  %v2763_v0 = vunpack.c.l.b16 %v2142_v47  ;;  %v1864_v3 = vrot.slane %v1782_v21, 7 }
 0x121   : > { %v1774_v8 = vunpack.c.l.b16 %v2132_v52  ;;  %v793_v9 = vcombine.high %v569_v5, %v569_v5  ;;  %v2131_v1 = vpack.c.bf16 %v2231_v57, %v2231_v57  ;;  %v1100_v4 = vmax.f32 %v1098_v17, %v1099_v48 }
 0x122   : > { %v1105_v11 = vmax.f32 %v1103_v51, %v1104_v56  ;;  %v808_v13 = vcombine.high %v800_v25, %v800_v25  ;;  %2240 = vtanh.f32 %v1416_v40  ;;  %v1112_v14 = vmax.f32 %v1110_v49, %v1111_v59 }
 0x123   : > { %v1118_v16 = vrot.slane %v1117_v20, 2  ;;  %v1262_v10 = vsel %vm925_vm2, %v800_v25, -inf  ;;  %v2134_v15 = vpack.c.bf16 %v2233_v30, %v2233_v30  ;;  %v1775_v18 = vunpack.c.l.b16 %v2133_v61 }
 0x124   : > { %v1263_v22 = vrot.slane %v1262_v10, 4  ;;  %v1269_v29 = vsel %vm925_vm2, %v808_v13, -inf  ;;  %v1781_v31 = vunpack.c.l.b16 %v2139_v32  ;;  %v1850_v35 = vrot.slane %v1774_v8, 7 }
 0x125   : > { %v807_v36 = vrot.slane %v793_v9, %v2645_v6  ;;  %v551_v37 = vmul.f32 %v2638_v63, %v514_v7  ;;  %v1866_v39 = vrot.slane %v1783_v60, 6  ;;  %v1773_v44 = vunpack.c.l.b16 %v2131_v1 }
 0x126   : > { %v1106_v17 = vrot.slane %v1105_v11, 1  ;;  %v1270_v27 = vrot.slane %v1269_v29, 4  ;;  %v2235_v46 = vpop.eup %2234  ;;  %v1113_v50 = vrot.slane %v1112_v14, 1  ;;  %v1119_v41 = vmax.f32 %v1117_v20, %v1118_v16 }
 0x127   : > { %v1405_v47 = vadd.f32 %v2668_v26, %v1100_v4  ;;  %v1264_v21 = vmax.f32 %v1262_v10, %v1263_v22  ;;  %v2237_v51 = vpop.eup %2236  ;;  %v1865_v23 = vsel %vm1830_vm3, %v1864_v3, %v1781_v31  ;;  %v1868_v32 = vrot.slane %v2763_v0, 5 }
 0x128   : > { %v2772_v52 = vunpack.c.l.b16 %v2134_v15  ;;  %v1852_v49 = vrot.slane %v1775_v18, 6  ;;  %v2239_v55 = vpop.eup %2238  ;;  %v1851_v48 = vsel %vm1830_vm3, %v1850_v35, %v1773_v44  ;;  %v1276_v56 = vsel %vm925_vm2, %v807_v36, -inf }
 0x129   : > { %v567_v5 = vadd.f32 %v551_v37, %v2643_v2  ;;  %v443_v57 = vmul.f32 %v2622_v42, %v386_v19  ;;  %v2156_v40 = vpack.c.bf16 %v2235_v46, %v2235_v46  ;;  %v1107_v59 = vmax.f32 %v1105_v11, %v1106_v17 }
 0x12a   : > { %v809_v20 = vcombine.high %v807_v36, %v807_v36  ;;  %v1271_v60 = vmax.f32 %v1269_v29, %v1270_v27  ;;  %v1114_v61 = vmax.f32 %v1112_v14, %v1113_v50  ;;  %v1120_v25 = vrot.slane %v1119_v41, 1 }
 0x12b   : > { %2242 = vtanh.f32 %v1405_v47  ;;  %v1265_v30 = vrot.slane %v1264_v21, 2  ;;  %v2779_v3 = vsel %vm1833_vm4, %v1866_v39, %v1865_v23  ;;  %v2155_v8 = vpack.c.bf16 %v2237_v51, %v2237_v51 }
 0x12c   : > { %v2157_v9 = vpack.c.bf16 %v2239_v55, %v2239_v55  ;;  %v1277_v1 = vrot.slane %v1276_v56, 4  ;;  %v2241_v4 = vpop.eup %2240  ;;  %v2782_v13 = vsel %vm1833_vm4, %v1852_v49, %v1851_v48  ;;  %v1854_v2 = vrot.slane %v2772_v52, 5  ;;  %v530_v48 = vpop.permute.xlu0 %529 }
 0x12d   : > { %v759_v7 = vcombine.high %v567_v5, %v567_v5  ;;  %v2786_v11 = vadd.f32 %v443_v57, %v2684_v33  ;;  %v1798_v14 = vunpack.c.l.b16 %v2156_v40  ;;  %v1406_v16 = vadd.f32 %v2668_v26, %v1107_v59 }
 0x12e   : > { %v1272_v10 = vrot.slane %v1271_v60, 2  ;;  %v1283_v15 = vsel %vm925_vm2, %v809_v20, -inf  ;;  %v1121_v18 = vmax.f32 %v1119_v41, %v1120_v25  ;;  %v1407_v22 = vadd.f32 %v2668_v26, %v1114_v61 }
 0x12f   : > { %v1266_v29 = vmax.f32 %v1264_v21, %v1265_v30  ;;  %v766_v31 = vrot.slane %v567_v5, %v2645_v6  ;;  %v2158_v35 = vpack.c.bf16 %v2241_v4, %v2241_v4  ;;  %v1797_v36 = vunpack.c.l.b16 %v2155_v8 }
 0x130   : > { %v1799_v37 = vunpack.c.l.b16 %v2157_v9  ;;  %v1278_v39 = vmax.f32 %v1276_v56, %v1277_v1  ;;  %v1284_v44 = vrot.slane %v1283_v15, 4  ;;  %v773_v33 = vrot.slane %v759_v7, %v2645_v6 }
 0x131   : > { %v774_v17 = vcombine.high %v766_v31, %v766_v31  ;;  %v1206_v27 = vsel %vm925_vm2, %v766_v31, -inf  ;;  %v1892_v19 = vrot.slane %v1798_v14, 7  ;;  %2244 = vtanh.f32 %v1406_v16 }
 0x132   : > { %v1273_v46 = vmax.f32 %v1271_v60, %v1272_v10  ;;  %v1207_v50 = vrot.slane %v1206_v27, 4  ;;  %v1408_v41 = vadd.f32 %v2668_v26, %v1121_v18  ;;  %2246 = vtanh.f32 %v1407_v22 }
 0x133   : > { %v1267_v47 = vrot.slane %v1266_v29, 1  ;;  %v1213_v21 = vsel %vm925_vm2, %v774_v17, -inf  ;;  %v2796_v51 = vunpack.c.l.b16 %v2158_v35  ;;  %v1279_v23 = vrot.slane %v1278_v39, 2 }
 0x134   : > { %v1208_v49 = vmax.f32 %v1206_v27, %v1207_v50  ;;  %v1214_v55 = vrot.slane %v1213_v21, 4  ;;  %v1894_v5 = vrot.slane %v1799_v37, 6  ;;  %v1285_v57 = vmax.f32 %v1283_v15, %v1284_v44 }
 0x135   : > { %v2243_v56 = vpop.eup %2242  ;;  %v775_v40 = vcombine.high %v773_v33, %v773_v33  ;;  %v1220_v59 = vsel %vm925_vm2, %v773_v33, -inf  ;;  %v1893_v20 = vsel %vm1830_vm3, %v1892_v19, %v1797_v36  ;;  %v1274_v60 = vrot.slane %v1273_v46, 1 }
 0x136   : > { %v1209_v61 = vrot.slane %v1208_v49, 2  ;;  %v1215_v25 = vmax.f32 %v1213_v21, %v1214_v55  ;;  %2248 = vtanh.f32 %v1408_v41  ;;  %v1268_v30 = vmax.f32 %v1266_v29, %v1267_v47  ;;  %v2810_v41 = vpop.permute.xlu1 %401 }
 0x137   : > { %v1221_v8 = vrot.slane %v1220_v59, 4  ;;  %v555_v9 = vmul.f32 %v2638_v63, %v530_v48  ;;  %v2147_v1 = vpack.c.bf16 %v2243_v56, %v2243_v56  ;;  %v1280_v4 = vmax.f32 %v1278_v39, %v1279_v23 }
 0x138   : > { %v1210_v7 = vmax.f32 %v1208_v49, %v1209_v61  ;;  %v1216_v14 = vrot.slane %v1215_v25, 2  ;;  %v2802_v16 = vsel %vm1833_vm4, %v1894_v5, %v1893_v20  ;;  %v1286_v10 = vrot.slane %v1285_v57, 2  ;;  %v2815_v20 = vpop.permute.xlu0 %393 }
 0x139   : > { %v1222_v15 = vmax.f32 %v1220_v59, %v1221_v8  ;;  %v1227_v18 = vsel %vm925_vm2, %v775_v40, -inf  ;;  %v1896_v22 = vrot.slane %v2796_v51, 5  ;;  %v1275_v31 = vmax.f32 %v1273_v46, %v1274_v60 }
 0x13a   : > { %v1211_v35 = vrot.slane %v1210_v7, 1  ;;  %v1217_v36 = vmax.f32 %v1215_v25, %v1216_v14  ;;  %v1429_v29 = vadd.f32 %v2668_v26, %v1268_v30  ;;  %v1228_v44 = vrot.slane %v1227_v18, 4 }
 0x13b   : > { %v1223_v37 = vrot.slane %v1222_v15, 2  ;;  %v571_v39 = vadd.f32 %v555_v9, %v2649_v12  ;;  %v2245_v33 = vpop.eup %2244  ;;  %v2808_v17 = vunpack.c.l.b16 %v2147_v1  ;;  %v1281_v27 = vrot.slane %v1280_v4, 1 }
 0x13c   : > { %v1212_v19 = vmax.f32 %v1210_v7, %v1211_v35  ;;  %v1218_v50 = vrot.slane %v1217_v36, 1  ;;  %v2247_v47 = vpop.eup %2246  ;;  %v1287_v21 = vmax.f32 %v1285_v57, %v1286_v10  ;;  %v1229_v46 = vmax.f32 %v1227_v18, %v1228_v44 }
 0x13d   : > { %v1224_v23 = vmax.f32 %v1222_v15, %v1223_v37  ;;  %v827_v49 = vcombine.high %v571_v39, %v571_v39  ;;  %v1430_v55 = vadd.f32 %v2668_v26, %v1275_v31  ;;  %v834_v12 = vrot.slane %v571_v39, %v2645_v6  ;;  %v418_v15 = vpop.permute.xlu1 %417 }
 0x13e   : > { %v1219_v48 = vmax.f32 %v1217_v36, %v1218_v50  ;;  %v1421_v56 = vadd.f32 %v2668_v26, %v1212_v19  ;;  %v2148_v5 = vpack.c.bf16 %v2245_v33, %v2245_v33  ;;  %2250 = vtanh.f32 %v1429_v29  ;;  %v410_v19 = vpop.permute.xlu0 %409 }
 0x13f   : > { %v1225_v40 = vrot.slane %v1224_v23, 1  ;;  %v1230_v59 = vrot.slane %v1229_v46, 2  ;;  %v1282_v60 = vmax.f32 %v1280_v4, %v1281_v27  ;;  %v841_v57 = vrot.slane %v827_v49, %v2645_v6 }
 0x140   : > { %v1422_v61 = vadd.f32 %v2668_v26, %v1219_v48  ;;  %v842_v25 = vcombine.high %v834_v12, %v834_v12  ;;  %v2249_v30 = vpop.eup %2248  ;;  %2252 = vtanh.f32 %v1421_v56  ;;  %v1318_v1 = vsel %vm925_vm2, %v834_v12, -inf }
 0x141   : > { %v1226_v8 = vmax.f32 %v1224_v23, %v1225_v40  ;;  %v1231_v9 = vmax.f32 %v1229_v46, %v1230_v59  ;;  %v2149_v7 = vpack.c.bf16 %v2247_v47, %v2247_v47  ;;  %v1288_v14 = vrot.slane %v1287_v21, 1 }
 0x142   : > { %2254 = vtanh.f32 %v1422_v61  ;;  %v1319_v10 = vrot.slane %v1318_v1, 4  ;;  %v843_v4 = vcombine.high %v841_v57, %v841_v57  ;;  %v1325_v35 = vsel %vm925_vm2, %v842_v25, -inf }
 0x143   : > { %v1232_v18 = vrot.slane %v1231_v9, 1  ;;  %v1423_v31 = vadd.f32 %v2668_v26, %v1226_v8  ;;  %v1790_v36 = vunpack.c.l.b16 %v2148_v5  ;;  %v1431_v29 = vadd.f32 %v2668_v26, %v1282_v60  ;;  %v434_v60 = vpop.permute.xlu1 %433 }
 0x144   : > { %v1320_v37 = vmax.f32 %v1318_v1, %v1319_v10  ;;  %v1326_v44 = vrot.slane %v1325_v35, 4  ;;  %v1332_v33 = vsel %vm925_vm2, %v841_v57, -inf  ;;  %v451_v27 = vmul.f32 %v2622_v42, %v418_v15  ;;  %v426_v15 = vpop.permute.xlu0 %425 }
 0x145   : > { %v1233_v39 = vmax.f32 %v1231_v9, %v1232_v18  ;;  %2256 = vtanh.f32 %v1423_v31  ;;  %v2150_v50 = vpack.c.bf16 %v2249_v30, %v2249_v30  ;;  %v1289_v47 = vmax.f32 %v1287_v21, %v1288_v14 }
 0x146   : > { %v1321_v23 = vrot.slane %v1320_v37, 2  ;;  %v1327_v46 = vmax.f32 %v1325_v35, %v1326_v44  ;;  %v1791_v49 = vunpack.c.l.b16 %v2149_v7  ;;  %v1333_v56 = vrot.slane %v1332_v33, 4 }
 0x147   : > { %v1424_v48 = vadd.f32 %v2668_v26, %v1233_v39  ;;  %v1339_v12 = vsel %vm925_vm2, %v843_v4, -inf  ;;  %v1878_v5 = vrot.slane %v1790_v36, 7  ;;  %2258 = vtanh.f32 %v1430_v55 }
 0x148   : > { %v1322_v40 = vmax.f32 %v1320_v37, %v1321_v23  ;;  %v1328_v59 = vrot.slane %v1327_v46, 2  ;;  %v2827_v61 = vpop.eup %2250  ;;  %2260 = vtanh.f32 %v1431_v29  ;;  %v1334_v57 = vmax.f32 %v1332_v33, %v1333_v56 }
 0x149   : > { %v1340_v25 = vrot.slane %v1339_v12, 4  ;;  %v2830_v21 = vadd.f32 %v451_v27, %v2707_v53  ;;  %v2833_v30 = vadd.f32 %v2668_v26, %v1289_v47  ;;  %2262 = vtanh.f32 %v1424_v48  ;;  %v486_v47 = vpop.permute.xlu1 %485 }
 0x14a   : > { %v1323_v8 = vrot.slane %v1322_v40, 1  ;;  %v1329_v9 = vmax.f32 %v1327_v46, %v1328_v59  ;;  %v2253_v1 = vpop.eup %2252  ;;  %v2835_v7 = vunpack.c.l.b16 %v2150_v50  ;;  %v1880_v55 = vrot.slane %v1791_v49, 6 }
 0x14b   : > { %v1335_v14 = vrot.slane %v1334_v57, 2  ;;  %v1341_v10 = vmax.f32 %v1339_v12, %v1340_v25  ;;  %v1879_v31 = vsel %vm1830_vm3, %v1878_v5, %v2808_v17  ;;  %v447_v35 = vmul.f32 %v2622_v42, %v2810_v41 }
 0x14c   : > { %v2255_v18 = vpop.eup %2254  ;;  %v1324_v53 = vmax.f32 %v1322_v40, %v1323_v8  ;;  %v1330_v4 = vrot.slane %v1329_v9, 1  ;;  %v445_v44 = vmul.f32 %v2622_v42, %v2815_v20  ;;  %v449_v27 = vmul.f32 %v2622_v42, %v410_v19 }
 0x14d   : > { %v2164_v36 = vpack.c.bf16 %v2255_v18, %v2255_v18  ;;  %v1336_v29 = vmax.f32 %v1334_v57, %v1335_v14  ;;  %v1342_v37 = vrot.slane %v1341_v10, 2  ;;  %v455_v50 = vmul.f32 %v2622_v42, %v434_v60  ;;  %v478_v60 = vpop.permute.xlu0 %477 }
 0x14e   : > { %v1331_v39 = vmax.f32 %v1329_v9, %v1330_v4  ;;  %v1437_v33 = vadd.f32 %v2668_v26, %v1324_v53  ;;  %v2163_v23 = vpack.c.bf16 %v2253_v1, %v2253_v1  ;;  %v2847_v41 = vsel %vm1833_vm4, %v1880_v55, %v1879_v31 }
 0x14f   : > { %v2257_v17 = vpop.eup %2256  ;;  %v1806_v46 = vunpack.c.l.b16 %v2164_v36  ;;  %v1337_v49 = vrot.slane %v1336_v29, 1  ;;  %v1343_v48 = vmax.f32 %v1341_v10, %v1342_v37  ;;  %v453_v20 = vmul.f32 %v2622_v42, %v426_v15 }
 0x150   : > { %v2165_v56 = vpack.c.bf16 %v2257_v17, %v2257_v17  ;;  %v1438_v12 = vadd.f32 %v2668_v26, %v1331_v39  ;;  %v1882_v5 = vrot.slane %v2835_v7, 5  ;;  %v463_v19 = vadd.f32 %v447_v35, %v2695_v54  ;;  %v2894_v39 = vld [vmem:[%s3139_s1 + $0x2] ss:$0 sm:$0xff] }
 0x151   : > { %v1338_v40 = vmax.f32 %v1336_v29, %v1337_v49  ;;  %v544_v59 = vmul.f32 %v2638_v63, %v486_v47  ;;  %v2854_v57 = vpop.eup %2258  ;;  %v1906_v25 = vrot.slane %v1806_v46, 7  ;;  %v1344_v8 = vrot.slane %v1343_v48, 1 }
 0x152   : > { %2264 = vtanh.f32 %v1437_v33  ;;  %v2857_v9 = vadd.f32 %v445_v44, %v2691_v43  ;;  %v2859_v1 = vpop.eup %2260  ;;  %v1805_v55 = vunpack.c.l.b16 %v2163_v23  ;;  %v2862_v42 = vadd.f32 %v449_v27, %v2604_v28 }
 0x153   : > { %v2865_v14 = vadd.f32 %v455_v50, %v2614_v38  ;;  %v560_v54 = vadd.f32 %v544_v59, %v2786_v11  ;;  %v2263_v10 = vpop.eup %2262  ;;  %v1807_v15 = vunpack.c.l.b16 %v2165_v56  ;;  %2266 = vtanh.f32 %v1438_v12  ;;  %v502_v38 = vpop.permute.xlu1 %501 }
 0x154   : > { %v2869_v18 = vadd.f32 %v453_v20, %v2610_v34  ;;  %v542_v43 = vmul.f32 %v2638_v63, %v478_v60  ;;  %v1439_v31 = vadd.f32 %v2668_v26, %v1338_v40  ;;  %v2878_v28 = vsel %vm1836_vm5, %v1854_v2, %v2782_v13 }
 0x155   : > { %v640_v53 = vcombine.high %v560_v54, %v560_v54  ;;  %v647_v4 = vrot.slane %v560_v54, %v2645_v6  ;;  %v1907_v11 = vsel %vm1830_vm3, %v1906_v25, %v1805_v55  ;;  %v1345_v35 = vmax.f32 %v1343_v48, %v1344_v8 }
 0x156   : > { %v2885_v34 = vsel %vm1836_vm5, %v1835_v45, %v2760_v24  ;;  %v558_v63 = vadd.f32 %v542_v43, %v2712_v62  ;;  %v2166_v36 = vpack.c.bf16 %v2263_v10, %v2263_v10  ;;  %v1908_v13 = vrot.slane %v1807_v15, 6 }
 0x157   : > { %v654_v29 = vrot.slane %v640_v53, %v2645_v6  ;;  %v655_v37 = vcombine.high %v647_v4, %v647_v4  ;;  %v1010_v52 = vsel %vm925_vm2, %v647_v4, -inf  ;;  %v548_v58 = vmul.f32 %v2894_v39, %v502_v38 }
 0x158   : > { %v1011_v2 = vrot.slane %v1010_v52, 4  ;;  %v613_v44 = vrot.slane %v558_v63, %v2645_v6  ;;  %2268 = vtanh.f32 %v1439_v31  ;;  %v1440_v33 = vadd.f32 %v2668_v26, %v1345_v35 }
 0x159   : > { %v656_v45 = vcombine.high %v654_v29, %v654_v29  ;;  %v1017_v62 = vsel %vm925_vm2, %v655_v37, -inf  ;;  %v1024_v24 = vsel %vm925_vm2, %v654_v29, -inf  ;;  %v606_v23 = vcombine.high %v558_v63, %v558_v63 }
 0x15a   : > { %v1012_v27 = vmax.f32 %v1010_v52, %v1011_v2  ;;  %v1018_v50 = vrot.slane %v1017_v62, 4  ;;  %v1025_v47 = vrot.slane %v1024_v24, 4  ;;  %v621_v46 = vcombine.high %v613_v44, %v613_v44 }
 0x15b   : > { %v1031_v17 = vsel %vm925_vm2, %v656_v45, -inf  ;;  %v954_v49 = vsel %vm925_vm2, %v613_v44, -inf  ;;  %v2902_v59 = vunpack.c.l.b16 %v2166_v36  ;;  %v2905_v60 = vsel %vm1833_vm4, %v1908_v13, %v1907_v11 }
 0x15c   : > { %v2265_v48 = vpop.eup %2264  ;;  %v1013_v56 = vrot.slane %v1012_v27, 2  ;;  %v1019_v12 = vmax.f32 %v1017_v62, %v1018_v50  ;;  %v1026_v20 = vmax.f32 %v1024_v24, %v1025_v47  ;;  %v1032_v40 = vrot.slane %v1031_v17, 4 }
 0x15d   : > { %v955_v25 = vrot.slane %v954_v49, 4  ;;  %v564_v8 = vadd.f32 %v548_v58, %v463_v19  ;;  %v2267_v55 = vpop.eup %2266  ;;  %2270 = vtanh.f32 %v1440_v33  ;;  %v2179_v31 = vpack.c.bf16 %v2265_v48, %v2265_v48 }
 0x15e   : > { %v1014_v54 = vmax.f32 %v1012_v27, %v1013_v56  ;;  %v1020_v10 = vrot.slane %v1019_v12, 2  ;;  %v1027_v15 = vrot.slane %v1026_v20, 2  ;;  %v1033_v43 = vmax.f32 %v1031_v17, %v1032_v40 }
 0x15f   : > { %v956_v53 = vmax.f32 %v954_v49, %v955_v25  ;;  %v961_v4 = vsel %vm925_vm2, %v621_v46, -inf  ;;  %v620_v36 = vrot.slane %v606_v23, %v2645_v6  ;;  %v1910_v11 = vrot.slane %v2902_v59, 5 }
 0x160   : > { %v1015_v38 = vrot.slane %v1014_v54, 1  ;;  %v1021_v35 = vmax.f32 %v1019_v12, %v1020_v10  ;;  %v1028_v63 = vmax.f32 %v1026_v20, %v1027_v15  ;;  %v1034_v29 = vrot.slane %v1033_v43, 2 }
 0x161   : > { %v957_v37 = vrot.slane %v956_v53, 2  ;;  %v962_v19 = vrot.slane %v961_v4, 4  ;;  %v2180_v52 = vpack.c.bf16 %v2267_v55, %v2267_v55  ;;  %v708_v44 = vcombine.high %v564_v8, %v564_v8 }
 0x162   : > { %v1016_v13 = vmax.f32 %v1014_v54, %v1015_v38  ;;  %v1022_v2 = vrot.slane %v1021_v35, 1  ;;  %v2910_v58 = vpop.eup %2268  ;;  %v2912_v45 = vunpack.c.l.b16 %v2179_v31  ;;  %v1029_v62 = vrot.slane %v1028_v63, 1 }
 0x163   : > { %v1035_v24 = vmax.f32 %v1033_v43, %v1034_v29  ;;  %v958_v33 = vmax.f32 %v956_v53, %v957_v37  ;;  %v622_v47 = vcombine.high %v620_v36, %v620_v36  ;;  %v968_v17 = vsel %vm925_vm2, %v620_v36, -inf  ;;  %v2926_v53 = vld [vmem:[#allocation2] ss:$0 sm:$0xff] }
 0x164   : > { %v1023_v27 = vmax.f32 %v1021_v35, %v1022_v2  ;;  %v1393_v50 = vadd.f32 %v2668_v26, %v1016_v13  ;;  %v1030_v23 = vmax.f32 %v1028_v63, %v1029_v62  ;;  %v963_v48 = vmax.f32 %v961_v4, %v962_v19 }
 0x165   : > { %v1036_v46 = vrot.slane %v1035_v24, 1  ;;  %v959_v49 = vrot.slane %v958_v33, 1  ;;  %v2181_v56 = vpack.c.bf16 %v2910_v58, %v2910_v58  ;;  %v2918_v12 = vunpack.c.l.b16 %v2180_v52 }
 0x166   : > { %v1394_v20 = vadd.f32 %v2668_v26, %v1023_v27  ;;  %2272 = vtanh.f32 %v1393_v50  ;;  %v1395_v25 = vadd.f32 %v2668_v26, %v1030_v23  ;;  %v964_v54 = vrot.slane %v963_v48, 2 }
 0x167   : > { %v1037_v40 = vmax.f32 %v1035_v24, %v1036_v46  ;;  %v960_v55 = vmax.f32 %v958_v33, %v959_v49  ;;  %v969_v10 = vrot.slane %v968_v17, 4  ;;  %v975_v15 = vsel %vm925_vm2, %v622_v47, -inf  ;;  %v2924_v31 = vpop.eup %2270 }
 0x168   : > { %2274 = vtanh.f32 %v1394_v20  ;;  %v715_v43 = vrot.slane %v564_v8, %v2645_v6  ;;  %v965_v38 = vmax.f32 %v963_v48, %v964_v54  ;;  %v976_v35 = vrot.slane %v975_v15, 4 }
 0x169   : > { %v1396_v4 = vadd.f32 %v2926_v53, %v1037_v40  ;;  %2276 = vtanh.f32 %v1395_v25  ;;  %v970_v63 = vmax.f32 %v968_v17, %v969_v10  ;;  %v1385_v26 = vadd.f32 %v2926_v53, %v960_v55 }
 0x16a   : > { %v722_v36 = vrot.slane %v708_v44, %v2645_v6  ;;  %v723_v29 = vcombine.high %v715_v43, %v715_v43  ;;  %v966_v37 = vrot.slane %v965_v38, 1  ;;  %v977_v19 = vmax.f32 %v975_v15, %v976_v35 }
 0x16b   : > { %2278 = vtanh.f32 %v1396_v4  ;;  %v1122_v8 = vsel %vm925_vm2, %v715_v43, -inf  ;;  %v971_v52 = vrot.slane %v970_v63, 2  ;;  %v1934_v23 = vrot.slane %v2918_v12, 7 }
 0x16c   : > { %2280 = vtanh.f32 %v1385_v26  ;;  %v724_v13 = vcombine.high %v722_v36, %v722_v36  ;;  %v1123_v2 = vrot.slane %v1122_v8, 4  ;;  %v967_v62 = vmax.f32 %v965_v38, %v966_v37 }
 0x16d   : > { %v978_v24 = vrot.slane %v977_v19, 2  ;;  %v1129_v33 = vsel %vm925_vm2, %v723_v29, -inf  ;;  %v1136_v27 = vsel %vm925_vm2, %v722_v36, -inf  ;;  %v972_v50 = vmax.f32 %v970_v63, %v971_v52 }
 0x16e   : > { %v1124_v44 = vmax.f32 %v1122_v8, %v1123_v2  ;;  %v1130_v47 = vrot.slane %v1129_v33, 4  ;;  %v1137_v17 = vrot.slane %v1136_v27, 4  ;;  %v1386_v49 = vadd.f32 %v2926_v53, %v967_v62 }
 0x16f   : > { %v979_v46 = vmax.f32 %v977_v19, %v978_v24  ;;  %v1143_v48 = vsel %vm925_vm2, %v724_v13, -inf  ;;  %v973_v40 = vrot.slane %v972_v50, 1 }
 0x170   : > { %v2273_v20 = vpop.eup %2272  ;;  %v1125_v25 = vrot.slane %v1124_v44, 2  ;;  %v1131_v55 = vmax.f32 %v1129_v33, %v1130_v47  ;;  %v1138_v54 = vmax.f32 %v1136_v27, %v1137_v17  ;;  %2282 = vtanh.f32 %v1386_v49 }
 0x171   : > { %v2135_v10 = vpack.c.bf16 %v2273_v20, %v2273_v20  ;;  %v980_v15 = vrot.slane %v979_v46, 1  ;;  %v1144_v43 = vrot.slane %v1143_v48, 4  ;;  %v974_v38 = vmax.f32 %v972_v50, %v973_v40 }
 0x172   : > { %v2275_v4 = vpop.eup %2274  ;;  %v1126_v35 = vmax.f32 %v1124_v44, %v1125_v25  ;;  %v1132_v63 = vrot.slane %v1131_v55, 2  ;;  %v1139_v26 = vrot.slane %v1138_v54, 2  ;;  %v494_v25 = vpop.permute.xlu0 %493 }
 0x173   : > { %v2277_v36 = vpop.eup %2276  ;;  %v2136_v29 = vpack.c.bf16 %v2275_v4, %v2275_v4  ;;  %v1777_v37 = vunpack.c.l.b16 %v2135_v10  ;;  %v981_v19 = vmax.f32 %v979_v46, %v980_v15  ;;  %v1145_v8 = vmax.f32 %v1143_v48, %v1144_v43 }
 0x174   : > { %v2137_v52 = vpack.c.bf16 %v2277_v36, %v2277_v36  ;;  %v1387_v13 = vadd.f32 %v2926_v53, %v974_v38  ;;  %v1127_v2 = vrot.slane %v1126_v35, 1  ;;  %v1133_v62 = vmax.f32 %v1131_v55, %v1132_v63  ;;  %v518_v55 = vpop.permute.xlu1 %517 }
 0x175   : > { %v2279_v24 = vpop.eup %2278  ;;  %v1778_v33 = vunpack.c.l.b16 %v2136_v29  ;;  %v1856_v27 = vrot.slane %v1777_v37, 4  ;;  %v1388_v47 = vadd.f32 %v2926_v53, %v981_v19  ;;  %v1140_v50 = vmax.f32 %v1138_v54, %v1139_v26 }
 0x176   : > { %v2281_v44 = vpop.eup %2280  ;;  %v2138_v17 = vpack.c.bf16 %v2279_v24, %v2279_v24  ;;  %v1779_v49 = vunpack.c.l.b16 %v2137_v52  ;;  %2284 = vtanh.f32 %v1387_v13  ;;  %v1128_v20 = vmax.f32 %v1126_v35, %v1127_v2 }
 0x177   : > { %v1857_v46 = vsel %vm1839_vm6, %v1856_v27, %v2878_v28  ;;  %v1858_v48 = vrot.slane %v1778_v33, 3  ;;  %2286 = vtanh.f32 %v1388_v47  ;;  %v2127_v40 = vpack.c.bf16 %v2281_v44, %v2281_v44  ;;  %v510_v44 = vpop.permute.xlu0 %509 }
 0x178   : > { %v1780_v10 = vunpack.c.l.b16 %v2138_v17  ;;  %v1860_v15 = vrot.slane %v1779_v49, 2  ;;  %v1134_v43 = vrot.slane %v1133_v62, 1  ;;  %v1141_v4 = vrot.slane %v1140_v50, 1  ;;  %v535_v17 = vpop.permute.xlu1 %534 }
 0x179   : > { %v1859_v54 = vsel %vm1842_vm7, %v1858_v48, %v1857_v46  ;;  %v1769_v38 = vunpack.c.l.b16 %v2127_v40  ;;  %v1146_v63 = vrot.slane %v1145_v8, 2  ;;  %v1409_v26 = vadd.f32 %v2926_v53, %v1128_v20 }
 0x17a   : > { %v1861_v35 = vsel %vm1845_vm8, %v1860_v15, %v1859_v54  ;;  %v1862_v36 = vrot.slane %v1780_v10, 1  ;;  %v1135_v28 = vmax.f32 %v1133_v62, %v1134_v43  ;;  %v1142_v29 = vmax.f32 %v1140_v50, %v1141_v4  ;;  %v2283_v37 = vpop.eup %2282 }
 0x17b   : > { %v2182_v19 = vpack.c.bf16 %v2924_v31, %v2924_v31  ;;  %v1838_v52 = vrot.slane %v1769_v38, 4  ;;  %v1147_v13 = vmax.f32 %v1145_v8, %v1146_v63  ;;  %2288 = vtanh.f32 %v1409_v26 }
 0x17c   : > { %v1863_v2 = vsel %vm1848_vm9, %v1862_v36, %v1861_v35  ;;  %v2128_v24 = vpack.c.bf16 %v2283_v37, %v2283_v37  ;;  %v1410_v33 = vadd.f32 %v2926_v53, %v1135_v28  ;;  %v1411_v62 = vadd.f32 %v2926_v53, %v1142_v29 }
 0x17d   : > { %v1949_v27 = vpack.c.b16 %v1863_v2, %v1863_v2  ;;  %v1840_v47 = vsel %vm1839_vm6, %v1838_v52, %v2885_v34  ;;  %v1148_v50 = vrot.slane %v1147_v13, 1  ;;  %v546_v8 = vmul.f32 %v2894_v39, %v494_v25 }
 0x17e   : > { %v1770_v49 = vunpack.c.l.b16 %v2128_v24  ;;  %2290 = vtanh.f32 %v1410_v33  ;;  %v2962_v20 = vsel %vm1836_vm5, %v1882_v5, %v2847_v41  ;;  %v552_v46 = vmul.f32 %v2894_v39, %v518_v55 }
 0x17f   : > { %1966 = vst.msk [vmem:[%s2950_s18 + $0x4] sm:$0xf] %vm1964_vm10, %v1949_v27  ;;  %v1149_v48 = vmax.f32 %v1147_v13, %v1148_v50  ;;  %2292 = vtanh.f32 %v1411_v62  ;;  %v2971_v34 = vsel %vm1836_vm5, %v1868_v32, %v2779_v3  ;;  %v562_v40 = vadd.f32 %v546_v8, %v2857_v9 }
 0x180   : > { %v2285_v25 = vpop.eup %2284  ;;  %v1841_v10 = vrot.slane %v1770_v49, 3  ;;  %v568_v7 = vadd.f32 %v552_v46, %v2830_v21  ;;  %v2976_v41 = vmul.f32 %v2894_v39, %v510_v44  ;;  %v2979_v5 = vmul.f32 %v2894_v39, %v535_v17 }
 0x181   : > { %v2287_v55 = vpop.eup %2286  ;;  %v2129_v15 = vpack.c.bf16 %v2285_v25, %v2285_v25  ;;  %v1412_v43 = vadd.f32 %v2926_v53, %v1149_v48  ;;  %v674_v0 = vcombine.high %v562_v40, %v562_v40  ;;  %v681_v32 = vrot.slane %v562_v40, %v2645_v6 }
 0x182   : > { %v2130_v3 = vpack.c.bf16 %v2287_v55, %v2287_v55  ;;  %v1843_v9 = vsel %vm1842_vm7, %v1841_v10, %v1840_v47  ;;  %v776_v4 = vcombine.high %v568_v7, %v568_v7  ;;  %v2985_v54 = vrot.slane %v568_v7, %v2645_v6 }
 0x183   : > { %v1771_v21 = vunpack.c.l.b16 %v2129_v15  ;;  %2294 = vtanh.f32 %v1412_v43  ;;  %v688_v38 = vrot.slane %v674_v0, %v2645_v6  ;;  %v689_v63 = vcombine.high %v681_v32, %v681_v32 }
 0x184   : > { %v1772_v26 = vunpack.c.l.b16 %v2130_v3  ;;  %v1066_v35 = vsel %vm925_vm2, %v681_v32, -inf  ;;  %v2990_v36 = vrot.slane %v776_v4, %v2645_v6  ;;  %v791_v28 = vcombine.high %v2985_v54, %v2985_v54 }
 0x185   : > { %v2289_v29 = vpop.eup %2288  ;;  %v1844_v37 = vrot.slane %v1771_v21, 2  ;;  %v690_v52 = vcombine.high %v688_v38, %v688_v38  ;;  %v1067_v13 = vrot.slane %v1066_v35, 4  ;;  %v1073_v2 = vsel %vm925_vm2, %v689_v63, -inf }
 0x186   : > { %v1847_v24 = vrot.slane %v1772_v26, 1  ;;  %v2151_v33 = vpack.c.bf16 %v2289_v29, %v2289_v29  ;;  %v1074_v62 = vrot.slane %v1073_v2, 4  ;;  %v1080_v27 = vsel %vm925_vm2, %v688_v38, -inf }
 0x187   : > { %v1846_v47 = vsel %vm1845_vm8, %v1844_v37, %v1843_v9  ;;  %v1068_v50 = vmax.f32 %v1066_v35, %v1067_v13  ;;  %v1081_v8 = vrot.slane %v1080_v27, 4  ;;  %v1087_v44 = vsel %vm925_vm2, %v690_v52, -inf }
 0x188   : > { %v2291_v17 = vpop.eup %2290  ;;  %v1849_v49 = vsel %vm1848_vm9, %v1847_v24, %v1846_v47  ;;  %v1793_v46 = vunpack.c.l.b16 %v2151_v33  ;;  %v1075_v48 = vmax.f32 %v1073_v2, %v1074_v62  ;;  %v1088_v40 = vrot.slane %v1087_v44, 4 }
 0x189   : > { %v2293_v25 = vpop.eup %2292  ;;  %v1948_v10 = vpack.c.b16 %v1849_v49, %v1849_v49  ;;  %v2152_v7 = vpack.c.bf16 %v2291_v17, %v2291_v17  ;;  %v1069_v55 = vrot.slane %v1068_v50, 2  ;;  %v1082_v15 = vmax.f32 %v1080_v27, %v1081_v8 }
 0x18a   : > { %v2153_v43 = vpack.c.bf16 %v2293_v25, %v2293_v25  ;;  %v1884_v0 = vrot.slane %v1793_v46, 4  ;;  %v1076_v32 = vrot.slane %v1075_v48, 2  ;;  %v1089_v3 = vmax.f32 %v1087_v44, %v1088_v40 }
 0x18b   : > { %1965 = vst.msk [vmem:[%s2950_s18] sm:$0xf] %vm1964_vm10, %v1948_v10  ;;  %v1794_v9 = vunpack.c.l.b16 %v2152_v7  ;;  %v1070_v4 = vmax.f32 %v1068_v50, %v1069_v55  ;;  %v1083_v21 = vrot.slane %v1082_v15, 2  ;;  %v792_v38 = vcombine.high %v2990_v36, %v2990_v36 }
 0x18c   : > { %v1795_v63 = vunpack.c.l.b16 %v2153_v43  ;;  %v1885_v26 = vsel %vm1839_vm6, %v1884_v0, %v2962_v20  ;;  %v1077_v35 = vmax.f32 %v1075_v48, %v1076_v32  ;;  %v1090_v29 = vrot.slane %v1089_v3, 2 }
 0x18d   : > { %v2295_v37 = vpop.eup %2294  ;;  %v1886_v52 = vrot.slane %v1794_v9, 3  ;;  %v1071_v13 = vrot.slane %v1070_v4, 1  ;;  %v1084_v2 = vmax.f32 %v1082_v15, %v1083_v21  ;;  %v1234_v24 = vsel %vm925_vm2, %v2985_v54, -inf }
 0x18e   : > { %v2154_v33 = vpack.c.bf16 %v2295_v37, %v2295_v37  ;;  %v1888_v62 = vrot.slane %v1795_v63, 2  ;;  %v1078_v27 = vrot.slane %v1077_v35, 1  ;;  %v1091_v47 = vmax.f32 %v1089_v3, %v1090_v29 }
 0x18f   : > { %v1887_v50 = vsel %vm1842_vm7, %v1886_v52, %v1885_v26  ;;  %v1072_v8 = vmax.f32 %v1070_v4, %v1071_v13  ;;  %v1085_v44 = vrot.slane %v1084_v2, 1  ;;  %v1235_v17 = vrot.slane %v1234_v24, 4 }
 0x190   : > { %v1796_v49 = vunpack.c.l.b16 %v2154_v33  ;;  %v1889_v20 = vsel %vm1845_vm8, %v1888_v62, %v1887_v50  ;;  %v1079_v46 = vmax.f32 %v1077_v35, %v1078_v27  ;;  %v1092_v48 = vrot.slane %v1091_v47, 1 }
 0x191   : > { %v1086_v40 = vmax.f32 %v1084_v2, %v1085_v44  ;;  %v1401_v25 = vadd.f32 %v2926_v53, %v1072_v8  ;;  %v1236_v10 = vmax.f32 %v1234_v24, %v1235_v17  ;;  %v1241_v54 = vsel %vm925_vm2, %v791_v28, -inf }
 0x192   : > { %v1890_v7 = vrot.slane %v1796_v49, 1  ;;  %v1093_v55 = vmax.f32 %v1091_v47, %v1092_v48  ;;  %v1402_v15 = vadd.f32 %v2926_v53, %v1079_v46  ;;  %v1242_v43 = vrot.slane %v1241_v54, 4 }
 0x193   : > { %v1403_v0 = vadd.f32 %v2926_v53, %v1086_v40  ;;  %2296 = vtanh.f32 %v1401_v25  ;;  %v1237_v32 = vrot.slane %v1236_v10, 2  ;;  %v1248_v3 = vsel %vm925_vm2, %v2990_v36, -inf }
 0x194   : > { %v1891_v9 = vsel %vm1848_vm9, %v1890_v7, %v1889_v20  ;;  %v1404_v4 = vadd.f32 %v2926_v53, %v1093_v55  ;;  %2298 = vtanh.f32 %v1402_v15  ;;  %v1243_v21 = vmax.f32 %v1241_v54, %v1242_v43 }
 0x195   : > { %v1951_v28 = vpack.c.b16 %v1891_v9, %v1891_v9  ;;  %2300 = vtanh.f32 %v1403_v0  ;;  %v1238_v63 = vmax.f32 %v1236_v10, %v1237_v32  ;;  %v1249_v26 = vrot.slane %v1248_v3, 4 }
 0x196   : > { %2302 = vtanh.f32 %v1404_v4  ;;  %v1244_v35 = vrot.slane %v1243_v21, 2  ;;  %v1255_v29 = vsel %vm925_vm2, %v792_v38, -inf  ;;  %v566_v37 = vadd.f32 %v2976_v41, %v2862_v42 }
 0x197   : > { %1968 = vst.msk [vmem:[%s2950_s18 + $0xc] sm:$0xf] %vm1964_vm10, %v1951_v28  ;;  %v1239_v36 = vrot.slane %v1238_v63, 1  ;;  %v1250_v52 = vmax.f32 %v1248_v3, %v1249_v26  ;;  %v1256_v13 = vrot.slane %v1255_v29, 4  ;;  %v3024_v2 = vadd.f32 %v2979_v5, %v2865_v14 }
 0x198   : > { %v1245_v24 = vmax.f32 %v1243_v21, %v1244_v35  ;;  %v3030_v33 = vsel %vm1836_vm5, %v1910_v11, %v2905_v60  ;;  %v742_v38 = vcombine.high %v566_v37, %v566_v37  ;;  %v749_v62 = vrot.slane %v566_v37, %v2645_v6 }
 0x199   : > { %v1240_v42 = vmax.f32 %v1238_v63, %v1239_v36  ;;  %v1251_v41 = vrot.slane %v1250_v52, 2  ;;  %v1257_v27 = vmax.f32 %v1255_v29, %v1256_v13  ;;  %v844_v47 = vcombine.high %v3024_v2, %v3024_v2 }
 0x19a   : > { %v1246_v50 = vrot.slane %v1245_v24, 1  ;;  %v756_v14 = vrot.slane %v742_v38, %v2645_v6  ;;  %v757_v5 = vcombine.high %v749_v62, %v749_v62  ;;  %v1178_v8 = vsel %vm925_vm2, %v749_v62, -inf }
 0x19b   : > { %v1252_v44 = vmax.f32 %v1250_v52, %v1251_v41  ;;  %v1258_v59 = vrot.slane %v1257_v27, 2  ;;  %v1425_v60 = vadd.f32 %v2926_v53, %v1240_v42  ;;  %v1179_v11 = vrot.slane %v1178_v8, 4 }
 0x19c   : > { %v1247_v17 = vmax.f32 %v1245_v24, %v1246_v50  ;;  %v758_v49 = vcombine.high %v756_v14, %v756_v14  ;;  %v1185_v20 = vsel %vm925_vm2, %v757_v5, -inf  ;;  %v1192_v46 = vsel %vm925_vm2, %v756_v14, -inf }
 0x19d   : > { %v2297_v48 = vpop.eup %2296  ;;  %v1253_v40 = vrot.slane %v1252_v44, 1  ;;  %v1259_v25 = vmax.f32 %v1257_v27, %v1258_v59  ;;  %2304 = vtanh.f32 %v1425_v60  ;;  %v1180_v10 = vmax.f32 %v1178_v8, %v1179_v11 }
 0x19e   : > { %v2299_v54 = vpop.eup %2298  ;;  %v2143_v7 = vpack.c.bf16 %v2297_v48, %v2297_v48  ;;  %v1426_v55 = vadd.f32 %v2926_v53, %v1247_v17  ;;  %v1186_v15 = vrot.slane %v1185_v20, 4  ;;  %v1193_v43 = vrot.slane %v1192_v46, 4 }
 0x19f   : > { %v2301_v0 = vpop.eup %2300  ;;  %v2144_v32 = vpack.c.bf16 %v2299_v54, %v2299_v54  ;;  %v1254_v3 = vmax.f32 %v1252_v44, %v1253_v40  ;;  %v1260_v9 = vrot.slane %v1259_v25, 1  ;;  %v1181_v4 = vrot.slane %v1180_v10, 2 }
 0x1a0   : > { %v2303_v21 = vpop.eup %2302  ;;  %v2145_v28 = vpack.c.bf16 %v2301_v0, %v2301_v0  ;;  %v1785_v63 = vunpack.c.l.b16 %v2143_v7  ;;  %2306 = vtanh.f32 %v1426_v55  ;;  %v1187_v26 = vmax.f32 %v1185_v20, %v1186_v15 }
 0x1a1   : > { %v2146_v35 = vpack.c.bf16 %v2303_v21, %v2303_v21  ;;  %v1786_v29 = vunpack.c.l.b16 %v2144_v32  ;;  %v1261_v37 = vmax.f32 %v1259_v25, %v1260_v9  ;;  %v1427_v36 = vadd.f32 %v2926_v53, %v1254_v3 }
 0x1a2   : > { %v1787_v52 = vunpack.c.l.b16 %v2145_v28  ;;  %v1870_v13 = vrot.slane %v1785_v63, 4  ;;  %v1182_v24 = vmax.f32 %v1180_v10, %v1181_v4  ;;  %v1188_v38 = vrot.slane %v1187_v26, 2 }
 0x1a3   : > { %v1788_v62 = vunpack.c.l.b16 %v2146_v35  ;;  %v1872_v42 = vrot.slane %v1786_v29, 3  ;;  %v1428_v41 = vadd.f32 %v2926_v53, %v1261_v37  ;;  %2308 = vtanh.f32 %v1427_v36 }
 0x1a4   : > { %v1871_v27 = vsel %vm1839_vm6, %v1870_v13, %v2971_v34  ;;  %v1874_v50 = vrot.slane %v1787_v52, 2  ;;  %v1183_v14 = vrot.slane %v1182_v24, 1  ;;  %v1189_v5 = vmax.f32 %v1187_v26, %v1188_v38 }
 0x1a5   : > { %v1873_v8 = vsel %vm1842_vm7, %v1872_v42, %v1871_v27  ;;  %v1876_v44 = vrot.slane %v1788_v62, 1  ;;  %2310 = vtanh.f32 %v1428_v41  ;;  %v1194_v59 = vmax.f32 %v1192_v46, %v1193_v43 }
 0x1a6   : > { %v1875_v60 = vsel %vm1845_vm8, %v1874_v50, %v1873_v8  ;;  %v1184_v11 = vmax.f32 %v1182_v24, %v1183_v14  ;;  %v1190_v17 = vrot.slane %v1189_v5, 1  ;;  %v1199_v20 = vsel %vm925_vm2, %v758_v49, -inf }
 0x1a7   : > { %v2305_v48 = vpop.eup %2304  ;;  %v1877_v40 = vsel %vm1848_vm9, %v1876_v44, %v1875_v60  ;;  %v1195_v25 = vrot.slane %v1194_v59, 2  ;;  %v1200_v34 = vrot.slane %v1199_v20, 4  ;;  %v851_v10 = vrot.slane %v3024_v2, %v2645_v6 }
 0x1a8   : > { %v1950_v54 = vpack.c.b16 %v1877_v40, %v1877_v40  ;;  %v2167_v7 = vpack.c.bf16 %v2305_v48, %v2305_v48  ;;  %v1191_v55 = vmax.f32 %v1189_v5, %v1190_v17  ;;  %v1417_v46 = vadd.f32 %v2926_v53, %v1184_v11 }
 0x1a9   : > { %v1196_v15 = vmax.f32 %v1194_v59, %v1195_v25  ;;  %v1201_v43 = vmax.f32 %v1199_v20, %v1200_v34  ;;  %v858_v49 = vrot.slane %v844_v47, %v2645_v6  ;;  %v859_v0 = vcombine.high %v851_v10, %v851_v10 }
 0x1aa   : > { %v2307_v32 = vpop.eup %2306  ;;  %1967 = vst.msk [vmem:[%s2950_s18 + $0x8] sm:$0xf] %vm1964_vm10, %v1950_v54  ;;  %v1809_v3 = vunpack.c.l.b16 %v2167_v7  ;;  %v1418_v9 = vadd.f32 %v2926_v53, %v1191_v55  ;;  %2312 = vtanh.f32 %v1417_v46  ;;  %v1346_v4 = vsel %vm925_vm2, %v851_v10, -inf  ;;  %v526_v55 = vpop.permute.xlu0 %525 }
 0x1ab   : > { %v2168_v21 = vpack.c.bf16 %v2307_v32, %v2307_v32  ;;  %v1197_v28 = vrot.slane %v1196_v15, 1  ;;  %v1202_v63 = vrot.slane %v1201_v43, 2  ;;  %v860_v26 = vcombine.high %v858_v49, %v858_v49 }
 0x1ac   : > { %v1912_v35 = vrot.slane %v1809_v3, 4  ;;  %2314 = vtanh.f32 %v1418_v9  ;;  %v1347_v29 = vrot.slane %v1346_v4, 4  ;;  %v1353_v2 = vsel %vm925_vm2, %v859_v0, -inf }
 0x1ad   : > { %v2309_v47 = vpop.eup %2308  ;;  %v1810_v37 = vunpack.c.l.b16 %v2168_v21  ;;  %v1198_v36 = vmax.f32 %v1196_v15, %v1197_v28  ;;  %v1203_v52 = vmax.f32 %v1201_v43, %v1202_v63  ;;  %v1354_v13 = vrot.slane %v1353_v2, 4 }
 0x1ae   : > { %v2169_v24 = vpack.c.bf16 %v2309_v47, %v2309_v47  ;;  %v1913_v38 = vsel %vm1839_vm6, %v1912_v35, %v3030_v33  ;;  %v1348_v62 = vmax.f32 %v1346_v4, %v1347_v29  ;;  %v1360_v42 = vsel %vm925_vm2, %v858_v49, -inf }
 0x1af   : > { %v2311_v41 = vpop.eup %2310  ;;  %v1914_v27 = vrot.slane %v1810_v37, 3  ;;  %v1204_v50 = vrot.slane %v1203_v52, 1  ;;  %v1419_v14 = vadd.f32 %v2926_v53, %v1198_v36  ;;  %v1355_v5 = vmax.f32 %v1353_v2, %v1354_v13 }
 0x1b0   : > { %v2170_v8 = vpack.c.bf16 %v2311_v41, %v2311_v41  ;;  %v1811_v44 = vunpack.c.l.b16 %v2169_v24  ;;  %v1349_v59 = vrot.slane %v1348_v62, 2  ;;  %v1361_v60 = vrot.slane %v1360_v42, 4 }
 0x1b1   : > { %v1915_v11 = vsel %vm1842_vm7, %v1914_v27, %v1913_v38  ;;  %v1205_v17 = vmax.f32 %v1203_v52, %v1204_v50  ;;  %2316 = vtanh.f32 %v1419_v14  ;;  %v1356_v20 = vrot.slane %v1355_v5, 2 }
 0x1b2   : > { %v1812_v48 = vunpack.c.l.b16 %v2170_v8  ;;  %v1916_v33 = vrot.slane %v1811_v44, 2  ;;  %v1350_v40 = vmax.f32 %v1348_v62, %v1349_v59  ;;  %v1362_v25 = vmax.f32 %v1360_v42, %v1361_v60 }
 0x1b3   : > { %v3069_v34 = vunpack.c.l.b16 %v2181_v56  ;;  %v1420_v10 = vadd.f32 %v2926_v53, %v1205_v17  ;;  %v1357_v54 = vmax.f32 %v1355_v5, %v1356_v20  ;;  %v1367_v7 = vsel %vm925_vm2, %v860_v26, -inf }
 0x1b4   : > { %v2313_v46 = vpop.eup %2312  ;;  %v1917_v15 = vsel %vm1845_vm8, %v1916_v33, %v1915_v11  ;;  %v1918_v43 = vrot.slane %v1812_v48, 1  ;;  %v1351_v49 = vrot.slane %v1350_v40, 1  ;;  %v1363_v0 = vrot.slane %v1362_v25, 2 }
 0x1b5   : > { %2318 = vtanh.f32 %v1420_v10  ;;  %v2159_v32 = vpack.c.bf16 %v2313_v46, %v2313_v46  ;;  %v1358_v3 = vrot.slane %v1357_v54, 1  ;;  %v1368_v9 = vrot.slane %v1367_v7, 4 }
 0x1b6   : > { %v2315_v58 = vpop.eup %2314  ;;  %v1919_v56 = vsel %vm1848_vm9, %v1918_v43, %v1917_v15  ;;  %v1352_v4 = vmax.f32 %v1350_v40, %v1351_v49  ;;  %v1364_v21 = vmax.f32 %v1362_v25, %v1363_v0  ;;  %v554_v28 = vmul.f32 %v2894_v39, %v526_v55 }
 0x1b7   : > { %v1953_v63 = vpack.c.b16 %v1919_v56, %v1919_v56  ;;  %v2160_v26 = vpack.c.bf16 %v2315_v58, %v2315_v58  ;;  %v1801_v35 = vunpack.c.l.b16 %v2159_v32  ;;  %v1359_v29 = vmax.f32 %v1357_v54, %v1358_v3 }
 0x1b8   : > { %v1365_v2 = vrot.slane %v1364_v21, 1  ;;  %v1369_v47 = vmax.f32 %v1367_v7, %v1368_v9  ;;  %v1441_v37 = vadd.f32 %v2926_v53, %v1352_v4  ;;  %v570_v36 = vadd.f32 %v554_v28, %v2869_v18 }
 0x1b9   : > { %1970 = vst.msk [vmem:[%s2950_s18 + $0x14] sm:$0xf] %vm1964_vm10, %v1953_v63  ;;  %v1897_v52 = vsel %vm1836_vm5, %v1896_v22, %v2802_v16  ;;  %v1802_v13 = vunpack.c.l.b16 %v2160_v26  ;;  %v1898_v24 = vrot.slane %v1801_v35, 4  ;;  %v1442_v39 = vadd.f32 %v2926_v53, %v1359_v29 }
 0x1ba   : > { %v1366_v38 = vmax.f32 %v1364_v21, %v1365_v2  ;;  %v1370_v62 = vrot.slane %v1369_v47, 2  ;;  %2320 = vtanh.f32 %v1441_v37  ;;  %v810_v42 = vcombine.high %v570_v36, %v570_v36 }
 0x1bb   : > { %v2317_v41 = vpop.eup %2316  ;;  %v1899_v27 = vsel %vm1839_vm6, %v1898_v24, %v1897_v52  ;;  %v1900_v50 = vrot.slane %v1802_v13, 3  ;;  %2322 = vtanh.f32 %v1442_v39  ;;  %v817_v18 = vrot.slane %v570_v36, %v2645_v6 }
 0x1bc   : > { %v2161_v14 = vpack.c.bf16 %v2317_v41, %v2317_v41  ;;  %v1371_v5 = vmax.f32 %v1369_v47, %v1370_v62  ;;  %v1443_v51 = vadd.f32 %v2926_v53, %v1366_v38  ;;  %v824_v16 = vrot.slane %v810_v42, %v2645_v6 }
 0x1bd   : > { %v1935_v22 = vsel %vm1830_vm3, %v1934_v23, %v2912_v45  ;;  %v1901_v8 = vsel %vm1842_vm7, %v1900_v50, %v1899_v27  ;;  %v825_v44 = vcombine.high %v817_v18, %v817_v18  ;;  %v1290_v59 = vsel %vm925_vm2, %v817_v18, -inf }
 0x1be   : > { %v1803_v60 = vunpack.c.l.b16 %v2161_v14  ;;  %v1372_v11 = vrot.slane %v1371_v5, 1  ;;  %2324 = vtanh.f32 %v1443_v51  ;;  %v826_v17 = vcombine.high %v824_v16, %v824_v16 }
 0x1bf   : > { %v2319_v20 = vpop.eup %2318  ;;  %v1936_v48 = vrot.slane %v3069_v34, 6  ;;  %v1291_v33 = vrot.slane %v1290_v59, 4  ;;  %v1297_v6 = vsel %vm925_vm2, %v825_v44, -inf  ;;  %v1304_v40 = vsel %vm925_vm2, %v824_v16, -inf }
 0x1c0   : > { %v2162_v12 = vpack.c.bf16 %v2319_v20, %v2319_v20  ;;  %v1902_v25 = vrot.slane %v1803_v60, 2  ;;  %v1373_v45 = vmax.f32 %v1371_v5, %v1372_v11  ;;  %v1298_v23 = vrot.slane %v1297_v6, 4 }
 0x1c1   : > { %v1824_v10 = vunpack.c.l.b16 %v2182_v19  ;;  %v1292_v54 = vmax.f32 %v1290_v59, %v1291_v33  ;;  %v1305_v7 = vrot.slane %v1304_v40, 4  ;;  %v1311_v55 = vsel %vm925_vm2, %v826_v17, -inf }
 0x1c2   : > { %v1804_v46 = vunpack.c.l.b16 %v2162_v12  ;;  %v1903_v34 = vsel %vm1845_vm8, %v1902_v25, %v1901_v8  ;;  %v1444_v15 = vadd.f32 %v2926_v53, %v1373_v45  ;;  %v1299_v43 = vmax.f32 %v1297_v6, %v1298_v23 }
 0x1c3   : > { %2326 = vtanh.f32 %v2833_v30  ;;  %v1293_v49 = vrot.slane %v1292_v54, 2  ;;  %v1306_v0 = vmax.f32 %v1304_v40, %v1305_v7  ;;  %v1312_v32 = vrot.slane %v1311_v55, 4 }
 0x1c4   : > { %v2321_v3 = vpop.eup %2320  ;;  %v1937_v9 = vsel %vm1833_vm4, %v1936_v48, %v1935_v22  ;;  %v1904_v31 = vrot.slane %v1804_v46, 1  ;;  %2328 = vtanh.f32 %v1444_v15  ;;  %v1300_v19 = vrot.slane %v1299_v43, 2 }
 0x1c5   : > { %v2323_v58 = vpop.eup %2322  ;;  %v2183_v56 = vpack.c.bf16 %v2321_v3, %v2321_v3  ;;  %v1294_v4 = vmax.f32 %v1292_v54, %v1293_v49  ;;  %v1307_v21 = vrot.slane %v1306_v0, 2  ;;  %v1313_v28 = vmax.f32 %v1311_v55, %v1312_v32 }
 0x1c6   : > { %v1938_v63 = vrot.slane %v1824_v10, 5  ;;  %v1905_v26 = vsel %vm1848_vm9, %v1904_v31, %v1903_v34  ;;  %v2184_v35 = vpack.c.bf16 %v2323_v58, %v2323_v58  ;;  %v1301_v30 = vmax.f32 %v1299_v43, %v1300_v19 }
 0x1c7   : > { %v1952_v29 = vpack.c.b16 %v1905_v26, %v1905_v26  ;;  %v1825_v2 = vunpack.c.l.b16 %v2183_v56  ;;  %v1295_v47 = vrot.slane %v1294_v4, 1  ;;  %v1308_v37 = vmax.f32 %v1306_v0, %v1307_v21 }
 0x1c8   : > { %v2325_v36 = vpop.eup %2324  ;;  %v2172_v52 = vpack.c.bf16 %v2854_v57, %v2854_v57  ;;  %v1826_v13 = vunpack.c.l.b16 %v2184_v35  ;;  %v1302_v24 = vrot.slane %v1301_v30, 1  ;;  %v1314_v39 = vrot.slane %v1313_v28, 2 }
 0x1c9   : > { %1969 = vst.msk [vmem:[%s2950_s18 + $0x10] sm:$0xf] %vm1964_vm10, %v1952_v29  ;;  %v2185_v38 = vpack.c.bf16 %v2325_v36, %v2325_v36  ;;  %v1940_v62 = vrot.slane %v1825_v2, 4  ;;  %v1296_v42 = vmax.f32 %v1294_v4, %v1295_v47  ;;  %v1309_v41 = vrot.slane %v1308_v37, 1 }
 0x1ca   : > { %v1939_v27 = vsel %vm1836_vm5, %v1938_v63, %v1937_v9  ;;  %v1942_v50 = vrot.slane %v1826_v13, 3  ;;  %v1303_v18 = vmax.f32 %v1301_v30, %v1302_v24  ;;  %v1315_v14 = vmax.f32 %v1313_v28, %v1314_v39 }
 0x1cb   : > { %v1827_v5 = vunpack.c.l.b16 %v2185_v38  ;;  %v1941_v51 = vsel %vm1839_vm6, %v1940_v62, %v1939_v27  ;;  %v1310_v16 = vmax.f32 %v1308_v37, %v1309_v41  ;;  %v1433_v57 = vadd.f32 %v2926_v53, %v1296_v42 }
 0x1cc   : > { %v1943_v22 = vsel %vm1842_vm7, %v1942_v50, %v1941_v51  ;;  %v1316_v8 = vrot.slane %v1315_v14, 1  ;;  %v1434_v44 = vadd.f32 %v2926_v53, %v1303_v18  ;;  %v2173_v20 = vpack.c.bf16 %v2859_v1, %v2859_v1 }
 0x1cd   : > { %v2327_v59 = vpop.eup %2326  ;;  %v1944_v60 = vrot.slane %v1827_v5, 2  ;;  %v1435_v11 = vadd.f32 %v2926_v53, %v1310_v16  ;;  %2330 = vtanh.f32 %v1433_v57  ;;  %v1814_v33 = vunpack.c.l.b16 %v2172_v52 }
 0x1ce   : > { %v2329_v17 = vpop.eup %2328  ;;  %v1317_v48 = vmax.f32 %v1315_v14, %v1316_v8  ;;  %2332 = vtanh.f32 %v1434_v44  ;;  %v2171_v25 = vpack.c.bf16 %v2827_v61, %v2827_v61  ;;  %v2174_v45 = vpack.c.bf16 %v2327_v59, %v2327_v59 }
 0x1cf   : > { %v2186_v6 = vpack.c.bf16 %v2329_v17, %v2329_v17  ;;  %v1945_v40 = vsel %vm1845_vm8, %v1944_v60, %v1943_v22  ;;  %2334 = vtanh.f32 %v1435_v11  ;;  %v1815_v10 = vunpack.c.l.b16 %v2173_v20 }
 0x1d0   : > { %v1436_v12 = vadd.f32 %v2926_v53, %v1317_v48  ;;  %v1920_v54 = vrot.slane %v1814_v33, 7  ;;  %v1813_v1 = vunpack.c.l.b16 %v2171_v25  ;;  %v1816_v55 = vunpack.c.l.b16 %v2174_v45 }
 0x1d1   : > { %v1828_v23 = vunpack.c.l.b16 %v2186_v6  ;;  %v1922_v34 = vrot.slane %v1815_v10, 6 }
 0x1d2   : > { %2336 = vtanh.f32 %v1436_v12  ;;  %v1921_v49 = vsel %vm1830_vm3, %v1920_v54, %v1813_v1  ;;  %v1924_v32 = vrot.slane %v1816_v55, 5 }
 0x1d3   : > { %v1946_v7 = vrot.slane %v1828_v23, 1  ;;  %v1923_v9 = vsel %vm1833_vm4, %v1922_v34, %v1921_v49 }
 0x1d4   : > { %v1925_v28 = vsel %vm1836_vm5, %v1924_v32, %v1923_v9 }
 0x1d5   : > { %v1947_v46 = vsel %vm1848_vm9, %v1946_v7, %v1945_v40 }
 0x1d6   : > { %v1955_v15 = vpack.c.b16 %v1947_v46, %v1947_v46 }
 0x1d7   : > { %v2331_v43 = vpop.eup %2330 }
 0x1d8   : > { %v2333_v53 = vpop.eup %2332  ;;  %1972 = vst.msk [vmem:[%s2950_s18 + $0x1c] sm:$0xf] %vm1964_vm10, %v1955_v15  ;;  %v2175_v0 = vpack.c.bf16 %v2331_v43, %v2331_v43 }
 0x1d9   : > { %v2335_v61 = vpop.eup %2334  ;;  %v2176_v3 = vpack.c.bf16 %v2333_v53, %v2333_v53 }
 0x1da   : > { %v2177_v31 = vpack.c.bf16 %v2335_v61, %v2335_v61  ;;  %v1817_v19 = vunpack.c.l.b16 %v2175_v0 }
 0x1db   : > { %v1818_v58 = vunpack.c.l.b16 %v2176_v3 }
 0x1dc   : > { %v2337_v56 = vpop.eup %2336  ;;  %v1819_v4 = vunpack.c.l.b16 %v2177_v31  ;;  %v1926_v21 = vrot.slane %v1817_v19, 4 }
 0x1dd   : > { %v2178_v63 = vpack.c.bf16 %v2337_v56, %v2337_v56  ;;  %v1928_v26 = vrot.slane %v1818_v58, 3 }
 0x1de   : > { %v1927_v35 = vsel %vm1839_vm6, %v1926_v21, %v1925_v28  ;;  %v1930_v30 = vrot.slane %v1819_v4, 2 }
 0x1df   : > { %v1820_v29 = vunpack.c.l.b16 %v2178_v63  ;;  %v1929_v2 = vsel %vm1842_vm7, %v1928_v26, %v1927_v35 }
 0x1e0   : > { %v1931_v47 = vsel %vm1845_vm8, %v1930_v30, %v1929_v2 }
 0x1e1   : > { %v1932_v37 = vrot.slane %v1820_v29, 1 }
 0x1e3   : > { %v1933_v36 = vsel %vm1848_vm9, %v1932_v37, %v1931_v47 }
 0x1e4   : > { %v1954_v52 = vpack.c.b16 %v1933_v36, %v1933_v36 }
 0x1e6   : > { %1971 = vst.msk [vmem:[%s2950_s18 + $0x18] sm:$0xf] %vm1964_vm10, %v1954_v52 }
 0x1e7 PF: > { %s14_s12 = sadd.s32 1, %s2378_s12  }
 0x1e8   : > { %p11_p2 = scmp.ge.s32.totalorder %s14_s12, 4  }
 0x1ea   :  { %13 = sbr.rel (!%p11_p2) target bundleno = 1 (0x1), region = 67 }
 0x1f1   :  { %1994 = vsyncpa [#allocation3], 1 }
 0x1f2   :  { %1996 = vsyncpa [#allocation3 + $0x1], 1 }

// kernel: cae1d_forward.13
= control target key start
LH: loop header
LB: loop body
LE: loop exit
PB: predicated region body
PF: predicated region fallthrough
CT: control target
= control target key end

     0   :  { %8 = vsyncpa [#allocation3], 0  ;;  %s1313_s12 = smov 0   ;;  %s1596_s0 = inlined_call_operand.vmem [shape: bf16[2,16,128], index: 0, kind: input, shape index: {}]   ;;  %s1597_s1 = inlined_call_operand.vmem [shape: bf16[384,256], index: 1, kind: input, shape index: {}]   ;;  %s1598_s2 = inlined_call_operand.hbm [shape: f32[1,256], index: 2, kind: input, shape index: {}]   ;;  %s1599_s3 = inlined_call_operand.vmem [shape: bf16[2,8,256], index: 3, kind: output, shape index: {}]  }
   0x1 LB: > { %s1319_s13 = sadd.s32 4294967295, %s1288_s12   ;;  %p1042_p0 = scmp.ge.s32.totalorder %s1288_s12, 1  ;;  %s1288_s12 = sphi %s1313_s12, %s14_s12  }
   0x2   : > { %p113_p1 = scmp.lt.s32.totalorder %s1288_s12, 3  ;;  %p1600_p3 = scmp.eq.s32.totalorder %s1319_s13, 0 }
   0x3   : > { %s1290_s15 = smov [#allocation2]   ;;  %s1250_s20 = scalar_lea.hbm %s1598_s2, 32 }
   0x4   : > { %p1323_p2 = pnand %p1042_p0, %p113_p1  ;;  %s129_s16 = sshll.u32 %s1290_s15, 4  ;;  %s130_s16 = int_to_ptr.vmem [resolvable:$true] %s129_s16 }
   0x5   : > { %p1251_p6 = scmp.ne.s32.totalorder %s1598_s2, %s1250_s20  ;;  %p1257_p10 = scmp.lt.u32.totalorder %s1250_s20, %s1598_s2 }
   0x6   : > { %s1602_s14 = scalar_select %p1323_p2, 1, 0 }
   0x7   : > { %p1128_p4 = pneg %p1323_p2 }
   0x9   : > { %p1332_p5 = pnand %p1600_p3, %p1128_p4 }
   0xb   : > { %p1252_p7 = pneg %p1332_p5 }
   0xd   : > { %p1253_p8 = pnand %p1252_p7, %p1251_p6 }
   0xf   : > { %p1254_p9 = pneg %p1253_p8 }
  0x11   : > { %p1259_p11 = pnand %p1257_p10, %p1254_p9 }
  0x13   : > { %1262 = shalt.err (!%p1259_p11)
}
  0x14   : > { %s1263_s25 = scalar_lea.vmem %s130_s16, 32  ;;  %p1271_p1 = scmp.lt.s32.totalorder %s130_s16, %s130_s16 }
  0x15   : > { %p1264_p12 = scmp.ne.s32.totalorder %s130_s16, %s1263_s25  ;;  %p1272_p4 = scmp.lt.s32.totalorder %s1263_s25, %s1263_s25 }
  0x17   : > { %p1266_p13 = pnand %p1264_p12, %p1252_p7  ;;  %p1273_p3 = por %p1272_p4, %p1271_p1 }
  0x19   : > { %p1267_p0 = pneg %p1266_p13 }
  0x1b   : > { %p1274_p2 = pnand %p1273_p3, %p1267_p0 }
  0x1d   : > { %1277 = shalt.err (!%p1274_p2)
}
  0x1e   : > { %1131 = dma.hbm_to_vmem [thread:$0]  (!%p1332_p5), %s1598_s2, 32, %s130_s16, [#allocation3]  }
  0x1f   : > { %p1604_p6 = scmp.ne.s32.totalorder %s1602_s14, 0 }
  0x20   : > { %p1605_p8 = scmp.eq.s32.totalorder (!%p1604_p6), %s1319_s13, 0 }
  0x21   : > { %150 = sbr.rel (%p1604_p6) target bundleno = 400 (0x190), region = 32 }
  0x28   : > { %1283 = dma.done.wait (%p1605_p8), [#allocation3], 32   ;;  %p1606_p7 = pmov %p1605_p8 }
  0x29   : > { %v1291_v0 = vmov 0   ;;  %v1145_v1 = vld [vmem:[%s1597_s1 + $0x4] ss:$8 sps:$4 sm:$0xff]   ;;  %v1147_v2 = vld [vmem:[%s1597_s1] ss:$8 sps:$4 sm:$0xff]   ;;  %p174_p2 = scmp.lt.s32.totalorder %s1319_s13, 1 }
  0x2a   : > { %1285 = vsyncadd (%p1606_p7), [#allocation3], 4294967264  ;;  %575 = vmatprep.mubr.bf16.mxu0 %v1291_v0  ;;  %500 = vmatprep.subr.bf16.mxu1 %v1145_v1  ;;  %v1148_v3 = vld [vmem:[%s1597_s1 + $0x14] ss:$8 sps:$4 sm:$0xff]   ;;  %v1150_v4 = vld [vmem:[%s1597_s1 + $0x10] ss:$8 sps:$4 sm:$0xff]   ;;  %v595_v0 = vlaneseq }
  0x2b   : > { %501 = vmatpush1.bf16.msra.mxu1 %v1147_v2  ;;  %v1151_v5 = vld [vmem:[%s1597_s1 + $0x24] ss:$8 sps:$4 sm:$0xff]   ;;  %v1153_v6 = vld [vmem:[%s1597_s1 + $0x20] ss:$8 sps:$4 sm:$0xff]   ;;  %v1154_v7 = vld [vmem:[%s1597_s1 + $0x34] ss:$8 sps:$4 sm:$0xff]  }
  0x2c   : > { %502 = vmatprep.subr.bf16.mxu1 %v1148_v3  ;;  %v1156_v8 = vld [vmem:[%s1597_s1 + $0x30] ss:$8 sps:$4 sm:$0xff]   ;;  %v1169_v9 = vld [vmem:[%s1597_s1 + $0x104] ss:$8 sps:$4 sm:$0xff]   ;;  %v1171_v10 = vld [vmem:[%s1597_s1 + $0x100] ss:$8 sps:$4 sm:$0xff]  }
  0x2d   : > { %v1157_v11 = vld [vmem:[%s1597_s1 + $0x44] ss:$8 sps:$4 sm:$0xff]   ;;  %543 = vmatprep.subr.bf16.mxu0 %v1169_v9  ;;  %v1175_v12 = vld [vmem:[%s1597_s1 + $0x114] ss:$8 sps:$4 sm:$0xff]   ;;  %v1177_v13 = vld [vmem:[%s1597_s1 + $0x110] ss:$8 sps:$4 sm:$0xff]  }
  0x2e   : > { %544 = vmatpush1.bf16.msra.mxu0 %v1171_v10  ;;  %v1159_v14 = vld [vmem:[%s1597_s1 + $0x40] ss:$8 sps:$4 sm:$0xff]   ;;  %v1160_v15 = vld [vmem:[%s1597_s1 + $0x54] ss:$8 sps:$4 sm:$0xff]   ;;  %v1181_v16 = vld [vmem:[%s1597_s1 + $0x124] ss:$8 sps:$4 sm:$0xff]  }
  0x2f   : > { %503 = vmatpush1.bf16.msra.mxu1 %v1150_v4  ;;  %545 = vmatprep.subr.bf16.mxu0 %v1175_v12  ;;  %v1183_v17 = vld [vmem:[%s1597_s1 + $0x120] ss:$8 sps:$4 sm:$0xff]   ;;  %v1162_v18 = vld [vmem:[%s1597_s1 + $0x50] ss:$8 sps:$4 sm:$0xff]   ;;  %v1187_v19 = vld [vmem:[%s1597_s1 + $0x134] ss:$8 sps:$4 sm:$0xff]  }
  0x30   : > { %504 = vmatprep.subr.bf16.mxu1 %v1151_v5  ;;  %v1163_v20 = vld [vmem:[%s1597_s1 + $0x64] ss:$8 sps:$4 sm:$0xff]   ;;  %v1189_v21 = vld [vmem:[%s1597_s1 + $0x130] ss:$8 sps:$4 sm:$0xff]   ;;  %s1608_s13 = smov (!%p174_p2, %s1319_s13), 1  ;;  %vm207_vm0 = vcmask 1047552  }
  0x31   : > { %v1165_v22 = vld [vmem:[%s1597_s1 + $0x60] ss:$8 sps:$4 sm:$0xff]   ;;  %v1193_v23 = vld [vmem:[%s1597_s1 + $0x144] ss:$8 sps:$4 sm:$0xff]   ;;  %v1166_v24 = vld [vmem:[%s1597_s1 + $0x74] ss:$8 sps:$4 sm:$0xff]  }
  0x32   : > { %546 = vmatpush1.bf16.msra.mxu0 %v1177_v13  ;;  %v1195_v25 = vld [vmem:[%s1597_s1 + $0x140] ss:$8 sps:$4 sm:$0xff]   ;;  %s1110_s28 = sshll.u32 %s1608_s13, 3  ;;  %v1168_v26 = vld [vmem:[%s1597_s1 + $0x70] ss:$8 sps:$4 sm:$0xff]   ;;  %vm200_vm3 = vcmask 1040384  }
  0x33   : > { %505 = vmatpush1.bf16.msra.mxu1 %v1153_v6  ;;  %547 = vmatprep.subr.bf16.mxu0 %v1181_v16  ;;  %v1199_v27 = vld [vmem:[%s1597_s1 + $0x154] ss:$8 sps:$4 sm:$0xff]   ;;  %v1172_v28 = vld [vmem:[%s1597_s1 + $0x84] ss:$8 sps:$4 sm:$0xff]   ;;  %s178_s10 = scalar_lea.vmem %s1596_s0, %s1110_s28  ;;  %v1174_v29 = vld [vmem:[%s1597_s1 + $0x80] ss:$8 sps:$4 sm:$0xff]   ;;  %s183_s5 = scalar_lea.vmem %s1599_s3, %s1110_s28 }
  0x34   : > { %506 = vmatprep.subr.bf16.mxu1 %v1154_v7  ;;  %v1201_v30 = vld [vmem:[%s1597_s1 + $0x150] ss:$8 sps:$4 sm:$0xff]   ;;  %v1178_v31 = vld [vmem:[%s1597_s1 + $0x94] ss:$8 sps:$4 sm:$0xff]   ;;  %v1205_v32 = vld [vmem:[%s1597_s1 + $0x164] ss:$8 sps:$4 sm:$0xff]  }
  0x35   : > { %v1217_v33 = vld [vmem:[%s178_s10] sm:$0xff]   ;;  %v1180_v37 = vld [vmem:[%s1597_s1 + $0x90] ss:$8 sps:$4 sm:$0xff]   ;;  %v1211_v38 = vld [vmem:[%s1597_s1 + $0x174] ss:$8 sps:$4 sm:$0xff]   ;;  %v596_v2 = vshrl.u32 %v595_v0, 7 }
  0x36   : > { %548 = vmatpush1.bf16.msra.mxu0 %v1183_v17  ;;  %v1207_v34 = vld [vmem:[%s1597_s1 + $0x160] ss:$8 sps:$4 sm:$0xff]   ;;  %v193_v35 = vshrl.u32 %v1217_v33, 16  ;;  %v196_v36 = vshll.u32 %v1217_v33, 16  ;;  %532 = vmatprep.mubr.bf16.mxu1 %v1217_v33  ;;  %v1184_v39 = vld [vmem:[%s1597_s1 + $0xa4] ss:$8 sps:$4 sm:$0xff]  }
  0x37   : > { %507 = vmatpush1.bf16.msra.mxu1 %v1156_v8  ;;  %549 = vmatprep.subr.bf16.mxu0 %v1187_v19  ;;  %vm208_vm1 = vsmask.f32 7424  ;;  %v1213_v41 = vld [vmem:[%s1597_s1 + $0x170] ss:$8 sps:$4 sm:$0xff]   ;;  %v1186_v43 = vld [vmem:[%s1597_s1 + $0xa0] ss:$8 sps:$4 sm:$0xff]  }
  0x38   : > { %508 = vmatprep.subr.bf16.mxu1 %v1157_v11  ;;  %v204_v40 = vrot.slane %v196_v36, 1  ;;  %vm209_vm2 = vmand %vm207_vm0, %vm208_vm1  ;;  %v1190_v44 = vld [vmem:[%s1597_s1 + $0xb4] ss:$8 sps:$4 sm:$0xff]   ;;  %v1192_v46 = vld [vmem:[%s1597_s1 + $0xb0] ss:$8 sps:$4 sm:$0xff]   ;;  %v195_v53 = vrot.slane %v193_v35, 7 }
  0x39   : > { %v1196_v47 = vld [vmem:[%s1597_s1 + $0xc4] ss:$8 sps:$4 sm:$0xff]   ;;  %v1198_v48 = vld [vmem:[%s1597_s1 + $0xc0] ss:$8 sps:$4 sm:$0xff]   ;;  %v1202_v49 = vld [vmem:[%s1597_s1 + $0xd4] ss:$8 sps:$4 sm:$0xff]  }
  0x3a   : > { %550 = vmatpush1.bf16.msra.mxu0 %v1189_v21  ;;  %v205_v42 = vor.u32 %v204_v40, %v193_v35  ;;  %v1204_v50 = vld [vmem:[%s1597_s1 + $0xd0] ss:$8 sps:$4 sm:$0xff]   ;;  %v1208_v51 = vld [vmem:[%s1597_s1 + $0xe4] ss:$8 sps:$4 sm:$0xff]   ;;  %v1210_v52 = vld [vmem:[%s1597_s1 + $0xe0] ss:$8 sps:$4 sm:$0xff]   ;;  %v198_v56 = vor.u32 %v196_v36, %v195_v53 }
  0x3b   : > { %509 = vmatpush1.bf16.msra.mxu1 %v1159_v14  ;;  %551 = vmatprep.subr.bf16.mxu0 %v1193_v23  ;;  %v1214_v54 = vld [vmem:[%s1597_s1 + $0xf4] ss:$8 sps:$4 sm:$0xff]   ;;  %vm201_vm4 = vsmask.f32 256  ;;  %v1216_v55 = vld [vmem:[%s1597_s1 + $0xf0] ss:$8 sps:$4 sm:$0xff]  }
  0x3c   : > { %510 = vmatprep.subr.bf16.mxu1 %v1160_v15  ;;  %v210_v45 = vsel %vm209_vm2, %v205_v42, 0  ;;  %vm202_vm5 = vmand %vm200_vm3, %vm201_vm4  ;;  %v1292_v62 = vmov 1983009808   ;;  %v823_v14 = vsub.s32 0, %v596_v2  ;;  %v827_v15 = vsub.s32 1, %v596_v2 }
  0x3d   : > { %v203_v57 = vsel %vm202_vm5, 0, %v198_v56  ;;  %v593_v63 = vunpack.c.l.s4 %v1292_v62  ;;  %vm706_vm6 = vcmask 1041408   ;;  %vm936_vm7 = vcmask 1041409  }
  0x3e   : > { %552 = vmatpush1.bf16.msra.mxu0 %v1195_v25  ;;  %vm939_vm8 = vcmask 1042434   ;;  %vm942_vm9 = vcmask 1043459   ;;  %vm945_vm10 = vcmask 1044484   ;;  %vm948_vm11 = vcmask 1045509  }
  0x3f   : > { %511 = vmatpush1.bf16.msra.mxu1 %v1162_v18  ;;  %553 = vmatprep.subr.bf16.mxu0 %v1199_v27  ;;  %v594_v1 = vunpack.c.0.s8 %v593_v63  ;;  %v819_v18 = vld [vmem:[#allocation2] sm:$0x3]  ;;  %vm951_vm12 = vcmask 1046534   ;;  %vm954_vm13 = vcmask 1047559  }
  0x40   : > { %512 = vmatprep.subr.bf16.mxu1 %v1163_v20  ;;  %v1518_v25 = vrot.slane %v819_v18, %v823_v14 }
  0x41   : > { %v1512_v7 = vsub.s32 %v594_v1, %v596_v2 }
  0x42   : > { %554 = vmatpush1.bf16.msra.mxu0 %v1201_v30 }
  0x43   : > { %513 = vmatpush1.bf16.msra.mxu1 %v1165_v22  ;;  %555 = vmatprep.subr.bf16.mxu0 %v1205_v32 }
  0x44   : > { %514 = vmatprep.subr.bf16.mxu1 %v1166_v24 }
  0x46   : > { %556 = vmatpush1.bf16.msra.mxu0 %v1207_v34 }
  0x47   : > { %515 = vmatpush1.bf16.msra.mxu1 %v1168_v26  ;;  %557 = vmatprep.subr.bf16.mxu0 %v1211_v38  ;;  %v1520_v26 = vrot.slane %v819_v18, %v827_v15 }
  0x48   : > { %516 = vmatprep.subr.bf16.mxu1 %v1172_v28 }
  0x4a   : > { %558 = vmatpush1.bf16.msra.mxu0 %v1213_v41 }
  0x4b   : > { %517 = vmatpush1.bf16.msra.mxu1 %v1174_v29 }
  0x4c   : > { %518 = vmatprep.subr.bf16.mxu1 %v1178_v31 }
  0x4d   : > { %576 = vmatmul.mubr.bf16.vlgmr.msra.gmra.mrb[0].mxu0 %v210_v45 }
  0x4f   : > { %519 = vmatpush1.bf16.msra.mxu1 %v1180_v37 }
  0x50   : > { %520 = vmatprep.subr.bf16.mxu1 %v1184_v39 }
  0x53   : > { %521 = vmatpush1.bf16.msra.mxu1 %v1186_v43 }
  0x54   : > { %522 = vmatprep.subr.bf16.mxu1 %v1190_v44 }
  0x57   : > { %523 = vmatpush1.bf16.msra.mxu1 %v1192_v46 }
  0x58   : > { %524 = vmatprep.subr.bf16.mxu1 %v1196_v47 }
  0x5b   : > { %525 = vmatpush1.bf16.msra.mxu1 %v1198_v48 }
  0x5c   : > { %526 = vmatprep.subr.bf16.mxu1 %v1202_v49 }
  0x5f   : > { %527 = vmatpush1.bf16.msra.mxu1 %v1204_v50 }
  0x60   : > { %528 = vmatprep.subr.bf16.mxu1 %v1208_v51 }
  0x63   : > { %529 = vmatpush1.bf16.msra.mxu1 %v1210_v52 }
  0x64   : > { %530 = vmatprep.subr.bf16.mxu1 %v1214_v54 }
  0x67   : > { %531 = vmatpush1.bf16.msra.mxu1 %v1216_v55 }
  0x6a   : > { %533 = vmatmul.mubr.bf16.vlgmr.msra.gmra.mrb[0].mxu1 %v203_v57 }
 0x120   : > { %v577_v58 = vpop.f32.mrb[0].mxu0 }
 0x121   : > { %v579_v59 = vpop.f32.mrb[1].mxu0 }
 0x122   : > { %v581_v60 = vpop.f32.mrb[2].mxu0 }
 0x123   : > { %v583_v61 = vpop.f32.mrb[3].mxu0 }
 0x13d   : > { %v534_v3 = vpop.f32.mrb[0].mxu1 }
 0x13e   : > { %v578_v4 = vadd.f32 %v577_v58, %v534_v3  ;;  %v536_v5 = vpop.f32.mrb[1].mxu1 }
 0x13f   : > { %v580_v6 = vadd.f32 %v579_v59, %v536_v5  ;;  %v538_v8 = vpop.f32.mrb[2].mxu1 }
 0x140   : > { %v582_v9 = vadd.f32 %v581_v60, %v538_v8  ;;  %v540_v10 = vpop.f32.mrb[3].mxu1 }
 0x141   : > { %v590_v11 = vcombine.low %v578_v4, %v580_v6  ;;  %v591_v12 = vcombine.high %v578_v4, %v580_v6  ;;  %v584_v13 = vadd.f32 %v583_v61, %v540_v10 }
 0x143   : > { %v598_v16 = vrot.slane %v590_v11, %v1512_v7  ;;  %v605_v17 = vrot.slane %v591_v12, %v1512_v7  ;;  %v608_v19 = vcombine.low %v582_v9, %v584_v13  ;;  %v609_v20 = vcombine.high %v582_v9, %v584_v13 }
 0x145   : > { %v606_v21 = vcombine.high %v598_v16, %v598_v16  ;;  %v607_v22 = vcombine.high %v605_v17, %v605_v17  ;;  %v632_v23 = vrot.slane %v598_v16, %v1512_v7  ;;  %v648_v24 = vrot.slane %v605_v17, %v1512_v7 }
 0x146   : > { %v1523_v27 = vrot.slane %v608_v19, %v1512_v7  ;;  %v1526_v28 = vrot.slane %v609_v20, %v1512_v7 }
 0x147   : > { %v633_v29 = vcombine.high %v632_v23, %v632_v23  ;;  %v640_v30 = vrot.slane %v606_v21, %v1512_v7  ;;  %v649_v31 = vcombine.high %v648_v24, %v648_v24  ;;  %v656_v32 = vrot.slane %v607_v22, %v1512_v7 }
 0x148   : > { %v707_v33 = vsel %vm706_vm6, %v632_v23, -inf  ;;  %v735_v34 = vsel %vm706_vm6, %v648_v24, -inf  ;;  %v624_v35 = vcombine.high %v1523_v27, %v1523_v27  ;;  %v625_v36 = vcombine.high %v1526_v28, %v1526_v28 }
 0x149   : > { %v641_v37 = vcombine.high %v640_v30, %v640_v30  ;;  %v657_v38 = vcombine.high %v656_v32, %v656_v32  ;;  %v708_v39 = vrot.slane %v707_v33, 4  ;;  %v714_v40 = vsel %vm706_vm6, %v633_v29, -inf }
 0x14a   : > { %v715_v41 = vrot.slane %v714_v40, 4  ;;  %v721_v42 = vsel %vm706_vm6, %v640_v30, -inf  ;;  %v736_v43 = vrot.slane %v735_v34, 4  ;;  %v742_v44 = vsel %vm706_vm6, %v649_v31, -inf }
 0x14b   : > { %v709_v45 = vmax.f32 %v707_v33, %v708_v39  ;;  %v722_v46 = vrot.slane %v721_v42, 4  ;;  %v728_v47 = vsel %vm706_vm6, %v641_v37, -inf  ;;  %v743_v48 = vrot.slane %v742_v44, 4 }
 0x14c   : > { %v716_v49 = vmax.f32 %v714_v40, %v715_v41  ;;  %v729_v50 = vrot.slane %v728_v47, 4  ;;  %v737_v51 = vmax.f32 %v735_v34, %v736_v43  ;;  %v749_v52 = vsel %vm706_vm6, %v656_v32, -inf }
 0x14d   : > { %v710_v53 = vrot.slane %v709_v45, 2  ;;  %v723_v54 = vmax.f32 %v721_v42, %v722_v46  ;;  %v744_v55 = vmax.f32 %v742_v44, %v743_v48  ;;  %v750_v56 = vrot.slane %v749_v52, 4 }
 0x14e   : > { %v717_v57 = vrot.slane %v716_v49, 2  ;;  %v730_v58 = vmax.f32 %v728_v47, %v729_v50  ;;  %v738_v59 = vrot.slane %v737_v51, 2  ;;  %v756_v60 = vsel %vm706_vm6, %v657_v38, -inf }
 0x14f   : > { %v711_v61 = vmax.f32 %v709_v45, %v710_v53  ;;  %v724_v62 = vrot.slane %v723_v54, 2  ;;  %v745_v63 = vrot.slane %v744_v55, 2  ;;  %v751_v0 = vmax.f32 %v749_v52, %v750_v56 }
 0x150   : > { %v718_v1 = vmax.f32 %v716_v49, %v717_v57  ;;  %v731_v2 = vrot.slane %v730_v58, 2  ;;  %v739_v3 = vmax.f32 %v737_v51, %v738_v59  ;;  %v757_v4 = vrot.slane %v756_v60, 4 }
 0x151   : > { %v712_v5 = vrot.slane %v711_v61, 1  ;;  %v725_v6 = vmax.f32 %v723_v54, %v724_v62  ;;  %v746_v8 = vmax.f32 %v744_v55, %v745_v63  ;;  %v752_v9 = vrot.slane %v751_v0, 2 }
 0x152   : > { %v719_v10 = vrot.slane %v718_v1, 1  ;;  %v732_v11 = vmax.f32 %v730_v58, %v731_v2  ;;  %v740_v12 = vrot.slane %v739_v3, 1  ;;  %v758_v13 = vmax.f32 %v756_v60, %v757_v4 }
 0x153   : > { %v713_v14 = vmax.f32 %v711_v61, %v712_v5  ;;  %v726_v15 = vrot.slane %v725_v6, 1  ;;  %v747_v16 = vrot.slane %v746_v8, 1  ;;  %v753_v17 = vmax.f32 %v751_v0, %v752_v9 }
 0x154   : > { %v720_v18 = vmax.f32 %v718_v1, %v719_v10  ;;  %v733_v19 = vrot.slane %v732_v11, 1  ;;  %v741_v20 = vmax.f32 %v739_v3, %v740_v12  ;;  %v759_v21 = vrot.slane %v758_v13, 2 }
 0x155   : > { %v727_v22 = vmax.f32 %v725_v6, %v726_v15  ;;  %v748_v23 = vmax.f32 %v746_v8, %v747_v16  ;;  %v754_v24 = vrot.slane %v753_v17, 1  ;;  %v831_v29 = vadd.f32 %v1518_v25, %v713_v14 }
 0x156   : > { %v734_v30 = vmax.f32 %v732_v11, %v733_v19  ;;  %v760_v31 = vmax.f32 %v758_v13, %v759_v21  ;;  %v832_v32 = vadd.f32 %v1520_v26, %v720_v18  ;;  %v835_v33 = vadd.f32 %v1518_v25, %v741_v20 }
 0x157   : > { %v755_v34 = vmax.f32 %v753_v17, %v754_v24  ;;  %v833_v37 = vadd.f32 %v1518_v25, %v727_v22  ;;  %v836_v38 = vadd.f32 %v1520_v26, %v748_v23  ;;  %1218 = vtanh.f32 %v831_v29 }
 0x158   : > { %v761_v39 = vrot.slane %v760_v31, 1  ;;  %v834_v40 = vadd.f32 %v1520_v26, %v734_v30  ;;  %1220 = vtanh.f32 %v832_v32  ;;  %v664_v41 = vrot.slane %v1523_v27, %v1512_v7 }
 0x159   : > { %v837_v42 = vadd.f32 %v1518_v25, %v755_v34  ;;  %1222 = vtanh.f32 %v833_v37  ;;  %v672_v43 = vrot.slane %v624_v35, %v1512_v7  ;;  %v680_v44 = vrot.slane %v1526_v28, %v1512_v7 }
 0x15a   : > { %v762_v45 = vmax.f32 %v760_v31, %v761_v39  ;;  %1224 = vtanh.f32 %v834_v40  ;;  %v665_v46 = vcombine.high %v664_v41, %v664_v41  ;;  %v688_v47 = vrot.slane %v625_v36, %v1512_v7 }
 0x15b   : > { %1226 = vtanh.f32 %v835_v33  ;;  %v673_v48 = vcombine.high %v672_v43, %v672_v43  ;;  %v681_v49 = vcombine.high %v680_v44, %v680_v44  ;;  %v763_v50 = vsel %vm706_vm6, %v664_v41, -inf }
 0x15c   : > { %v838_v51 = vadd.f32 %v1520_v26, %v762_v45  ;;  %1228 = vtanh.f32 %v836_v38  ;;  %v689_v27 = vcombine.high %v688_v47, %v688_v47  ;;  %v764_v35 = vrot.slane %v763_v50, 4 }
 0x15d   : > { %1230 = vtanh.f32 %v837_v42  ;;  %v770_v52 = vsel %vm706_vm6, %v665_v46, -inf  ;;  %v777_v53 = vsel %vm706_vm6, %v672_v43, -inf  ;;  %v784_v54 = vsel %vm706_vm6, %v673_v48, -inf }
 0x15e   : > { %1232 = vtanh.f32 %v838_v51  ;;  %v765_v28 = vmax.f32 %v763_v50, %v764_v35  ;;  %v771_v7 = vrot.slane %v770_v52, 4  ;;  %v778_v36 = vrot.slane %v777_v53, 4 }
 0x15f   : > { %v785_v55 = vrot.slane %v784_v54, 4  ;;  %v791_v56 = vsel %vm706_vm6, %v680_v44, -inf  ;;  %v798_v57 = vsel %vm706_vm6, %v681_v49, -inf  ;;  %v805_v58 = vsel %vm706_vm6, %v688_v47, -inf }
 0x160   : > { %v766_v59 = vrot.slane %v765_v28, 2  ;;  %v772_v60 = vmax.f32 %v770_v52, %v771_v7  ;;  %v779_v61 = vmax.f32 %v777_v53, %v778_v36  ;;  %v792_v62 = vrot.slane %v791_v56, 4 }
 0x161   : > { %v1219_v63 = vpop.eup %1218  ;;  %v786_v0 = vmax.f32 %v784_v54, %v785_v55  ;;  %v799_v1 = vrot.slane %v798_v57, 4  ;;  %v806_v2 = vrot.slane %v805_v58, 4  ;;  %v1570_v3 = vsel %vm706_vm6, %v689_v27, -inf }
 0x162   : > { %v1221_v4 = vpop.eup %1220  ;;  %v767_v5 = vmax.f32 %v765_v28, %v766_v59  ;;  %v773_v6 = vrot.slane %v772_v60, 2  ;;  %v780_v8 = vrot.slane %v779_v61, 2  ;;  %v793_v9 = vmax.f32 %v791_v56, %v792_v62 }
 0x163   : > { %v1223_v10 = vpop.eup %1222  ;;  %v1112_v11 = vpack.c.bf16 %v1221_v4, %v1219_v63  ;;  %v787_v12 = vrot.slane %v786_v0, 2  ;;  %v800_v13 = vmax.f32 %v798_v57, %v799_v1  ;;  %v807_v14 = vmax.f32 %v805_v58, %v806_v2 }
 0x164   : > { %v1225_v15 = vpop.eup %1224  ;;  %v768_v16 = vrot.slane %v767_v5, 1  ;;  %v774_v17 = vmax.f32 %v772_v60, %v773_v6  ;;  %v781_v18 = vmax.f32 %v779_v61, %v780_v8  ;;  %v794_v19 = vrot.slane %v793_v9, 2 }
 0x165   : > { %v1227_v20 = vpop.eup %1226  ;;  %v1113_v21 = vpack.c.bf16 %v1225_v15, %v1223_v10  ;;  %v919_v22 = vunpack.c.l.b16 %v1112_v11  ;;  %v920_v23 = vunpack.c.h.b16 %v1112_v11  ;;  %v788_v24 = vmax.f32 %v786_v0, %v787_v12 }
 0x166   : > { %v1229_v29 = vpop.eup %1228  ;;  %v769_v30 = vmax.f32 %v767_v5, %v768_v16  ;;  %v775_v31 = vrot.slane %v774_v17, 1  ;;  %v782_v32 = vrot.slane %v781_v18, 1  ;;  %v795_v33 = vmax.f32 %v793_v9, %v794_v19 }
 0x167   : > { %v1231_v34 = vpop.eup %1230  ;;  %v1114_v37 = vpack.c.bf16 %v1229_v29, %v1227_v20  ;;  %v921_v38 = vunpack.c.l.b16 %v1113_v21  ;;  %v922_v39 = vunpack.c.h.b16 %v1113_v21  ;;  %v789_v40 = vrot.slane %v788_v24, 1 }
 0x168   : > { %v1233_v41 = vpop.eup %1232  ;;  %v776_v42 = vmax.f32 %v774_v17, %v775_v31  ;;  %v783_v43 = vmax.f32 %v781_v18, %v782_v32  ;;  %v796_v44 = vrot.slane %v795_v33, 1  ;;  %v801_v45 = vrot.slane %v800_v13, 2 }
 0x169   : > { %v1115_v46 = vpack.c.bf16 %v1233_v41, %v1231_v34  ;;  %v923_v47 = vunpack.c.l.b16 %v1114_v37  ;;  %v924_v48 = vunpack.c.h.b16 %v1114_v37  ;;  %v935_v49 = vrot.slane %v921_v38, 7 }
 0x16a   : > { %v956_v50 = vrot.slane %v922_v39, 7  ;;  %v790_v51 = vmax.f32 %v788_v24, %v789_v40  ;;  %v797_v27 = vmax.f32 %v795_v33, %v796_v44  ;;  %v802_v35 = vmax.f32 %v800_v13, %v801_v45 }
 0x16b   : > { %v925_v52 = vunpack.c.l.b16 %v1115_v46  ;;  %v926_v53 = vunpack.c.h.b16 %v1115_v46  ;;  %v937_v54 = vsel %vm936_vm7, %v935_v49, %v919_v22  ;;  %v938_v28 = vrot.slane %v923_v47, 6 }
 0x16c   : > { %v957_v7 = vsel %vm936_vm7, %v956_v50, %v920_v23  ;;  %v958_v36 = vrot.slane %v924_v48, 6  ;;  %v803_v55 = vrot.slane %v802_v35, 1  ;;  %v808_v56 = vrot.slane %v807_v14, 2 }
 0x16d   : > { %v940_v57 = vsel %vm939_vm8, %v938_v28, %v937_v54  ;;  %v941_v58 = vrot.slane %v925_v52, 5  ;;  %v960_v59 = vrot.slane %v926_v53, 5  ;;  %v813_v60 = vrot.slane %v1570_v3, 4 }
 0x16e   : > { %v959_v61 = vsel %vm939_vm8, %v958_v36, %v957_v7  ;;  %v804_v62 = vmax.f32 %v802_v35, %v803_v55  ;;  %v809_v63 = vmax.f32 %v807_v14, %v808_v56  ;;  %v839_v0 = vadd.f32 %v1518_v25, %v769_v30 }
 0x16f   : > { %v943_v1 = vsel %vm942_vm9, %v941_v58, %v940_v57  ;;  %v961_v2 = vsel %vm942_vm9, %v960_v59, %v959_v61  ;;  %v814_v4 = vmax.f32 %v1570_v3, %v813_v60  ;;  %v840_v5 = vadd.f32 %v1520_v26, %v776_v42 }
 0x170   : > { %v810_v6 = vrot.slane %v809_v63, 1  ;;  %v841_v8 = vadd.f32 %v1518_v25, %v783_v43  ;;  %v842_v9 = vadd.f32 %v1520_v26, %v790_v51  ;;  %v843_v11 = vadd.f32 %v1518_v25, %v797_v27 }
 0x171   : > { %v815_v10 = vrot.slane %v814_v4, 2  ;;  %1234 = vtanh.f32 %v839_v0  ;;  %v844_v13 = vadd.f32 %v1520_v26, %v804_v62 }
 0x172   : > { %v811_v12 = vmax.f32 %v809_v63, %v810_v6  ;;  %1236 = vtanh.f32 %v840_v5 }
 0x173   : > { %v816_v14 = vmax.f32 %v814_v4, %v815_v10  ;;  %1238 = vtanh.f32 %v841_v8 }
 0x174   : > { %1240 = vtanh.f32 %v842_v9  ;;  %v845_v3 = vadd.f32 %v1518_v25, %v811_v12 }
 0x175   : > { %v817_v15 = vrot.slane %v816_v14, 1  ;;  %1242 = vtanh.f32 %v843_v11 }
 0x176   : > { %1244 = vtanh.f32 %v844_v13 }
 0x177   : > { %v818_v16 = vmax.f32 %v816_v14, %v817_v15  ;;  %1246 = vtanh.f32 %v845_v3 }
 0x179   : > { %v846_v17 = vadd.f32 %v1520_v26, %v818_v16 }
 0x17b   : > { %v1235_v18 = vpop.eup %1234  ;;  %1248 = vtanh.f32 %v846_v17 }
 0x17c   : > { %v1237_v19 = vpop.eup %1236 }
 0x17d   : > { %v1239_v20 = vpop.eup %1238  ;;  %v1116_v21 = vpack.c.bf16 %v1237_v19, %v1235_v18 }
 0x17e   : > { %v1241_v22 = vpop.eup %1240 }
 0x17f   : > { %v1243_v23 = vpop.eup %1242  ;;  %v1117_v24 = vpack.c.bf16 %v1241_v22, %v1239_v20  ;;  %v927_v29 = vunpack.c.l.b16 %v1116_v21  ;;  %v928_v30 = vunpack.c.h.b16 %v1116_v21 }
 0x180   : > { %v1245_v31 = vpop.eup %1244 }
 0x181   : > { %v1118_v32 = vpack.c.bf16 %v1245_v31, %v1243_v23  ;;  %v929_v33 = vunpack.c.l.b16 %v1117_v24  ;;  %v930_v25 = vunpack.c.h.b16 %v1117_v24  ;;  %v944_v34 = vrot.slane %v927_v29, 4  ;;  %v1247_v41 = vpop.eup %1246 }
 0x182   : > { %v962_v37 = vrot.slane %v928_v30, 4 }
 0x183   : > { %v931_v26 = vunpack.c.l.b16 %v1118_v32  ;;  %v932_v38 = vunpack.c.h.b16 %v1118_v32  ;;  %v946_v39 = vsel %vm945_vm10, %v944_v34, %v943_v1  ;;  %v947_v40 = vrot.slane %v929_v33, 3 }
 0x184   : > { %v963_v42 = vsel %vm945_vm10, %v962_v37, %v961_v2  ;;  %v964_v43 = vrot.slane %v930_v25, 3 }
 0x185   : > { %v1249_v44 = vpop.eup %1248  ;;  %v949_v45 = vsel %vm948_vm11, %v947_v40, %v946_v39  ;;  %v950_v46 = vrot.slane %v931_v26, 2  ;;  %v966_v47 = vrot.slane %v932_v38, 2 }
 0x186   : > { %v1119_v48 = vpack.c.bf16 %v1249_v44, %v1247_v41  ;;  %v965_v49 = vsel %vm948_vm11, %v964_v43, %v963_v42 }
 0x187   : > { %v952_v50 = vsel %vm951_vm12, %v950_v46, %v949_v45  ;;  %v967_v51 = vsel %vm951_vm12, %v966_v47, %v965_v49 }
 0x188   : > { %v933_v27 = vunpack.c.l.b16 %v1119_v48  ;;  %v934_v35 = vunpack.c.h.b16 %v1119_v48 }
 0x18a   : > { %v953_v52 = vrot.slane %v933_v27, 1  ;;  %v968_v53 = vrot.slane %v934_v35, 1 }
 0x18c   : > { %v955_v54 = vsel %vm954_vm13, %v953_v52, %v952_v50  ;;  %v969_v28 = vsel %vm954_vm13, %v968_v53, %v967_v51 }
 0x18d   : > { %v970_v7 = vpack.c.b16 %v969_v28, %v955_v54 }
 0x18f   : > { %972 = vst [vmem:[%s183_s5] sm:$0xff] %v970_v7 }
 0x190 PF: > { %s14_s12 = sadd.s32 1, %s1288_s12  }
 0x191   : > { %p11_p3 = scmp.ge.s32.totalorder %s14_s12, 4  }
 0x193   :  { %13 = sbr.rel (!%p11_p3) target bundleno = 1 (0x1), region = 67 }
 0x19a   :  { %994 = vsyncpa [#allocation3], 1 }
 0x19b   :  { %996 = vsyncpa [#allocation3 + $0x1], 1 }

// kernel: cae1d_forward.14
= control target key start
LH: loop header
LB: loop body
LE: loop exit
PB: predicated region body
PF: predicated region fallthrough
CT: control target
= control target key end

     0   :  { %s2777_s12 = smov 0   ;;  %s3510_s0 = inlined_call_operand.vmem [shape: bf16[2,8,256], index: 0, kind: input, shape index: {}]   ;;  %s3511_s1 = inlined_call_operand.vmem [shape: bf16[768,512], index: 1, kind: input, shape index: {}]   ;;  %s3512_s2 = inlined_call_operand.vmem [shape: f32[1,512], index: 2, kind: input, shape index: {}]   ;;  %s3513_s3 = inlined_call_operand.vmem [shape: bf16[2,4,512], index: 3, kind: output, shape index: {}]  }
   0x1 LB: > { %s2178_s13 = sadd.s32 4294967295, %s2754_s12   ;;  %p2182_p0 = scmp.ge.s32.totalorder %s2754_s12, 1  ;;  %s2754_s12 = sphi %s2777_s12, %s13_s12  }
   0x2   : > { %p137_p1 = scmp.lt.s32.totalorder %s2754_s12, 3 }
   0x4   : > { %p138_p2 = pnand %p2182_p0, %p137_p1 }
   0x5   : > { %v2426_v0 = vld [vmem:[%s3511_s1 + $0x4] ss:$16 sps:$4 sm:$0xff] (!%p138_p2)   ;;  %v2428_v1 = vld [vmem:[%s3511_s1 + $0xc] ss:$16 sps:$4 sm:$0xff] (!%p138_p2)   ;;  %v2430_v2 = vld [vmem:[%s3511_s1] ss:$16 sps:$4 sm:$0xff] (!%p138_p2)  }
   0x6   : > { %141 = sbr.rel (%p138_p2) target bundleno = 493 (0x1ed), region = 32  ;;  %1364 = vmatprep.subr.bf16.mxu0 (!%p138_p2), %v2426_v0  ;;  %v2431_v3 = vld [vmem:[%s3511_s1 + $0x8] ss:$16 sps:$4 sm:$0xff] (!%p138_p2)   ;;  %1487 = vmatprep.subr.bf16.mxu1 (!%p138_p2), %v2428_v1  ;;  %v2432_v4 = vld [vmem:[%s3511_s1 + $0x24] ss:$16 sps:$4 sm:$0xff] (!%p138_p2)   ;;  %p161_p3 = scmp.lt.s32.totalorder (!%p138_p2), %s2178_s13, 1 }
   0x7   : > { %1365 = vmatpush1.bf16.msra.mxu0 (!%p138_p2), %v2430_v2  ;;  %1488 = vmatpush1.bf16.msra.mxu1 (!%p138_p2), %v2431_v3  ;;  %v2434_v5 = vld [vmem:[%s3511_s1 + $0x2c] ss:$16 sps:$4 sm:$0xff] (!%p138_p2)   ;;  %v2436_v6 = vld [vmem:[%s3511_s1 + $0x20] ss:$16 sps:$4 sm:$0xff] (!%p138_p2)   ;;  %v2437_v7 = vld [vmem:[%s3511_s1 + $0x28] ss:$16 sps:$4 sm:$0xff] (!%p138_p2)  }
   0x8   : > { %1366 = vmatprep.subr.bf16.mxu0 (!%p138_p2), %v2432_v4  ;;  %1489 = vmatprep.subr.bf16.mxu1 (!%p138_p2), %v2434_v5  ;;  %v2438_v8 = vld [vmem:[%s3511_s1 + $0x44] ss:$16 sps:$4 sm:$0xff] (!%p138_p2)   ;;  %v2440_v9 = vld [vmem:[%s3511_s1 + $0x4c] ss:$16 sps:$4 sm:$0xff] (!%p138_p2)   ;;  %v2442_v10 = vld [vmem:[%s3511_s1 + $0x40] ss:$16 sps:$4 sm:$0xff] (!%p138_p2)  }
   0x9   : > { %v2443_v11 = vld [vmem:[%s3511_s1 + $0x48] ss:$16 sps:$4 sm:$0xff] (!%p138_p2)   ;;  %v2444_v12 = vld [vmem:[%s3511_s1 + $0x64] ss:$16 sps:$4 sm:$0xff] (!%p138_p2)   ;;  %v2446_v13 = vld [vmem:[%s3511_s1 + $0x6c] ss:$16 sps:$4 sm:$0xff] (!%p138_p2)  }
   0xa   : > { %v2448_v14 = vld [vmem:[%s3511_s1 + $0x60] ss:$16 sps:$4 sm:$0xff] (!%p138_p2)   ;;  %v2449_v15 = vld [vmem:[%s3511_s1 + $0x68] ss:$16 sps:$4 sm:$0xff] (!%p138_p2)   ;;  %v2450_v16 = vld [vmem:[%s3511_s1 + $0x84] ss:$16 sps:$4 sm:$0xff] (!%p138_p2)  }
   0xb   : > { %1367 = vmatpush1.bf16.msra.mxu0 (!%p138_p2), %v2436_v6  ;;  %1490 = vmatpush1.bf16.msra.mxu1 (!%p138_p2), %v2437_v7  ;;  %v2452_v17 = vld [vmem:[%s3511_s1 + $0x8c] ss:$16 sps:$4 sm:$0xff] (!%p138_p2)   ;;  %v2454_v18 = vld [vmem:[%s3511_s1 + $0x80] ss:$16 sps:$4 sm:$0xff] (!%p138_p2)   ;;  %v2455_v19 = vld [vmem:[%s3511_s1 + $0x88] ss:$16 sps:$4 sm:$0xff] (!%p138_p2)  }
   0xc   : > { %1368 = vmatprep.subr.bf16.mxu0 (!%p138_p2), %v2438_v8  ;;  %1491 = vmatprep.subr.bf16.mxu1 (!%p138_p2), %v2440_v9  ;;  %v2456_v20 = vld [vmem:[%s3511_s1 + $0xa4] ss:$16 sps:$4 sm:$0xff] (!%p138_p2)   ;;  %v2458_v21 = vld [vmem:[%s3511_s1 + $0xac] ss:$16 sps:$4 sm:$0xff] (!%p138_p2)   ;;  %v2460_v22 = vld [vmem:[%s3511_s1 + $0xa0] ss:$16 sps:$4 sm:$0xff] (!%p138_p2)  }
   0xd   : > { %v2461_v23 = vld [vmem:[%s3511_s1 + $0xa8] ss:$16 sps:$4 sm:$0xff]   ;;  %v2462_v24 = vld [vmem:[%s3511_s1 + $0xc4] ss:$16 sps:$4 sm:$0xff]   ;;  %v2464_v25 = vld [vmem:[%s3511_s1 + $0xcc] ss:$16 sps:$4 sm:$0xff]  }
   0xe   : > { %v2466_v26 = vld [vmem:[%s3511_s1 + $0xc0] ss:$16 sps:$4 sm:$0xff]   ;;  %v2467_v27 = vld [vmem:[%s3511_s1 + $0xc8] ss:$16 sps:$4 sm:$0xff]   ;;  %v2468_v28 = vld [vmem:[%s3511_s1 + $0xe4] ss:$16 sps:$4 sm:$0xff]  }
   0xf   : > { %1369 = vmatpush1.bf16.msra.mxu0 %v2442_v10  ;;  %1492 = vmatpush1.bf16.msra.mxu1 %v2443_v11  ;;  %v2470_v29 = vld [vmem:[%s3511_s1 + $0xec] ss:$16 sps:$4 sm:$0xff]   ;;  %v2472_v30 = vld [vmem:[%s3511_s1 + $0xe0] ss:$16 sps:$4 sm:$0xff]   ;;  %v2473_v31 = vld [vmem:[%s3511_s1 + $0xe8] ss:$16 sps:$4 sm:$0xff]  }
  0x10   : > { %1370 = vmatprep.subr.bf16.mxu0 %v2444_v12  ;;  %1493 = vmatprep.subr.bf16.mxu1 %v2446_v13  ;;  %v2474_v32 = vld [vmem:[%s3511_s1 + $0x104] ss:$16 sps:$4 sm:$0xff]   ;;  %v2476_v33 = vld [vmem:[%s3511_s1 + $0x10c] ss:$16 sps:$4 sm:$0xff]   ;;  %v2478_v34 = vld [vmem:[%s3511_s1 + $0x100] ss:$16 sps:$4 sm:$0xff]  }
  0x11   : > { %v2479_v35 = vld [vmem:[%s3511_s1 + $0x108] ss:$16 sps:$4 sm:$0xff]   ;;  %v2480_v36 = vld [vmem:[%s3511_s1 + $0x124] ss:$16 sps:$4 sm:$0xff]   ;;  %s3519_s13 = smov (!%p161_p3, %s2178_s13), 1  ;;  %vm194_vm1 = vcmask 1040384  }
  0x12   : > { %v2482_v37 = vld [vmem:[%s3511_s1 + $0x12c] ss:$16 sps:$4 sm:$0xff]   ;;  %v2484_v38 = vld [vmem:[%s3511_s1 + $0x120] ss:$16 sps:$4 sm:$0xff]   ;;  %v2485_v39 = vld [vmem:[%s3511_s1 + $0x128] ss:$16 sps:$4 sm:$0xff]  }
  0x13   : > { %1371 = vmatpush1.bf16.msra.mxu0 %v2448_v14  ;;  %1494 = vmatpush1.bf16.msra.mxu1 %v2449_v15  ;;  %v2486_v40 = vld [vmem:[%s3511_s1 + $0x144] ss:$16 sps:$4 sm:$0xff]   ;;  %s2399_s21 = sshll.u32 %s3519_s13, 3  ;;  %v2488_v41 = vld [vmem:[%s3511_s1 + $0x14c] ss:$16 sps:$4 sm:$0xff]   ;;  %vm205_vm3 = vcmask 1043456  }
  0x14   : > { %1372 = vmatprep.subr.bf16.mxu0 %v2450_v16  ;;  %1495 = vmatprep.subr.bf16.mxu1 %v2452_v17  ;;  %v2490_v42 = vld [vmem:[%s3511_s1 + $0x140] ss:$16 sps:$4 sm:$0xff]   ;;  %v2491_v43 = vld [vmem:[%s3511_s1 + $0x148] ss:$16 sps:$4 sm:$0xff]   ;;  %s165_s30 = scalar_lea.vmem %s3510_s0, %s2399_s21  ;;  %v2492_v44 = vld [vmem:[%s3511_s1 + $0x164] ss:$16 sps:$4 sm:$0xff]   ;;  %s170_s18 = scalar_lea.vmem %s3513_s3, %s2399_s21 }
  0x15   : > { %v2494_v45 = vld [vmem:[%s3511_s1 + $0x16c] ss:$16 sps:$4 sm:$0xff]   ;;  %v172_v46 = vld [vmem:[%s165_s30] sm:$0xff]  ;;  %vm195_vm0 = vsmask.f32 256  ;;  %vm1734_vm6 = vcmask 1041408  }
  0x16   : > { %v2496_v47 = vld [vmem:[%s3511_s1 + $0x160] ss:$16 sps:$4 sm:$0xff]   ;;  %v2938_v48 = vcombine.high %v172_v46, %v172_v46  ;;  %v2497_v49 = vld [vmem:[%s3511_s1 + $0x168] ss:$16 sps:$4 sm:$0xff]   ;;  %v2498_v50 = vld [vmem:[%s3511_s1 + $0x184] ss:$16 sps:$4 sm:$0xff]   ;;  %v2965_v59 = vcombine.low %v172_v46, %v172_v46 }
  0x17   : > { %1373 = vmatpush1.bf16.msra.mxu0 %v2454_v18  ;;  %1496 = vmatpush1.bf16.msra.mxu1 %v2455_v19  ;;  %v2500_v51 = vld [vmem:[%s3511_s1 + $0x18c] ss:$16 sps:$4 sm:$0xff]   ;;  %v2502_v54 = vld [vmem:[%s3511_s1 + $0x180] ss:$16 sps:$4 sm:$0xff]   ;;  %v2503_v55 = vld [vmem:[%s3511_s1 + $0x188] ss:$16 sps:$4 sm:$0xff]  }
  0x18   : > { %1374 = vmatprep.subr.bf16.mxu0 %v2456_v20  ;;  %1497 = vmatprep.subr.bf16.mxu1 %v2458_v21  ;;  %v186_v52 = vshrl.u32 %v2938_v48, 16  ;;  %v189_v53 = vshll.u32 %v2938_v48, 16  ;;  %v2504_v56 = vld [vmem:[%s3511_s1 + $0x1a4] ss:$16 sps:$4 sm:$0xff]   ;;  %vm2961_vm2 = vmand %vm194_vm1, %vm195_vm0  ;;  %v2506_v60 = vld [vmem:[%s3511_s1 + $0x1ac] ss:$16 sps:$4 sm:$0xff]  }
  0x19   : > { %v2508_v62 = vld [vmem:[%s3511_s1 + $0x1a0] ss:$16 sps:$4 sm:$0xff]   ;;  %v2509_v0 = vld [vmem:[%s3511_s1 + $0x1a8] ss:$16 sps:$4 sm:$0xff]   ;;  %v2510_v1 = vld [vmem:[%s3511_s1 + $0x1c4] ss:$16 sps:$4 sm:$0xff]  }
  0x1a   : > { %v188_v57 = vrot.slane %v186_v52, 7  ;;  %v179_v2 = vshrl.u32 %v2965_v59, 16  ;;  %v2512_v3 = vld [vmem:[%s3511_s1 + $0x1cc] ss:$16 sps:$4 sm:$0xff]   ;;  %v2514_v4 = vld [vmem:[%s3511_s1 + $0x1c0] ss:$16 sps:$4 sm:$0xff]  }
  0x1b   : > { %1375 = vmatpush1.bf16.msra.mxu0 %v2460_v22  ;;  %1498 = vmatpush1.bf16.msra.mxu1 %v2461_v23  ;;  %v2515_v5 = vld [vmem:[%s3511_s1 + $0x1c8] ss:$16 sps:$4 sm:$0xff]   ;;  %v2516_v6 = vld [vmem:[%s3511_s1 + $0x1e4] ss:$16 sps:$4 sm:$0xff]   ;;  %v182_v8 = vshll.u32 %v2965_v59, 16  ;;  %v201_v15 = vrot.slane %v189_v53, 1 }
  0x1c   : > { %1376 = vmatprep.subr.bf16.mxu0 %v2462_v24  ;;  %1499 = vmatprep.subr.bf16.mxu1 %v2464_v25  ;;  %v191_v61 = vor.u32 %v189_v53, %v188_v57  ;;  %v181_v7 = vrot.slane %v179_v2, 7  ;;  %v2518_v9 = vld [vmem:[%s3511_s1 + $0x1ec] ss:$16 sps:$4 sm:$0xff]   ;;  %v2520_v10 = vld [vmem:[%s3511_s1 + $0x1e0] ss:$16 sps:$4 sm:$0xff]   ;;  %vm2078_vm7 = vcmask 1041409  }
  0x1d   : > { %v2521_v11 = vld [vmem:[%s3511_s1 + $0x1e8] ss:$16 sps:$4 sm:$0xff]   ;;  %v2525_v12 = vld [vmem:[%s3511_s1 + $0x204] ss:$16 sps:$4 sm:$0xff]   ;;  %v2528_v14 = vld [vmem:[%s3511_s1 + $0x20c] ss:$16 sps:$4 sm:$0xff]   ;;  %v3016_v19 = vor.u32 %v201_v15, %v186_v52 }
  0x1e   : > { %v198_v63 = vsel %vm2961_vm2, 0, %v191_v61  ;;  %v184_v13 = vor.u32 %v182_v8, %v181_v7  ;;  %v199_v16 = vrot.slane %v182_v8, 1  ;;  %v2523_v17 = vld [vmem:[%s3511_s1 + $0x200] ss:$16 sps:$4 sm:$0xff]   ;;  %v2526_v18 = vld [vmem:[%s3511_s1 + $0x208] ss:$16 sps:$4 sm:$0xff]  }
  0x1f   : > { %1377 = vmatpush1.bf16.msra.mxu0 %v2466_v26  ;;  %1500 = vmatpush1.bf16.msra.mxu1 %v2467_v27  ;;  %v2532_v21 = vld [vmem:[%s3511_s1 + $0x224] ss:$16 sps:$4 sm:$0xff]   ;;  %v2535_v23 = vld [vmem:[%s3511_s1 + $0x22c] ss:$16 sps:$4 sm:$0xff]   ;;  %v2530_v24 = vld [vmem:[%s3511_s1 + $0x220] ss:$16 sps:$4 sm:$0xff]  }
  0x20   : > { %1378 = vmatprep.subr.bf16.mxu0 %v2468_v28  ;;  %1501 = vmatprep.subr.bf16.mxu1 %v2470_v29  ;;  %v197_v20 = vsel %vm2961_vm2, 0, %v184_v13  ;;  %v3023_v22 = vor.u32 %v199_v16, %v179_v2  ;;  %v2533_v25 = vld [vmem:[%s3511_s1 + $0x228] ss:$16 sps:$4 sm:$0xff]   ;;  %v2538_v26 = vld [vmem:[%s3511_s1 + $0x244] ss:$16 sps:$4 sm:$0xff]   ;;  %vm2081_vm8 = vcmask 1042434  }
  0x21   : > { %1396 = vmatprep.mubr.bf16.mxu0 %v198_v63  ;;  %1519 = vmatprep.mubr.bf16.mxu1 %v198_v63  ;;  %v2541_v27 = vld [vmem:[%s3511_s1 + $0x24c] ss:$16 sps:$4 sm:$0xff]   ;;  %v2536_v28 = vld [vmem:[%s3511_s1 + $0x240] ss:$16 sps:$4 sm:$0xff]   ;;  %v2539_v29 = vld [vmem:[%s3511_s1 + $0x248] ss:$16 sps:$4 sm:$0xff]  }
  0x22   : > { %v2568_v46 = vld [vmem:[%s3511_s1 + $0x2e4] ss:$16 sps:$4 sm:$0xff]   ;;  %v2572_v52 = vld [vmem:[%s3511_s1 + $0x300] ss:$16 sps:$4 sm:$0xff]   ;;  %v2575_v53 = vld [vmem:[%s3511_s1 + $0x308] ss:$16 sps:$4 sm:$0xff]  }
  0x23   : > { %1379 = vmatpush1.bf16.msra.mxu0 %v2472_v30  ;;  %1502 = vmatpush1.bf16.msra.mxu1 %v2473_v31  ;;  %v2544_v30 = vld [vmem:[%s3511_s1 + $0x264] ss:$16 sps:$4 sm:$0xff]   ;;  %v2547_v31 = vld [vmem:[%s3511_s1 + $0x26c] ss:$16 sps:$4 sm:$0xff]   ;;  %v2581_v57 = vld [vmem:[%s3511_s1 + $0x328] ss:$16 sps:$4 sm:$0xff]  }
  0x24   : > { %1380 = vmatprep.subr.bf16.mxu0 %v2474_v32  ;;  %1503 = vmatprep.subr.bf16.mxu1 %v2476_v33  ;;  %v2542_v32 = vld [vmem:[%s3511_s1 + $0x260] ss:$16 sps:$4 sm:$0xff]   ;;  %v2545_v33 = vld [vmem:[%s3511_s1 + $0x268] ss:$16 sps:$4 sm:$0xff]   ;;  %v2586_v58 = vld [vmem:[%s3511_s1 + $0x344] ss:$16 sps:$4 sm:$0xff]  }
  0x25   : > { %v2584_v61 = vld [vmem:[%s3511_s1 + $0x340] ss:$16 sps:$4 sm:$0xff]   ;;  %v2592_v63 = vld [vmem:[%s3511_s1 + $0x364] ss:$16 sps:$4 sm:$0xff]   ;;  %v2593_v2 = vld [vmem:[%s3511_s1 + $0x368] ss:$16 sps:$4 sm:$0xff]  }
  0x26   : > { %v2604_v7 = vld [vmem:[%s3511_s1 + $0x3a4] ss:$16 sps:$4 sm:$0xff]   ;;  %v2607_v8 = vld [vmem:[%s3511_s1 + $0x3ac] ss:$16 sps:$4 sm:$0xff]   ;;  %v2608_v13 = vld [vmem:[%s3511_s1 + $0x3c0] ss:$16 sps:$4 sm:$0xff]  }
  0x27   : > { %1381 = vmatpush1.bf16.msra.mxu0 %v2478_v34  ;;  %1504 = vmatpush1.bf16.msra.mxu1 %v2479_v35  ;;  %v2550_v34 = vld [vmem:[%s3511_s1 + $0x284] ss:$16 sps:$4 sm:$0xff]   ;;  %v2553_v35 = vld [vmem:[%s3511_s1 + $0x28c] ss:$16 sps:$4 sm:$0xff]   ;;  %vm206_vm4 = vsmask.f32 3328 }
  0x28   : > { %1382 = vmatprep.subr.bf16.mxu0 %v2480_v36  ;;  %1505 = vmatprep.subr.bf16.mxu1 %v2482_v37  ;;  %v2548_v36 = vld [vmem:[%s3511_s1 + $0x280] ss:$16 sps:$4 sm:$0xff]   ;;  %v2551_v37 = vld [vmem:[%s3511_s1 + $0x288] ss:$16 sps:$4 sm:$0xff]   ;;  %v2616_v15 = vld [vmem:[%s3511_s1 + $0x3e4] ss:$16 sps:$4 sm:$0xff]  }
  0x29   : > { %v2619_v16 = vld [vmem:[%s3511_s1 + $0x3ec] ss:$16 sps:$4 sm:$0xff]   ;;  %vm3222_vm5 = vmand %vm205_vm3, %vm206_vm4  ;;  %vm2084_vm9 = vcmask 1043459  }
  0x2b   : > { %1383 = vmatpush1.bf16.msra.mxu0 %v2484_v38  ;;  %1506 = vmatpush1.bf16.msra.mxu1 %v2485_v39  ;;  %v2556_v38 = vld [vmem:[%s3511_s1 + $0x2a4] ss:$16 sps:$4 sm:$0xff]   ;;  %v2559_v39 = vld [vmem:[%s3511_s1 + $0x2ac] ss:$16 sps:$4 sm:$0xff]  }
  0x2c   : > { %1384 = vmatprep.subr.bf16.mxu0 %v2486_v40  ;;  %1507 = vmatprep.subr.bf16.mxu1 %v2488_v41  ;;  %v2554_v40 = vld [vmem:[%s3511_s1 + $0x2a0] ss:$16 sps:$4 sm:$0xff]   ;;  %v2557_v41 = vld [vmem:[%s3511_s1 + $0x2a8] ss:$16 sps:$4 sm:$0xff]  }
  0x2f   : > { %1385 = vmatpush1.bf16.msra.mxu0 %v2490_v42  ;;  %1508 = vmatpush1.bf16.msra.mxu1 %v2491_v43  ;;  %v2562_v42 = vld [vmem:[%s3511_s1 + $0x2c4] ss:$16 sps:$4 sm:$0xff]   ;;  %v2565_v43 = vld [vmem:[%s3511_s1 + $0x2cc] ss:$16 sps:$4 sm:$0xff]  }
  0x30   : > { %1386 = vmatprep.subr.bf16.mxu0 %v2492_v44  ;;  %1509 = vmatprep.subr.bf16.mxu1 %v2494_v45  ;;  %v2560_v44 = vld [vmem:[%s3511_s1 + $0x2c0] ss:$16 sps:$4 sm:$0xff]   ;;  %v2563_v45 = vld [vmem:[%s3511_s1 + $0x2c8] ss:$16 sps:$4 sm:$0xff]  }
  0x33   : > { %1387 = vmatpush1.bf16.msra.mxu0 %v2496_v47  ;;  %1510 = vmatpush1.bf16.msra.mxu1 %v2497_v49  ;;  %v2571_v47 = vld [vmem:[%s3511_s1 + $0x2ec] ss:$16 sps:$4 sm:$0xff]   ;;  %v2569_v49 = vld [vmem:[%s3511_s1 + $0x2e8] ss:$16 sps:$4 sm:$0xff]  }
  0x34   : > { %1388 = vmatprep.subr.bf16.mxu0 %v2498_v50  ;;  %1511 = vmatprep.subr.bf16.mxu1 %v2500_v51  ;;  %v2574_v50 = vld [vmem:[%s3511_s1 + $0x304] ss:$16 sps:$4 sm:$0xff]   ;;  %v2577_v51 = vld [vmem:[%s3511_s1 + $0x30c] ss:$16 sps:$4 sm:$0xff]  }
  0x37   : > { %1389 = vmatpush1.bf16.msra.mxu0 %v2502_v54  ;;  %1512 = vmatpush1.bf16.msra.mxu1 %v2503_v55  ;;  %v2580_v54 = vld [vmem:[%s3511_s1 + $0x324] ss:$16 sps:$4 sm:$0xff]   ;;  %v2583_v55 = vld [vmem:[%s3511_s1 + $0x32c] ss:$16 sps:$4 sm:$0xff]  }
  0x38   : > { %1390 = vmatprep.subr.bf16.mxu0 %v2504_v56  ;;  %1513 = vmatprep.subr.bf16.mxu1 %v2506_v60  ;;  %v2578_v56 = vld [vmem:[%s3511_s1 + $0x320] ss:$16 sps:$4 sm:$0xff]   ;;  %v2589_v60 = vld [vmem:[%s3511_s1 + $0x34c] ss:$16 sps:$4 sm:$0xff]  }
  0x3b   : > { %1391 = vmatpush1.bf16.msra.mxu0 %v2508_v62  ;;  %1514 = vmatpush1.bf16.msra.mxu1 %v2509_v0  ;;  %v2587_v62 = vld [vmem:[%s3511_s1 + $0x348] ss:$16 sps:$4 sm:$0xff]   ;;  %v2595_v0 = vld [vmem:[%s3511_s1 + $0x36c] ss:$16 sps:$4 sm:$0xff]  }
  0x3c   : > { %1392 = vmatprep.subr.bf16.mxu0 %v2510_v1  ;;  %1515 = vmatprep.subr.bf16.mxu1 %v2512_v3  ;;  %v2590_v1 = vld [vmem:[%s3511_s1 + $0x360] ss:$16 sps:$4 sm:$0xff]   ;;  %v2598_v3 = vld [vmem:[%s3511_s1 + $0x384] ss:$16 sps:$4 sm:$0xff]  }
  0x3f   : > { %1393 = vmatpush1.bf16.msra.mxu0 %v2514_v4  ;;  %1516 = vmatpush1.bf16.msra.mxu1 %v2515_v5  ;;  %v2601_v4 = vld [vmem:[%s3511_s1 + $0x38c] ss:$16 sps:$4 sm:$0xff]   ;;  %v2596_v5 = vld [vmem:[%s3511_s1 + $0x380] ss:$16 sps:$4 sm:$0xff]  }
  0x40   : > { %1394 = vmatprep.subr.bf16.mxu0 %v2516_v6  ;;  %1517 = vmatprep.subr.bf16.mxu1 %v2518_v9  ;;  %v2599_v6 = vld [vmem:[%s3511_s1 + $0x388] ss:$16 sps:$4 sm:$0xff]   ;;  %v2602_v9 = vld [vmem:[%s3511_s1 + $0x3a0] ss:$16 sps:$4 sm:$0xff]  }
  0x43   : > { %1395 = vmatpush1.bf16.msra.mxu0 %v2520_v10  ;;  %1518 = vmatpush1.bf16.msra.mxu1 %v2521_v11  ;;  %v2605_v10 = vld [vmem:[%s3511_s1 + $0x3a8] ss:$16 sps:$4 sm:$0xff]   ;;  %v2610_v11 = vld [vmem:[%s3511_s1 + $0x3c4] ss:$16 sps:$4 sm:$0xff]  }
  0x44   : > { %1405 = vmatprep.subr.bf16.mxu0 %v2525_v12  ;;  %1528 = vmatprep.subr.bf16.mxu1 %v2528_v14  ;;  %v2613_v12 = vld [vmem:[%s3511_s1 + $0x3cc] ss:$16 sps:$4 sm:$0xff]   ;;  %v2611_v14 = vld [vmem:[%s3511_s1 + $0x3c8] ss:$16 sps:$4 sm:$0xff]  }
  0x46   : > { %1397 = vmatmul.mubr.bf16.vlgmr.msra.gmra.mrb[0].mxu0 %v197_v20  ;;  %1520 = vmatmul.mubr.bf16.vlgmr.msra.gmra.mrb[0].mxu1 %v197_v20  ;;  %v2622_v20 = vld [vmem:[%s3511_s1 + $0x404] ss:$16 sps:$4 sm:$0xff]  }
  0x47   : > { %1406 = vmatpush1.bf16.msra.mxu0 %v2523_v17  ;;  %1529 = vmatpush1.bf16.msra.mxu1 %v2526_v18  ;;  %v2614_v17 = vld [vmem:[%s3511_s1 + $0x3e0] ss:$16 sps:$4 sm:$0xff]   ;;  %v2617_v18 = vld [vmem:[%s3511_s1 + $0x3e8] ss:$16 sps:$4 sm:$0xff]  }
  0x48   : > { %1407 = vmatprep.subr.bf16.mxu0 %v2532_v21  ;;  %1530 = vmatprep.subr.bf16.mxu1 %v2535_v23  ;;  %v2625_v21 = vld [vmem:[%s3511_s1 + $0x40c] ss:$16 sps:$4 sm:$0xff]   ;;  %v2620_v23 = vld [vmem:[%s3511_s1 + $0x400] ss:$16 sps:$4 sm:$0xff]  }
  0x49   : > { %1437 = vmatprep.mubr.bf16.mxu0 %v2938_v48  ;;  %1560 = vmatprep.mubr.bf16.mxu1 %v2938_v48  ;;  %v2566_v48 = vld [vmem:[%s3511_s1 + $0x2e0] ss:$16 sps:$4 sm:$0xff]  }
  0x4b   : > { %1408 = vmatpush1.bf16.msra.mxu0 %v2530_v24  ;;  %1531 = vmatpush1.bf16.msra.mxu1 %v2533_v25  ;;  %v2623_v24 = vld [vmem:[%s3511_s1 + $0x408] ss:$16 sps:$4 sm:$0xff]   ;;  %v2628_v25 = vld [vmem:[%s3511_s1 + $0x424] ss:$16 sps:$4 sm:$0xff]  }
  0x4c   : > { %1409 = vmatprep.subr.bf16.mxu0 %v2538_v26  ;;  %1532 = vmatprep.subr.bf16.mxu1 %v2541_v27  ;;  %v2631_v26 = vld [vmem:[%s3511_s1 + $0x42c] ss:$16 sps:$4 sm:$0xff]  }
  0x4f   : > { %1410 = vmatpush1.bf16.msra.mxu0 %v2536_v28  ;;  %1533 = vmatpush1.bf16.msra.mxu1 %v2539_v29  ;;  %v209_v28 = vsel %vm3222_vm5, %v3016_v19, 0  ;;  %v2626_v29 = vld [vmem:[%s3511_s1 + $0x420] ss:$16 sps:$4 sm:$0xff]   ;;  %v2637_v19 = vld [vmem:[%s3511_s1 + $0x44c] ss:$16 sps:$4 sm:$0xff]  }
  0x50   : > { %1411 = vmatprep.subr.bf16.mxu0 %v2544_v30  ;;  %1534 = vmatprep.subr.bf16.mxu1 %v2547_v31  ;;  %v2629_v30 = vld [vmem:[%s3511_s1 + $0x428] ss:$16 sps:$4 sm:$0xff]   ;;  %v2632_v31 = vld [vmem:[%s3511_s1 + $0x440] ss:$16 sps:$4 sm:$0xff]  }
  0x53   : > { %1412 = vmatpush1.bf16.msra.mxu0 %v2542_v32  ;;  %1535 = vmatpush1.bf16.msra.mxu1 %v2545_v33  ;;  %v2635_v32 = vld [vmem:[%s3511_s1 + $0x448] ss:$16 sps:$4 sm:$0xff]   ;;  %v2640_v33 = vld [vmem:[%s3511_s1 + $0x464] ss:$16 sps:$4 sm:$0xff]  }
  0x54   : > { %1413 = vmatprep.subr.bf16.mxu0 %v2550_v34  ;;  %1536 = vmatprep.subr.bf16.mxu1 %v2553_v35  ;;  %v2643_v34 = vld [vmem:[%s3511_s1 + $0x46c] ss:$16 sps:$4 sm:$0xff]   ;;  %v2638_v35 = vld [vmem:[%s3511_s1 + $0x460] ss:$16 sps:$4 sm:$0xff]  }
  0x57   : > { %1414 = vmatpush1.bf16.msra.mxu0 %v2548_v36  ;;  %1537 = vmatpush1.bf16.msra.mxu1 %v2551_v37  ;;  %v2641_v36 = vld [vmem:[%s3511_s1 + $0x468] ss:$16 sps:$4 sm:$0xff]   ;;  %v2646_v37 = vld [vmem:[%s3511_s1 + $0x484] ss:$16 sps:$4 sm:$0xff]  }
  0x58   : > { %1415 = vmatprep.subr.bf16.mxu0 %v2556_v38  ;;  %1538 = vmatprep.subr.bf16.mxu1 %v2559_v39  ;;  %v2649_v38 = vld [vmem:[%s3511_s1 + $0x48c] ss:$16 sps:$4 sm:$0xff]   ;;  %v2644_v39 = vld [vmem:[%s3511_s1 + $0x480] ss:$16 sps:$4 sm:$0xff]  }
  0x5b   : > { %1416 = vmatpush1.bf16.msra.mxu0 %v2554_v40  ;;  %1539 = vmatpush1.bf16.msra.mxu1 %v2557_v41  ;;  %v2647_v40 = vld [vmem:[%s3511_s1 + $0x488] ss:$16 sps:$4 sm:$0xff]   ;;  %v2652_v41 = vld [vmem:[%s3511_s1 + $0x4a4] ss:$16 sps:$4 sm:$0xff]  }
  0x5c   : > { %1417 = vmatprep.subr.bf16.mxu0 %v2562_v42  ;;  %1540 = vmatprep.subr.bf16.mxu1 %v2565_v43  ;;  %v2655_v42 = vld [vmem:[%s3511_s1 + $0x4ac] ss:$16 sps:$4 sm:$0xff]   ;;  %v2650_v43 = vld [vmem:[%s3511_s1 + $0x4a0] ss:$16 sps:$4 sm:$0xff]  }
  0x5f   : > { %1418 = vmatpush1.bf16.msra.mxu0 %v2560_v44  ;;  %1541 = vmatpush1.bf16.msra.mxu1 %v2563_v45  ;;  %v2653_v44 = vld [vmem:[%s3511_s1 + $0x4a8] ss:$16 sps:$4 sm:$0xff]   ;;  %v2658_v45 = vld [vmem:[%s3511_s1 + $0x4c4] ss:$16 sps:$4 sm:$0xff]  }
  0x60   : > { %1419 = vmatprep.subr.bf16.mxu0 %v2568_v46  ;;  %1542 = vmatprep.subr.bf16.mxu1 %v2571_v47  ;;  %v2661_v46 = vld [vmem:[%s3511_s1 + $0x4cc] ss:$16 sps:$4 sm:$0xff]   ;;  %v2656_v47 = vld [vmem:[%s3511_s1 + $0x4c0] ss:$16 sps:$4 sm:$0xff]  }
  0x63   : > { %1420 = vmatpush1.bf16.msra.mxu0 %v2566_v48  ;;  %1543 = vmatpush1.bf16.msra.mxu1 %v2569_v49  ;;  %v2659_v48 = vld [vmem:[%s3511_s1 + $0x4c8] ss:$16 sps:$4 sm:$0xff]   ;;  %v2664_v49 = vld [vmem:[%s3511_s1 + $0x4e4] ss:$16 sps:$4 sm:$0xff]  }
  0x64   : > { %1421 = vmatprep.subr.bf16.mxu0 %v2574_v50  ;;  %1544 = vmatprep.subr.bf16.mxu1 %v2577_v51  ;;  %v2667_v50 = vld [vmem:[%s3511_s1 + $0x4ec] ss:$16 sps:$4 sm:$0xff]   ;;  %v2662_v51 = vld [vmem:[%s3511_s1 + $0x4e0] ss:$16 sps:$4 sm:$0xff]  }
  0x67   : > { %1422 = vmatpush1.bf16.msra.mxu0 %v2572_v52  ;;  %1545 = vmatpush1.bf16.msra.mxu1 %v2575_v53  ;;  %v2665_v52 = vld [vmem:[%s3511_s1 + $0x4e8] ss:$16 sps:$4 sm:$0xff]   ;;  %v2670_v53 = vld [vmem:[%s3511_s1 + $0x504] ss:$16 sps:$4 sm:$0xff]  }
  0x68   : > { %1423 = vmatprep.subr.bf16.mxu0 %v2580_v54  ;;  %1546 = vmatprep.subr.bf16.mxu1 %v2583_v55  ;;  %v2673_v54 = vld [vmem:[%s3511_s1 + $0x50c] ss:$16 sps:$4 sm:$0xff]   ;;  %v2668_v55 = vld [vmem:[%s3511_s1 + $0x500] ss:$16 sps:$4 sm:$0xff]  }
  0x6b   : > { %1424 = vmatpush1.bf16.msra.mxu0 %v2578_v56  ;;  %1547 = vmatpush1.bf16.msra.mxu1 %v2581_v57  ;;  %v2671_v56 = vld [vmem:[%s3511_s1 + $0x508] ss:$16 sps:$4 sm:$0xff]   ;;  %v2676_v57 = vld [vmem:[%s3511_s1 + $0x524] ss:$16 sps:$4 sm:$0xff]  }
  0x6c   : > { %1425 = vmatprep.subr.bf16.mxu0 %v2586_v58  ;;  %1548 = vmatprep.subr.bf16.mxu1 %v2589_v60  ;;  %v2679_v58 = vld [vmem:[%s3511_s1 + $0x52c] ss:$16 sps:$4 sm:$0xff]   ;;  %v2674_v60 = vld [vmem:[%s3511_s1 + $0x520] ss:$16 sps:$4 sm:$0xff]  }
  0x6f   : > { %1426 = vmatpush1.bf16.msra.mxu0 %v2584_v61  ;;  %1549 = vmatpush1.bf16.msra.mxu1 %v2587_v62  ;;  %v2677_v61 = vld [vmem:[%s3511_s1 + $0x528] ss:$16 sps:$4 sm:$0xff]   ;;  %v2682_v62 = vld [vmem:[%s3511_s1 + $0x544] ss:$16 sps:$4 sm:$0xff]  }
  0x70   : > { %1427 = vmatprep.subr.bf16.mxu0 %v2592_v63  ;;  %1550 = vmatprep.subr.bf16.mxu1 %v2595_v0  ;;  %v2685_v63 = vld [vmem:[%s3511_s1 + $0x54c] ss:$16 sps:$4 sm:$0xff]   ;;  %v2680_v0 = vld [vmem:[%s3511_s1 + $0x540] ss:$16 sps:$4 sm:$0xff]  }
  0x73   : > { %1428 = vmatpush1.bf16.msra.mxu0 %v2590_v1  ;;  %1551 = vmatpush1.bf16.msra.mxu1 %v2593_v2  ;;  %v2683_v1 = vld [vmem:[%s3511_s1 + $0x548] ss:$16 sps:$4 sm:$0xff]   ;;  %v2688_v2 = vld [vmem:[%s3511_s1 + $0x564] ss:$16 sps:$4 sm:$0xff]  }
  0x74   : > { %1429 = vmatprep.subr.bf16.mxu0 %v2598_v3  ;;  %1552 = vmatprep.subr.bf16.mxu1 %v2601_v4  ;;  %v2691_v3 = vld [vmem:[%s3511_s1 + $0x56c] ss:$16 sps:$4 sm:$0xff]   ;;  %v2686_v4 = vld [vmem:[%s3511_s1 + $0x560] ss:$16 sps:$4 sm:$0xff]  }
  0x77   : > { %1430 = vmatpush1.bf16.msra.mxu0 %v2596_v5  ;;  %1553 = vmatpush1.bf16.msra.mxu1 %v2599_v6  ;;  %v2689_v5 = vld [vmem:[%s3511_s1 + $0x568] ss:$16 sps:$4 sm:$0xff]   ;;  %v2694_v6 = vld [vmem:[%s3511_s1 + $0x584] ss:$16 sps:$4 sm:$0xff]  }
  0x78   : > { %1431 = vmatprep.subr.bf16.mxu0 %v2604_v7  ;;  %1554 = vmatprep.subr.bf16.mxu1 %v2607_v8  ;;  %v2697_v7 = vld [vmem:[%s3511_s1 + $0x58c] ss:$16 sps:$4 sm:$0xff]   ;;  %v2692_v8 = vld [vmem:[%s3511_s1 + $0x580] ss:$16 sps:$4 sm:$0xff]  }
  0x7b   : > { %1432 = vmatpush1.bf16.msra.mxu0 %v2602_v9  ;;  %1555 = vmatpush1.bf16.msra.mxu1 %v2605_v10  ;;  %v2695_v9 = vld [vmem:[%s3511_s1 + $0x588] ss:$16 sps:$4 sm:$0xff]   ;;  %v2700_v10 = vld [vmem:[%s3511_s1 + $0x5a4] ss:$16 sps:$4 sm:$0xff]  }
  0x7c   : > { %1433 = vmatprep.subr.bf16.mxu0 %v2610_v11  ;;  %1556 = vmatprep.subr.bf16.mxu1 %v2613_v12  ;;  %v2703_v11 = vld [vmem:[%s3511_s1 + $0x5ac] ss:$16 sps:$4 sm:$0xff]   ;;  %v2698_v12 = vld [vmem:[%s3511_s1 + $0x5a0] ss:$16 sps:$4 sm:$0xff]  }
  0x7f   : > { %1434 = vmatpush1.bf16.msra.mxu0 %v2608_v13  ;;  %1557 = vmatpush1.bf16.msra.mxu1 %v2611_v14  ;;  %v2701_v13 = vld [vmem:[%s3511_s1 + $0x5a8] ss:$16 sps:$4 sm:$0xff]   ;;  %v2706_v14 = vld [vmem:[%s3511_s1 + $0x5c4] ss:$16 sps:$4 sm:$0xff]  }
  0x80   : > { %1435 = vmatprep.subr.bf16.mxu0 %v2616_v15  ;;  %1558 = vmatprep.subr.bf16.mxu1 %v2619_v16  ;;  %v2709_v15 = vld [vmem:[%s3511_s1 + $0x5cc] ss:$16 sps:$4 sm:$0xff]   ;;  %v2704_v16 = vld [vmem:[%s3511_s1 + $0x5c0] ss:$16 sps:$4 sm:$0xff]  }
  0x83   : > { %1436 = vmatpush1.bf16.msra.mxu0 %v2614_v17  ;;  %1559 = vmatpush1.bf16.msra.mxu1 %v2617_v18  ;;  %v2707_v17 = vld [vmem:[%s3511_s1 + $0x5c8] ss:$16 sps:$4 sm:$0xff]   ;;  %v2712_v18 = vld [vmem:[%s3511_s1 + $0x5e4] ss:$16 sps:$4 sm:$0xff]  }
  0x84   : > { %1446 = vmatprep.subr.bf16.mxu0 %v2622_v20  ;;  %1569 = vmatprep.subr.bf16.mxu1 %v2625_v21  ;;  %v2715_v20 = vld [vmem:[%s3511_s1 + $0x5ec] ss:$16 sps:$4 sm:$0xff]   ;;  %v2710_v21 = vld [vmem:[%s3511_s1 + $0x5e0] ss:$16 sps:$4 sm:$0xff]  }
  0x86   : > { %1438 = vmatmul.mubr.bf16.vlgmr.msra.gmra.mrb[0].mxu0 %v2965_v59  ;;  %1561 = vmatmul.mubr.bf16.vlgmr.msra.gmra.mrb[0].mxu1 %v2965_v59  ;;  %v2634_v59 = vld [vmem:[%s3511_s1 + $0x444] ss:$16 sps:$4 sm:$0xff]  }
  0x87   : > { %1447 = vmatpush1.bf16.msra.mxu0 %v2620_v23  ;;  %1570 = vmatpush1.bf16.msra.mxu1 %v2623_v24  ;;  %v2713_v23 = vld [vmem:[%s3511_s1 + $0x5e8] ss:$16 sps:$4 sm:$0xff]   ;;  %v208_v24 = vsel %vm3222_vm5, %v3023_v22, 0 }
  0x88   : > { %1448 = vmatprep.subr.bf16.mxu0 %v2628_v25  ;;  %1571 = vmatprep.subr.bf16.mxu1 %v2631_v26  ;;  %v2756_v25 = vmov 1983009808  }
  0x89   : > { %1478 = vmatprep.mubr.bf16.mxu0 %v209_v28  ;;  %1601 = vmatprep.mubr.bf16.mxu1 %v209_v28  ;;  %v1619_v26 = vunpack.c.l.s4 %v2756_v25  ;;  %v1621_v28 = vlaneseq }
  0x8b   : > { %1449 = vmatpush1.bf16.msra.mxu0 %v2626_v29  ;;  %1572 = vmatpush1.bf16.msra.mxu1 %v2629_v30  ;;  %v1620_v29 = vunpack.c.0.s8 %v1619_v26  ;;  %v3408_v30 = vshrl.u32 %v1621_v28, 7 }
  0x8c   : > { %1450 = vmatprep.subr.bf16.mxu0 %v2634_v59  ;;  %1573 = vmatprep.subr.bf16.mxu1 %v2637_v19 }
  0x8f   : > { %1451 = vmatpush1.bf16.msra.mxu0 %v2632_v31  ;;  %1574 = vmatpush1.bf16.msra.mxu1 %v2635_v32  ;;  %v3411_v31 = vsub.s32 %v1620_v29, %v3408_v30 }
  0x90   : > { %1452 = vmatprep.subr.bf16.mxu0 %v2640_v33  ;;  %1575 = vmatprep.subr.bf16.mxu1 %v2643_v34 }
  0x93   : > { %1453 = vmatpush1.bf16.msra.mxu0 %v2638_v35  ;;  %1576 = vmatpush1.bf16.msra.mxu1 %v2641_v36 }
  0x94   : > { %1454 = vmatprep.subr.bf16.mxu0 %v2646_v37  ;;  %1577 = vmatprep.subr.bf16.mxu1 %v2649_v38 }
  0x97   : > { %1455 = vmatpush1.bf16.msra.mxu0 %v2644_v39  ;;  %1578 = vmatpush1.bf16.msra.mxu1 %v2647_v40 }
  0x98   : > { %1456 = vmatprep.subr.bf16.mxu0 %v2652_v41  ;;  %1579 = vmatprep.subr.bf16.mxu1 %v2655_v42 }
  0x9b   : > { %1457 = vmatpush1.bf16.msra.mxu0 %v2650_v43  ;;  %1580 = vmatpush1.bf16.msra.mxu1 %v2653_v44 }
  0x9c   : > { %1458 = vmatprep.subr.bf16.mxu0 %v2658_v45  ;;  %1581 = vmatprep.subr.bf16.mxu1 %v2661_v46 }
  0x9f   : > { %1459 = vmatpush1.bf16.msra.mxu0 %v2656_v47  ;;  %1582 = vmatpush1.bf16.msra.mxu1 %v2659_v48 }
  0xa0   : > { %1460 = vmatprep.subr.bf16.mxu0 %v2664_v49  ;;  %1583 = vmatprep.subr.bf16.mxu1 %v2667_v50 }
  0xa3   : > { %1461 = vmatpush1.bf16.msra.mxu0 %v2662_v51  ;;  %1584 = vmatpush1.bf16.msra.mxu1 %v2665_v52 }
  0xa4   : > { %1462 = vmatprep.subr.bf16.mxu0 %v2670_v53  ;;  %1585 = vmatprep.subr.bf16.mxu1 %v2673_v54 }
  0xa7   : > { %1463 = vmatpush1.bf16.msra.mxu0 %v2668_v55  ;;  %1586 = vmatpush1.bf16.msra.mxu1 %v2671_v56 }
  0xa8   : > { %1464 = vmatprep.subr.bf16.mxu0 %v2676_v57  ;;  %1587 = vmatprep.subr.bf16.mxu1 %v2679_v58 }
  0xab   : > { %1465 = vmatpush1.bf16.msra.mxu0 %v2674_v60  ;;  %1588 = vmatpush1.bf16.msra.mxu1 %v2677_v61 }
  0xac   : > { %1466 = vmatprep.subr.bf16.mxu0 %v2682_v62  ;;  %1589 = vmatprep.subr.bf16.mxu1 %v2685_v63 }
  0xaf   : > { %1467 = vmatpush1.bf16.msra.mxu0 %v2680_v0  ;;  %1590 = vmatpush1.bf16.msra.mxu1 %v2683_v1 }
  0xb0   : > { %1468 = vmatprep.subr.bf16.mxu0 %v2688_v2  ;;  %1591 = vmatprep.subr.bf16.mxu1 %v2691_v3 }
  0xb3   : > { %1469 = vmatpush1.bf16.msra.mxu0 %v2686_v4  ;;  %1592 = vmatpush1.bf16.msra.mxu1 %v2689_v5 }
  0xb4   : > { %1470 = vmatprep.subr.bf16.mxu0 %v2694_v6  ;;  %1593 = vmatprep.subr.bf16.mxu1 %v2697_v7 }
  0xb7   : > { %1471 = vmatpush1.bf16.msra.mxu0 %v2692_v8  ;;  %1594 = vmatpush1.bf16.msra.mxu1 %v2695_v9 }
  0xb8   : > { %1472 = vmatprep.subr.bf16.mxu0 %v2700_v10  ;;  %1595 = vmatprep.subr.bf16.mxu1 %v2703_v11 }
  0xbb   : > { %1473 = vmatpush1.bf16.msra.mxu0 %v2698_v12  ;;  %1596 = vmatpush1.bf16.msra.mxu1 %v2701_v13 }
  0xbc   : > { %1474 = vmatprep.subr.bf16.mxu0 %v2706_v14  ;;  %1597 = vmatprep.subr.bf16.mxu1 %v2709_v15  ;;  %v1851_v15 = vsub.s32 0, %v3408_v30 }
  0xbf   : > { %1475 = vmatpush1.bf16.msra.mxu0 %v2704_v16  ;;  %1598 = vmatpush1.bf16.msra.mxu1 %v2707_v17  ;;  %v1859_v16 = vsub.s32 2, %v3408_v30 }
  0xc0   : > { %1476 = vmatprep.subr.bf16.mxu0 %v2712_v18  ;;  %1599 = vmatprep.subr.bf16.mxu1 %v2715_v20  ;;  %v1847_v20 = vld [vmem:[%s3512_s2] sm:$0xf] }
  0xc3   : > { %1477 = vmatpush1.bf16.msra.mxu0 %v2710_v21  ;;  %1600 = vmatpush1.bf16.msra.mxu1 %v2713_v23  ;;  %v1855_v21 = vsub.s32 1, %v3408_v30  ;;  %v1863_v23 = vsub.s32 3, %v3408_v30 }
  0xc5   : > { %v3444_v30 = vrot.slane %v1847_v20, %v1855_v21 }
  0xc6   : > { %1479 = vmatmul.mubr.bf16.vlgmr.msra.gmra.mrb[0].mxu0 %v208_v24  ;;  %1602 = vmatmul.mubr.bf16.vlgmr.msra.gmra.mrb[0].mxu1 %v208_v24 }
 0x199   : > { %v1480_v59 = vpop.f32.mrb[0].mxu0  ;;  %v1603_v19 = vpop.f32.mrb[0].mxu1 }
 0x19a   : > { %v1482_v32 = vpop.f32.mrb[1].mxu0  ;;  %v1605_v33 = vpop.f32.mrb[1].mxu1 }
 0x19b   : > { %v1614_v34 = vcombine.low %v1480_v59, %v1482_v32  ;;  %v1615_v35 = vcombine.high %v1480_v59, %v1482_v32  ;;  %v1616_v36 = vcombine.low %v1603_v19, %v1605_v33  ;;  %v1617_v27 = vcombine.high %v1603_v19, %v1605_v33  ;;  %v1484_v22 = vpop.f32.mrb[2].mxu0  ;;  %v1607_v37 = vpop.f32.mrb[2].mxu1 }
 0x19c   : > { %v1485_v38 = vpop.f32.mrb[3].mxu0  ;;  %v1608_v39 = vpop.f32.mrb[3].mxu1  ;;  %v3446_v37 = vrot.slane %v1847_v20, %v1863_v23 }
 0x19d   : > { %v1624_v40 = vrot.slane %v1614_v34, %v3411_v31  ;;  %v1631_v41 = vrot.slane %v1615_v35, %v3411_v31  ;;  %v1638_v42 = vrot.slane %v1616_v36, %v3411_v31  ;;  %v1645_v43 = vrot.slane %v1617_v27, %v3411_v31 }
 0x19e   : > { %v3440_v35 = vrot.slane %v1847_v20, %v1851_v15  ;;  %v3442_v36 = vrot.slane %v1847_v20, %v1859_v16 }
 0x19f   : > { %v1646_v44 = vcombine.low %v1624_v40, %v1638_v42  ;;  %v1647_v45 = vcombine.high %v1624_v40, %v1638_v42  ;;  %v1648_v46 = vcombine.low %v1631_v41, %v1645_v43  ;;  %v1649_v47 = vcombine.high %v1631_v41, %v1645_v43 }
 0x1a0   : > { %v2381_v48 = vcombine.low %v1638_v42, %v1638_v42  ;;  %v2382_v49 = vcombine.high %v1638_v42, %v1638_v42  ;;  %v2383_v6 = vcombine.low %v1645_v43, %v1645_v43  ;;  %v2384_v7 = vcombine.high %v1645_v43, %v1645_v43 }
 0x1a1   : > { %v1657_v50 = vrot.slane %v1646_v44, %v3411_v31  ;;  %v1674_v51 = vrot.slane %v1647_v45, %v3411_v31  ;;  %v1691_v13 = vrot.slane %v1648_v46, %v3411_v31  ;;  %v1708_v17 = vrot.slane %v1649_v47, %v3411_v31 }
 0x1a2   : > { %v1664_v52 = vrot.slane %v2381_v48, %v3411_v31  ;;  %v1681_v56 = vrot.slane %v2382_v49, %v3411_v31  ;;  %v1698_v24 = vrot.slane %v2383_v6, %v3411_v31  ;;  %v1715_v25 = vrot.slane %v2384_v7, %v3411_v31 }
 0x1a3   : > { %v1665_v53 = vcombine.high %v1657_v50, %v1657_v50  ;;  %v1682_v54 = vcombine.high %v1674_v51, %v1674_v51  ;;  %v1735_v57 = vsel %vm1734_vm6, %v1657_v50, -inf  ;;  %v1763_v61 = vsel %vm1734_vm6, %v1674_v51, -inf }
 0x1a4   : > { %v1666_v55 = vcombine.high %v1664_v52, %v1664_v52  ;;  %v1749_v60 = vsel %vm1734_vm6, %v1664_v52, -inf  ;;  %v1736_v62 = vrot.slane %v1735_v57, 4  ;;  %v1764_v3 = vrot.slane %v1763_v61, 4 }
 0x1a5   : > { %v1742_v58 = vsel %vm1734_vm6, %v1665_v53, -inf  ;;  %v1750_v0 = vrot.slane %v1749_v60, 4  ;;  %v1770_v4 = vsel %vm1734_vm6, %v1682_v54, -inf  ;;  %v1683_v5 = vcombine.high %v1681_v56, %v1681_v56 }
 0x1a6   : > { %v1743_v63 = vrot.slane %v1742_v58, 4  ;;  %v1756_v1 = vsel %vm1734_vm6, %v1666_v55, -inf  ;;  %v1777_v8 = vsel %vm1734_vm6, %v1681_v56, -inf  ;;  %v1737_v9 = vmax.f32 %v1735_v57, %v1736_v62 }
 0x1a7   : > { %v1757_v2 = vrot.slane %v1756_v1, 4  ;;  %v1751_v11 = vmax.f32 %v1749_v60, %v1750_v0  ;;  %v1771_v12 = vrot.slane %v1770_v4, 4  ;;  %v1765_v18 = vmax.f32 %v1763_v61, %v1764_v3 }
 0x1a8   : > { %v1744_v10 = vmax.f32 %v1742_v58, %v1743_v63  ;;  %v1778_v26 = vrot.slane %v1777_v8, 4  ;;  %v1784_v28 = vsel %vm1734_vm6, %v1683_v5, -inf  ;;  %v1738_v29 = vrot.slane %v1737_v9, 2 }
 0x1a9   : > { %v1758_v14 = vmax.f32 %v1756_v1, %v1757_v2  ;;  %v1752_v19 = vrot.slane %v1751_v11, 2  ;;  %v1772_v32 = vmax.f32 %v1770_v4, %v1771_v12  ;;  %v1699_v33 = vcombine.high %v1691_v13, %v1691_v13 }
 0x1aa   : > { %v1745_v59 = vrot.slane %v1744_v10, 2  ;;  %v1766_v27 = vrot.slane %v1765_v18, 2  ;;  %v1785_v22 = vrot.slane %v1784_v28, 4  ;;  %v1700_v38 = vcombine.high %v1698_v24, %v1698_v24 }
 0x1ab   : > { %v1759_v34 = vrot.slane %v1758_v14, 2  ;;  %v1716_v39 = vcombine.high %v1708_v17, %v1708_v17  ;;  %v1717_v40 = vcombine.high %v1715_v25, %v1715_v25  ;;  %v1779_v41 = vmax.f32 %v1777_v8, %v1778_v26 }
 0x1ac   : > { %v1739_v42 = vmax.f32 %v1737_v9, %v1738_v29  ;;  %v1746_v43 = vmax.f32 %v1744_v10, %v1745_v59  ;;  %v1753_v44 = vmax.f32 %v1751_v11, %v1752_v19  ;;  %v1773_v45 = vrot.slane %v1772_v32, 2 }
 0x1ad   : > { %v1760_v46 = vmax.f32 %v1758_v14, %v1759_v34  ;;  %v1791_v47 = vsel %vm1734_vm6, %v1691_v13, -inf  ;;  %v1798_v48 = vsel %vm1734_vm6, %v1699_v33, -inf  ;;  %v1805_v49 = vsel %vm1734_vm6, %v1698_v24, -inf }
 0x1ae   : > { %v1767_v50 = vmax.f32 %v1765_v18, %v1766_v27  ;;  %v1786_v51 = vmax.f32 %v1784_v28, %v1785_v22  ;;  %v1792_v52 = vrot.slane %v1791_v47, 4  ;;  %v1799_v53 = vrot.slane %v1798_v48, 4 }
 0x1af   : > { %v1806_v54 = vrot.slane %v1805_v49, 4  ;;  %v1812_v55 = vsel %vm1734_vm6, %v1700_v38, -inf  ;;  %v1819_v56 = vsel %vm1734_vm6, %v1708_v17, -inf  ;;  %v1826_v57 = vsel %vm1734_vm6, %v1716_v39, -inf }
 0x1b0   : > { %v1780_v58 = vrot.slane %v1779_v41, 2  ;;  %v1793_v60 = vmax.f32 %v1791_v47, %v1792_v52  ;;  %v1800_v61 = vmax.f32 %v1798_v48, %v1799_v53  ;;  %v1813_v62 = vrot.slane %v1812_v55, 4 }
 0x1b1   : > { %v1807_v63 = vmax.f32 %v1805_v49, %v1806_v54  ;;  %v1820_v0 = vrot.slane %v1819_v56, 4  ;;  %v1827_v1 = vrot.slane %v1826_v57, 4  ;;  %v1833_v2 = vsel %vm1734_vm6, %v1715_v25, -inf }
 0x1b2   : > { %v1740_v3 = vrot.slane %v1739_v42, 1  ;;  %v1787_v4 = vrot.slane %v1786_v51, 2  ;;  %v1814_v5 = vmax.f32 %v1812_v55, %v1813_v62  ;;  %v1834_v6 = vrot.slane %v1833_v2, 4 }
 0x1b3   : > { %v1747_v7 = vrot.slane %v1746_v43, 1  ;;  %v1794_v8 = vrot.slane %v1793_v60, 2  ;;  %v1821_v9 = vmax.f32 %v1819_v56, %v1820_v0  ;;  %v1840_v10 = vsel %vm1734_vm6, %v1717_v40, -inf }
 0x1b4   : > { %v1754_v11 = vrot.slane %v1753_v44, 1  ;;  %v1774_v12 = vmax.f32 %v1772_v32, %v1773_v45  ;;  %v1801_v13 = vrot.slane %v1800_v61, 2  ;;  %v1828_v14 = vmax.f32 %v1826_v57, %v1827_v1 }
 0x1b5   : > { %v1781_v15 = vmax.f32 %v1779_v41, %v1780_v58  ;;  %v1808_v16 = vrot.slane %v1807_v63, 2  ;;  %v1835_v17 = vmax.f32 %v1833_v2, %v1834_v6  ;;  %v1841_v18 = vrot.slane %v1840_v10, 4 }
 0x1b6   : > { %v1761_v20 = vrot.slane %v1760_v46, 1  ;;  %v1768_v21 = vrot.slane %v1767_v50, 1  ;;  %v1788_v23 = vmax.f32 %v1786_v51, %v1787_v4  ;;  %v1815_v24 = vrot.slane %v1814_v5, 2 }
 0x1b7   : > { %v1741_v25 = vmax.f32 %v1739_v42, %v1740_v3  ;;  %v1795_v26 = vmax.f32 %v1793_v60, %v1794_v8  ;;  %v1822_v28 = vrot.slane %v1821_v9, 2  ;;  %v1842_v29 = vmax.f32 %v1840_v10, %v1841_v18 }
 0x1b8   : > { %v1748_v59 = vmax.f32 %v1746_v43, %v1747_v7  ;;  %v1775_v19 = vrot.slane %v1774_v12, 1  ;;  %v1802_v33 = vmax.f32 %v1800_v61, %v1801_v13  ;;  %v1829_v34 = vrot.slane %v1828_v14, 2 }
 0x1b9   : > { %v1755_v27 = vmax.f32 %v1753_v44, %v1754_v11  ;;  %v1782_v32 = vrot.slane %v1781_v15, 1  ;;  %v1809_v22 = vmax.f32 %v1807_v63, %v1808_v16  ;;  %v1836_v38 = vrot.slane %v1835_v17, 2 }
 0x1ba   : > { %v1762_v39 = vmax.f32 %v1760_v46, %v1761_v20  ;;  %v1789_v40 = vrot.slane %v1788_v23, 1  ;;  %v1816_v41 = vmax.f32 %v1814_v5, %v1815_v24  ;;  %v1843_v45 = vrot.slane %v1842_v29, 2 }
 0x1bb   : > { %v1769_v47 = vmax.f32 %v1767_v50, %v1768_v21  ;;  %v1796_v48 = vrot.slane %v1795_v26, 1  ;;  %v1823_v49 = vmax.f32 %v1821_v9, %v1822_v28  ;;  %v1869_v42 = vadd.f32 %v3440_v35, %v1741_v25 }
 0x1bc   : > { %v1776_v51 = vmax.f32 %v1774_v12, %v1775_v19  ;;  %v1803_v52 = vrot.slane %v1802_v33, 1  ;;  %v1830_v53 = vmax.f32 %v1828_v14, %v1829_v34  ;;  %v1870_v43 = vadd.f32 %v3444_v30, %v1748_v59 }
 0x1bd   : > { %v1783_v54 = vmax.f32 %v1781_v15, %v1782_v32  ;;  %v1810_v55 = vrot.slane %v1809_v22, 1  ;;  %v1837_v44 = vmax.f32 %v1835_v17, %v1836_v38  ;;  %v1871_v56 = vadd.f32 %v3442_v36, %v1755_v27 }
 0x1be   : > { %v1790_v57 = vmax.f32 %v1788_v23, %v1789_v40  ;;  %v1817_v46 = vrot.slane %v1816_v41, 1  ;;  %v1844_v58 = vmax.f32 %v1842_v29, %v1843_v45  ;;  %v1872_v60 = vadd.f32 %v3446_v37, %v1762_v39 }
 0x1bf   : > { %v1797_v50 = vmax.f32 %v1795_v26, %v1796_v48  ;;  %v1824_v61 = vrot.slane %v1823_v49, 1  ;;  %v1873_v62 = vadd.f32 %v3440_v35, %v1769_v47  ;;  %2716 = vtanh.f32 %v1869_v42 }
 0x1c0   : > { %v1804_v63 = vmax.f32 %v1802_v33, %v1803_v52  ;;  %v1831_v0 = vrot.slane %v1830_v53, 1  ;;  %v1874_v1 = vadd.f32 %v3444_v30, %v1776_v51  ;;  %2718 = vtanh.f32 %v1870_v43 }
 0x1c1   : > { %v1811_v2 = vmax.f32 %v1809_v22, %v1810_v55  ;;  %v1838_v3 = vrot.slane %v1837_v44, 1  ;;  %v1875_v4 = vadd.f32 %v3442_v36, %v1783_v54  ;;  %2720 = vtanh.f32 %v1871_v56 }
 0x1c2   : > { %v1818_v5 = vmax.f32 %v1816_v41, %v1817_v46  ;;  %v1845_v6 = vrot.slane %v1844_v58, 1  ;;  %v1876_v7 = vadd.f32 %v3446_v37, %v1790_v57  ;;  %2722 = vtanh.f32 %v1872_v60 }
 0x1c3   : > { %v1825_v8 = vmax.f32 %v1823_v49, %v1824_v61  ;;  %v1877_v9 = vadd.f32 %v3440_v35, %v1797_v50  ;;  %2724 = vtanh.f32 %v1873_v62  ;;  %v1832_v10 = vmax.f32 %v1830_v53, %v1831_v0 }
 0x1c4   : > { %v1878_v11 = vadd.f32 %v3444_v30, %v1804_v63  ;;  %2726 = vtanh.f32 %v1874_v1  ;;  %v1839_v12 = vmax.f32 %v1837_v44, %v1838_v3  ;;  %v1879_v13 = vadd.f32 %v3442_v36, %v1811_v2 }
 0x1c5   : > { %2728 = vtanh.f32 %v1875_v4  ;;  %v1846_v14 = vmax.f32 %v1844_v58, %v1845_v6  ;;  %v1880_v15 = vadd.f32 %v3446_v37, %v1818_v5  ;;  %v1881_v16 = vadd.f32 %v3440_v35, %v1825_v8 }
 0x1c6   : > { %2730 = vtanh.f32 %v1876_v7  ;;  %v1882_v17 = vadd.f32 %v3444_v30, %v1832_v10  ;;  %v1883_v20 = vadd.f32 %v3442_v36, %v1839_v12 }
 0x1c7   : > { %2732 = vtanh.f32 %v1877_v9  ;;  %v1884_v23 = vadd.f32 %v3446_v37, %v1846_v14 }
 0x1c8   : > { %2734 = vtanh.f32 %v1878_v11 }
 0x1c9   : > { %v2717_v18 = vpop.eup %2716  ;;  %2736 = vtanh.f32 %v1879_v13 }
 0x1ca   : > { %v2719_v21 = vpop.eup %2718  ;;  %2738 = vtanh.f32 %v1880_v15 }
 0x1cb   : > { %v2721_v24 = vpop.eup %2720  ;;  %2740 = vtanh.f32 %v1881_v16  ;;  %v2385_v25 = vpack.c.bf16 %v2719_v21, %v2717_v18 }
 0x1cc   : > { %v2723_v26 = vpop.eup %2722  ;;  %2742 = vtanh.f32 %v1882_v17 }
 0x1cd   : > { %v2725_v28 = vpop.eup %2724  ;;  %2744 = vtanh.f32 %v1883_v20  ;;  %v2386_v35 = vpack.c.bf16 %v2723_v26, %v2721_v24  ;;  %v1941_v29 = vrot.slane %v2385_v25, %v3411_v31 }
 0x1ce   : > { %v2727_v30 = vpop.eup %2726  ;;  %2746 = vtanh.f32 %v1884_v23 }
 0x1cf   : > { %v2729_v59 = vpop.eup %2728  ;;  %v1948_v36 = vrot.slane %v2386_v35, %v3411_v31  ;;  %v2387_v19 = vpack.c.bf16 %v2727_v30, %v2725_v28 }
 0x1d0   : > { %v2731_v33 = vpop.eup %2730 }
 0x1d1   : > { %v2733_v34 = vpop.eup %2732  ;;  %v1949_v37 = vcombine.low %v1941_v29, %v1948_v36  ;;  %v2388_v27 = vpack.c.bf16 %v2731_v33, %v2729_v59  ;;  %v1958_v32 = vrot.slane %v2387_v19, %v3411_v31  ;;  %v2393_v22 = vcombine.low %v1948_v36, %v1948_v36 }
 0x1d2   : > { %v2735_v38 = vpop.eup %2734 }
 0x1d3   : > { %v2737_v39 = vpop.eup %2736  ;;  %v1965_v40 = vrot.slane %v2388_v27, %v3411_v31  ;;  %v2389_v41 = vpack.c.bf16 %v2735_v38, %v2733_v34  ;;  %v2008_v47 = vrot.slane %v1949_v37, %v3411_v31  ;;  %v2015_v48 = vrot.slane %v2393_v22, %v3411_v31 }
 0x1d4   : > { %v2739_v45 = vpop.eup %2738 }
 0x1d5   : > { %v2741_v49 = vpop.eup %2740  ;;  %v1966_v42 = vcombine.low %v1958_v32, %v1965_v40  ;;  %v2390_v51 = vpack.c.bf16 %v2739_v45, %v2737_v39  ;;  %v1975_v52 = vrot.slane %v2389_v41, %v3411_v31  ;;  %v2394_v53 = vcombine.low %v1965_v40, %v1965_v40 }
 0x1d6   : > { %v2743_v43 = vpop.eup %2742  ;;  %v2061_v58 = vunpack.c.l.b16 %v2008_v47  ;;  %v2062_v60 = vunpack.c.h.b16 %v2008_v47  ;;  %v2063_v50 = vunpack.c.l.b16 %v2015_v48  ;;  %v2064_v8 = vunpack.c.h.b16 %v2015_v48 }
 0x1d7   : > { %v2745_v54 = vpop.eup %2744  ;;  %v1982_v55 = vrot.slane %v2390_v51, %v3411_v31  ;;  %v2391_v44 = vpack.c.bf16 %v2743_v43, %v2741_v49  ;;  %v2023_v56 = vrot.slane %v1966_v42, %v3411_v31  ;;  %v2030_v57 = vrot.slane %v2394_v53, %v3411_v31 }
 0x1d8   : > { %v2747_v46 = vpop.eup %2746 }
 0x1d9   : > { %v1983_v61 = vcombine.low %v1975_v52, %v1982_v55  ;;  %v2392_v62 = vpack.c.bf16 %v2747_v46, %v2745_v54  ;;  %v1992_v63 = vrot.slane %v2391_v44, %v3411_v31  ;;  %v2395_v0 = vcombine.low %v1982_v55, %v1982_v55 }
 0x1da   : > { %v2065_v1 = vunpack.c.l.b16 %v2023_v56  ;;  %v2066_v2 = vunpack.c.h.b16 %v2023_v56  ;;  %v2067_v3 = vunpack.c.l.b16 %v2030_v57  ;;  %v2068_v4 = vunpack.c.h.b16 %v2030_v57 }
 0x1db   : > { %v1999_v5 = vrot.slane %v2392_v62, %v3411_v31  ;;  %v2038_v6 = vrot.slane %v1983_v61, %v3411_v31  ;;  %v2045_v7 = vrot.slane %v2395_v0, %v3411_v31 }
 0x1dc   : > { %v2077_v9 = vrot.slane %v2065_v1, 7  ;;  %v2086_v10 = vrot.slane %v2066_v2, 7  ;;  %v2092_v11 = vrot.slane %v2067_v3, 7  ;;  %v2098_v12 = vrot.slane %v2068_v4, 7 }
 0x1dd   : > { %v2000_v13 = vcombine.low %v1992_v63, %v1999_v5  ;;  %v2396_v14 = vcombine.low %v1999_v5, %v1999_v5  ;;  %v2069_v15 = vunpack.c.l.b16 %v2038_v6  ;;  %v2070_v16 = vunpack.c.h.b16 %v2038_v6 }
 0x1de   : > { %v2071_v17 = vunpack.c.l.b16 %v2045_v7  ;;  %v2072_v18 = vunpack.c.h.b16 %v2045_v7  ;;  %v2079_v20 = vsel %vm2078_vm7, %v2077_v9, %v2061_v58  ;;  %v2087_v21 = vsel %vm2078_vm7, %v2086_v10, %v2062_v60 }
 0x1df   : > { %v2053_v23 = vrot.slane %v2000_v13, %v3411_v31  ;;  %v2060_v24 = vrot.slane %v2396_v14, %v3411_v31  ;;  %v2080_v25 = vrot.slane %v2069_v15, 6  ;;  %v2088_v26 = vrot.slane %v2070_v16, 6 }
 0x1e0   : > { %v2093_v28 = vsel %vm2078_vm7, %v2092_v11, %v2063_v50  ;;  %v2094_v35 = vrot.slane %v2071_v17, 6  ;;  %v2099_v29 = vsel %vm2078_vm7, %v2098_v12, %v2064_v8  ;;  %v2100_v30 = vrot.slane %v2072_v18, 6 }
 0x1e1   : > { %v2073_v59 = vunpack.c.l.b16 %v2053_v23  ;;  %v2074_v36 = vunpack.c.h.b16 %v2053_v23  ;;  %v2075_v19 = vunpack.c.l.b16 %v2060_v24  ;;  %v2076_v33 = vunpack.c.h.b16 %v2060_v24 }
 0x1e2   : > { %v2082_v34 = vsel %vm2081_vm8, %v2080_v25, %v2079_v20  ;;  %v2089_v37 = vsel %vm2081_vm8, %v2088_v26, %v2087_v21  ;;  %v2095_v27 = vsel %vm2081_vm8, %v2094_v35, %v2093_v28  ;;  %v2101_v32 = vsel %vm2081_vm8, %v2100_v30, %v2099_v29 }
 0x1e3   : > { %v2083_v22 = vrot.slane %v2073_v59, 5  ;;  %v2090_v38 = vrot.slane %v2074_v36, 5  ;;  %v2096_v39 = vrot.slane %v2075_v19, 5  ;;  %v2102_v40 = vrot.slane %v2076_v33, 5 }
 0x1e5   : > { %v2085_v41 = vsel %vm2084_vm9, %v2083_v22, %v2082_v34  ;;  %v2091_v45 = vsel %vm2084_vm9, %v2090_v38, %v2089_v37  ;;  %v2097_v47 = vsel %vm2084_vm9, %v2096_v39, %v2095_v27  ;;  %v2103_v48 = vsel %vm2084_vm9, %v2102_v40, %v2101_v32 }
 0x1e6   : > { %v2104_v49 = vpack.c.b16 %v2091_v45, %v2085_v41  ;;  %v2105_v42 = vpack.c.b16 %v2103_v48, %v2097_v47 }
 0x1e8   : > { %v2112_v51 = vrot.slane %v2104_v49, %v3411_v31  ;;  %v2119_v52 = vrot.slane %v2105_v42, %v3411_v31 }
 0x1ea   : > { %v2120_v53 = vcombine.low %v2112_v51, %v2119_v52 }
 0x1ec   : > { %2122 = vst [vmem:[%s170_s18] sm:$0xff] %v2120_v53 }
 0x1ed PF: > { %s13_s12 = sadd.s32 1, %s2754_s12  }
 0x1ee   : > { %p10_p4 = scmp.ge.s32.totalorder %s13_s12, 4  }
 0x1f0   :  { %12 = sbr.rel (!%p10_p4) target bundleno = 1 (0x1), region = 62 }

// kernel: cae1d_forward.16
= control target key start
LH: loop header
LB: loop body
LE: loop exit
PB: predicated region body
PF: predicated region fallthrough
CT: control target
= control target key end

     0   :  { %s1155_s12 = smov 0   ;;  %s1360_s0 = inlined_call_operand.vmem [shape: bf16[2,9,256], index: 0, kind: input, shape index: {}]   ;;  %s1361_s1 = inlined_call_operand.vmem [shape: bf16[256,384], index: 1, kind: input, shape index: {}]   ;;  %s1362_s2 = inlined_call_operand.vmem [shape: f32[1,128], index: 2, kind: input, shape index: {}]   ;;  %s1363_s3 = inlined_call_operand.vmem [shape: bf16[2,19,128], index: 3, kind: output, shape index: {}]  }
   0x1 LB: > { %s941_s13 = sadd.s32 4294967295, %s1131_s12   ;;  %p945_p0 = scmp.ge.s32.totalorder %s1131_s12, 1  ;;  %s1131_s12 = sphi %s1155_s12, %s13_s12  }
   0x2   : > { %p137_p1 = scmp.lt.s32.totalorder %s1131_s12, 3 }
   0x4   : > { %p138_p2 = pnand %p945_p0, %p137_p1 }
   0x5   : > { %v1048_v0 = vld [vmem:[%s1361_s1 + $0x4] ss:$12 sps:$4 sm:$0xff] (!%p138_p2)   ;;  %v1050_v1 = vld [vmem:[%s1361_s1] ss:$12 sps:$4 sm:$0xff] (!%p138_p2)   ;;  %v1051_v2 = vld [vmem:[%s1361_s1 + $0x1c] ss:$12 sps:$4 sm:$0xff] (!%p138_p2)   ;;  %v597_v58 = vlaneseq (!%p138_p2) }
   0x6   : > { %141 = sbr.rel (%p138_p2) target bundleno = 319 (0x13f), region = 32  ;;  %504 = vmatprep.subr.bf16.mxu0 (!%p138_p2), %v1048_v0  ;;  %v1053_v3 = vld [vmem:[%s1361_s1 + $0x18] ss:$12 sps:$4 sm:$0xff] (!%p138_p2)   ;;  %v1054_v4 = vld [vmem:[%s1361_s1 + $0x34] ss:$12 sps:$4 sm:$0xff] (!%p138_p2)   ;;  %p161_p3 = scmp.lt.s32.totalorder (!%p138_p2), %s941_s13, 1 }
   0x7   : > { %505 = vmatpush1.bf16.msra.mxu0 (!%p138_p2), %v1050_v1  ;;  %v1056_v5 = vld [vmem:[%s1361_s1 + $0x30] ss:$12 sps:$4 sm:$0xff] (!%p138_p2)   ;;  %v1057_v6 = vld [vmem:[%s1361_s1 + $0x4c] ss:$12 sps:$4 sm:$0xff] (!%p138_p2)   ;;  %v1068_v7 = vld [vmem:[%s1361_s1 + $0xc8] ss:$12 sps:$4 sm:$0xff] (!%p138_p2)  }
   0x8   : > { %506 = vmatprep.subr.bf16.mxu0 (!%p138_p2), %v1051_v2  ;;  %v1059_v8 = vld [vmem:[%s1361_s1 + $0x48] ss:$12 sps:$4 sm:$0xff] (!%p138_p2)   ;;  %1015 = vmatprep.subr.bf16.mxu1 (!%p138_p2), %v1068_v7  ;;  %v1060_v10 = vld [vmem:[%s1361_s1 + $0x64] ss:$12 sps:$4 sm:$0xff] (!%p138_p2)   ;;  %v1073_v11 = vld [vmem:[%s1361_s1 + $0xe0] ss:$12 sps:$4 sm:$0xff] (!%p138_p2)  }
   0x9   : > { %v1070_v9 = vld [vmem:[%s1361_s1 + $0x8] ss:$12 sps:$4 sm:$0xff] (!%p138_p2)   ;;  %v1075_v12 = vld [vmem:[%s1361_s1 + $0x20] ss:$12 sps:$4 sm:$0xff] (!%p138_p2)   ;;  %v1078_v15 = vld [vmem:[%s1361_s1 + $0xf8] ss:$12 sps:$4 sm:$0xff] (!%p138_p2)  }
   0xa   : > { %1016 = vmatpush3.bf16.msra.mxu1 (!%p138_p2), %v1070_v9  ;;  %v1062_v13 = vld [vmem:[%s1361_s1 + $0x60] ss:$12 sps:$4 sm:$0xff] (!%p138_p2)   ;;  %v1063_v14 = vld [vmem:[%s1361_s1 + $0x7c] ss:$12 sps:$4 sm:$0xff] (!%p138_p2)   ;;  %v1080_v16 = vld [vmem:[%s1361_s1 + $0x38] ss:$12 sps:$4 sm:$0xff] (!%p138_p2)  }
   0xb   : > { %507 = vmatpush1.bf16.msra.mxu0 (!%p138_p2), %v1053_v3  ;;  %1017 = vmatprep.subr.bf16.mxu1 (!%p138_p2), %v1073_v11  ;;  %v1065_v17 = vld [vmem:[%s1361_s1 + $0x78] ss:$12 sps:$4 sm:$0xff] (!%p138_p2)   ;;  %v1083_v18 = vld [vmem:[%s1361_s1 + $0x110] ss:$12 sps:$4 sm:$0xff] (!%p138_p2)   ;;  %v1066_v19 = vld [vmem:[%s1361_s1 + $0x94] ss:$12 sps:$4 sm:$0xff] (!%p138_p2)  }
   0xc   : > { %508 = vmatprep.subr.bf16.mxu0 (!%p138_p2), %v1054_v4  ;;  %v1085_v20 = vld [vmem:[%s1361_s1 + $0x50] ss:$12 sps:$4 sm:$0xff] (!%p138_p2)   ;;  %v1088_v22 = vld [vmem:[%s1361_s1 + $0x128] ss:$12 sps:$4 sm:$0xff] (!%p138_p2)   ;;  %v1071_v23 = vld [vmem:[%s1361_s1 + $0xac] ss:$12 sps:$4 sm:$0xff] (!%p138_p2)  }
   0xd   : > { %v1069_v21 = vld [vmem:[%s1361_s1 + $0x90] ss:$12 sps:$4 sm:$0xff]   ;;  %s1365_s13 = smov (!%p161_p3, %s941_s13), 1  ;;  %v1090_v24 = vld [vmem:[%s1361_s1 + $0x68] ss:$12 sps:$4 sm:$0xff]   ;;  %v1320_v59 = vshrl.u32 %v597_v58, 7 }
   0xe   : > { %1018 = vmatpush3.bf16.msra.mxu1 %v1075_v12  ;;  %v1093_v25 = vld [vmem:[%s1361_s1 + $0x140] ss:$12 sps:$4 sm:$0xff]   ;;  %v1074_v26 = vld [vmem:[%s1361_s1 + $0xa8] ss:$12 sps:$4 sm:$0xff]   ;;  %v1076_v27 = vld [vmem:[%s1361_s1 + $0xc4] ss:$12 sps:$4 sm:$0xff]  }
   0xf   : > { %509 = vmatpush1.bf16.msra.mxu0 %v1056_v5  ;;  %1019 = vmatprep.subr.bf16.mxu1 %v1078_v15  ;;  %s1005_s20 = sshll.u32 %s1365_s13, 4  ;;  %v1095_v28 = vld [vmem:[%s1361_s1 + $0x80] ss:$12 sps:$4 sm:$0xff]   ;;  %v1098_v29 = vld [vmem:[%s1361_s1 + $0x158] ss:$12 sps:$4 sm:$0xff]   ;;  %s1037_s16 = smul.u32 12, %s1365_s13 }
  0x10   : > { %510 = vmatprep.subr.bf16.mxu0 %v1057_v6  ;;  %v1079_v30 = vld [vmem:[%s1361_s1 + $0xc0] ss:$12 sps:$4 sm:$0xff]   ;;  %v1081_v31 = vld [vmem:[%s1361_s1 + $0xdc] ss:$12 sps:$4 sm:$0xff]   ;;  %v1100_v32 = vld [vmem:[%s1361_s1 + $0x98] ss:$12 sps:$4 sm:$0xff]   ;;  %s165_s6 = scalar_lea.vmem %s1360_s0, %s1005_s20 }
  0x11   : > { %v1103_v33 = vld [vmem:[%s1361_s1 + $0x170] ss:$12 sps:$4 sm:$0xff]   ;;  %v1084_v34 = vld [vmem:[%s1361_s1 + $0xd8] ss:$12 sps:$4 sm:$0xff]   ;;  %v1086_v35 = vld [vmem:[%s1361_s1 + $0xf4] ss:$12 sps:$4 sm:$0xff]   ;;  %s1329_s19 = scalar_lea.vmem %s1363_s3, %s1037_s16 }
  0x12   : > { %1020 = vmatpush3.bf16.msra.mxu1 %v1080_v16  ;;  %v1108_v36 = vld [vmem:[%s165_s6 + $0x4] ss:$8 sps:$4 sm:$0x1f]   ;;  %v1105_v37 = vld [vmem:[%s1361_s1 + $0xb0] ss:$12 sps:$4 sm:$0xff]   ;;  %v1324_v61 = vsub.s32 0, %v1320_v59 }
  0x13   : > { %511 = vmatpush1.bf16.msra.mxu0 %v1059_v8  ;;  %1021 = vmatprep.subr.bf16.mxu1 %v1083_v18  ;;  %v1089_v38 = vld [vmem:[%s1361_s1 + $0xf0] ss:$12 sps:$4 sm:$0xff]   ;;  %v1091_v39 = vld [vmem:[%s1361_s1 + $0x10c] ss:$12 sps:$4 sm:$0xff]   ;;  %v1094_v41 = vld [vmem:[%s1361_s1 + $0x108] ss:$12 sps:$4 sm:$0xff]  }
  0x14   : > { %512 = vmatprep.subr.bf16.mxu0 %v1060_v10  ;;  %579 = vmatprep.mubr.bf16.mxu1 %v1108_v36  ;;  %v1106_v40 = vld [vmem:[%s165_s6] ss:$8 sps:$4 sm:$0x1f]   ;;  %v1096_v42 = vld [vmem:[%s1361_s1 + $0x124] ss:$12 sps:$4 sm:$0xff]   ;;  %vm880_vm0 = vcmask 1041409  }
  0x15   : > { %536 = vmatprep.mubr.bf16.mxu0 %v1108_v36  ;;  %v1099_v43 = vld [vmem:[%s1361_s1 + $0x120] ss:$12 sps:$4 sm:$0xff]   ;;  %v1101_v44 = vld [vmem:[%s1361_s1 + $0x13c] ss:$12 sps:$4 sm:$0xff]   ;;  %v1104_v45 = vld [vmem:[%s1361_s1 + $0x138] ss:$12 sps:$4 sm:$0xff]  }
  0x16   : > { %1022 = vmatpush3.bf16.msra.mxu1 %v1085_v20  ;;  %v1109_v46 = vld [vmem:[%s1361_s1 + $0x154] ss:$12 sps:$4 sm:$0xff]   ;;  %v1111_v47 = vld [vmem:[%s1361_s1 + $0x150] ss:$12 sps:$4 sm:$0xff]   ;;  %v1112_v48 = vld [vmem:[%s1361_s1 + $0x16c] ss:$12 sps:$4 sm:$0xff]  }
  0x17   : > { %513 = vmatpush1.bf16.msra.mxu0 %v1062_v13  ;;  %1023 = vmatprep.subr.bf16.mxu1 %v1088_v22  ;;  %v1114_v49 = vld [vmem:[%s1361_s1 + $0x168] ss:$12 sps:$4 sm:$0xff]   ;;  %v588_v55 = vld [vmem:[%s1362_s2] sm:$0x1]  ;;  %vm881_vm1 = vsmask.f32 1280 }
  0x18   : > { %514 = vmatprep.subr.bf16.mxu0 %v1063_v14  ;;  %vm592_vm2 = vcmask 1040384   ;;  %v883_v0 = vld [vmem:[%s1329_s19 + $0x8] sm:$0x2]  ;;  %v600_v1 = vrot.slane %v588_v55, %v1324_v61  ;;  %vm882_vm3 = vmand %vm880_vm0, %vm881_vm1  ;;  %v1133_v10 = vmov 1966171168  }
  0x19   : > { %v616_v11 = vunpack.c.l.s4 %v1133_v10 }
  0x1a   : > { %1024 = vmatpush3.bf16.msra.mxu1 %v1090_v24 }
  0x1b   : > { %515 = vmatpush1.bf16.msra.mxu0 %v1065_v17  ;;  %1025 = vmatprep.subr.bf16.mxu1 %v1093_v25  ;;  %v617_v17 = vunpack.c.0.s8 %v616_v11 }
  0x1c   : > { %516 = vmatprep.subr.bf16.mxu0 %v1066_v19  ;;  %v1134_v19 = vmov 1983009808  }
  0x1d   : > { %v620_v18 = vsub.s32 %v617_v17, %v1320_v59  ;;  %v817_v20 = vunpack.c.l.s4 %v1134_v19 }
  0x1e   : > { %1026 = vmatpush3.bf16.msra.mxu1 %v1095_v28 }
  0x1f   : > { %517 = vmatpush1.bf16.msra.mxu0 %v1069_v21  ;;  %1027 = vmatprep.subr.bf16.mxu1 %v1098_v29  ;;  %v818_v28 = vunpack.c.0.s8 %v817_v20 }
  0x20   : > { %518 = vmatprep.subr.bf16.mxu0 %v1071_v23 }
  0x21   : > { %v821_v10 = vsub.s32 %v818_v28, %v1320_v59 }
  0x22   : > { %1028 = vmatpush3.bf16.msra.mxu1 %v1100_v32 }
  0x23   : > { %519 = vmatpush1.bf16.msra.mxu0 %v1074_v26  ;;  %1029 = vmatprep.subr.bf16.mxu1 %v1103_v33 }
  0x24   : > { %520 = vmatprep.subr.bf16.mxu0 %v1076_v27 }
  0x26   : > { %1030 = vmatpush3.bf16.msra.mxu1 %v1105_v37 }
  0x27   : > { %521 = vmatpush1.bf16.msra.mxu0 %v1079_v30 }
  0x28   : > { %522 = vmatprep.subr.bf16.mxu0 %v1081_v31 }
  0x29   : > { %580 = vmatmul.mubr.bf16.vlgmr.msra.gmra.mrb[0].mxu1 %v1106_v40 }
  0x2b   : > { %523 = vmatpush1.bf16.msra.mxu0 %v1084_v34 }
  0x2c   : > { %524 = vmatprep.subr.bf16.mxu0 %v1086_v35 }
  0x2f   : > { %525 = vmatpush1.bf16.msra.mxu0 %v1089_v38 }
  0x30   : > { %526 = vmatprep.subr.bf16.mxu0 %v1091_v39 }
  0x33   : > { %527 = vmatpush1.bf16.msra.mxu0 %v1094_v41 }
  0x34   : > { %528 = vmatprep.subr.bf16.mxu0 %v1096_v42 }
  0x37   : > { %529 = vmatpush1.bf16.msra.mxu0 %v1099_v43 }
  0x38   : > { %530 = vmatprep.subr.bf16.mxu0 %v1101_v44 }
  0x3b   : > { %531 = vmatpush1.bf16.msra.mxu0 %v1104_v45 }
  0x3c   : > { %532 = vmatprep.subr.bf16.mxu0 %v1109_v46 }
  0x3f   : > { %533 = vmatpush1.bf16.msra.mxu0 %v1111_v47 }
  0x40   : > { %534 = vmatprep.subr.bf16.mxu0 %v1112_v48 }
  0x43   : > { %535 = vmatpush1.bf16.msra.mxu0 %v1114_v49 }
  0x46   : > { %537 = vmatmul.mubr.bf16.vlgmr.msra.gmra.mrb[0].mxu0 %v1106_v40 }
  0xfc   : > { %v1031_v50 = vpop.f32.mrb[0].mxu1 }
  0xfd   : > { %v1032_v51 = vpop.f32.mrb[1].mxu1 }
  0xfe   : > { %v1033_v52 = vadd.f32 %v1032_v51, %v1031_v50  ;;  %v1034_v53 = vpop.f32.mrb[2].mxu1 }
  0xff   : > { %v1035_v54 = vpop.f32.mrb[3].mxu1 }
 0x100   : > { %v1036_v56 = vadd.f32 %v1035_v54, %v1034_v53  ;;  %v590_v60 = vrot.slane %v1033_v52, 7 }
 0x102   : > { %v610_v57 = vadd.f32 %v1036_v56, %v588_v55  ;;  %v593_v2 = vsel %vm592_vm2, 0.0, %v590_v60 }
 0x104   : > { %1115 = vtanh.f32 %v610_v57 }
 0x10e   : > { %v1116_v62 = vpop.eup %1115 }
 0x10f   : > { %v1009_v63 = vpack.c.bf16 %v1116_v62, %v1116_v62 }
 0x111   : > { %v878_v3 = vrot.slane %v1009_v63, 7 }
 0x113   : > { %v884_v5 = vsel %vm882_vm3, %v878_v3, %v883_v0 }
 0x114   : > { %885 = vst [vmem:[%s1329_s19 + $0x8] sm:$0x2] %v884_v5 }
 0x119   : > { %v538_v4 = vpop.f32.mrb[0].mxu0 }
 0x11a   : > { %v594_v6 = vadd.f32 %v593_v2, %v538_v4  ;;  %v540_v7 = vpop.f32.mrb[1].mxu0 }
 0x11b   : > { %v606_v8 = vadd.f32 %v600_v1, %v540_v7  ;;  %v542_v9 = vpop.f32.mrb[2].mxu0 }
 0x11c   : > { %v602_v12 = vadd.f32 %v600_v1, %v594_v6  ;;  %v595_v13 = vadd.f32 %v590_v60, %v542_v9  ;;  %v544_v14 = vpop.f32.mrb[3].mxu0 }
 0x11d   : > { %1117 = vtanh.f32 %v606_v8  ;;  %v607_v15 = vadd.f32 %v600_v1, %v544_v14 }
 0x11e   : > { %1119 = vtanh.f32 %v602_v12  ;;  %v603_v16 = vadd.f32 %v600_v1, %v595_v13 }
 0x11f   : > { %1121 = vtanh.f32 %v607_v15 }
 0x120   : > { %1123 = vtanh.f32 %v603_v16 }
 0x127   : > { %v1118_v21 = vpop.eup %1117 }
 0x128   : > { %v1120_v22 = vpop.eup %1119  ;;  %v688_v23 = vcombine.high %v1118_v21, %v1118_v21  ;;  %v695_v24 = vrot.slane %v1118_v21, %v620_v18 }
 0x129   : > { %v1122_v25 = vpop.eup %1121  ;;  %v614_v26 = vcombine.high %v1120_v22, %v1120_v22  ;;  %v621_v27 = vrot.slane %v1120_v22, %v620_v18 }
 0x12a   : > { %v1124_v29 = vpop.eup %1123  ;;  %v702_v30 = vrot.slane %v688_v23, %v620_v18  ;;  %v703_v31 = vcombine.high %v695_v24, %v695_v24  ;;  %v711_v32 = vrot.slane %v695_v24, %v620_v18  ;;  %v743_v33 = vrot.slane %v1122_v25, %v620_v18 }
 0x12b   : > { %v628_v34 = vrot.slane %v614_v26, %v620_v18  ;;  %v629_v35 = vcombine.high %v621_v27, %v621_v27  ;;  %v637_v36 = vrot.slane %v621_v27, %v620_v18  ;;  %v669_v37 = vrot.slane %v1124_v29, %v620_v18 }
 0x12c   : > { %v704_v38 = vcombine.high %v702_v30, %v702_v30  ;;  %v718_v39 = vrot.slane %v702_v30, %v620_v18  ;;  %v725_v40 = vrot.slane %v703_v31, %v620_v18  ;;  %v733_v41 = vcombine.high %v711_v32, %v711_v32 }
 0x12d   : > { %v630_v42 = vcombine.high %v628_v34, %v628_v34  ;;  %v644_v43 = vrot.slane %v628_v34, %v620_v18  ;;  %v651_v44 = vrot.slane %v629_v35, %v620_v18  ;;  %v659_v45 = vcombine.high %v637_v36, %v637_v36 }
 0x12e   : > { %v732_v46 = vrot.slane %v704_v38, %v620_v18  ;;  %v734_v47 = vcombine.high %v718_v39, %v718_v39  ;;  %v735_v48 = vcombine.high %v725_v40, %v725_v40  ;;  %v754_v49 = vrot.slane %v711_v32, %v1324_v61 }
 0x12f   : > { %v658_v50 = vrot.slane %v630_v42, %v620_v18  ;;  %v660_v51 = vcombine.high %v644_v43, %v644_v43  ;;  %v661_v52 = vcombine.high %v651_v44, %v651_v44  ;;  %v758_v53 = vrot.slane %v725_v40, %v1324_v61 }
 0x130   : > { %v736_v54 = vcombine.high %v732_v46, %v732_v46  ;;  %v762_v55 = vrot.slane %v733_v41, %v1324_v61  ;;  %v766_v56 = vrot.slane %v735_v48, %v1324_v61  ;;  %v770_v57 = vrot.slane %v718_v39, %v1324_v61 }
 0x131   : > { %v662_v58 = vcombine.high %v658_v50, %v658_v50  ;;  %v774_v60 = vrot.slane %v732_v46, %v1324_v61  ;;  %v778_v62 = vrot.slane %v734_v47, %v1324_v61  ;;  %v796_v63 = vsel %vm592_vm2, %v637_v36, %v754_v49 }
 0x132   : > { %v782_v0 = vrot.slane %v736_v54, %v1324_v61  ;;  %v797_v1 = vsel %vm592_vm2, %v651_v44, %v758_v53  ;;  %v798_v2 = vsel %vm592_vm2, %v659_v45, %v762_v55  ;;  %v799_v3 = vsel %vm592_vm2, %v661_v52, %v766_v56 }
 0x133   : > { %v800_v4 = vsel %vm592_vm2, %v644_v43, %v770_v57  ;;  %v801_v5 = vsel %vm592_vm2, %v658_v50, %v774_v60  ;;  %v802_v6 = vsel %vm592_vm2, %v660_v51, %v778_v62  ;;  %v814_v7 = vcombine.low %v796_v63, %v797_v1 }
 0x134   : > { %v803_v8 = vsel %vm592_vm2, %v662_v58, %v782_v0  ;;  %v815_v9 = vcombine.low %v798_v2, %v799_v3  ;;  %v831_v11 = vcombine.low %v800_v4, %v801_v5  ;;  %v676_v13 = vrot.slane %v669_v37, %v620_v18 }
 0x135   : > { %v832_v12 = vcombine.low %v802_v6, %v803_v8  ;;  %v750_v14 = vrot.slane %v743_v33, %v620_v18  ;;  %v822_v15 = vrot.slane %v814_v7, %v821_v10 }
 0x136   : > { %v829_v16 = vrot.slane %v815_v9, %v821_v10  ;;  %v839_v17 = vrot.slane %v831_v11, %v821_v10 }
 0x137   : > { %v846_v19 = vrot.slane %v832_v12, %v821_v10  ;;  %v786_v20 = vrot.slane %v750_v14, %v1324_v61 }
 0x138   : > { %v830_v21 = vcombine.low %v822_v15, %v829_v16 }
 0x139   : > { %v847_v22 = vcombine.low %v839_v17, %v846_v19  ;;  %v804_v23 = vsel %vm592_vm2, %v676_v13, %v786_v20 }
 0x13a   : > { %v854_v24 = vrot.slane %v804_v23, %v821_v10 }
 0x13b   : > { %v1013_v25 = vpack.c.bf16 %v847_v22, %v830_v21 }
 0x13c   : > { %v1008_v26 = vpack.c.bf16 %v854_v24, %v854_v24 }
 0x13d   : > { %1014 = vst [vmem:[%s1329_s19] sm:$0xff] %v1013_v25  }
 0x13e   : > { %873 = vst [vmem:[%s1329_s19 + $0x8] sm:$0x1] %v1008_v26 }
 0x13f PF: > { %s13_s12 = sadd.s32 1, %s1131_s12  }
 0x140   : > { %p10_p4 = scmp.ge.s32.totalorder %s13_s12, 4  }
 0x142   :  { %12 = sbr.rel (!%p10_p4) target bundleno = 1 (0x1), region = 62 }

// kernel: cae1d_forward.15
= control target key start
LH: loop header
LB: loop body
LE: loop exit
PB: predicated region body
PF: predicated region fallthrough
CT: control target
= control target key end

     0   :  { %s2471_s12 = smov 0   ;;  %s3154_s0 = inlined_call_operand.vmem [shape: bf16[2,4,512], index: 0, kind: input, shape index: {}]   ;;  %s3155_s1 = inlined_call_operand.vmem [shape: bf16[512,768], index: 1, kind: input, shape index: {}]   ;;  %s3156_s2 = inlined_call_operand.vmem [shape: f32[1,256], index: 2, kind: input, shape index: {}]   ;;  %s3157_s3 = inlined_call_operand.vmem [shape: bf16[2,9,256], index: 3, kind: output, shape index: {}]  }
   0x1 LB: > { %s1916_s13 = sadd.s32 4294967295, %s2447_s12   ;;  %p1920_p0 = scmp.ge.s32.totalorder %s2447_s12, 1  ;;  %s2447_s12 = sphi %s2471_s12, %s13_s12  }
   0x2   : > { %p137_p1 = scmp.lt.s32.totalorder %s2447_s12, 3 }
   0x4   : > { %p138_p2 = pnand %p1920_p0, %p137_p1 }
   0x5   : > { %v2140_v0 = vld [vmem:[%s3155_s1 + $0x4] ss:$24 sps:$4 sm:$0xff] (!%p138_p2)   ;;  %v2144_v2 = vld [vmem:[%s3155_s1] ss:$24 sps:$4 sm:$0xff] (!%p138_p2)   ;;  %v2146_v4 = vld [vmem:[%s3155_s1 + $0x34] ss:$24 sps:$4 sm:$0xff] (!%p138_p2)   ;;  %v369_v38 = vlaneseq (!%p138_p2) }
   0x6   : > { %141 = sbr.rel (%p138_p2) target bundleno = 456 (0x1c8), region = 32  ;;  %v2142_v1 = vld [vmem:[%s3155_s1 + $0xc] ss:$24 sps:$4 sm:$0xff] (!%p138_p2)   ;;  %1346 = vmatprep.subr.bf16.mxu1 (!%p138_p2), %v2140_v0  ;;  %v2145_v3 = vld [vmem:[%s3155_s1 + $0x8] ss:$24 sps:$4 sm:$0xff] (!%p138_p2)   ;;  %p161_p3 = scmp.lt.s32.totalorder (!%p138_p2), %s1916_s13, 1 }
   0x7   : > { %1428 = vmatprep.subr.bf16.mxu0 (!%p138_p2), %v2142_v1  ;;  %1347 = vmatpush1.bf16.msra.mxu1 (!%p138_p2), %v2144_v2  ;;  %v2148_v5 = vld [vmem:[%s3155_s1 + $0x3c] ss:$24 sps:$4 sm:$0xff] (!%p138_p2)   ;;  %v2150_v6 = vld [vmem:[%s3155_s1 + $0x30] ss:$24 sps:$4 sm:$0xff] (!%p138_p2)   ;;  %v2154_v9 = vld [vmem:[%s3155_s1 + $0x6c] ss:$24 sps:$4 sm:$0xff] (!%p138_p2)  }
   0x8   : > { %1429 = vmatpush1.bf16.msra.mxu0 (!%p138_p2), %v2145_v3  ;;  %1348 = vmatprep.subr.bf16.mxu1 (!%p138_p2), %v2146_v4  ;;  %v2151_v7 = vld [vmem:[%s3155_s1 + $0x38] ss:$24 sps:$4 sm:$0xff] (!%p138_p2)   ;;  %v2152_v8 = vld [vmem:[%s3155_s1 + $0x64] ss:$24 sps:$4 sm:$0xff] (!%p138_p2)   ;;  %v2157_v11 = vld [vmem:[%s3155_s1 + $0x68] ss:$24 sps:$4 sm:$0xff] (!%p138_p2)  }
   0x9   : > { %1430 = vmatprep.subr.bf16.mxu0 (!%p138_p2), %v2148_v5  ;;  %v2156_v10 = vld [vmem:[%s3155_s1 + $0x60] ss:$24 sps:$4 sm:$0xff] (!%p138_p2)   ;;  %v2158_v12 = vld [vmem:[%s3155_s1 + $0x94] ss:$24 sps:$4 sm:$0xff] (!%p138_p2)   ;;  %v2162_v14 = vld [vmem:[%s3155_s1 + $0x90] ss:$24 sps:$4 sm:$0xff] (!%p138_p2)  }
   0xa   : > { %v2160_v13 = vld [vmem:[%s3155_s1 + $0x9c] ss:$24 sps:$4 sm:$0xff] (!%p138_p2)   ;;  %v2163_v15 = vld [vmem:[%s3155_s1 + $0x98] ss:$24 sps:$4 sm:$0xff] (!%p138_p2)   ;;  %v2166_v17 = vld [vmem:[%s3155_s1 + $0xcc] ss:$24 sps:$4 sm:$0xff] (!%p138_p2)  }
   0xb   : > { %1349 = vmatpush1.bf16.msra.mxu1 (!%p138_p2), %v2150_v6  ;;  %v2164_v16 = vld [vmem:[%s3155_s1 + $0xc4] ss:$24 sps:$4 sm:$0xff] (!%p138_p2)   ;;  %v2168_v18 = vld [vmem:[%s3155_s1 + $0xc0] ss:$24 sps:$4 sm:$0xff] (!%p138_p2)   ;;  %v2170_v20 = vld [vmem:[%s3155_s1 + $0xf4] ss:$24 sps:$4 sm:$0xff] (!%p138_p2)  }
   0xc   : > { %1431 = vmatpush1.bf16.msra.mxu0 (!%p138_p2), %v2151_v7  ;;  %1350 = vmatprep.subr.bf16.mxu1 (!%p138_p2), %v2152_v8  ;;  %v2169_v19 = vld [vmem:[%s3155_s1 + $0xc8] ss:$24 sps:$4 sm:$0xff] (!%p138_p2)   ;;  %v2172_v21 = vld [vmem:[%s3155_s1 + $0xfc] ss:$24 sps:$4 sm:$0xff] (!%p138_p2)   ;;  %v2175_v23 = vld [vmem:[%s3155_s1 + $0xf8] ss:$24 sps:$4 sm:$0xff] (!%p138_p2)  }
   0xd   : > { %1432 = vmatprep.subr.bf16.mxu0 %v2154_v9  ;;  %v2174_v22 = vld [vmem:[%s3155_s1 + $0xf0] ss:$24 sps:$4 sm:$0xff]   ;;  %v2176_v24 = vld [vmem:[%s3155_s1 + $0x124] ss:$24 sps:$4 sm:$0xff]   ;;  %v2180_v26 = vld [vmem:[%s3155_s1 + $0x120] ss:$24 sps:$4 sm:$0xff]  }
   0xe   : > { %v2178_v25 = vld [vmem:[%s3155_s1 + $0x12c] ss:$24 sps:$4 sm:$0xff]   ;;  %v2181_v27 = vld [vmem:[%s3155_s1 + $0x128] ss:$24 sps:$4 sm:$0xff]   ;;  %v2184_v29 = vld [vmem:[%s3155_s1 + $0x15c] ss:$24 sps:$4 sm:$0xff]  }
   0xf   : > { %1351 = vmatpush1.bf16.msra.mxu1 %v2156_v10  ;;  %v2182_v28 = vld [vmem:[%s3155_s1 + $0x154] ss:$24 sps:$4 sm:$0xff]   ;;  %v2186_v30 = vld [vmem:[%s3155_s1 + $0x150] ss:$24 sps:$4 sm:$0xff]   ;;  %v2188_v32 = vld [vmem:[%s3155_s1 + $0x184] ss:$24 sps:$4 sm:$0xff]  }
  0x10   : > { %1433 = vmatpush1.bf16.msra.mxu0 %v2157_v11  ;;  %1352 = vmatprep.subr.bf16.mxu1 %v2158_v12  ;;  %v2187_v31 = vld [vmem:[%s3155_s1 + $0x158] ss:$24 sps:$4 sm:$0xff]   ;;  %v2190_v33 = vld [vmem:[%s3155_s1 + $0x18c] ss:$24 sps:$4 sm:$0xff]   ;;  %v2193_v35 = vld [vmem:[%s3155_s1 + $0x188] ss:$24 sps:$4 sm:$0xff]  }
  0x11   : > { %1434 = vmatprep.subr.bf16.mxu0 %v2160_v13  ;;  %v2192_v34 = vld [vmem:[%s3155_s1 + $0x180] ss:$24 sps:$4 sm:$0xff]   ;;  %v2449_v36 = vmov 1983009808   ;;  %v2194_v39 = vld [vmem:[%s3155_s1 + $0x1b4] ss:$24 sps:$4 sm:$0xff]  }
  0x12   : > { %v367_v37 = vunpack.c.l.s4 %v2449_v36  ;;  %s3161_s13 = smov (!%p161_p3, %s1916_s13), 1  ;;  %v2196_v40 = vld [vmem:[%s3155_s1 + $0x1bc] ss:$24 sps:$4 sm:$0xff]   ;;  %v2198_v41 = vld [vmem:[%s3155_s1 + $0x1b0] ss:$24 sps:$4 sm:$0xff]   ;;  %v2602_v43 = vshrl.u32 %v369_v38, 7 }
  0x13   : > { %1353 = vmatpush1.bf16.msra.mxu1 %v2162_v14  ;;  %v2199_v44 = vld [vmem:[%s3155_s1 + $0x1b8] ss:$24 sps:$4 sm:$0xff]   ;;  %v2200_v45 = vld [vmem:[%s3155_s1 + $0x1e4] ss:$24 sps:$4 sm:$0xff]   ;;  %s2122_s21 = sshll.u32 %s3161_s13, 3  ;;  %vm1599_vm0 = vcmask 1040384  }
  0x14   : > { %1435 = vmatpush1.bf16.msra.mxu0 %v2163_v15  ;;  %1354 = vmatprep.subr.bf16.mxu1 %v2164_v16  ;;  %v368_v42 = vunpack.c.0.s8 %v367_v37  ;;  %v2202_v46 = vld [vmem:[%s3155_s1 + $0x1ec] ss:$24 sps:$4 sm:$0xff]   ;;  %v2204_v47 = vld [vmem:[%s3155_s1 + $0x1e0] ss:$24 sps:$4 sm:$0xff]   ;;  %s165_s30 = scalar_lea.vmem %s3154_s0, %s2122_s21  ;;  %v2208_v51 = vld [vmem:[%s3155_s1 + $0x21c] ss:$24 sps:$4 sm:$0xff]  }
  0x15   : > { %1436 = vmatprep.subr.bf16.mxu0 %v2166_v17  ;;  %v2205_v48 = vld [vmem:[%s3155_s1 + $0x1e8] ss:$24 sps:$4 sm:$0xff]   ;;  %v2206_v50 = vld [vmem:[%s3155_s1 + $0x214] ss:$24 sps:$4 sm:$0xff]   ;;  %v2211_v55 = vld [vmem:[%s3155_s1 + $0x218] ss:$24 sps:$4 sm:$0xff]  }
  0x16   : > { %v2624_v49 = vsub.s32 %v368_v42, %v2602_v43  ;;  %v171_v52 = vld [vmem:[%s165_s30] sm:$0xff]  ;;  %v2210_v54 = vld [vmem:[%s3155_s1 + $0x210] ss:$24 sps:$4 sm:$0xff]   ;;  %v2218_v61 = vld [vmem:[%s3155_s1 + $0x274] ss:$24 sps:$4 sm:$0xff]   ;;  %s2123_s29 = sshll.u32 %s3161_s13, 4 }
  0x17   : > { %1355 = vmatpush1.bf16.msra.mxu1 %v2168_v18  ;;  %v2212_v56 = vld [vmem:[%s3155_s1 + $0x244] ss:$24 sps:$4 sm:$0xff]   ;;  %v2216_v59 = vld [vmem:[%s3155_s1 + $0x240] ss:$24 sps:$4 sm:$0xff]   ;;  %v2222_v63 = vld [vmem:[%s3155_s1 + $0x270] ss:$24 sps:$4 sm:$0xff]   ;;  %v365_v7 = vcombine.high %v171_v52, %v171_v52  ;;  %s3113_s5 = scalar_lea.vmem %s3157_s3, %s2123_s29 }
  0x18   : > { %1437 = vmatpush1.bf16.msra.mxu0 %v2169_v19  ;;  %1356 = vmatprep.subr.bf16.mxu1 %v2170_v20  ;;  %v2633_v53 = vrot.slane %v171_v52, %v2624_v49  ;;  %v2214_v57 = vld [vmem:[%s3155_s1 + $0x24c] ss:$24 sps:$4 sm:$0xff]   ;;  %v2217_v60 = vld [vmem:[%s3155_s1 + $0x248] ss:$24 sps:$4 sm:$0xff]   ;;  %v2220_v62 = vld [vmem:[%s3155_s1 + $0x27c] ss:$24 sps:$4 sm:$0xff]  }
  0x19   : > { %1438 = vmatprep.subr.bf16.mxu0 %v2172_v21  ;;  %v2223_v0 = vld [vmem:[%s3155_s1 + $0x278] ss:$24 sps:$4 sm:$0xff]   ;;  %v2224_v1 = vld [vmem:[%s3155_s1 + $0x2a4] ss:$24 sps:$4 sm:$0xff]   ;;  %v2229_v4 = vld [vmem:[%s3155_s1 + $0x2a8] ss:$24 sps:$4 sm:$0xff]   ;;  %v2698_v12 = vrot.slane %v365_v7, %v2624_v49 }
  0x1a   : > { %v380_v58 = vcombine.high %v2633_v53, %v2633_v53  ;;  %v2226_v2 = vld [vmem:[%s3155_s1 + $0x2ac] ss:$24 sps:$4 sm:$0xff]   ;;  %v2228_v3 = vld [vmem:[%s3155_s1 + $0x2a0] ss:$24 sps:$4 sm:$0xff]   ;;  %v2232_v6 = vld [vmem:[%s3155_s1 + $0x2dc] ss:$24 sps:$4 sm:$0xff]  }
  0x1b   : > { %1357 = vmatpush1.bf16.msra.mxu1 %v2174_v22  ;;  %v2230_v5 = vld [vmem:[%s3155_s1 + $0x2d4] ss:$24 sps:$4 sm:$0xff]   ;;  %v2234_v8 = vld [vmem:[%s3155_s1 + $0x2d0] ss:$24 sps:$4 sm:$0xff]   ;;  %v2238_v10 = vld [vmem:[%s3155_s1 + $0x304] ss:$24 sps:$4 sm:$0xff]   ;;  %v2714_v17 = vcombine.high %v2698_v12, %v2698_v12 }
  0x1c   : > { %1439 = vmatpush1.bf16.msra.mxu0 %v2175_v23  ;;  %1358 = vmatprep.subr.bf16.mxu1 %v2176_v24  ;;  %v2235_v9 = vld [vmem:[%s3155_s1 + $0x2d8] ss:$24 sps:$4 sm:$0xff]   ;;  %v2241_v11 = vld [vmem:[%s3155_s1 + $0x14] ss:$24 sps:$4 sm:$0xff]   ;;  %v2247_v16 = vld [vmem:[%s3155_s1 + $0x44] ss:$24 sps:$4 sm:$0xff]  }
  0x1d   : > { %1440 = vmatprep.subr.bf16.mxu0 %v2178_v25  ;;  %1460 = vmatprep.mubr.bf16.mxu0 %v380_v58  ;;  %v2236_v13 = vld [vmem:[%s3155_s1 + $0x300] ss:$24 sps:$4 sm:$0xff]   ;;  %v2239_v14 = vld [vmem:[%s3155_s1 + $0x10] ss:$24 sps:$4 sm:$0xff]   ;;  %v2244_v15 = vld [vmem:[%s3155_s1 + $0x334] ss:$24 sps:$4 sm:$0xff]  }
  0x1e   : > { %1378 = vmatprep.mubr.bf16.mxu1 %v380_v58  ;;  %v2242_v18 = vld [vmem:[%s3155_s1 + $0x330] ss:$24 sps:$4 sm:$0xff]   ;;  %v2245_v19 = vld [vmem:[%s3155_s1 + $0x40] ss:$24 sps:$4 sm:$0xff]   ;;  %v2250_v20 = vld [vmem:[%s3155_s1 + $0x364] ss:$24 sps:$4 sm:$0xff]  }
  0x1f   : > { %1359 = vmatpush1.bf16.msra.mxu1 %v2180_v26  ;;  %v2253_v21 = vld [vmem:[%s3155_s1 + $0x74] ss:$24 sps:$4 sm:$0xff]   ;;  %v2248_v22 = vld [vmem:[%s3155_s1 + $0x360] ss:$24 sps:$4 sm:$0xff]   ;;  %v2251_v23 = vld [vmem:[%s3155_s1 + $0x70] ss:$24 sps:$4 sm:$0xff]  }
  0x20   : > { %1441 = vmatpush1.bf16.msra.mxu0 %v2181_v27  ;;  %1360 = vmatprep.subr.bf16.mxu1 %v2182_v28  ;;  %v2256_v24 = vld [vmem:[%s3155_s1 + $0x394] ss:$24 sps:$4 sm:$0xff]   ;;  %v2259_v25 = vld [vmem:[%s3155_s1 + $0xa4] ss:$24 sps:$4 sm:$0xff]   ;;  %v2254_v26 = vld [vmem:[%s3155_s1 + $0x390] ss:$24 sps:$4 sm:$0xff]  }
  0x21   : > { %1442 = vmatprep.subr.bf16.mxu0 %v2184_v29  ;;  %v2257_v27 = vld [vmem:[%s3155_s1 + $0xa0] ss:$24 sps:$4 sm:$0xff]   ;;  %v2262_v28 = vld [vmem:[%s3155_s1 + $0x3c4] ss:$24 sps:$4 sm:$0xff]   ;;  %v2265_v29 = vld [vmem:[%s3155_s1 + $0xd4] ss:$24 sps:$4 sm:$0xff]  }
  0x22   : > { %v2274_v36 = vld [vmem:[%s3155_s1 + $0x424] ss:$24 sps:$4 sm:$0xff]   ;;  %v2277_v37 = vld [vmem:[%s3155_s1 + $0x134] ss:$24 sps:$4 sm:$0xff]   ;;  %v2272_v38 = vld [vmem:[%s3155_s1 + $0x420] ss:$24 sps:$4 sm:$0xff]  }
  0x23   : > { %1361 = vmatpush1.bf16.msra.mxu1 %v2186_v30  ;;  %v2260_v30 = vld [vmem:[%s3155_s1 + $0x3c0] ss:$24 sps:$4 sm:$0xff]   ;;  %v2278_v42 = vld [vmem:[%s3155_s1 + $0x450] ss:$24 sps:$4 sm:$0xff]   ;;  %v2322_v7 = vld [vmem:[%s3155_s1 + $0x5a4] ss:$24 sps:$4 sm:$0xff]  }
  0x24   : > { %1443 = vmatpush1.bf16.msra.mxu0 %v2187_v31  ;;  %1362 = vmatprep.subr.bf16.mxu1 %v2188_v32  ;;  %v2263_v31 = vld [vmem:[%s3155_s1 + $0xd0] ss:$24 sps:$4 sm:$0xff]   ;;  %v2268_v32 = vld [vmem:[%s3155_s1 + $0x3f4] ss:$24 sps:$4 sm:$0xff]   ;;  %vm1852_vm1 = vsmask.f32 256 }
  0x25   : > { %1444 = vmatprep.subr.bf16.mxu0 %v2190_v33  ;;  %v2271_v33 = vld [vmem:[%s3155_s1 + $0x104] ss:$24 sps:$4 sm:$0xff]   ;;  %v2290_v52 = vld [vmem:[%s3155_s1 + $0x4b0] ss:$24 sps:$4 sm:$0xff]   ;;  %vm1854_vm2 = vcmask 1044484   ;;  %vm3106_vm4 = vmand %vm1599_vm0, %vm1852_vm1 }
  0x26   : > { %vm1855_vm3 = vsmask.f32 4352 }
  0x27   : > { %1363 = vmatpush1.bf16.msra.mxu1 %v2192_v34  ;;  %v2266_v34 = vld [vmem:[%s3155_s1 + $0x3f0] ss:$24 sps:$4 sm:$0xff]   ;;  %vm1856_vm5 = vmand %vm1854_vm2, %vm1855_vm3 }
  0x28   : > { %1445 = vmatpush1.bf16.msra.mxu0 %v2193_v35  ;;  %1364 = vmatprep.subr.bf16.mxu1 %v2194_v39  ;;  %v2269_v35 = vld [vmem:[%s3155_s1 + $0x100] ss:$24 sps:$4 sm:$0xff]   ;;  %v2275_v39 = vld [vmem:[%s3155_s1 + $0x130] ss:$24 sps:$4 sm:$0xff]   ;;  %vm1857_vm6 = vmor %vm1856_vm5, %vm3106_vm4 }
  0x29   : > { %1446 = vmatprep.subr.bf16.mxu0 %v2196_v40  ;;  %v2280_v40 = vld [vmem:[%s3155_s1 + $0x454] ss:$24 sps:$4 sm:$0xff]  }
  0x2b   : > { %1365 = vmatpush1.bf16.msra.mxu1 %v2198_v41  ;;  %v2283_v41 = vld [vmem:[%s3155_s1 + $0x164] ss:$24 sps:$4 sm:$0xff]  }
  0x2c   : > { %1447 = vmatpush1.bf16.msra.mxu0 %v2199_v44  ;;  %1366 = vmatprep.subr.bf16.mxu1 %v2200_v45  ;;  %v2281_v44 = vld [vmem:[%s3155_s1 + $0x160] ss:$24 sps:$4 sm:$0xff]   ;;  %v2286_v45 = vld [vmem:[%s3155_s1 + $0x484] ss:$24 sps:$4 sm:$0xff]  }
  0x2d   : > { %1448 = vmatprep.subr.bf16.mxu0 %v2202_v46  ;;  %v2289_v46 = vld [vmem:[%s3155_s1 + $0x194] ss:$24 sps:$4 sm:$0xff]  }
  0x2f   : > { %1367 = vmatpush1.bf16.msra.mxu1 %v2204_v47  ;;  %v2284_v47 = vld [vmem:[%s3155_s1 + $0x480] ss:$24 sps:$4 sm:$0xff]  }
  0x30   : > { %1449 = vmatpush1.bf16.msra.mxu0 %v2205_v48  ;;  %1368 = vmatprep.subr.bf16.mxu1 %v2206_v50  ;;  %v2287_v48 = vld [vmem:[%s3155_s1 + $0x190] ss:$24 sps:$4 sm:$0xff]   ;;  %v2292_v50 = vld [vmem:[%s3155_s1 + $0x4b4] ss:$24 sps:$4 sm:$0xff]  }
  0x31   : > { %1450 = vmatprep.subr.bf16.mxu0 %v2208_v51  ;;  %v2295_v51 = vld [vmem:[%s3155_s1 + $0x1c4] ss:$24 sps:$4 sm:$0xff]  }
  0x33   : > { %1369 = vmatpush1.bf16.msra.mxu1 %v2210_v54  ;;  %v2293_v54 = vld [vmem:[%s3155_s1 + $0x1c0] ss:$24 sps:$4 sm:$0xff]  }
  0x34   : > { %1451 = vmatpush1.bf16.msra.mxu0 %v2211_v55  ;;  %1370 = vmatprep.subr.bf16.mxu1 %v2212_v56  ;;  %v2298_v55 = vld [vmem:[%s3155_s1 + $0x4e4] ss:$24 sps:$4 sm:$0xff]   ;;  %v2301_v56 = vld [vmem:[%s3155_s1 + $0x1f4] ss:$24 sps:$4 sm:$0xff]  }
  0x35   : > { %1452 = vmatprep.subr.bf16.mxu0 %v2214_v57  ;;  %v2296_v57 = vld [vmem:[%s3155_s1 + $0x4e0] ss:$24 sps:$4 sm:$0xff]  }
  0x37   : > { %1371 = vmatpush1.bf16.msra.mxu1 %v2216_v59  ;;  %v2304_v59 = vld [vmem:[%s3155_s1 + $0x514] ss:$24 sps:$4 sm:$0xff]  }
  0x38   : > { %1453 = vmatpush1.bf16.msra.mxu0 %v2217_v60  ;;  %1372 = vmatprep.subr.bf16.mxu1 %v2218_v61  ;;  %v2307_v60 = vld [vmem:[%s3155_s1 + $0x224] ss:$24 sps:$4 sm:$0xff]   ;;  %v2302_v61 = vld [vmem:[%s3155_s1 + $0x510] ss:$24 sps:$4 sm:$0xff]  }
  0x39   : > { %1454 = vmatprep.subr.bf16.mxu0 %v2220_v62  ;;  %v2305_v62 = vld [vmem:[%s3155_s1 + $0x220] ss:$24 sps:$4 sm:$0xff]  }
  0x3b   : > { %1373 = vmatpush1.bf16.msra.mxu1 %v2222_v63  ;;  %v2310_v63 = vld [vmem:[%s3155_s1 + $0x544] ss:$24 sps:$4 sm:$0xff]  }
  0x3c   : > { %1455 = vmatpush1.bf16.msra.mxu0 %v2223_v0  ;;  %1374 = vmatprep.subr.bf16.mxu1 %v2224_v1  ;;  %v2313_v0 = vld [vmem:[%s3155_s1 + $0x254] ss:$24 sps:$4 sm:$0xff]   ;;  %v2308_v1 = vld [vmem:[%s3155_s1 + $0x540] ss:$24 sps:$4 sm:$0xff]  }
  0x3d   : > { %1456 = vmatprep.subr.bf16.mxu0 %v2226_v2  ;;  %v2311_v2 = vld [vmem:[%s3155_s1 + $0x250] ss:$24 sps:$4 sm:$0xff]  }
  0x3f   : > { %1375 = vmatpush1.bf16.msra.mxu1 %v2228_v3  ;;  %v2316_v3 = vld [vmem:[%s3155_s1 + $0x574] ss:$24 sps:$4 sm:$0xff]  }
  0x40   : > { %1457 = vmatpush1.bf16.msra.mxu0 %v2229_v4  ;;  %1376 = vmatprep.subr.bf16.mxu1 %v2230_v5  ;;  %v2319_v4 = vld [vmem:[%s3155_s1 + $0x284] ss:$24 sps:$4 sm:$0xff]   ;;  %v2314_v5 = vld [vmem:[%s3155_s1 + $0x570] ss:$24 sps:$4 sm:$0xff]  }
  0x41   : > { %1458 = vmatprep.subr.bf16.mxu0 %v2232_v6  ;;  %v2317_v6 = vld [vmem:[%s3155_s1 + $0x280] ss:$24 sps:$4 sm:$0xff]  }
  0x43   : > { %1377 = vmatpush1.bf16.msra.mxu1 %v2234_v8  ;;  %v2325_v8 = vld [vmem:[%s3155_s1 + $0x2b4] ss:$24 sps:$4 sm:$0xff]  }
  0x44   : > { %1459 = vmatpush1.bf16.msra.mxu0 %v2235_v9  ;;  %1387 = vmatprep.subr.bf16.mxu1 %v2238_v10  ;;  %v2320_v9 = vld [vmem:[%s3155_s1 + $0x5a0] ss:$24 sps:$4 sm:$0xff]   ;;  %v2323_v10 = vld [vmem:[%s3155_s1 + $0x2b0] ss:$24 sps:$4 sm:$0xff]  }
  0x45   : > { %1510 = vmatprep.subr.bf16.mxu0 %v2241_v11  ;;  %v2328_v11 = vld [vmem:[%s3155_s1 + $0x5d4] ss:$24 sps:$4 sm:$0xff]  }
  0x46   : > { %1379 = vmatmul.mubr.bf16.vlgmr.msra.gmra.mrb[0].mxu1 %v2633_v53 }
  0x47   : > { %1461 = vmatmul.mubr.bf16.vlgmr.msra.gmra.mrb[0].mxu0 %v2633_v53  ;;  %1388 = vmatpush1.bf16.msra.mxu1 %v2236_v13  ;;  %v2331_v13 = vld [vmem:[%s3155_s1 + $0x2e4] ss:$24 sps:$4 sm:$0xff]  }
  0x48   : > { %1511 = vmatpush1.bf16.msra.mxu0 %v2239_v14  ;;  %1389 = vmatprep.subr.bf16.mxu1 %v2244_v15  ;;  %v2326_v14 = vld [vmem:[%s3155_s1 + $0x5d0] ss:$24 sps:$4 sm:$0xff]   ;;  %v2329_v15 = vld [vmem:[%s3155_s1 + $0x2e0] ss:$24 sps:$4 sm:$0xff]  }
  0x49   : > { %1512 = vmatprep.subr.bf16.mxu0 %v2247_v16  ;;  %1419 = vmatprep.mubr.bf16.mxu1 %v2714_v17  ;;  %v2335_v16 = vld [vmem:[%s3155_s1 + $0x30c] ss:$24 sps:$4 sm:$0xff]  }
  0x4a   : > { %1542 = vmatprep.mubr.bf16.mxu0 %v380_v58  ;;  %v2299_v58 = vld [vmem:[%s3155_s1 + $0x1f0] ss:$24 sps:$4 sm:$0xff]  }
  0x4b   : > { %1390 = vmatpush1.bf16.msra.mxu1 %v2242_v18  ;;  %v2338_v18 = vld [vmem:[%s3155_s1 + $0x314] ss:$24 sps:$4 sm:$0xff]  }
  0x4c   : > { %1513 = vmatpush1.bf16.msra.mxu0 %v2245_v19  ;;  %1391 = vmatprep.subr.bf16.mxu1 %v2250_v20  ;;  %v2333_v19 = vld [vmem:[%s3155_s1 + $0x308] ss:$24 sps:$4 sm:$0xff]  }
  0x4d   : > { %1514 = vmatprep.subr.bf16.mxu0 %v2253_v21  ;;  %v2336_v20 = vld [vmem:[%s3155_s1 + $0x310] ss:$24 sps:$4 sm:$0xff]   ;;  %v2341_v21 = vld [vmem:[%s3155_s1 + $0x33c] ss:$24 sps:$4 sm:$0xff]  }
  0x4f   : > { %1392 = vmatpush1.bf16.msra.mxu1 %v2248_v22  ;;  %v2344_v22 = vld [vmem:[%s3155_s1 + $0x344] ss:$24 sps:$4 sm:$0xff]  }
  0x50   : > { %1515 = vmatpush1.bf16.msra.mxu0 %v2251_v23  ;;  %1393 = vmatprep.subr.bf16.mxu1 %v2256_v24  ;;  %v2339_v23 = vld [vmem:[%s3155_s1 + $0x338] ss:$24 sps:$4 sm:$0xff]  }
  0x51   : > { %1516 = vmatprep.subr.bf16.mxu0 %v2259_v25  ;;  %v2342_v24 = vld [vmem:[%s3155_s1 + $0x340] ss:$24 sps:$4 sm:$0xff]   ;;  %v2347_v25 = vld [vmem:[%s3155_s1 + $0x36c] ss:$24 sps:$4 sm:$0xff]  }
  0x53   : > { %1394 = vmatpush1.bf16.msra.mxu1 %v2254_v26  ;;  %v2345_v26 = vld [vmem:[%s3155_s1 + $0x368] ss:$24 sps:$4 sm:$0xff]  }
  0x54   : > { %1517 = vmatpush1.bf16.msra.mxu0 %v2257_v27  ;;  %1395 = vmatprep.subr.bf16.mxu1 %v2262_v28  ;;  %v2348_v27 = vld [vmem:[%s3155_s1 + $0x370] ss:$24 sps:$4 sm:$0xff]   ;;  %v2353_v28 = vld [vmem:[%s3155_s1 + $0x39c] ss:$24 sps:$4 sm:$0xff]  }
  0x55   : > { %1518 = vmatprep.subr.bf16.mxu0 %v2265_v29  ;;  %v2351_v29 = vld [vmem:[%s3155_s1 + $0x398] ss:$24 sps:$4 sm:$0xff]  }
  0x57   : > { %1396 = vmatpush1.bf16.msra.mxu1 %v2260_v30  ;;  %v2354_v30 = vld [vmem:[%s3155_s1 + $0x3a0] ss:$24 sps:$4 sm:$0xff]  }
  0x58   : > { %1519 = vmatpush1.bf16.msra.mxu0 %v2263_v31  ;;  %1397 = vmatprep.subr.bf16.mxu1 %v2268_v32  ;;  %v2359_v31 = vld [vmem:[%s3155_s1 + $0x3cc] ss:$24 sps:$4 sm:$0xff]  }
  0x59   : > { %1520 = vmatprep.subr.bf16.mxu0 %v2271_v33  ;;  %v2362_v32 = vld [vmem:[%s3155_s1 + $0x3d4] ss:$24 sps:$4 sm:$0xff]   ;;  %v2357_v33 = vld [vmem:[%s3155_s1 + $0x3c8] ss:$24 sps:$4 sm:$0xff]  }
  0x5b   : > { %1398 = vmatpush1.bf16.msra.mxu1 %v2266_v34  ;;  %v2360_v34 = vld [vmem:[%s3155_s1 + $0x3d0] ss:$24 sps:$4 sm:$0xff]  }
  0x5c   : > { %1521 = vmatpush1.bf16.msra.mxu0 %v2269_v35  ;;  %1399 = vmatprep.subr.bf16.mxu1 %v2274_v36  ;;  %v2365_v35 = vld [vmem:[%s3155_s1 + $0x3fc] ss:$24 sps:$4 sm:$0xff]  }
  0x5d   : > { %1522 = vmatprep.subr.bf16.mxu0 %v2277_v37  ;;  %v2368_v36 = vld [vmem:[%s3155_s1 + $0x404] ss:$24 sps:$4 sm:$0xff]   ;;  %v2363_v37 = vld [vmem:[%s3155_s1 + $0x3f8] ss:$24 sps:$4 sm:$0xff]  }
  0x5f   : > { %1400 = vmatpush1.bf16.msra.mxu1 %v2272_v38  ;;  %v2366_v38 = vld [vmem:[%s3155_s1 + $0x400] ss:$24 sps:$4 sm:$0xff]  }
  0x60   : > { %1523 = vmatpush1.bf16.msra.mxu0 %v2275_v39  ;;  %1401 = vmatprep.subr.bf16.mxu1 %v2280_v40  ;;  %v2371_v39 = vld [vmem:[%s3155_s1 + $0x42c] ss:$24 sps:$4 sm:$0xff]  }
  0x61   : > { %1524 = vmatprep.subr.bf16.mxu0 %v2283_v41  ;;  %v2374_v40 = vld [vmem:[%s3155_s1 + $0x434] ss:$24 sps:$4 sm:$0xff]   ;;  %v2369_v41 = vld [vmem:[%s3155_s1 + $0x428] ss:$24 sps:$4 sm:$0xff]  }
  0x63   : > { %1402 = vmatpush1.bf16.msra.mxu1 %v2278_v42  ;;  %v2372_v42 = vld [vmem:[%s3155_s1 + $0x430] ss:$24 sps:$4 sm:$0xff]  }
  0x64   : > { %1525 = vmatpush1.bf16.msra.mxu0 %v2281_v44  ;;  %1403 = vmatprep.subr.bf16.mxu1 %v2286_v45  ;;  %v2377_v44 = vld [vmem:[%s3155_s1 + $0x45c] ss:$24 sps:$4 sm:$0xff]  }
  0x65   : > { %1526 = vmatprep.subr.bf16.mxu0 %v2289_v46  ;;  %v2380_v45 = vld [vmem:[%s3155_s1 + $0x464] ss:$24 sps:$4 sm:$0xff]   ;;  %v2375_v46 = vld [vmem:[%s3155_s1 + $0x458] ss:$24 sps:$4 sm:$0xff]  }
  0x67   : > { %1404 = vmatpush1.bf16.msra.mxu1 %v2284_v47  ;;  %v2378_v47 = vld [vmem:[%s3155_s1 + $0x460] ss:$24 sps:$4 sm:$0xff]  }
  0x68   : > { %1527 = vmatpush1.bf16.msra.mxu0 %v2287_v48  ;;  %1405 = vmatprep.subr.bf16.mxu1 %v2292_v50  ;;  %v2383_v48 = vld [vmem:[%s3155_s1 + $0x48c] ss:$24 sps:$4 sm:$0xff]  }
  0x69   : > { %1528 = vmatprep.subr.bf16.mxu0 %v2295_v51  ;;  %v2386_v50 = vld [vmem:[%s3155_s1 + $0x494] ss:$24 sps:$4 sm:$0xff]   ;;  %v2381_v51 = vld [vmem:[%s3155_s1 + $0x488] ss:$24 sps:$4 sm:$0xff]  }
  0x6b   : > { %1406 = vmatpush1.bf16.msra.mxu1 %v2290_v52  ;;  %v2384_v52 = vld [vmem:[%s3155_s1 + $0x490] ss:$24 sps:$4 sm:$0xff]  }
  0x6c   : > { %1529 = vmatpush1.bf16.msra.mxu0 %v2293_v54  ;;  %1407 = vmatprep.subr.bf16.mxu1 %v2298_v55  ;;  %v2389_v54 = vld [vmem:[%s3155_s1 + $0x4bc] ss:$24 sps:$4 sm:$0xff]  }
  0x6d   : > { %1530 = vmatprep.subr.bf16.mxu0 %v2301_v56  ;;  %v2392_v55 = vld [vmem:[%s3155_s1 + $0x4c4] ss:$24 sps:$4 sm:$0xff]   ;;  %v2387_v56 = vld [vmem:[%s3155_s1 + $0x4b8] ss:$24 sps:$4 sm:$0xff]  }
  0x6f   : > { %1408 = vmatpush1.bf16.msra.mxu1 %v2296_v57  ;;  %v2390_v57 = vld [vmem:[%s3155_s1 + $0x4c0] ss:$24 sps:$4 sm:$0xff]  }
  0x70   : > { %1531 = vmatpush1.bf16.msra.mxu0 %v2299_v58  ;;  %1409 = vmatprep.subr.bf16.mxu1 %v2304_v59  ;;  %v2395_v58 = vld [vmem:[%s3155_s1 + $0x4ec] ss:$24 sps:$4 sm:$0xff]  }
  0x71   : > { %1532 = vmatprep.subr.bf16.mxu0 %v2307_v60  ;;  %v2398_v59 = vld [vmem:[%s3155_s1 + $0x4f4] ss:$24 sps:$4 sm:$0xff]   ;;  %v2393_v60 = vld [vmem:[%s3155_s1 + $0x4e8] ss:$24 sps:$4 sm:$0xff]  }
  0x73   : > { %1410 = vmatpush1.bf16.msra.mxu1 %v2302_v61  ;;  %v2396_v61 = vld [vmem:[%s3155_s1 + $0x4f0] ss:$24 sps:$4 sm:$0xff]  }
  0x74   : > { %1533 = vmatpush1.bf16.msra.mxu0 %v2305_v62  ;;  %1411 = vmatprep.subr.bf16.mxu1 %v2310_v63  ;;  %v2401_v62 = vld [vmem:[%s3155_s1 + $0x51c] ss:$24 sps:$4 sm:$0xff]  }
  0x75   : > { %1534 = vmatprep.subr.bf16.mxu0 %v2313_v0  ;;  %v2404_v63 = vld [vmem:[%s3155_s1 + $0x524] ss:$24 sps:$4 sm:$0xff]   ;;  %v2399_v0 = vld [vmem:[%s3155_s1 + $0x518] ss:$24 sps:$4 sm:$0xff]  }
  0x77   : > { %1412 = vmatpush1.bf16.msra.mxu1 %v2308_v1  ;;  %v2402_v1 = vld [vmem:[%s3155_s1 + $0x520] ss:$24 sps:$4 sm:$0xff]  }
  0x78   : > { %1535 = vmatpush1.bf16.msra.mxu0 %v2311_v2  ;;  %1413 = vmatprep.subr.bf16.mxu1 %v2316_v3  ;;  %v2407_v2 = vld [vmem:[%s3155_s1 + $0x54c] ss:$24 sps:$4 sm:$0xff]  }
  0x79   : > { %1536 = vmatprep.subr.bf16.mxu0 %v2319_v4  ;;  %v2410_v3 = vld [vmem:[%s3155_s1 + $0x554] ss:$24 sps:$4 sm:$0xff]   ;;  %v2405_v4 = vld [vmem:[%s3155_s1 + $0x548] ss:$24 sps:$4 sm:$0xff]  }
  0x7b   : > { %1414 = vmatpush1.bf16.msra.mxu1 %v2314_v5  ;;  %v2408_v5 = vld [vmem:[%s3155_s1 + $0x550] ss:$24 sps:$4 sm:$0xff]  }
  0x7c   : > { %1537 = vmatpush1.bf16.msra.mxu0 %v2317_v6  ;;  %1415 = vmatprep.subr.bf16.mxu1 %v2322_v7  ;;  %v2413_v6 = vld [vmem:[%s3155_s1 + $0x57c] ss:$24 sps:$4 sm:$0xff]  }
  0x7d   : > { %1538 = vmatprep.subr.bf16.mxu0 %v2325_v8  ;;  %v2416_v7 = vld [vmem:[%s3155_s1 + $0x584] ss:$24 sps:$4 sm:$0xff]   ;;  %v2411_v8 = vld [vmem:[%s3155_s1 + $0x578] ss:$24 sps:$4 sm:$0xff]  }
  0x7f   : > { %1416 = vmatpush1.bf16.msra.mxu1 %v2320_v9  ;;  %v2414_v9 = vld [vmem:[%s3155_s1 + $0x580] ss:$24 sps:$4 sm:$0xff]  }
  0x80   : > { %1539 = vmatpush1.bf16.msra.mxu0 %v2323_v10  ;;  %1417 = vmatprep.subr.bf16.mxu1 %v2328_v11  ;;  %v2419_v10 = vld [vmem:[%s3155_s1 + $0x5ac] ss:$24 sps:$4 sm:$0xff]  }
  0x81   : > { %1540 = vmatprep.subr.bf16.mxu0 %v2331_v13  ;;  %v2422_v11 = vld [vmem:[%s3155_s1 + $0x5b4] ss:$24 sps:$4 sm:$0xff]   ;;  %v2417_v13 = vld [vmem:[%s3155_s1 + $0x5a8] ss:$24 sps:$4 sm:$0xff]  }
  0x83   : > { %1418 = vmatpush1.bf16.msra.mxu1 %v2326_v14  ;;  %v2420_v14 = vld [vmem:[%s3155_s1 + $0x5b0] ss:$24 sps:$4 sm:$0xff]  }
  0x84   : > { %1541 = vmatpush1.bf16.msra.mxu0 %v2329_v15  ;;  %1469 = vmatprep.subr.bf16.mxu1 %v2335_v16  ;;  %v2425_v15 = vld [vmem:[%s3155_s1 + $0x5dc] ss:$24 sps:$4 sm:$0xff]  }
  0x85   : > { %1551 = vmatprep.subr.bf16.mxu0 %v2338_v18  ;;  %v2428_v16 = vld [vmem:[%s3155_s1 + $0x5e4] ss:$24 sps:$4 sm:$0xff]   ;;  %v2423_v18 = vld [vmem:[%s3155_s1 + $0x5d8] ss:$24 sps:$4 sm:$0xff]  }
  0x86   : > { %1420 = vmatmul.mubr.bf16.vlgmr.msra.gmra.mrb[4].mxu1 %v2698_v12 }
  0x87   : > { %1543 = vmatmul.mubr.bf16.vlgmr.msra.gmra.mrb[4].mxu0 %v2633_v53  ;;  %1470 = vmatpush1.bf16.msra.mxu1 %v2333_v19  ;;  %v2350_v53 = vld [vmem:[%s3155_s1 + $0x374] ss:$24 sps:$4 sm:$0xff]   ;;  %v2426_v19 = vld [vmem:[%s3155_s1 + $0x5e0] ss:$24 sps:$4 sm:$0xff]  }
  0x88   : > { %1552 = vmatpush1.bf16.msra.mxu0 %v2336_v20  ;;  %1471 = vmatprep.subr.bf16.mxu1 %v2341_v21 }
  0x89   : > { %1553 = vmatprep.subr.bf16.mxu0 %v2344_v22  ;;  %1501 = vmatprep.mubr.bf16.mxu1 %v2714_v17 }
  0x8a   : > { %1583 = vmatprep.mubr.bf16.mxu0 %v2714_v17  ;;  %v2356_v17 = vld [vmem:[%s3155_s1 + $0x3a4] ss:$24 sps:$4 sm:$0xff]  }
  0x8b   : > { %1472 = vmatpush1.bf16.msra.mxu1 %v2339_v23 }
  0x8c   : > { %1554 = vmatpush1.bf16.msra.mxu0 %v2342_v24  ;;  %1473 = vmatprep.subr.bf16.mxu1 %v2347_v25 }
  0x8d   : > { %1555 = vmatprep.subr.bf16.mxu0 %v2350_v53 }
  0x8f   : > { %1474 = vmatpush1.bf16.msra.mxu1 %v2345_v26 }
  0x90   : > { %1556 = vmatpush1.bf16.msra.mxu0 %v2348_v27  ;;  %1475 = vmatprep.subr.bf16.mxu1 %v2353_v28 }
  0x91   : > { %1557 = vmatprep.subr.bf16.mxu0 %v2356_v17 }
  0x93   : > { %1476 = vmatpush1.bf16.msra.mxu1 %v2351_v29 }
  0x94   : > { %1558 = vmatpush1.bf16.msra.mxu0 %v2354_v30  ;;  %1477 = vmatprep.subr.bf16.mxu1 %v2359_v31 }
  0x95   : > { %1559 = vmatprep.subr.bf16.mxu0 %v2362_v32  ;;  %v3092_v32 = vsub.s32 0, %v2602_v43 }
  0x97   : > { %1478 = vmatpush1.bf16.msra.mxu1 %v2357_v33  ;;  %v3098_v33 = vsub.s32 1, %v2602_v43 }
  0x98   : > { %1560 = vmatpush1.bf16.msra.mxu0 %v2360_v34  ;;  %1479 = vmatprep.subr.bf16.mxu1 %v2365_v35 }
  0x99   : > { %1561 = vmatprep.subr.bf16.mxu0 %v2368_v36 }
  0x9b   : > { %1480 = vmatpush1.bf16.msra.mxu1 %v2363_v37 }
  0x9c   : > { %1562 = vmatpush1.bf16.msra.mxu0 %v2366_v38  ;;  %1481 = vmatprep.subr.bf16.mxu1 %v2371_v39 }
  0x9d   : > { %1563 = vmatprep.subr.bf16.mxu0 %v2374_v40 }
  0x9f   : > { %1482 = vmatpush1.bf16.msra.mxu1 %v2369_v41 }
  0xa0   : > { %1564 = vmatpush1.bf16.msra.mxu0 %v2372_v42  ;;  %1483 = vmatprep.subr.bf16.mxu1 %v2377_v44 }
  0xa1   : > { %1565 = vmatprep.subr.bf16.mxu0 %v2380_v45 }
  0xa3   : > { %1484 = vmatpush1.bf16.msra.mxu1 %v2375_v46 }
  0xa4   : > { %1566 = vmatpush1.bf16.msra.mxu0 %v2378_v47  ;;  %1485 = vmatprep.subr.bf16.mxu1 %v2383_v48 }
  0xa5   : > { %1567 = vmatprep.subr.bf16.mxu0 %v2386_v50 }
  0xa7   : > { %1486 = vmatpush1.bf16.msra.mxu1 %v2381_v51 }
  0xa8   : > { %1568 = vmatpush1.bf16.msra.mxu0 %v2384_v52  ;;  %1487 = vmatprep.subr.bf16.mxu1 %v2389_v54 }
  0xa9   : > { %1569 = vmatprep.subr.bf16.mxu0 %v2392_v55 }
  0xab   : > { %1488 = vmatpush1.bf16.msra.mxu1 %v2387_v56 }
  0xac   : > { %1570 = vmatpush1.bf16.msra.mxu0 %v2390_v57  ;;  %1489 = vmatprep.subr.bf16.mxu1 %v2395_v58 }
  0xad   : > { %1571 = vmatprep.subr.bf16.mxu0 %v2398_v59 }
  0xaf   : > { %1490 = vmatpush1.bf16.msra.mxu1 %v2393_v60  ;;  %v2450_v60 = vmov 1966171168  }
  0xb0   : > { %1572 = vmatpush1.bf16.msra.mxu0 %v2396_v61  ;;  %1491 = vmatprep.subr.bf16.mxu1 %v2401_v62  ;;  %v1631_v61 = vunpack.c.l.s4 %v2450_v60 }
  0xb1   : > { %1573 = vmatprep.subr.bf16.mxu0 %v2404_v63 }
  0xb2   : > { %v1632_v63 = vunpack.c.0.s8 %v1631_v61 }
  0xb3   : > { %1492 = vmatpush1.bf16.msra.mxu1 %v2399_v0 }
  0xb4   : > { %1574 = vmatpush1.bf16.msra.mxu0 %v2402_v1  ;;  %1493 = vmatprep.subr.bf16.mxu1 %v2407_v2 }
  0xb5   : > { %1575 = vmatprep.subr.bf16.mxu0 %v2410_v3 }
  0xb7   : > { %1494 = vmatpush1.bf16.msra.mxu1 %v2405_v4  ;;  %v1635_v4 = vsub.s32 %v1632_v63, %v2602_v43 }
  0xb8   : > { %1576 = vmatpush1.bf16.msra.mxu0 %v2408_v5  ;;  %1495 = vmatprep.subr.bf16.mxu1 %v2413_v6 }
  0xb9   : > { %1577 = vmatprep.subr.bf16.mxu0 %v2416_v7 }
  0xbb   : > { %1496 = vmatpush1.bf16.msra.mxu1 %v2411_v8 }
  0xbc   : > { %1578 = vmatpush1.bf16.msra.mxu0 %v2414_v9  ;;  %1497 = vmatprep.subr.bf16.mxu1 %v2419_v10  ;;  %v1858_v10 = vld [vmem:[%s3113_s5 + $0x8] sm:$0x11] }
  0xbd   : > { %1579 = vmatprep.subr.bf16.mxu0 %v2422_v11 }
  0xbf   : > { %1498 = vmatpush1.bf16.msra.mxu1 %v2417_v13 }
  0xc0   : > { %1580 = vmatpush1.bf16.msra.mxu0 %v2420_v14  ;;  %1499 = vmatprep.subr.bf16.mxu1 %v2425_v15 }
  0xc1   : > { %1581 = vmatprep.subr.bf16.mxu0 %v2428_v16 }
  0xc3   : > { %1500 = vmatpush1.bf16.msra.mxu1 %v2423_v18 }
  0xc4   : > { %1582 = vmatpush1.bf16.msra.mxu0 %v2426_v19 }
  0xc6   : > { %1502 = vmatmul.mubr.bf16.vlgmr.msra.gmra.mrb[8].mxu1 %v2698_v12 }
  0xc7   : > { %1584 = vmatmul.mubr.bf16.vlgmr.msra.gmra.mrb[4].mxu0 %v2698_v12  ;;  %v1592_v12 = vld [vmem:[%s3156_s2] sm:$0x3] }
  0xc8   : > { %v1608_v34 = vrot.slane %v1592_v12, %v3092_v32  ;;  %v1612_v35 = vrot.slane %v1592_v12, %v3098_v33 }
 0x119   : > { %v1380_v21 = vpop.f32.mrb[0].mxu1 }
 0x11a   : > { %v1462_v20 = vpop.f32.mrb[0].mxu0  ;;  %v1382_v23 = vpop.f32.mrb[1].mxu1 }
 0x11b   : > { %v1464_v22 = vpop.f32.mrb[1].mxu0  ;;  %v1384_v25 = vpop.f32.mrb[2].mxu1 }
 0x11c   : > { %v1466_v24 = vpop.f32.mrb[2].mxu0  ;;  %v1385_v26 = vpop.f32.mrb[3].mxu1 }
 0x11d   : > { %v1467_v53 = vpop.f32.mrb[3].mxu0 }
 0x159   : > { %v1421_v27 = vpop.f32.mrb[4].mxu1 }
 0x15a   : > { %v1422_v28 = vadd.f32 %v1421_v27, %v1380_v21  ;;  %v1423_v17 = vpop.f32.mrb[5].mxu1 }
 0x15b   : > { %v1424_v29 = vadd.f32 %v1423_v17, %v1382_v23  ;;  %v1425_v30 = vpop.f32.mrb[6].mxu1 }
 0x15c   : > { %v1426_v31 = vpop.f32.mrb[7].mxu1 }
 0x199   : > { %v1503_v36 = vpop.f32.mrb[8].mxu1 }
 0x19a   : > { %v1585_v37 = vpop.f32.mrb[4].mxu0  ;;  %v1504_v38 = vadd.f32 %v1503_v36, %v1462_v20  ;;  %v1505_v41 = vpop.f32.mrb[9].mxu1 }
 0x19b   : > { %v1595_v39 = vrot.slane %v1585_v37, 7  ;;  %v1623_v40 = vadd.f32 %v1608_v34, %v1585_v37  ;;  %v1587_v42 = vpop.f32.mrb[5].mxu0  ;;  %v1506_v44 = vadd.f32 %v1505_v41, %v1464_v22  ;;  %v1507_v47 = vpop.f32.mrb[10].mxu1 }
 0x19c   : > { %v1596_v45 = vrot.slane %v1587_v42, 7  ;;  %v1624_v46 = vadd.f32 %v1612_v35, %v1587_v42  ;;  %v1589_v48 = vpop.f32.mrb[6].mxu0  ;;  %v1619_v50 = vadd.f32 %v1608_v34, %v1504_v38  ;;  %v1508_v52 = vpop.f32.mrb[11].mxu1 }
 0x19d   : > { %v1600_v51 = vsel %vm1599_vm0, 0.0, %v1595_v39  ;;  %2429 = vtanh.f32 %v1623_v40  ;;  %v1590_v54 = vpop.f32.mrb[7].mxu0  ;;  %v1620_v56 = vadd.f32 %v1612_v35, %v1506_v44 }
 0x19e   : > { %v1602_v55 = vadd.f32 %v1600_v51, %v1422_v28  ;;  %v1601_v57 = vsel %vm1599_vm0, 0.0, %v1596_v45  ;;  %2431 = vtanh.f32 %v1624_v46 }
 0x19f   : > { %2433 = vtanh.f32 %v1619_v50  ;;  %v1603_v58 = vadd.f32 %v1601_v57, %v1424_v29 }
 0x1a0   : > { %v1615_v59 = vadd.f32 %v1608_v34, %v1602_v55  ;;  %2435 = vtanh.f32 %v1620_v56 }
 0x1a1   : > { %v1616_v62 = vadd.f32 %v1612_v35, %v1603_v58 }
 0x1a2   : > { %2437 = vtanh.f32 %v1615_v59 }
 0x1a3   : > { %2439 = vtanh.f32 %v1616_v62 }
 0x1a7   : > { %v2430_v0 = vpop.eup %2429 }
 0x1a8   : > { %v2432_v1 = vpop.eup %2431 }
 0x1a9   : > { %v2434_v3 = vpop.eup %2433  ;;  %v2125_v5 = vpack.c.bf16 %v2432_v1, %v2430_v0 }
 0x1aa   : > { %v2436_v6 = vpop.eup %2435 }
 0x1ab   : > { %v1656_v7 = vcombine.low %v2434_v3, %v2436_v6  ;;  %v1846_v8 = vshrl.u32 %v2125_v5, 16 }
 0x1ac   : > { %v2438_v9 = vpop.eup %2437 }
 0x1ad   : > { %v2440_v11 = vpop.eup %2439  ;;  %v1663_v13 = vrot.slane %v1656_v7, %v1635_v4  ;;  %v2119_v14 = vrot.slane %v1846_v8, 9 }
 0x1ae   : > { %v1629_v15 = vcombine.low %v2438_v9, %v2440_v11 }
 0x1af   : > { %v1664_v16 = vcombine.high %v1663_v13, %v1663_v13  ;;  %v1671_v18 = vrot.slane %v1663_v13, %v1635_v4  ;;  %v1859_v19 = vsel %vm1857_vm6, %v2119_v14, %v1858_v10 }
 0x1b0   : > { %v1636_v20 = vrot.slane %v1629_v15, %v1635_v4  ;;  %1860 = vst [vmem:[%s3113_s5 + $0x8] sm:$0x11] %v1859_v19 }
 0x1b1   : > { %v1678_v43 = vrot.slane %v1664_v16, %v1635_v4  ;;  %v1679_v21 = vcombine.high %v1671_v18, %v1671_v18  ;;  %v1724_v25 = vrot.slane %v1671_v18, %v3092_v32  ;;  %v1728_v53 = vrot.slane %v1671_v18, %v3098_v33 }
 0x1b2   : > { %v1637_v22 = vcombine.high %v1636_v20, %v1636_v20  ;;  %v1644_v23 = vrot.slane %v1636_v20, %v1635_v4 }
 0x1b3   : > { %v1680_v24 = vcombine.high %v1678_v43, %v1678_v43  ;;  %v1732_v26 = vrot.slane %v1678_v43, %v3092_v32  ;;  %v1736_v27 = vrot.slane %v1678_v43, %v3098_v33  ;;  %v1740_v30 = vrot.slane %v1679_v21, %v3092_v32 }
 0x1b4   : > { %v1651_v28 = vrot.slane %v1637_v22, %v1635_v4  ;;  %v1652_v17 = vcombine.high %v1644_v23, %v1644_v23  ;;  %v1684_v29 = vrot.slane %v1644_v23, %v3092_v32  ;;  %v1744_v31 = vrot.slane %v1679_v21, %v3098_v33 }
 0x1b5   : > { %v1748_v12 = vrot.slane %v1680_v24, %v3092_v32  ;;  %v1688_v34 = vrot.slane %v1644_v23, %v3098_v33  ;;  %v1752_v39 = vrot.slane %v1680_v24, %v3098_v33 }
 0x1b6   : > { %v1653_v35 = vcombine.high %v1651_v28, %v1651_v28  ;;  %v1692_v36 = vrot.slane %v1651_v28, %v3092_v32  ;;  %v1696_v37 = vrot.slane %v1651_v28, %v3098_v33  ;;  %v1700_v38 = vrot.slane %v1652_v17, %v3092_v32 }
 0x1b7   : > { %v1704_v40 = vrot.slane %v1652_v17, %v3098_v33  ;;  %v1761_v41 = vsel %vm1599_vm0, %v1684_v29, %v1724_v25  ;;  %v1762_v42 = vsel %vm1599_vm0, %v1688_v34, %v1728_v53 }
 0x1b8   : > { %v1708_v44 = vrot.slane %v1653_v35, %v3092_v32  ;;  %v1712_v45 = vrot.slane %v1653_v35, %v3098_v33  ;;  %v1763_v46 = vsel %vm1599_vm0, %v1692_v36, %v1732_v26  ;;  %v1764_v47 = vsel %vm1599_vm0, %v1696_v37, %v1736_v27 }
 0x1b9   : > { %v1765_v48 = vsel %vm1599_vm0, %v1700_v38, %v1740_v30  ;;  %v1766_v50 = vsel %vm1599_vm0, %v1704_v40, %v1744_v31  ;;  %v1777_v51 = vcombine.low %v1761_v41, %v1762_v42  ;;  %v1785_v52 = vcombine.low %v1763_v46, %v1764_v47 }
 0x1ba   : > { %v1767_v54 = vsel %vm1599_vm0, %v1708_v44, %v1748_v12  ;;  %v1768_v55 = vsel %vm1599_vm0, %v1712_v45, %v1752_v39  ;;  %v1793_v56 = vcombine.low %v1765_v48, %v1766_v50 }
 0x1bb   : > { %v1784_v32 = vrot.slane %v1777_v51, %v2624_v49  ;;  %v1792_v33 = vrot.slane %v1785_v52, %v2624_v49  ;;  %v1801_v57 = vcombine.low %v1767_v54, %v1768_v55 }
 0x1bc   : > { %v1800_v58 = vrot.slane %v1793_v56, %v2624_v49 }
 0x1bd   : > { %v1808_v59 = vrot.slane %v1801_v57, %v2624_v49  ;;  %v1809_v60 = vcombine.low %v1784_v32, %v1792_v33 }
 0x1bf   : > { %v1810_v61 = vcombine.low %v1800_v58, %v1808_v59  ;;  %v1817_v62 = vrot.slane %v1809_v60, %v2624_v49 }
 0x1c1   : > { %v1824_v63 = vrot.slane %v1810_v61, %v2624_v49 }
 0x1c3   : > { %v1825_v0 = vcombine.low %v1817_v62, %v1824_v63  ;;  %v1826_v1 = vcombine.high %v1817_v62, %v1824_v63 }
 0x1c5   : > { %v2124_v2 = vpack.c.bf16 %v1826_v1, %v1825_v0 }
 0x1c7   : > { %1837 = vst [vmem:[%s3113_s5] sm:$0xff] %v2124_v2 }
 0x1c8 PF: > { %s13_s12 = sadd.s32 1, %s2447_s12  }
 0x1c9   : > { %p10_p4 = scmp.ge.s32.totalorder %s13_s12, 4  }
 0x1cb   :  { %12 = sbr.rel (!%p10_p4) target bundleno = 1 (0x1), region = 62 }

// kernel: cae1d_forward.18
= control target key start
LH: loop header
LB: loop body
LE: loop exit
PB: predicated region body
PF: predicated region fallthrough
CT: control target
= control target key end

     0   :  { %s1704_s12 = smov 0   ;;  %s2104_s0 = inlined_call_operand.vmem [shape: bf16[2,39,64], index: 0, kind: input, shape index: {}]   ;;  %s2105_s1 = inlined_call_operand.vmem [shape: bf16[64,96], index: 1, kind: input, shape index: {}]   ;;  %s2106_s2 = inlined_call_operand.vmem [shape: f32[1,32], index: 2, kind: input, shape index: {}]   ;;  %s2107_s3 = inlined_call_operand.vmem [shape: bf16[2,79,32], index: 3, kind: output, shape index: {}]  }
   0x1 LB: > { %s1546_s13 = sadd.s32 4294967295, %s1675_s12   ;;  %p1550_p0 = scmp.ge.s32.totalorder %s1675_s12, 1  ;;  %s1675_s12 = sphi %s1704_s12, %s13_s12  }
   0x2   : > { %p137_p1 = scmp.lt.s32.totalorder %s1675_s12, 3 }
   0x4   : > { %p138_p2 = pnand %p1550_p0, %p137_p1 }
   0x5   : > { %v1640_v0 = vld [vmem:[%s2105_s1] sm:$0xff] (!%p138_p2)   ;;  %v1677_v1 = vmov (!%p138_p2), 0.0   ;;  %v1641_v2 = vld [vmem:[%s2105_s1 + $0x8] sm:$0xff] (!%p138_p2)   ;;  %p161_p3 = scmp.lt.s32.totalorder (!%p138_p2), %s1546_s13, 1  ;;  %vm1678_vm0 = vmmov (!%p138_p2), 0   ;;  %v1642_v4 = vld [vmem:[%s2105_s1 + $0x10] sm:$0xff] (!%p138_p2)   ;;  %v368_v22 = vlaneseq (!%p138_p2) }
   0x6   : > { %141 = sbr.rel (%p138_p2) target bundleno = 452 (0x1c4), region = 32  ;;  %1595 = vmatprep.subr.bf16.mxu0 (!%p138_p2), %v1677_v1  ;;  %1615 = vmatprep.subr.bf16.mxu1 (!%p138_p2), %v1677_v1  ;;  %v1725_v3 = vld [vmem:[%s2106_s2] ss:$0 sm:$0xff] (!%p138_p2)  ;;  %s1679_s26 = smov (!%p138_p2), 32   ;;  %v1643_v5 = vld [vmem:[%s2105_s1 + $0x18] sm:$0xff] (!%p138_p2)   ;;  %vm222_vm1 = vcmask (!%p138_p2), 523264  }
   0x7   : > { %1596 = vmatpush3.bf16.msra.mxu0 (!%p138_p2), %v1640_v0  ;;  %1619 = vmatpush3.bf16.msra.mxu1 (!%p138_p2), %v1640_v0  ;;  %s1680_s29 = smov (!%p138_p2), 64   ;;  %vm294_vm2 = vcmask (!%p138_p2), 1040384   ;;  %v1681_v20 = vmov (!%p138_p2), 1966171168   ;;  %v1760_v31 = vshrl.u32 (!%p138_p2), %v368_v22, 7  ;;  %s1682_s30 = smov (!%p138_p2), 96  }
   0x8   : > { %1597 = vmatprep.subr.bf16.mxu0 (!%p138_p2), %v1677_v1  ;;  %1616 = vmatprep.subr.bf16.mxu1 (!%p138_p2), %v1677_v1  ;;  %v366_v21 = vunpack.c.l.s4 (!%p138_p2), %v1681_v20  ;;  %vm1466_vm3 = vcmask (!%p138_p2), 257024   ;;  %vm1485_vm4 = vcmask (!%p138_p2), 257027   ;;  %vm1486_vm5 = vsmask.f32 (!%p138_p2), 3328 }
   0x9   : > { %1603 = vmatprep.mubr.msk.bf16.mxu0 (!%p138_p2), %vm1678_vm0, %v1677_v1  ;;  %1607 = vmatprep.mubr.msk.bf16.mxu1 (!%p138_p2), %vm1678_vm0, %v1677_v1  ;;  %v1776_v44 = vsub.s32 (!%p138_p2), 0, %v1760_v31  ;;  %vm1487_vm6 = vmand (!%p138_p2), %vm1485_vm4, %vm1486_vm5  ;;  %vm1476_vm7 = vcmask (!%p138_p2), 256000  }
   0xa   : > { %341 = vrot.lane.b32.xlu0 (!%p138_p2), %v1725_v3, %s1679_s26  ;;  %v367_v30 = vunpack.c.0.s8 (!%p138_p2), %v366_v21 }
   0xb   : > { %1598 = vmatpush3.bf16.msra.mxu0 (!%p138_p2), %v1641_v2  ;;  %1620 = vmatpush3.bf16.msra.mxu1 (!%p138_p2), %v1641_v2 }
   0xc   : > { %1599 = vmatprep.subr.bf16.mxu0 (!%p138_p2), %v1677_v1  ;;  %1617 = vmatprep.subr.bf16.mxu1 (!%p138_p2), %v1677_v1  ;;  %v1768_v37 = vsub.s32 (!%p138_p2), %v367_v30, %v1760_v31 }
   0xd   : > { %s2109_s13 = smov (!%p161_p3, %s1546_s13), 1 }
   0xe   : > { %s1623_s22 = smul.u32 20, %s2109_s13  ;;  %354 = vrot.lane.b32.xlu0 %v1725_v3, %s1680_s29 }
   0xf   : > { %1600 = vmatpush3.bf16.msra.mxu0 %v1642_v4  ;;  %1621 = vmatpush3.bf16.msra.mxu1 %v1642_v4  ;;  %s1624_s4 = smul.u32 40, %s2109_s13 }
  0x10   : > { %s165_s25 = scalar_lea.vmem %s2104_s0, %s1623_s22  ;;  %1601 = vmatprep.subr.bf16.mxu0 %v1677_v1  ;;  %1618 = vmatprep.subr.bf16.mxu1 %v1677_v1 }
  0x11   : > { %v1644_v6 = vld [vmem:[%s165_s25] sm:$0xff]   ;;  %v1645_v7 = vld [vmem:[%s165_s25 + $0x8] sm:$0xff]   ;;  %v1646_v8 = vld [vmem:[%s165_s25 + $0x10] ss:$0 sps:$4 sm:$0xff]   ;;  %s1983_s7 = scalar_lea.vmem %s2107_s3, %s1624_s4 }
  0x13   : > { %1602 = vmatpush3.bf16.msra.mxu0 %v1643_v5  ;;  %1622 = vmatpush3.bf16.msra.mxu1 %v1643_v5 }
  0x16   : > { %1604 = vmatmul.mubr.msk.bf16.vlgmr.msra.gmra.mrb[0].mxu0 %vm222_vm1, %v1644_v6  ;;  %1608 = vmatmul.mubr.msk.bf16.vlgmr.msra.gmra.mrb[0].mxu1 %vm222_vm1, %v1645_v7 }
  0x17   : > { %1611 = vmatprep.mubr.msk.bf16.mxu1 %vm1678_vm0, %v1677_v1 }
  0x1e   : > { %1612 = vmatmul.mubr.msk.bf16.gmra.mrb[4].mxu1 %vm222_vm1, %v1646_v8 }
  0x7c   : > { %v342_v9 = vpop.permute.xlu0 %341 }
  0xe9   : > { %v1741_v10 = vpop.f32.mrb[0].mxu0  ;;  %v1743_v11 = vpop.f32.mrb[0].mxu1 }
  0xea   : > { %v344_v12 = vadd.f32 %v342_v9, %v1741_v10  ;;  %v298_v13 = vrot.slane %v1743_v11, 7  ;;  %v346_v14 = vadd.f32 %v342_v9, %v1743_v11  ;;  %v1605_v15 = vpop.f32.mrb[1].mxu0  ;;  %v1609_v16 = vpop.f32.mrb[1].mxu1  ;;  %v295_v17 = vrot.slane %v1741_v10, 7 }
  0xeb   : > { %v1749_v18 = vpop.f32.mrb[2].mxu0  ;;  %v1751_v19 = vpop.f32.mrb[2].mxu1 }
  0xec   : > { %1647 = vtanh.f32 %v344_v12  ;;  %v296_v23 = vrot.slane %v1749_v18, 7  ;;  %v300_v24 = vrot.slane %v1751_v19, 7  ;;  %304 = vrot.lane.b32.xlu1 %v295_v17, %s1680_s29  ;;  %v1606_v25 = vpop.f32.mrb[3].mxu0  ;;  %v1610_v26 = vpop.f32.mrb[3].mxu1  ;;  %v345_v32 = vadd.f32 %v342_v9, %v1749_v18 }
  0xed   : > { %1649 = vtanh.f32 %v346_v14  ;;  %v347_v50 = vadd.f32 %v342_v9, %v1751_v19 }
  0xee   : > { %v299_v27 = vsel %vm294_vm2, %v296_v23, %v298_v13  ;;  %v297_v28 = vsel %vm294_vm2, %v295_v17, %v296_v23  ;;  %v301_v29 = vsel %vm294_vm2, %v298_v13, %v300_v24  ;;  %1651 = vtanh.f32 %v345_v32 }
  0xef   : > { %308 = vrot.lane.b32.xlu0 %v299_v27, %s1680_s29 }
  0xf0   : > { %306 = vrot.lane.b32.xlu1 %v297_v28, %s1680_s29 }
  0xf1   : > { %v1764_v33 = vpop.f32.mrb[4].mxu1 }
  0xf2   : > { %v302_v34 = vrot.slane %v1764_v33, 7  ;;  %v1613_v35 = vpop.f32.mrb[5].mxu1  ;;  %v348_v41 = vadd.f32 %v342_v9, %v1764_v33 }
  0xf3   : > { %v285_v36 = vpop.f32.mrb[6].mxu1 }
  0xf4   : > { %310 = vrot.lane.b32.xlu1 %v301_v29, %s1680_s29  ;;  %v303_v38 = vsel %vm294_vm2, %v300_v24, %v302_v34  ;;  %v1614_v39 = vpop.f32.mrb[7].mxu1  ;;  %1653 = vtanh.f32 %v348_v41 }
  0xf5   : > { %312 = vrot.lane.b32.xlu0 %v303_v38, %s1680_s29  ;;  %1655 = vtanh.f32 %v347_v50 }
  0xf6   : > { %v1648_v40 = vpop.eup %1647 }
  0xf7   : > { %v1650_v42 = vpop.eup %1649  ;;  %v659_v43 = vrot.slane %v1648_v40, %v1768_v37  ;;  %v652_v48 = vcombine.high %v1648_v40, %v1648_v40 }
  0xf8   : > { %v757_v45 = vrot.slane %v1650_v42, %v1768_v37  ;;  %v1788_v57 = vpop.eup %1651  ;;  %v750_v4 = vcombine.high %v1650_v42, %v1650_v42 }
  0xf9   : > { %v675_v46 = vrot.slane %v659_v43, %v1768_v37  ;;  %v667_v47 = vcombine.high %v659_v43, %v659_v43  ;;  %v666_v56 = vrot.slane %v652_v48, %v1768_v37  ;;  %v708_v63 = vrot.slane %v1788_v57, %v1768_v37 }
  0xfa   : > { %v765_v49 = vcombine.high %v757_v45, %v757_v45  ;;  %v773_v53 = vrot.slane %v757_v45, %v1768_v37  ;;  %v764_v13 = vrot.slane %v750_v4, %v1768_v37 }
  0xfb   : > { %v899_v51 = vrot.slane %v675_v46, %v1776_v44  ;;  %v689_v52 = vrot.slane %v667_v47, %v1768_v37  ;;  %v697_v59 = vcombine.high %v675_v46, %v675_v46  ;;  %v668_v62 = vcombine.high %v666_v56, %v666_v56 }
  0xfc   : > { %v787_v55 = vrot.slane %v765_v49, %v1768_v37  ;;  %v963_v58 = vrot.slane %v773_v53, %v1776_v44  ;;  %v1799_v1 = vrot.slane %v666_v56, %v1768_v37  ;;  %v716_v7 = vcombine.high %v708_v63, %v708_v63 }
  0xfd   : > { %1052 = vrot.lane.b32.xlu1 %v899_v51, %s1682_s30  ;;  %v903_v54 = vrot.slane %v689_v52, %v1776_v44  ;;  %v699_v61 = vcombine.high %v689_v52, %v689_v52  ;;  %v907_v0 = vrot.slane %v697_v59, %v1776_v44  ;;  %v1804_v6 = vrot.slane %v668_v62, %v1768_v37 }
  0xfe   : > { %v967_v60 = vrot.slane %v787_v55, %v1776_v44  ;;  %v1654_v2 = vpop.eup %1653  ;;  %v915_v8 = vrot.slane %v1799_v1, %v1776_v44  ;;  %v1810_v9 = vrot.slane %v708_v63, %v1768_v37  ;;  %v738_v16 = vrot.slane %v716_v7, %v1768_v37 }
  0xff   : > { %1054 = vrot.lane.b32.xlu0 %v903_v54, %s1682_s30  ;;  %v911_v5 = vrot.slane %v699_v61, %v1776_v44  ;;  %v855_v12 = vrot.slane %v1654_v2, %v1768_v37  ;;  %v1814_v14 = vpop.eup %1655  ;;  %v919_v15 = vrot.slane %v1804_v6, %v1776_v44  ;;  %v848_v21 = vcombine.high %v1654_v2, %v1654_v2 }
 0x100   : > { %v931_v22 = vrot.slane %v1810_v9, %v1776_v44  ;;  %v795_v23 = vcombine.high %v773_v53, %v773_v53  ;;  %v806_v26 = vrot.slane %v1814_v14, %v1768_v37  ;;  %v935_v28 = vrot.slane %v738_v16, %v1776_v44 }
 0x101   : > { %1084 = vrot.lane.b32.xlu1 %v963_v58, %s1682_s30  ;;  %v1821_v17 = vrot.slane %v855_v12, %v1768_v37  ;;  %v863_v20 = vcombine.high %v855_v12, %v855_v12  ;;  %v797_v29 = vcombine.high %v787_v55, %v787_v55  ;;  %v766_v30 = vcombine.high %v764_v13, %v764_v13 }
 0x102   : > { %v862_v36 = vrot.slane %v848_v21, %v1768_v37  ;;  %v971_v38 = vrot.slane %v795_v23, %v1776_v44  ;;  %v780_v39 = vrot.slane %v764_v13, %v1768_v37  ;;  %v814_v46 = vcombine.high %v806_v26, %v806_v26 }
 0x103   : > { %1086 = vrot.lane.b32.xlu0 %v967_v60, %s1682_s30  ;;  %v1027_v24 = vrot.slane %v1821_v17, %v1776_v44  ;;  %v1829_v25 = vrot.slane %v863_v20, %v1768_v37  ;;  %v893_v27 = vcombine.high %v1821_v17, %v1821_v17  ;;  %v975_v43 = vrot.slane %v797_v29, %v1776_v44 }
 0x104   : > { %v1852_v41 = vrot.slane %v862_v36, %v1768_v37  ;;  %v864_v42 = vcombine.high %v862_v36, %v862_v36  ;;  %v794_v45 = vrot.slane %v766_v30, %v1768_v37  ;;  %v979_v50 = vrot.slane %v780_v39, %v1776_v44 }
 0x105   : > { %1056 = vrot.lane.b32.xlu1 %v907_v0, %s1682_s30  ;;  %v1031_v32 = vrot.slane %v1829_v25, %v1776_v44  ;;  %v1840_v34 = vrot.slane %v893_v27, %v1776_v44  ;;  %v895_v35 = vcombine.high %v1829_v25, %v1829_v25  ;;  %v822_v51 = vrot.slane %v806_v26, %v1768_v37 }
 0x106   : > { %v1043_v47 = vrot.slane %v1852_v41, %v1776_v44  ;;  %v1860_v48 = vrot.slane %v864_v42, %v1768_v37  ;;  %v894_v49 = vcombine.high %v1852_v41, %v1852_v41  ;;  %v983_v54 = vrot.slane %v794_v45, %v1776_v44 }
 0x107   : > { %1058 = vrot.lane.b32.xlu0 %v911_v5, %s1682_s30  ;;  %v1849_v40 = vrot.slane %v895_v35, %v1776_v44  ;;  %v836_v55 = vrot.slane %v814_v46, %v1768_v37  ;;  %v701_v56 = vcombine.high %v1788_v57, %v1788_v57  ;;  %v995_v58 = vrot.slane %v822_v51, %v1776_v44 }
 0x108   : > { %v1047_v52 = vrot.slane %v1860_v48, %v1776_v44  ;;  %v1870_v53 = vrot.slane %v894_v49, %v1776_v44  ;;  %v698_v59 = vcombine.high %v1799_v1, %v1799_v1  ;;  %v700_v61 = vcombine.high %v1804_v6, %v1804_v6 }
 0x109   : > { %1060 = vrot.lane.b32.xlu1 %v915_v8, %s1682_s30  ;;  %v999_v60 = vrot.slane %v836_v55, %v1776_v44  ;;  %v715_v62 = vrot.slane %v701_v56, %v1768_v37  ;;  %v746_v63 = vcombine.high %v1810_v9, %v1810_v9  ;;  %v748_v1 = vcombine.high %v738_v16, %v738_v16 }
 0x10a   : > { %v923_v57 = vrot.slane %v698_v59, %v1776_v44  ;;  %v927_v0 = vrot.slane %v700_v61, %v1776_v44  ;;  %v799_v8 = vcombine.high %v1814_v14, %v1814_v14  ;;  %v796_v12 = vcombine.high %v780_v39, %v780_v39 }
 0x10b   : > { %1062 = vrot.lane.b32.xlu0 %v919_v15, %s1682_s30  ;;  %v717_v2 = vcombine.high %v715_v62, %v715_v62  ;;  %v939_v4 = vrot.slane %v746_v63, %v1776_v44  ;;  %v731_v5 = vrot.slane %v715_v62, %v1768_v37  ;;  %v943_v6 = vrot.slane %v748_v1, %v1776_v44 }
 0x10c   : > { %v798_v15 = vcombine.high %v794_v45, %v794_v45  ;;  %v813_v16 = vrot.slane %v799_v8, %v1768_v37  ;;  %v987_v20 = vrot.slane %v796_v12, %v1776_v44  ;;  %v844_v21 = vcombine.high %v822_v51, %v822_v51 }
 0x10d   : > { %1068 = vrot.lane.b32.xlu1 %v931_v22, %s1682_s30  ;;  %v745_v7 = vrot.slane %v717_v2, %v1768_v37  ;;  %v947_v9 = vrot.slane %v731_v5, %v1776_v44  ;;  %v846_v22 = vcombine.high %v836_v55, %v836_v55  ;;  %v747_v35 = vcombine.high %v731_v5, %v731_v5 }
 0x10e   : > { %v991_v14 = vrot.slane %v798_v15, %v1776_v44  ;;  %v815_v23 = vcombine.high %v813_v16, %v813_v16  ;;  %v1003_v26 = vrot.slane %v844_v21, %v1776_v44  ;;  %v829_v27 = vrot.slane %v813_v16, %v1768_v37 }
 0x10f   : > { %1070 = vrot.lane.b32.xlu0 %v935_v28, %s1682_s30  ;;  %v951_v13 = vrot.slane %v745_v7, %v1776_v44  ;;  %v1007_v28 = vrot.slane %v846_v22, %v1776_v44  ;;  %v955_v39 = vrot.slane %v747_v35, %v1776_v44  ;;  %v1683_v59 = vmov 1983009808  }
 0x110   : > { %v843_v29 = vrot.slane %v815_v23, %v1768_v37  ;;  %v1011_v30 = vrot.slane %v829_v27, %v1776_v44  ;;  %v845_v42 = vcombine.high %v829_v27, %v829_v27 }
 0x111   : > { %1088 = vrot.lane.b32.xlu1 %v971_v38, %s1682_s30  ;;  %v749_v38 = vcombine.high %v745_v7, %v745_v7 }
 0x112   : > { %v1015_v36 = vrot.slane %v843_v29, %v1776_v44  ;;  %v847_v46 = vcombine.high %v843_v29, %v843_v29  ;;  %v1019_v49 = vrot.slane %v845_v42, %v1776_v44 }
 0x113   : > { %1090 = vrot.lane.b32.xlu0 %v975_v43, %s1682_s30  ;;  %v355_v43 = vpop.permute.xlu0 %354  ;;  %v959_v45 = vrot.slane %v749_v38, %v1776_v44 }
 0x114   : > { %v1023_v51 = vrot.slane %v847_v46, %v1776_v44 }
 0x115   : > { %1092 = vrot.lane.b32.xlu1 %v979_v50, %s1682_s30  ;;  %v357_v50 = vadd.f32 %v355_v43, %v1764_v33 }
 0x117   : > { %1094 = vrot.lane.b32.xlu0 %v983_v54, %s1682_s30  ;;  %1657 = vtanh.f32 %v357_v50 }
 0x119   : > { %1100 = vrot.lane.b32.xlu1 %v995_v58, %s1682_s30 }
 0x11b   : > { %1102 = vrot.lane.b32.xlu0 %v999_v60, %s1682_s30 }
 0x11d   : > { %1064 = vrot.lane.b32.xlu1 %v923_v57, %s1682_s30 }
 0x11f   : > { %1066 = vrot.lane.b32.xlu0 %v927_v0, %s1682_s30 }
 0x121   : > { %1072 = vrot.lane.b32.xlu1 %v939_v4, %s1682_s30  ;;  %v1658_v54 = vpop.eup %1657 }
 0x122   : > { %v1587_v17 = vpack.c.bf16 %v1658_v54, %v1658_v54 }
 0x123   : > { %1074 = vrot.lane.b32.xlu0 %v943_v6, %s1682_s30 }
 0x125   : > { %1076 = vrot.lane.b32.xlu1 %v947_v9, %s1682_s30 }
 0x127   : > { %1078 = vrot.lane.b32.xlu0 %v951_v13, %s1682_s30 }
 0x129   : > { %1096 = vrot.lane.b32.xlu1 %v987_v20, %s1682_s30 }
 0x12b   : > { %1098 = vrot.lane.b32.xlu0 %v991_v14, %s1682_s30 }
 0x12d   : > { %1104 = vrot.lane.b32.xlu1 %v1003_v26, %s1682_s30 }
 0x12f   : > { %1106 = vrot.lane.b32.xlu0 %v1007_v28, %s1682_s30 }
 0x131   : > { %1108 = vrot.lane.b32.xlu1 %v1011_v30, %s1682_s30 }
 0x133   : > { %1110 = vrot.lane.b32.xlu0 %v1015_v36, %s1682_s30 }
 0x135   : > { %1080 = vrot.lane.b32.xlu1 %v955_v39, %s1682_s30 }
 0x137   : > { %1082 = vrot.lane.b32.xlu0 %v959_v45, %s1682_s30 }
 0x139   : > { %1112 = vrot.lane.b32.xlu1 %v1019_v49, %s1682_s30 }
 0x13b   : > { %1114 = vrot.lane.b32.xlu0 %v1023_v51, %s1682_s30 }
 0x13d   : > { %1116 = vrot.lane.b32.xlu1 %v1027_v24, %s1682_s30 }
 0x13f   : > { %1118 = vrot.lane.b32.xlu0 %v1031_v32, %s1682_s30 }
 0x141   : > { %1120 = vrot.lane.b32.xlu1 %v1840_v34, %s1682_s30 }
 0x143   : > { %1122 = vrot.lane.b32.xlu0 %v1849_v40, %s1682_s30 }
 0x145   : > { %1124 = vrot.lane.b32.xlu1 %v1043_v47, %s1682_s30 }
 0x147   : > { %1126 = vrot.lane.b32.xlu0 %v1047_v52, %s1682_s30 }
 0x149   : > { %1128 = vrot.lane.b32.xlu1 %v1870_v53, %s1682_s30 }
 0x14b   : > { %1482 = vrot.lane.b32.xlu0 %v1587_v17, %s1680_s29 }
 0x15e   : > { %v305_v24 = vpop.permute.xlu1 %304 }
 0x15f   : > { %v319_v25 = vsel %vm294_vm2, 0.0, %v305_v24 }
 0x160   : > { %v320_v32 = vadd.f32 %v319_v25, %v1741_v10  ;;  %v1250_v10 = vunpack.c.l.s4 %v1683_v59 }
 0x161   : > { %v309_v34 = vpop.permute.xlu0 %308 }
 0x162   : > { %v331_v40 = vadd.f32 %v1725_v3, %v320_v32  ;;  %v322_v41 = vadd.f32 %v309_v34, %v1743_v11  ;;  %v307_v47 = vpop.permute.xlu1 %306  ;;  %v1251_v0 = vunpack.c.0.s8 %v1250_v10 }
 0x163   : > { %v321_v11 = vadd.f32 %v307_v47, %v1749_v18 }
 0x164   : > { %1659 = vtanh.f32 %v331_v40  ;;  %v333_v44 = vadd.f32 %v1725_v3, %v322_v41  ;;  %v1971_v9 = vsub.s32 %v1251_v0, %v1760_v31 }
 0x165   : > { %v332_v5 = vadd.f32 %v1725_v3, %v321_v11 }
 0x166   : > { %1661 = vtanh.f32 %v333_v44  ;;  %v311_v48 = vpop.permute.xlu1 %310 }
 0x167   : > { %v1957_v52 = vpop.permute.xlu0 %312  ;;  %1663 = vtanh.f32 %v332_v5  ;;  %v323_v27 = vadd.f32 %v311_v48, %v1751_v19 }
 0x169   : > { %v334_v39 = vadd.f32 %v1725_v3, %v323_v27 }
 0x16b   : > { %1665 = vtanh.f32 %v334_v39 }
 0x16e   : > { %v1660_v53 = vpop.eup %1659 }
 0x16f   : > { %v371_v55 = vrot.slane %v1660_v53, %v1768_v37  ;;  %v1053_v56 = vpop.permute.xlu1 %1052  ;;  %v364_v35 = vcombine.high %v1660_v53, %v1660_v53 }
 0x170   : > { %v1960_v61 = vpop.eup %1661 }
 0x171   : > { %v379_v58 = vcombine.high %v371_v55, %v371_v55  ;;  %v1055_v60 = vpop.permute.xlu0 %1054  ;;  %v387_v63 = vrot.slane %v371_v55, %v1768_v37  ;;  %v469_v4 = vrot.slane %v1960_v61, %v1768_v37  ;;  %v378_v45 = vrot.slane %v364_v35, %v1768_v37  ;;  %v1992_v50 = vpop.eup %1663 }
 0x172   : > { %v420_v40 = vrot.slane %v1992_v50, %v1768_v37  ;;  %v462_v53 = vcombine.high %v1960_v61, %v1960_v61 }
 0x173   : > { %v401_v62 = vrot.slane %v379_v58, %v1768_v37  ;;  %v1085_v57 = vpop.permute.xlu1 %1084  ;;  %v1169_v7 = vsel %vm294_vm2, %v387_v63, %v1053_v56  ;;  %v409_v8 = vcombine.high %v387_v63, %v387_v63  ;;  %v477_v15 = vcombine.high %v469_v4, %v469_v4 }
 0x174   : > { %v485_v30 = vrot.slane %v469_v4, %v1768_v37  ;;  %v380_v34 = vcombine.high %v378_v45, %v378_v45  ;;  %v394_v56 = vrot.slane %v378_v45, %v1768_v37  ;;  %v428_v59 = vcombine.high %v420_v40, %v420_v40 }
 0x175   : > { %v1087_v1 = vpop.permute.xlu0 %1086  ;;  %v1170_v2 = vsel %vm294_vm2, %v401_v62, %v1055_v60  ;;  %v411_v18 = vcombine.high %v401_v62, %v401_v62  ;;  %v499_v31 = vrot.slane %v477_v15, %v1768_v37  ;;  %v436_v62 = vrot.slane %v420_v40, %v1768_v37  ;;  %v1666_v0 = vpop.eup %1665 }
 0x176   : > { %v1247_v12 = vcombine.low %v1169_v7, %v1170_v2  ;;  %v1185_v43 = vsel %vm294_vm2, %v485_v30, %v1085_v57  ;;  %v507_v46 = vcombine.high %v485_v30, %v485_v30  ;;  %v408_v58 = vrot.slane %v380_v34, %v1768_v37 }
 0x177   : > { %v1057_v6 = vpop.permute.xlu1 %1056  ;;  %v1186_v19 = vsel %vm294_vm2, %v499_v31, %v1087_v1  ;;  %v509_v49 = vcombine.high %v499_v31, %v499_v31  ;;  %v476_v57 = vrot.slane %v462_v53, %v1768_v37  ;;  %v450_v1 = vrot.slane %v428_v59, %v1768_v37 }
 0x178   : > { %v1171_v16 = vsel %vm294_vm2, %v409_v8, %v1057_v6  ;;  %v1255_v22 = vrot.slane %v1247_v12, %v1971_v9  ;;  %v1315_v51 = vcombine.low %v1185_v43, %v1186_v19  ;;  %v410_v2 = vcombine.high %v394_v56, %v394_v56 }
 0x179   : > { %v1059_v13 = vpop.permute.xlu0 %1058  ;;  %v412_v4 = vcombine.high %v408_v58, %v408_v58  ;;  %v324_v7 = vadd.f32 %v1957_v52, %v1764_v33  ;;  %v492_v39 = vrot.slane %v476_v57, %v1768_v37  ;;  %v511_v40 = vcombine.high %v1666_v0, %v1666_v0 }
 0x17a   : > { %v1172_v20 = vsel %vm294_vm2, %v411_v18, %v1059_v13  ;;  %v1323_v41 = vrot.slane %v1315_v51, %v1971_v9  ;;  %v518_v13 = vrot.slane %v1666_v0, %v1768_v37 }
 0x17b   : > { %v1248_v21 = vcombine.low %v1171_v16, %v1172_v20  ;;  %v1061_v14 = vpop.permute.xlu1 %1060  ;;  %v335_v27 = vadd.f32 %v1725_v3, %v324_v7 }
 0x17c   : > { %v1173_v61 = vsel %vm294_vm2, %v394_v56, %v1061_v14  ;;  %v458_v14 = vcombine.high %v436_v62, %v436_v62  ;;  %v526_v30 = vcombine.high %v518_v13, %v518_v13 }
 0x17d   : > { %v1262_v23 = vrot.slane %v1248_v21, %v1971_v9  ;;  %v1063_v26 = vpop.permute.xlu0 %1062  ;;  %v478_v21 = vcombine.high %v476_v57, %v476_v57  ;;  %1667 = vtanh.f32 %v335_v27  ;;  %v525_v57 = vrot.slane %v511_v40, %v1768_v37 }
 0x17e   : > { %v1174_v11 = vsel %vm294_vm2, %v408_v58, %v1063_v26  ;;  %v548_v51 = vrot.slane %v526_v30, %v1768_v37 }
 0x17f   : > { %v1263_v28 = vcombine.low %v1255_v22, %v1262_v23  ;;  %v1069_v29 = vpop.permute.xlu1 %1068  ;;  %v1264_v5 = vcombine.low %v1173_v61, %v1174_v11  ;;  %v460_v22 = vcombine.high %v450_v1, %v450_v1  ;;  %v506_v19 = vrot.slane %v478_v21, %v1768_v37 }
 0x180   : > { %v1177_v20 = vsel %vm294_vm2, %v436_v62, %v1069_v29  ;;  %v413_v29 = vcombine.high %v1992_v50, %v1992_v50  ;;  %v558_v62 = vcombine.high %v548_v51, %v548_v51 }
 0x181   : > { %v1577_v36 = vpack.c.bf16 %v1263_v28, %v1263_v28  ;;  %v1071_v38 = vpop.permute.xlu0 %1070  ;;  %v1272_v23 = vrot.slane %v1264_v5, %v1971_v9  ;;  %v510_v34 = vcombine.high %v506_v19, %v506_v19 }
 0x182   : > { %v1178_v8 = vsel %vm294_vm2, %v450_v1, %v1071_v38 }
 0x183   : > { %1467 = vst.msk [vmem:[%s1983_s7] sm:$0xf] %vm1466_vm3, %v1577_v36  ;;  %v1089_v42 = vpop.permute.xlu1 %1088  ;;  %v1281_v26 = vcombine.low %v1177_v20, %v1178_v8 }
 0x184   : > { %v1187_v17 = vsel %vm294_vm2, %v507_v46, %v1089_v42 }
 0x185   : > { %v1091_v54 = vpop.permute.xlu0 %1090  ;;  %v1289_v42 = vrot.slane %v1281_v26, %v1971_v9 }
 0x186   : > { %v1188_v24 = vsel %vm294_vm2, %v509_v49, %v1091_v54  ;;  %v534_v49 = vrot.slane %v518_v13, %v1768_v37  ;;  %v427_v54 = vrot.slane %v413_v29, %v1768_v37 }
 0x187   : > { %v1316_v25 = vcombine.low %v1187_v17, %v1188_v24  ;;  %v1996_v32 = vpop.permute.xlu1 %1092  ;;  %v1668_v7 = vpop.eup %1667 }
 0x188   : > { %v1189_v24 = vsel %vm294_vm2, %v492_v39, %v1996_v32  ;;  %v556_v59 = vcombine.high %v534_v49, %v534_v49  ;;  %v429_v11 = vcombine.high %v427_v54, %v427_v54 }
 0x189   : > { %v1330_v44 = vrot.slane %v1316_v25, %v1971_v9  ;;  %v1095_v47 = vpop.permute.xlu0 %1094  ;;  %v508_v25 = vcombine.high %v492_v39, %v492_v39 }
 0x18a   : > { %v1190_v46 = vsel %vm294_vm2, %v506_v19, %v1095_v47  ;;  %v457_v8 = vrot.slane %v429_v11, %v1768_v37 }
 0x18b   : > { %v1331_v48 = vcombine.low %v1323_v41, %v1330_v44  ;;  %v2004_v55 = vpop.permute.xlu1 %1100  ;;  %v1332_v41 = vcombine.low %v1189_v24, %v1190_v46 }
 0x18c   : > { %v1193_v32 = vsel %vm294_vm2, %v534_v49, %v2004_v55  ;;  %v461_v27 = vcombine.high %v457_v8, %v457_v8 }
 0x18d   : > { %v1581_v10 = vpack.c.bf16 %v1331_v48, %v1331_v48  ;;  %v1103_v60 = vpop.permute.xlu0 %1102 }
 0x18e   : > { %v1194_v48 = vsel %vm294_vm2, %v548_v51, %v1103_v60 }
 0x18f   : > { %1471 = vst.msk [vmem:[%s1983_s7 + $0x10] sm:$0xf] %vm1466_vm3, %v1581_v10  ;;  %v1065_v63 = vpop.permute.xlu1 %1064  ;;  %v1349_v0 = vcombine.low %v1193_v32, %v1194_v48 }
 0x190   : > { %v1175_v18 = vsel %vm294_vm2, %v410_v2, %v1065_v63  ;;  %v1340_v63 = vrot.slane %v1332_v41, %v1971_v9 }
 0x191   : > { %v1067_v6 = vpop.permute.xlu0 %1066 }
 0x192   : > { %v1176_v12 = vsel %vm294_vm2, %v412_v4, %v1067_v6  ;;  %v443_v4 = vrot.slane %v427_v54, %v1768_v37 }
 0x193   : > { %v1265_v15 = vcombine.low %v1175_v18, %v1176_v12  ;;  %v1073_v16 = vpop.permute.xlu1 %1072  ;;  %v527_v18 = vcombine.high %v525_v57, %v525_v57  ;;  %v1357_v12 = vrot.slane %v1349_v0, %v1971_v9 }
 0x194   : > { %v1179_v31 = vsel %vm294_vm2, %v458_v14, %v1073_v16  ;;  %v459_v14 = vcombine.high %v443_v4, %v443_v4 }
 0x195   : > { %v1279_v33 = vrot.slane %v1265_v15, %v1971_v9  ;;  %v1075_v52 = vpop.permute.xlu0 %1074 }
 0x196   : > { %v1180_v28 = vsel %vm294_vm2, %v460_v22, %v1075_v52  ;;  %v555_v52 = vrot.slane %v527_v18, %v1768_v37 }
 0x197   : > { %v1280_v35 = vcombine.low %v1272_v23, %v1279_v33  ;;  %v1282_v36 = vcombine.low %v1179_v31, %v1180_v28  ;;  %v1077_v38 = vpop.permute.xlu1 %1076  ;;  %v567_v23 = vrot.slane %v1668_v7, %v1768_v37  ;;  %v541_v33 = vrot.slane %v525_v57, %v1768_v37 }
 0x198   : > { %v1181_v26 = vsel %vm294_vm2, %v443_v4, %v1077_v38 }
 0x199   : > { %v1578_v43 = vpack.c.bf16 %v1280_v35, %v1280_v35  ;;  %v1296_v3 = vrot.slane %v1282_v36, %v1971_v9  ;;  %v1079_v45 = vpop.permute.xlu0 %1078  ;;  %v583_v40 = vrot.slane %v567_v23, %v1768_v37 }
 0x19a   : > { %v1182_v20 = vsel %vm294_vm2, %v457_v8, %v1079_v45  ;;  %v575_v45 = vcombine.high %v567_v23, %v567_v23 }
 0x19b   : > { %1468 = vst.msk [vmem:[%s1983_s7 + $0x4] sm:$0xf] %vm1466_vm3, %v1578_v43  ;;  %v1297_v50 = vcombine.low %v1289_v42, %v1296_v3  ;;  %v1097_v17 = vpop.permute.xlu1 %1096  ;;  %v1298_v31 = vcombine.low %v1181_v26, %v1182_v20  ;;  %v560_v42 = vcombine.high %v1668_v7, %v1668_v7  ;;  %v557_v43 = vcombine.high %v541_v33, %v541_v33 }
 0x19c   : > { %v1191_v53 = vsel %vm294_vm2, %v508_v25, %v1097_v17  ;;  %v559_v3 = vcombine.high %v555_v52, %v555_v52  ;;  %v597_v41 = vrot.slane %v575_v45, %v1768_v37  ;;  %v605_v11 = vcombine.high %v583_v40, %v583_v40 }
 0x19d   : > { %v1579_v44 = vpack.c.bf16 %v1297_v50, %v1297_v50  ;;  %v1099_v47 = vpop.permute.xlu0 %1098  ;;  %v1306_v46 = vrot.slane %v1298_v31, %v1971_v9 }
 0x19e   : > { %v1192_v56 = vsel %vm294_vm2, %v510_v34, %v1099_v47 }
 0x19f   : > { %1469 = vst.msk [vmem:[%s1983_s7 + $0x8] sm:$0xf] %vm1466_vm3, %v1579_v44  ;;  %v1333_v58 = vcombine.low %v1191_v53, %v1192_v56  ;;  %v1105_v10 = vpop.permute.xlu1 %1104  ;;  %v574_v44 = vrot.slane %v560_v42, %v1768_v37 }
 0x1a0   : > { %v1195_v1 = vsel %vm294_vm2, %v556_v59, %v1105_v10 }
 0x1a1   : > { %v1347_v60 = vrot.slane %v1333_v58, %v1971_v9  ;;  %v1107_v61 = vpop.permute.xlu0 %1106  ;;  %v576_v57 = vcombine.high %v574_v44, %v574_v44 }
 0x1a2   : > { %v1196_v2 = vsel %vm294_vm2, %v558_v62, %v1107_v61  ;;  %v607_v62 = vcombine.high %v597_v41, %v597_v41 }
 0x1a3   : > { %v1348_v5 = vcombine.low %v1340_v63, %v1347_v60  ;;  %v1350_v6 = vcombine.low %v1195_v1, %v1196_v2  ;;  %v1109_v55 = vpop.permute.xlu1 %1108  ;;  %v590_v2 = vrot.slane %v574_v44, %v1768_v37 }
 0x1a4   : > { %v1197_v38 = vsel %vm294_vm2, %v541_v33, %v1109_v55 }
 0x1a5   : > { %v1582_v13 = vpack.c.bf16 %v1348_v5, %v1348_v5  ;;  %v1364_v15 = vrot.slane %v1350_v6, %v1971_v9  ;;  %v1111_v16 = vpop.permute.xlu0 %1110  ;;  %v604_v6 = vrot.slane %v576_v57, %v1768_v37  ;;  %v1488_v37 = vld [vmem:[%s1983_s7 + $0x24] sm:$0x8] }
 0x1a6   : > { %v1198_v35 = vsel %vm294_vm2, %v555_v52, %v1111_v16 }
 0x1a7   : > { %1472 = vst.msk [vmem:[%s1983_s7 + $0x14] sm:$0xf] %vm1466_vm3, %v1582_v13  ;;  %v1365_v21 = vcombine.low %v1357_v12, %v1364_v15  ;;  %v1081_v22 = vpop.permute.xlu1 %1080  ;;  %v1366_v49 = vcombine.low %v1197_v38, %v1198_v35  ;;  %v606_v13 = vcombine.high %v590_v2, %v590_v2 }
 0x1a8   : > { %v1183_v36 = vsel %vm294_vm2, %v459_v14, %v1081_v22 }
 0x1a9   : > { %v1583_v28 = vpack.c.bf16 %v1365_v21, %v1365_v21  ;;  %v1083_v30 = vpop.permute.xlu0 %1082  ;;  %v1374_v47 = vrot.slane %v1366_v49, %v1971_v9 }
 0x1aa   : > { %v1184_v29 = vsel %vm294_vm2, %v461_v27, %v1083_v30 }
 0x1ab   : > { %1473 = vst.msk [vmem:[%s1983_s7 + $0x18] sm:$0xf] %vm1466_vm3, %v1583_v28  ;;  %v1299_v39 = vcombine.low %v1183_v36, %v1184_v29  ;;  %v1113_v19 = vpop.permute.xlu1 %1112 }
 0x1ac   : > { %v1199_v54 = vsel %vm294_vm2, %v557_v43, %v1113_v19 }
 0x1ad   : > { %v1313_v51 = vrot.slane %v1299_v39, %v1971_v9  ;;  %v1115_v50 = vpop.permute.xlu0 %1114 }
 0x1ae   : > { %v1200_v17 = vsel %vm294_vm2, %v559_v3, %v1115_v50 }
 0x1af   : > { %v1314_v24 = vcombine.low %v1306_v46, %v1313_v51  ;;  %v1367_v25 = vcombine.low %v1199_v54, %v1200_v17  ;;  %v1117_v34 = vpop.permute.xlu1 %1116 }
 0x1b0   : > { %v1201_v32 = vsel %vm294_vm2, %v583_v40, %v1117_v34 }
 0x1b1   : > { %v1580_v48 = vpack.c.bf16 %v1314_v24, %v1314_v24  ;;  %v1381_v53 = vrot.slane %v1367_v25, %v1971_v9  ;;  %v1119_v56 = vpop.permute.xlu0 %1118 }
 0x1b2   : > { %v1202_v58 = vsel %vm294_vm2, %v597_v41, %v1119_v56 }
 0x1b3   : > { %1470 = vst.msk [vmem:[%s1983_s7 + $0xc] sm:$0xf] %vm1466_vm3, %v1580_v48  ;;  %v1382_v59 = vcombine.low %v1374_v47, %v1381_v53  ;;  %v1121_v10 = vpop.permute.xlu1 %1120  ;;  %v1383_v0 = vcombine.low %v1201_v32, %v1202_v58 }
 0x1b4   : > { %v1203_v61 = vsel %vm294_vm2, %v605_v11, %v1121_v10 }
 0x1b5   : > { %v1584_v63 = vpack.c.bf16 %v1382_v59, %v1382_v59  ;;  %v1123_v60 = vpop.permute.xlu0 %1122  ;;  %v1391_v55 = vrot.slane %v1383_v0, %v1971_v9 }
 0x1b6   : > { %v1204_v1 = vsel %vm294_vm2, %v607_v62, %v1123_v60 }
 0x1b7   : > { %1474 = vst.msk [vmem:[%s1983_s7 + $0x1c] sm:$0xf] %vm1466_vm3, %v1584_v63  ;;  %v1384_v4 = vcombine.low %v1203_v61, %v1204_v1  ;;  %v1125_v5 = vpop.permute.xlu1 %1124 }
 0x1b8   : > { %v1205_v18 = vsel %vm294_vm2, %v590_v2, %v1125_v5 }
 0x1b9   : > { %v1398_v7 = vrot.slane %v1384_v4, %v1971_v9  ;;  %v1127_v8 = vpop.permute.xlu0 %1126 }
 0x1ba   : > { %v1206_v12 = vsel %vm294_vm2, %v604_v6, %v1127_v8 }
 0x1bb   : > { %v1399_v15 = vcombine.low %v1391_v55, %v1398_v7  ;;  %v1400_v16 = vcombine.low %v1205_v18, %v1206_v12  ;;  %v1129_v20 = vpop.permute.xlu1 %1128 }
 0x1bc   : > { %v1207_v21 = vsel %vm294_vm2, %v606_v13, %v1129_v20 }
 0x1bd   : > { %v1585_v14 = vpack.c.bf16 %v1399_v15, %v1399_v15  ;;  %v1407_v22 = vrot.slane %v1400_v16, %v1971_v9  ;;  %v1414_v23 = vrot.slane %v1207_v21, %v1971_v9  ;;  %v1483_v26 = vpop.permute.xlu0 %1482 }
 0x1be   : > { %v1489_v33 = vsel %vm1487_vm6, %v1483_v26, %v1488_v37 }
 0x1bf   : > { %1475 = vst.msk [vmem:[%s1983_s7 + $0x20] sm:$0xf] %vm1466_vm3, %v1585_v14  ;;  %v1415_v52 = vcombine.low %v1407_v22, %v1414_v23  ;;  %1490 = vst [vmem:[%s1983_s7 + $0x24] sm:$0x8] %v1489_v33 }
 0x1c1   : > { %v1586_v27 = vpack.c.bf16 %v1415_v52, %v1415_v52 }
 0x1c3   : > { %1477 = vst.msk [vmem:[%s1983_s7 + $0x24] sm:$0x7] %vm1476_vm7, %v1586_v27 }
 0x1c4 PF: > { %s13_s12 = sadd.s32 1, %s1675_s12  }
 0x1c5   : > { %p10_p4 = scmp.ge.s32.totalorder %s13_s12, 4  }
 0x1c7   :  { %12 = sbr.rel (!%p10_p4) target bundleno = 1 (0x1), region = 62 }

// kernel: cae1d_forward.17
= control target key start
LH: loop header
LB: loop body
LE: loop exit
PB: predicated region body
PF: predicated region fallthrough
CT: control target
= control target key end

     0   :  { %s1136_s12 = smov 0   ;;  %s1406_s0 = inlined_call_operand.vmem [shape: bf16[2,19,128], index: 0, kind: input, shape index: {}]   ;;  %s1407_s1 = inlined_call_operand.vmem [shape: bf16[128,192], index: 1, kind: input, shape index: {}]   ;;  %s1408_s2 = inlined_call_operand.vmem [shape: f32[1,64], index: 2, kind: input, shape index: {}]   ;;  %s1409_s3 = inlined_call_operand.vmem [shape: bf16[2,39,64], index: 3, kind: output, shape index: {}]  }
   0x1 LB: > { %s994_s13 = sadd.s32 4294967295, %s1110_s12   ;;  %p998_p0 = scmp.ge.s32.totalorder %s1110_s12, 1  ;;  %s1110_s12 = sphi %s1136_s12, %s13_s12  }
   0x2   : > { %p137_p1 = scmp.lt.s32.totalorder %s1110_s12, 3 }
   0x4   : > { %p138_p2 = pnand %p998_p0, %p137_p1 }
   0x5   : > { %v1064_v0 = vld [vmem:[%s1407_s1 + $0x4] ss:$8 sps:$4 sm:$0xff] (!%p138_p2)   ;;  %p161_p3 = scmp.lt.s32.totalorder (!%p138_p2), %s994_s13, 1  ;;  %v1066_v1 = vld [vmem:[%s1407_s1] ss:$8 sps:$4 sm:$0xff] (!%p138_p2)   ;;  %v1112_v2 = vmov (!%p138_p2), 0   ;;  %v379_v33 = vlaneseq (!%p138_p2) }
   0x6   : > { %141 = sbr.rel (%p138_p2) target bundleno = 430 (0x1ae), region = 32  ;;  %313 = vmatprep.mubr.bf16.mxu0 (!%p138_p2), %v1112_v2  ;;  %323 = vmatprep.mubr.bf16.mxu1 (!%p138_p2), %v1112_v2  ;;  %v1067_v3 = vld [vmem:[%s1407_s1 + $0x14] ss:$8 sps:$4 sm:$0xff] (!%p138_p2)   ;;  %v1069_v4 = vld [vmem:[%s1407_s1 + $0x10] ss:$8 sps:$4 sm:$0xff] (!%p138_p2)   ;;  %s1113_s11 = smov (!%p138_p2), 64  }
   0x7   : > { %281 = vmatprep.subr.bf16.mxu0 (!%p138_p2), %v1064_v0  ;;  %1034 = vmatprep.subr.bf16.mxu1 (!%p138_p2), %v1064_v0  ;;  %v1070_v5 = vld [vmem:[%s1407_s1 + $0x24] ss:$8 sps:$4 sm:$0xff] (!%p138_p2)   ;;  %v1072_v6 = vld [vmem:[%s1407_s1 + $0x20] ss:$8 sps:$4 sm:$0xff] (!%p138_p2)   ;;  %v1073_v7 = vld [vmem:[%s1407_s1 + $0x34] ss:$8 sps:$4 sm:$0xff] (!%p138_p2)  }
   0x8   : > { %282 = vmatpush1.bf16.msra.mxu0 (!%p138_p2), %v1066_v1  ;;  %1042 = vmatpush1.bf16.msra.mxu1 (!%p138_p2), %v1066_v1  ;;  %v1075_v8 = vld [vmem:[%s1407_s1 + $0x30] ss:$8 sps:$4 sm:$0xff] (!%p138_p2)   ;;  %v1076_v9 = vld [vmem:[%s1407_s1 + $0x44] ss:$8 sps:$4 sm:$0xff] (!%p138_p2)   ;;  %v1182_v10 = vld [vmem:[%s1408_s2] ss:$0 sm:$0xff] (!%p138_p2) }
   0x9   : > { %283 = vmatprep.subr.bf16.mxu0 (!%p138_p2), %v1067_v3  ;;  %1035 = vmatprep.subr.bf16.mxu1 (!%p138_p2), %v1067_v3  ;;  %v1078_v11 = vld [vmem:[%s1407_s1 + $0x40] ss:$8 sps:$4 sm:$0xff] (!%p138_p2)   ;;  %v1079_v12 = vld [vmem:[%s1407_s1 + $0x54] ss:$8 sps:$4 sm:$0xff] (!%p138_p2)   ;;  %v1081_v13 = vld [vmem:[%s1407_s1 + $0x50] ss:$8 sps:$4 sm:$0xff] (!%p138_p2)  }
   0xa   : > { %361 = vrot.lane.b32.xlu0 (!%p138_p2), %v1182_v10, %s1113_s11  ;;  %v1082_v14 = vld [vmem:[%s1407_s1 + $0x64] ss:$8 sps:$4 sm:$0xff] (!%p138_p2)   ;;  %v1084_v15 = vld [vmem:[%s1407_s1 + $0x60] ss:$8 sps:$4 sm:$0xff] (!%p138_p2)   ;;  %v1085_v16 = vld [vmem:[%s1407_s1 + $0x74] ss:$8 sps:$4 sm:$0xff] (!%p138_p2)  }
   0xb   : > { %v1087_v17 = vld [vmem:[%s1407_s1 + $0x70] ss:$8 sps:$4 sm:$0xff] (!%p138_p2)   ;;  %vm336_vm0 = vcmask (!%p138_p2), 1040384   ;;  %v1114_v27 = vmov (!%p138_p2), 1966171168   ;;  %v1213_v44 = vshrl.u32 (!%p138_p2), %v379_v33, 7 }
   0xc   : > { %284 = vmatpush1.bf16.msra.mxu0 (!%p138_p2), %v1069_v4  ;;  %1043 = vmatpush1.bf16.msra.mxu1 (!%p138_p2), %v1069_v4  ;;  %v377_v28 = vunpack.c.l.s4 (!%p138_p2), %v1114_v27  ;;  %vm933_vm1 = vcmask (!%p138_p2), 519171   ;;  %vm934_vm2 = vsmask.f32 (!%p138_p2), 3328  ;;  %vm920_vm4 = vcmask (!%p138_p2), 519168  }
   0xd   : > { %s1411_s13 = smov (!%p161_p3, %s994_s13), 1  ;;  %285 = vmatprep.subr.bf16.mxu0 %v1070_v5  ;;  %1036 = vmatprep.subr.bf16.mxu1 %v1070_v5  ;;  %v1223_v52 = vsub.s32 0, %v1213_v44  ;;  %vm935_vm3 = vmand %vm933_vm1, %vm934_vm2  ;;  %vm925_vm5 = vcmask 518144  }
   0xe   : > { %s1050_s24 = smul.u32 12, %s1411_s13  ;;  %v378_v41 = vunpack.c.0.s8 %v377_v28 }
   0xf   : > { %s1051_s28 = smul.u32 20, %s1411_s13 }
  0x10   : > { %s1171_s4 = scalar_lea.vmem %s1406_s0, %s1050_s24  ;;  %286 = vmatpush1.bf16.msra.mxu0 %v1072_v6  ;;  %1044 = vmatpush1.bf16.msra.mxu1 %v1072_v6  ;;  %v1219_v49 = vsub.s32 %v378_v41, %v1213_v44 }
  0x11   : > { %287 = vmatprep.subr.bf16.mxu0 %v1073_v7  ;;  %1037 = vmatprep.subr.bf16.mxu1 %v1073_v7  ;;  %v1088_v18 = vld [vmem:[%s1171_s4] sm:$0xff]   ;;  %v1089_v19 = vld [vmem:[%s1171_s4 + $0x8] ss:$0 sps:$4 sm:$0x33]   ;;  %s1228_s4 = scalar_lea.vmem %s1409_s3, %s1051_s28 }
  0x12   : > { %v936_v63 = vld [vmem:[%s1228_s4 + $0x10] sm:$0x8] }
  0x14   : > { %288 = vmatpush1.bf16.msra.mxu0 %v1075_v8  ;;  %1045 = vmatpush1.bf16.msra.mxu1 %v1075_v8 }
  0x15   : > { %289 = vmatprep.subr.bf16.mxu0 %v1076_v9  ;;  %1038 = vmatprep.subr.bf16.mxu1 %v1076_v9 }
  0x18   : > { %290 = vmatpush1.bf16.msra.mxu0 %v1078_v11  ;;  %1046 = vmatpush1.bf16.msra.mxu1 %v1078_v11 }
  0x19   : > { %291 = vmatprep.subr.bf16.mxu0 %v1079_v12  ;;  %1039 = vmatprep.subr.bf16.mxu1 %v1079_v12 }
  0x1c   : > { %292 = vmatpush1.bf16.msra.mxu0 %v1081_v13  ;;  %1047 = vmatpush1.bf16.msra.mxu1 %v1081_v13 }
  0x1d   : > { %293 = vmatprep.subr.bf16.mxu0 %v1082_v14  ;;  %1040 = vmatprep.subr.bf16.mxu1 %v1082_v14 }
  0x20   : > { %294 = vmatpush1.bf16.msra.mxu0 %v1084_v15  ;;  %1048 = vmatpush1.bf16.msra.mxu1 %v1084_v15 }
  0x21   : > { %295 = vmatprep.subr.bf16.mxu0 %v1085_v16  ;;  %1041 = vmatprep.subr.bf16.mxu1 %v1085_v16 }
  0x24   : > { %296 = vmatpush1.bf16.msra.mxu0 %v1087_v17  ;;  %1049 = vmatpush1.bf16.msra.mxu1 %v1087_v17 }
  0x27   : > { %314 = vmatmul.mubr.bf16.vlgmr.msra.gmra.mrb[0].mxu0 %v1088_v18  ;;  %324 = vmatmul.mubr.bf16.vlgmr.msra.gmra.mrb[0].mxu1 %v1089_v19 }
  0x7c   : > { %v362_v20 = vpop.permute.xlu0 %361 }
  0xfa   : > { %v315_v21 = vpop.f32.mrb[0].mxu0  ;;  %v325_v22 = vpop.f32.mrb[0].mxu1 }
  0xfb   : > { %v364_v23 = vadd.f32 %v362_v20, %v315_v21  ;;  %v366_v24 = vadd.f32 %v362_v20, %v325_v22  ;;  %v317_v25 = vpop.f32.mrb[1].mxu0  ;;  %v327_v26 = vpop.f32.mrb[1].mxu1 }
  0xfc   : > { %v337_v29 = vrot.slane %v317_v25, 7  ;;  %v370_v30 = vadd.f32 %v1182_v10, %v327_v26  ;;  %v319_v31 = vpop.f32.mrb[2].mxu0  ;;  %v329_v32 = vpop.f32.mrb[2].mxu1  ;;  %v340_v38 = vrot.slane %v327_v26, 7 }
  0xfd   : > { %1090 = vtanh.f32 %v364_v23  ;;  %v365_v34 = vadd.f32 %v362_v20, %v319_v31  ;;  %v321_v35 = vpop.f32.mrb[3].mxu0  ;;  %v330_v36 = vpop.f32.mrb[3].mxu1 }
  0xfe   : > { %1092 = vtanh.f32 %v366_v24  ;;  %v345_v37 = vsel %vm336_vm0, 0.0, %v337_v29  ;;  %v338_v39 = vrot.slane %v321_v35, 7 }
  0xff   : > { %v346_v40 = vadd.f32 %v345_v37, %v315_v21  ;;  %1094 = vtanh.f32 %v370_v30 }
 0x100   : > { %1096 = vtanh.f32 %v365_v34  ;;  %v339_v42 = vsel %vm336_vm0, %v337_v29, %v338_v39  ;;  %v341_v43 = vsel %vm336_vm0, %v338_v39, %v340_v38 }
 0x101   : > { %v347_v45 = vadd.f32 %v339_v42, %v319_v31  ;;  %v348_v46 = vadd.f32 %v341_v43, %v325_v22  ;;  %v355_v47 = vadd.f32 %v1182_v10, %v346_v40 }
 0x103   : > { %v357_v48 = vadd.f32 %v1182_v10, %v348_v46  ;;  %v356_v50 = vadd.f32 %v1182_v10, %v347_v45  ;;  %1098 = vtanh.f32 %v355_v47 }
 0x105   : > { %1100 = vtanh.f32 %v357_v48 }
 0x106   : > { %1102 = vtanh.f32 %v356_v50 }
 0x107   : > { %v1091_v51 = vpop.eup %1090 }
 0x108   : > { %v1093_v53 = vpop.eup %1092  ;;  %v525_v54 = vrot.slane %v1091_v51, %v1219_v49  ;;  %v518_v55 = vcombine.high %v1091_v51, %v1091_v51 }
 0x109   : > { %v1095_v56 = vpop.eup %1094  ;;  %v1232_v57 = vrot.slane %v1093_v53, %v1219_v49 }
 0x10a   : > { %v1097_v58 = vpop.eup %1096  ;;  %v1033_v59 = vpack.c.bf16 %v1095_v56, %v1095_v56  ;;  %v541_v60 = vrot.slane %v525_v54, %v1219_v49  ;;  %v533_v61 = vcombine.high %v525_v54, %v525_v54  ;;  %v532_v62 = vrot.slane %v518_v55, %v1219_v49 }
 0x10b   : > { %v1240_v0 = vrot.slane %v1232_v57, %v1219_v49  ;;  %v574_v4 = vrot.slane %v1097_v58, %v1219_v49  ;;  %v567_v17 = vcombine.high %v1097_v58, %v1097_v58 }
 0x10c   : > { %v931_v1 = vrot.slane %v1033_v59, 6  ;;  %v642_v2 = vrot.slane %v541_v60, %v1223_v52  ;;  %v555_v3 = vrot.slane %v533_v61, %v1219_v49  ;;  %v534_v6 = vcombine.high %v532_v62, %v532_v62 }
 0x10d   : > { %v706_v5 = vrot.slane %v1240_v0, %v1223_v52  ;;  %v582_v11 = vcombine.high %v574_v4, %v574_v4  ;;  %v1099_v12 = vpop.eup %1098  ;;  %v563_v14 = vcombine.high %v541_v60, %v541_v60  ;;  %v548_v16 = vrot.slane %v532_v62, %v1219_v49 }
 0x10e   : > { %v937_v7 = vsel %vm935_vm3, %v931_v1, %v936_v63  ;;  %715 = vrot.lane.b32.xlu0 %v642_v2, %s1113_s11  ;;  %v565_v8 = vcombine.high %v555_v3, %v555_v3  ;;  %v562_v10 = vrot.slane %v534_v6, %v1219_v49  ;;  %v646_v13 = vrot.slane %v555_v3, %v1223_v52 }
 0x10f   : > { %938 = vst [vmem:[%s1228_s4 + $0x10] sm:$0x8] %v937_v7  ;;  %747 = vrot.lane.b32.xlu1 %v706_v5, %s1113_s11  ;;  %v1101_v15 = vpop.eup %1100  ;;  %v604_v20 = vrot.slane %v582_v11, %v1219_v49  ;;  %v650_v21 = vrot.slane %v563_v14, %v1223_v52  ;;  %v382_v23 = vrot.slane %v1099_v12, %v1219_v49 }
 0x110   : > { %v654_v9 = vrot.slane %v565_v8, %v1223_v52  ;;  %v1103_v18 = vpop.eup %1102  ;;  %v662_v19 = vrot.slane %v562_v10, %v1223_v52  ;;  %v479_v22 = vrot.slane %v1101_v15, %v1219_v49  ;;  %v658_v24 = vrot.slane %v548_v16, %v1223_v52 }
 0x111   : > { %v566_v25 = vcombine.high %v562_v10, %v562_v10  ;;  %v581_v26 = vrot.slane %v567_v17, %v1219_v49  ;;  %v375_v27 = vcombine.high %v1099_v12, %v1099_v12  ;;  %v1269_v29 = vrot.slane %v382_v23, %v1219_v49 }
 0x112   : > { %721 = vrot.lane.b32.xlu0 %v654_v9, %s1113_s11  ;;  %v1266_v28 = vrot.slane %v479_v22, %v1219_v49  ;;  %v390_v30 = vcombine.high %v382_v23, %v382_v23  ;;  %v431_v31 = vrot.slane %v1103_v18, %v1219_v49  ;;  %v678_v32 = vrot.slane %v604_v20, %v1223_v52 }
 0x113   : > { %717 = vrot.lane.b32.xlu1 %v646_v13, %s1113_s11  ;;  %v389_v33 = vrot.slane %v375_v27, %v1219_v49  ;;  %v424_v34 = vcombine.high %v1103_v18, %v1103_v18  ;;  %v480_v35 = vcombine.high %v479_v22, %v479_v22  ;;  %v590_v36 = vrot.slane %v574_v4, %v1219_v49 }
 0x114   : > { %v1276_v37 = vrot.slane %v390_v30, %v1219_v49  ;;  %v439_v38 = vcombine.high %v431_v31, %v431_v31  ;;  %v1279_v39 = vrot.slane %v431_v31, %v1219_v49  ;;  %v670_v45 = vrot.slane %v566_v25, %v1223_v52 }
 0x115   : > { %v391_v40 = vcombine.high %v389_v33, %v389_v33  ;;  %v1283_v41 = vrot.slane %v389_v33, %v1219_v49  ;;  %v438_v42 = vrot.slane %v424_v34, %v1219_v49  ;;  %v1287_v43 = vrot.slane %v480_v35, %v1219_v49 }
 0x116   : > { %725 = vrot.lane.b32.xlu0 %v662_v19, %s1113_s11  ;;  %v583_v46 = vcombine.high %v581_v26, %v581_v26  ;;  %v1292_v47 = vrot.slane %v439_v38, %v1219_v49  ;;  %v614_v48 = vcombine.high %v604_v20, %v604_v20  ;;  %v674_v54 = vrot.slane %v590_v36, %v1223_v52 }
 0x117   : > { %719 = vrot.lane.b32.xlu1 %v650_v21, %s1113_s11  ;;  %v1295_v50 = vrot.slane %v391_v40, %v1219_v49  ;;  %v440_v51 = vcombine.high %v438_v42, %v438_v42  ;;  %v1298_v53 = vrot.slane %v438_v42, %v1219_v49  ;;  %v564_v55 = vcombine.high %v548_v16, %v548_v16 }
 0x118   : > { %v686_v58 = vrot.slane %v614_v48, %v1223_v52  ;;  %v611_v59 = vrot.slane %v583_v46, %v1219_v49  ;;  %v612_v61 = vcombine.high %v590_v36, %v590_v36  ;;  %v623_v62 = vcombine.high %v1232_v57, %v1232_v57 }
 0x119   : > { %v1303_v56 = vrot.slane %v440_v51, %v1219_v49  ;;  %v666_v60 = vrot.slane %v564_v55, %v1223_v52  ;;  %v597_v3 = vrot.slane %v581_v26, %v1219_v49  ;;  %v638_v8 = vcombine.high %v1240_v0, %v1240_v0 }
 0x11a   : > { %733 = vrot.lane.b32.xlu0 %v678_v32, %s1113_s11  ;;  %v694_v63 = vrot.slane %v611_v59, %v1223_v52  ;;  %v615_v1 = vcombine.high %v611_v59, %v611_v59  ;;  %v682_v2 = vrot.slane %v612_v61, %v1223_v52  ;;  %v637_v5 = vrot.slane %v623_v62, %v1219_v49 }
 0x11b   : > { %723 = vrot.lane.b32.xlu1 %v658_v24, %s1113_s11  ;;  %v690_v6 = vrot.slane %v597_v3, %v1223_v52  ;;  %v613_v7 = vcombine.high %v597_v3, %v597_v3  ;;  %v714_v49 = vrot.slane %v638_v8, %v1223_v52  ;;  %v1115_v12 = vmov 1983009808  }
 0x11c   : > { %v702_v4 = vrot.slane %v615_v1, %v1223_v52  ;;  %v710_v57 = vrot.slane %v637_v5, %v1223_v52  ;;  %v813_v13 = vunpack.c.l.s4 %v1115_v12  ;;  %v420_v19 = vcombine.high %v1269_v29, %v1269_v29 }
 0x11d   : > { %v698_v9 = vrot.slane %v613_v7, %v1223_v52  ;;  %v422_v52 = vcombine.high %v1276_v37, %v1276_v37  ;;  %v423_v42 = vcombine.high %v1295_v50, %v1295_v50  ;;  %v469_v59 = vcombine.high %v1279_v39, %v1279_v39 }
 0x11e   : > { %729 = vrot.lane.b32.xlu0 %v670_v45, %s1113_s11  ;;  %v814_v15 = vunpack.c.0.s8 %v813_v13  ;;  %v421_v45 = vcombine.high %v1283_v41, %v1283_v41 }
 0x11f   : > { %731 = vrot.lane.b32.xlu1 %v674_v54, %s1113_s11 }
 0x120   : > { %v1342_v21 = vsub.s32 %v814_v15, %v1213_v44 }
 0x122   : > { %737 = vrot.lane.b32.xlu0 %v686_v58, %s1113_s11  ;;  %v471_v58 = vcombine.high %v1292_v47, %v1292_v47 }
 0x123   : > { %727 = vrot.lane.b32.xlu1 %v666_v60, %s1113_s11 }
 0x126   : > { %741 = vrot.lane.b32.xlu0 %v694_v63, %s1113_s11 }
 0x127   : > { %735 = vrot.lane.b32.xlu1 %v682_v2, %s1113_s11 }
 0x12a   : > { %745 = vrot.lane.b32.xlu0 %v702_v4, %s1113_s11 }
 0x12b   : > { %739 = vrot.lane.b32.xlu1 %v690_v6, %s1113_s11 }
 0x12e   : > { %749 = vrot.lane.b32.xlu0 %v710_v57, %s1113_s11 }
 0x12f   : > { %743 = vrot.lane.b32.xlu1 %v698_v9, %s1113_s11  ;;  %v472_v9 = vcombine.high %v1303_v56, %v1303_v56 }
 0x133   : > { %751 = vrot.lane.b32.xlu1 %v714_v49, %s1113_s11  ;;  %v470_v49 = vcombine.high %v1298_v53, %v1298_v53 }
 0x180   : > { %v716_v10 = vpop.permute.xlu0 %715 }
 0x181   : > { %v1331_v11 = vpop.permute.xlu1 %747  ;;  %v772_v0 = vsel %vm336_vm0, %v1269_v29, %v716_v10 }
 0x182   : > { %v788_v12 = vsel %vm336_vm0, %v1266_v28, %v1331_v11 }
 0x184   : > { %v722_v14 = vpop.permute.xlu0 %721 }
 0x185   : > { %v718_v16 = vpop.permute.xlu1 %717  ;;  %v775_v23 = vsel %vm336_vm0, %v422_v52, %v722_v14 }
 0x186   : > { %v773_v17 = vsel %vm336_vm0, %v1276_v37, %v718_v16 }
 0x187   : > { %v810_v18 = vcombine.low %v772_v0, %v773_v17 }
 0x188   : > { %v726_v20 = vpop.permute.xlu0 %725 }
 0x189   : > { %v720_v22 = vpop.permute.xlu1 %719  ;;  %v818_v27 = vrot.slane %v810_v18, %v1342_v21  ;;  %v777_v29 = vsel %vm336_vm0, %v1295_v50, %v726_v20 }
 0x18a   : > { %v774_v24 = vsel %vm336_vm0, %v420_v19, %v720_v22 }
 0x18b   : > { %v811_v25 = vcombine.low %v774_v24, %v775_v23 }
 0x18c   : > { %v734_v26 = vpop.permute.xlu0 %733 }
 0x18d   : > { %v825_v30 = vrot.slane %v811_v25, %v1342_v21  ;;  %v724_v31 = vpop.permute.xlu1 %723  ;;  %v781_v37 = vsel %vm336_vm0, %v1292_v47, %v734_v26 }
 0x18e   : > { %v776_v44 = vsel %vm336_vm0, %v1283_v41, %v724_v31 }
 0x18f   : > { %v826_v32 = vcombine.low %v818_v27, %v825_v30  ;;  %v827_v33 = vcombine.low %v776_v44, %v777_v29 }
 0x190   : > { %v730_v34 = vpop.permute.xlu0 %729 }
 0x191   : > { %v1028_v35 = vpack.c.bf16 %v826_v32, %v826_v32  ;;  %v732_v36 = vpop.permute.xlu1 %731  ;;  %v779_v51 = vsel %vm336_vm0, %v423_v42, %v730_v34  ;;  %v835_v50 = vrot.slane %v827_v33, %v1342_v21 }
 0x192   : > { %v780_v38 = vsel %vm336_vm0, %v1279_v39, %v732_v36 }
 0x193   : > { %921 = vst.msk [vmem:[%s1228_s4] sm:$0xf] %vm920_vm4, %v1028_v35  ;;  %v844_v40 = vcombine.low %v780_v38, %v781_v37 }
 0x194   : > { %v738_v46 = vpop.permute.xlu0 %737 }
 0x195   : > { %v728_v48 = vpop.permute.xlu1 %727  ;;  %v783_v62 = vsel %vm336_vm0, %v471_v58, %v738_v46  ;;  %v852_v4 = vrot.slane %v844_v40, %v1342_v21 }
 0x196   : > { %v778_v54 = vsel %vm336_vm0, %v421_v45, %v728_v48 }
 0x197   : > { %v828_v55 = vcombine.low %v778_v54, %v779_v51 }
 0x198   : > { %v742_v60 = vpop.permute.xlu0 %741 }
 0x199   : > { %v842_v61 = vrot.slane %v828_v55, %v1342_v21  ;;  %v736_v41 = vpop.permute.xlu1 %735  ;;  %v785_v6 = vsel %vm336_vm0, %v1303_v56, %v742_v60  ;;  %v495_v56 = vcombine.high %v1266_v28, %v1266_v28 }
 0x19a   : > { %v782_v63 = vsel %vm336_vm0, %v469_v59, %v736_v41 }
 0x19b   : > { %v843_v1 = vcombine.low %v835_v50, %v842_v61  ;;  %v845_v2 = vcombine.low %v782_v63, %v783_v62 }
 0x19c   : > { %v746_v3 = vpop.permute.xlu0 %745 }
 0x19d   : > { %v1029_v47 = vpack.c.bf16 %v843_v1, %v843_v1  ;;  %v859_v5 = vrot.slane %v845_v2, %v1342_v21  ;;  %v740_v39 = vpop.permute.xlu1 %739  ;;  %v787_v16 = vsel %vm336_vm0, %v472_v9, %v746_v3 }
 0x19e   : > { %v784_v7 = vsel %vm336_vm0, %v1298_v53, %v740_v39 }
 0x19f   : > { %922 = vst.msk [vmem:[%s1228_s4 + $0x4] sm:$0xf] %vm920_vm4, %v1029_v47  ;;  %v860_v57 = vcombine.low %v852_v4, %v859_v5  ;;  %v861_v8 = vcombine.low %v784_v7, %v785_v6 }
 0x1a0   : > { %v750_v10 = vpop.permute.xlu0 %749 }
 0x1a1   : > { %v1030_v13 = vpack.c.bf16 %v860_v57, %v860_v57  ;;  %v744_v14 = vpop.permute.xlu1 %743  ;;  %v789_v15 = vsel %vm336_vm0, %v1287_v43, %v750_v10  ;;  %v869_v11 = vrot.slane %v861_v8, %v1342_v21 }
 0x1a2   : > { %v786_v0 = vsel %vm336_vm0, %v470_v49, %v744_v14  ;;  %v878_v17 = vcombine.low %v788_v12, %v789_v15 }
 0x1a3   : > { %923 = vst.msk [vmem:[%s1228_s4 + $0x8] sm:$0xf] %vm920_vm4, %v1030_v13  ;;  %v862_v53 = vcombine.low %v786_v0, %v787_v16 }
 0x1a4   : > { %v885_v20 = vrot.slane %v878_v17, %v1342_v21 }
 0x1a5   : > { %v876_v18 = vrot.slane %v862_v53, %v1342_v21  ;;  %v752_v52 = vpop.permute.xlu1 %751 }
 0x1a6   : > { %v790_v43 = vsel %vm336_vm0, %v495_v56, %v752_v52 }
 0x1a7   : > { %v877_v19 = vcombine.low %v869_v11, %v876_v18  ;;  %v892_v22 = vrot.slane %v790_v43, %v1342_v21 }
 0x1a9   : > { %v1031_v23 = vpack.c.bf16 %v877_v19, %v877_v19  ;;  %v893_v24 = vcombine.low %v885_v20, %v892_v22 }
 0x1ab   : > { %924 = vst.msk [vmem:[%s1228_s4 + $0xc] sm:$0xf] %vm920_vm4, %v1031_v23  ;;  %v1032_v25 = vpack.c.bf16 %v893_v24, %v893_v24 }
 0x1ad   : > { %926 = vst.msk [vmem:[%s1228_s4 + $0x10] sm:$0x7] %vm925_vm5, %v1032_v25 }
 0x1ae PF: > { %s13_s12 = sadd.s32 1, %s1110_s12  }
 0x1af   : > { %p10_p4 = scmp.ge.s32.totalorder %s13_s12, 4  }
 0x1b1   :  { %12 = sbr.rel (!%p10_p4) target bundleno = 1 (0x1), region = 62 }

// kernel: cae1d_forward.19
= control target key start
LH: loop header
LB: loop body
LE: loop exit
PB: predicated region body
PF: predicated region fallthrough
CT: control target
= control target key end

     0   :  { %s2622_s14 = smov 0   ;;  %s3437_s0 = inlined_call_operand.vmem [shape: bf16[2,79,32], index: 0, kind: input, shape index: {}]   ;;  %s3438_s1 = inlined_call_operand.vmem [shape: f32[3,32], index: 1, kind: input, shape index: {}]   ;;  %s3439_s2 = inlined_call_operand.<no memory space> [shape: f32[1,1], index: 2, kind: input, shape index: {}]   ;;  %s3440_s3 = inlined_call_operand.vmem [shape: f32[2,159,1], index: 3, kind: output, shape index: {}]  }
   0x1   :  { %v8_v0 = vstv %s3439_s2 }
   0x2   :  { %9 = vst [vmem:[#allocation2] sm:$0x1] %v8_v0 }
   0x3 LB: > { %s2498_s15 = sadd.s32 4294967295, %s2595_s14   ;;  %p2502_p0 = scmp.ge.s32.totalorder %s2595_s14, 1  ;;  %s2595_s14 = sphi %s2622_s14, %s15_s14  }
   0x4   : > { %p139_p1 = scmp.lt.s32.totalorder %s2595_s14, 3 }
   0x6   : > { %p140_p2 = pnand %p2502_p0, %p139_p1 }
   0x7   : > { %p163_p3 = scmp.lt.s32.totalorder (!%p140_p2), %s2498_s15, 1  ;;  %v2507_v1 = vld [vmem:[%s3438_s1 + $0x2] ss:$0 sm:$0xff] (!%p140_p2)  ;;  %vm208_vm0 = vcmask (!%p140_p2), 261120   ;;  %vm236_vm1 = vcmask (!%p140_p2), 260096   ;;  %vm341_vm2 = vcmask (!%p140_p2), 1040384  }
   0x8   : > { %143 = sbr.rel (%p140_p2) target bundleno = 345 (0x159), region = 32  ;;  %v2505_v35 = vld [vmem:[%s3438_s1] ss:$0 sm:$0xff] (!%p140_p2)  ;;  %v2506_v52 = vld [vmem:[%s3438_s1 + $0x1] ss:$0 sm:$0xff] (!%p140_p2)  ;;  %vm2441_vm3 = vcmask (!%p140_p2), 6150  }
   0x9   : > { %vm2419_vm4 = vcmask (!%p140_p2), 7168   ;;  %vm2439_vm5 = vcmask (!%p140_p2), 5120  }
   0xf   : > { %s3462_s15 = smov (!%p163_p3, %s2498_s15), 1 }
  0x10   : > { %s2535_s2 = smul.u32 40, %s3462_s15 }
  0x11   : > { %s2536_s25 = smul.u32 160, %s3462_s15 }
  0x12   : > { %s167_s18 = scalar_lea.vmem %s3437_s0, %s2535_s2 }
  0x13   : > { %v2531_v2 = vld [vmem:[%s167_s18 + $0x8] sm:$0xff]   ;;  %v2512_v3 = vld [vmem:[%s167_s18] sm:$0xff]   ;;  %v2532_v4 = vld [vmem:[%s167_s18 + $0x10] sm:$0xff]   ;;  %s2742_s28 = scalar_lea.vmem %s3440_s3, %s2536_s25 }
  0x14   : > { %v2639_v5 = vunpack.c.l.bf16 %v2531_v2  ;;  %v2641_v6 = vunpack.c.l.bf16 %v2512_v3  ;;  %v2643_v7 = vunpack.c.h.bf16 %v2531_v2  ;;  %v2645_v8 = vunpack.c.h.bf16 %v2512_v3  ;;  %v2533_v15 = vld [vmem:[%s167_s18 + $0x18] sm:$0xff]   ;;  %v2534_v24 = vld [vmem:[%s167_s18 + $0x20] sm:$0xff]  }
  0x15   : > { %v2647_v9 = vunpack.c.h.bf16 %v2532_v4  ;;  %v2649_v10 = vunpack.c.l.bf16 %v2532_v4  ;;  %v2657_v18 = vunpack.c.h.bf16 %v2533_v15  ;;  %v2659_v19 = vunpack.c.l.bf16 %v2533_v15 }
  0x16   : > { %v292_v11 = vmul.f32 %v2639_v5, %v2507_v1  ;;  %v290_v12 = vmul.f32 %v2641_v6, %v2507_v1  ;;  %v293_v13 = vmul.f32 %v2643_v7, %v2507_v1  ;;  %v291_v14 = vmul.f32 %v2645_v8, %v2507_v1 }
  0x17   : > { %v295_v22 = vmul.f32 %v2647_v9, %v2507_v1  ;;  %v294_v23 = vmul.f32 %v2649_v10, %v2507_v1  ;;  %v297_v25 = vmul.f32 %v2657_v18, %v2507_v1  ;;  %v296_v26 = vmul.f32 %v2659_v19, %v2507_v1 }
  0x18   : > { %v306_v16 = vsel %vm208_vm0, %v292_v11, 0.0  ;;  %v300_v17 = vsel %vm208_vm0, %v290_v12, 0.0  ;;  %v309_v20 = vsel %vm208_vm0, %v293_v13, 0.0  ;;  %v303_v21 = vsel %vm208_vm0, %v291_v14, 0.0 }
  0x19   : > { %307 = vadd.xlane.f32.xlu1 %v306_v16  ;;  %301 = vadd.xlane.f32.xlu0 %v300_v17  ;;  %v315_v27 = vsel %vm208_vm0, %v295_v22, 0.0  ;;  %v312_v28 = vsel %vm208_vm0, %v294_v23, 0.0  ;;  %v2669_v29 = vunpack.c.h.bf16 %v2534_v24  ;;  %v2529_v30 = vunpack.c.l.bf16 %v2534_v24  ;;  %v2722_v23 = vld [vmem:[#allocation2] ss:$0 sm:$0xff] }
  0x1a   : > { %v321_v31 = vsel %vm208_vm0, %v297_v25, 0.0  ;;  %v318_v32 = vsel %vm208_vm0, %v296_v26, 0.0  ;;  %v199_v38 = vmul.f32 %v2645_v8, %v2505_v35  ;;  %v198_v39 = vmul.f32 %v2641_v6, %v2505_v35 }
  0x1b   : > { %v299_v33 = vmul.f32 %v2669_v29, %v2507_v1  ;;  %v298_v34 = vmul.f32 %v2529_v30, %v2507_v1  ;;  %v201_v42 = vmul.f32 %v2643_v7, %v2505_v35  ;;  %v200_v43 = vmul.f32 %v2639_v5, %v2505_v35 }
  0x1c   : > { %v212_v40 = vsel %vm208_vm0, %v199_v38, 0.0  ;;  %v209_v41 = vsel %vm208_vm0, %v198_v39, 0.0  ;;  %v203_v46 = vmul.f32 %v2647_v9, %v2505_v35  ;;  %v202_v47 = vmul.f32 %v2649_v10, %v2505_v35 }
  0x1d   : > { %310 = vadd.xlane.f32.xlu1 %v309_v20  ;;  %304 = vadd.xlane.f32.xlu0 %v303_v21  ;;  %v327_v36 = vsel %vm236_vm1, %v299_v33, 0.0  ;;  %v324_v37 = vsel %vm208_vm0, %v298_v34, 0.0  ;;  %v218_v44 = vsel %vm208_vm0, %v201_v42, 0.0  ;;  %v215_v45 = vsel %vm208_vm0, %v200_v43, 0.0 }
  0x1e   : > { %v224_v48 = vsel %vm208_vm0, %v203_v46, 0.0  ;;  %v221_v49 = vsel %vm208_vm0, %v202_v47, 0.0  ;;  %v205_v50 = vmul.f32 %v2657_v18, %v2505_v35  ;;  %v204_v51 = vmul.f32 %v2659_v19, %v2505_v35 }
  0x1f   : > { %v245_v55 = vmul.f32 %v2641_v6, %v2506_v52  ;;  %v206_v56 = vmul.f32 %v2529_v30, %v2505_v35  ;;  %v247_v59 = vmul.f32 %v2639_v5, %v2506_v52  ;;  %v246_v60 = vmul.f32 %v2645_v8, %v2506_v52 }
  0x20   : > { %v230_v53 = vsel %vm208_vm0, %v205_v50, 0.0  ;;  %v227_v54 = vsel %vm208_vm0, %v204_v51, 0.0  ;;  %v249_v63 = vmul.f32 %v2649_v10, %v2506_v52  ;;  %v248_v0 = vmul.f32 %v2643_v7, %v2506_v52 }
  0x21   : > { %316 = vadd.xlane.f32.xlu1 %v315_v27  ;;  %313 = vadd.xlane.f32.xlu0 %v312_v28  ;;  %v255_v57 = vsel %vm208_vm0, %v245_v55, 0.0  ;;  %v233_v58 = vsel %vm208_vm0, %v206_v56, 0.0  ;;  %v261_v61 = vsel %vm208_vm0, %v247_v59, 0.0  ;;  %v258_v62 = vsel %vm208_vm0, %v246_v60, 0.0 }
  0x22   : > { %v267_v1 = vsel %vm208_vm0, %v249_v63, 0.0  ;;  %v264_v2 = vsel %vm208_vm0, %v248_v0, 0.0  ;;  %v251_v3 = vmul.f32 %v2659_v19, %v2506_v52  ;;  %v250_v4 = vmul.f32 %v2647_v9, %v2506_v52 }
  0x23   : > { %v253_v8 = vmul.f32 %v2529_v30, %v2506_v52  ;;  %v252_v10 = vmul.f32 %v2657_v18, %v2506_v52  ;;  %v254_v12 = vmul.f32 %v2669_v29, %v2506_v52  ;;  %v207_v13 = vmul.f32 %v2669_v29, %v2505_v35 }
  0x24   : > { %v273_v5 = vsel %vm208_vm0, %v251_v3, 0.0  ;;  %v270_v6 = vsel %vm208_vm0, %v250_v4, 0.0  ;;  %v2597_v42 = vmov 1966171168  }
  0x25   : > { %322 = vadd.xlane.f32.xlu1 %v321_v31  ;;  %319 = vadd.xlane.f32.xlu0 %v318_v32  ;;  %v279_v7 = vsel %vm208_vm0, %v253_v8, 0.0  ;;  %v276_v11 = vsel %vm208_vm0, %v252_v10, 0.0  ;;  %v282_v9 = vsel %vm236_vm1, %v254_v12, 0.0  ;;  %v237_v14 = vsel %vm236_vm1, %v207_v13, 0.0 }
  0x26   : > { %v442_v43 = vunpack.c.l.s4 %v2597_v42  ;;  %v2598_v13 = vmov 1983009808  }
  0x28   : > { %v443_v55 = vunpack.c.0.s8 %v442_v43 }
  0x29   : > { %328 = vadd.xlane.f32.xlu1 %v327_v36  ;;  %325 = vadd.xlane.f32.xlu0 %v324_v37 }
  0x2d   : > { %213 = vadd.xlane.f32.xlu1 %v212_v40  ;;  %210 = vadd.xlane.f32.xlu0 %v209_v41 }
  0x31   : > { %219 = vadd.xlane.f32.xlu1 %v218_v44  ;;  %216 = vadd.xlane.f32.xlu0 %v215_v45  ;;  %v444_v44 = vlaneseq }
  0x33   : > { %v445_v59 = vshrl.u32 %v444_v44, 7 }
  0x35   : > { %225 = vadd.xlane.f32.xlu1 %v224_v48  ;;  %222 = vadd.xlane.f32.xlu0 %v221_v49 }
  0x39   : > { %231 = vadd.xlane.f32.xlu1 %v230_v53  ;;  %228 = vadd.xlane.f32.xlu0 %v227_v54 }
  0x3d   : > { %256 = vadd.xlane.f32.xlu1 %v255_v57  ;;  %234 = vadd.xlane.f32.xlu0 %v233_v58 }
  0x41   : > { %262 = vadd.xlane.f32.xlu1 %v261_v61  ;;  %259 = vadd.xlane.f32.xlu0 %v258_v62 }
  0x45   : > { %268 = vadd.xlane.f32.xlu1 %v267_v1  ;;  %265 = vadd.xlane.f32.xlu0 %v264_v2 }
  0x49   : > { %274 = vadd.xlane.f32.xlu1 %v273_v5  ;;  %271 = vadd.xlane.f32.xlu0 %v270_v6  ;;  %v2751_v5 = vsub.s32 %v443_v55, %v445_v59 }
  0x4d   : > { %280 = vadd.xlane.f32.xlu1 %v279_v7  ;;  %277 = vadd.xlane.f32.xlu0 %v276_v11 }
  0x51   : > { %283 = vadd.xlane.f32.xlu1 %v282_v9  ;;  %238 = vadd.xlane.f32.xlu0 %v237_v14  ;;  %v2063_v9 = vunpack.c.l.s4 %v2598_v13 }
  0xa6   : > { %v308_v15 = vpop.xlane.xlu1 %307  ;;  %v302_v16 = vpop.xlane.xlu0 %301 }
  0xa7   : > { %v342_v24 = vrot.slane %v302_v16, 7  ;;  %v345_v41 = vrot.slane %v308_v15, 7 }
  0xa9   : > { %v371_v37 = vsel %vm341_vm2, 0.0, %v342_v24 }
  0xaa   : > { %v311_v17 = vpop.xlane.xlu1 %310  ;;  %v305_v18 = vpop.xlane.xlu0 %304 }
  0xab   : > { %v343_v25 = vrot.slane %v305_v18, 7  ;;  %v347_v34 = vrot.slane %v311_v17, 7 }
  0xad   : > { %v344_v36 = vsel %vm341_vm2, %v342_v24, %v343_v25  ;;  %v348_v49 = vsel %vm341_vm2, %v345_v41, %v347_v34  ;;  %v346_v51 = vsel %vm341_vm2, %v343_v25, %v345_v41 }
  0xae   : > { %v2720_v19 = vpop.xlane.xlu1 %316  ;;  %v314_v20 = vpop.xlane.xlu0 %313 }
  0xaf   : > { %v351_v47 = vrot.slane %v2720_v19, 7  ;;  %v349_v48 = vrot.slane %v314_v20, 7 }
  0xb1   : > { %v352_v61 = vsel %vm341_vm2, %v349_v48, %v351_v47  ;;  %v350_v62 = vsel %vm341_vm2, %v347_v34, %v349_v48 }
  0xb2   : > { %v323_v21 = vpop.xlane.xlu1 %322  ;;  %v320_v22 = vpop.xlane.xlu0 %319 }
  0xb3   : > { %v355_v28 = vrot.slane %v323_v21, 7  ;;  %v353_v58 = vrot.slane %v320_v22, 7  ;;  %v2064_v21 = vunpack.c.0.s8 %v2063_v9 }
  0xb5   : > { %v356_v8 = vsel %vm341_vm2, %v353_v58, %v355_v28  ;;  %v354_v10 = vsel %vm341_vm2, %v351_v47, %v353_v58 }
  0xb6   : > { %v329_v26 = vpop.xlane.xlu1 %328  ;;  %v326_v27 = vpop.xlane.xlu0 %325 }
  0xb7   : > { %v359_v29 = vrot.slane %v329_v26, 7  ;;  %v428_v30 = vadd.f32 %v2722_v23, %v329_v26  ;;  %v357_v31 = vrot.slane %v326_v27, 7 }
  0xb9   : > { %2547 = vtanh.f32 %v428_v30  ;;  %v2726_v32 = vsel %vm341_vm2, %v355_v28, %v357_v31  ;;  %v2729_v33 = vsel %vm341_vm2, %v357_v31, %v359_v29  ;;  %v2761_v30 = vsub.s32 0, %v445_v59 }
  0xba   : > { %v214_v35 = vpop.xlane.xlu1 %213  ;;  %v211_v38 = vpop.xlane.xlu0 %210  ;;  %v2763_v31 = vsub.s32 %v2064_v21, %v445_v59 }
  0xbb   : > { %v373_v39 = vadd.f32 %v344_v36, %v214_v35  ;;  %v372_v40 = vadd.f32 %v371_v37, %v211_v38 }
  0xbd   : > { %v389_v45 = vadd.f32 %v2722_v23, %v373_v39  ;;  %v388_v46 = vadd.f32 %v2722_v23, %v372_v40 }
  0xbe   : > { %v220_v50 = vpop.xlane.xlu1 %219  ;;  %v217_v52 = vpop.xlane.xlu0 %216 }
  0xbf   : > { %2549 = vtanh.f32 %v389_v45  ;;  %v375_v53 = vadd.f32 %v348_v49, %v220_v50  ;;  %v374_v54 = vadd.f32 %v346_v51, %v217_v52 }
  0xc0   : > { %2551 = vtanh.f32 %v388_v46 }
  0xc1   : > { %v391_v56 = vadd.f32 %v2722_v23, %v375_v53  ;;  %v390_v57 = vadd.f32 %v2722_v23, %v374_v54 }
  0xc2   : > { %v226_v60 = vpop.xlane.xlu1 %225  ;;  %v223_v63 = vpop.xlane.xlu0 %222 }
  0xc3   : > { %v2548_v0 = vpop.eup %2547  ;;  %2553 = vtanh.f32 %v391_v56  ;;  %v377_v1 = vadd.f32 %v352_v61, %v226_v60  ;;  %v376_v2 = vadd.f32 %v350_v62, %v223_v63 }
  0xc4   : > { %2442 = vst.msk [vmem:[%s2742_s28 + $0x98] sm:$0x40] %vm2441_vm3, %v2548_v0  ;;  %2555 = vtanh.f32 %v390_v57 }
  0xc5   : > { %v393_v3 = vadd.f32 %v2722_v23, %v377_v1  ;;  %v392_v4 = vadd.f32 %v2722_v23, %v376_v2 }
  0xc6   : > { %v232_v6 = vpop.xlane.xlu1 %231  ;;  %v229_v7 = vpop.xlane.xlu0 %228 }
  0xc7   : > { %2557 = vtanh.f32 %v393_v3  ;;  %v379_v11 = vadd.f32 %v356_v8, %v232_v6  ;;  %v378_v12 = vadd.f32 %v354_v10, %v229_v7 }
  0xc8   : > { %2559 = vtanh.f32 %v392_v4 }
  0xc9   : > { %v2550_v14 = vpop.eup %2549  ;;  %v395_v15 = vadd.f32 %v2722_v23, %v379_v11  ;;  %v394_v16 = vadd.f32 %v2722_v23, %v378_v12 }
  0xca   : > { %v2552_v17 = vpop.eup %2551  ;;  %v489_v18 = vcombine.high %v2550_v14, %v2550_v14  ;;  %v496_v19 = vrot.slane %v2550_v14, %v2751_v5  ;;  %v257_v27 = vpop.xlane.xlu1 %256 }
  0xcb   : > { %v440_v20 = vcombine.high %v2552_v17, %v2552_v17  ;;  %v447_v22 = vrot.slane %v2552_v17, %v2751_v5  ;;  %v408_v37 = vadd.f32 %v2722_v23, %v257_v27  ;;  %2561 = vtanh.f32 %v394_v16  ;;  %v2781_v49 = vpop.xlane.xlu0 %234 }
  0xcc   : > { %v503_v25 = vrot.slane %v489_v18, %v2751_v5  ;;  %v504_v29 = vcombine.high %v496_v19, %v496_v19  ;;  %v2766_v34 = vrot.slane %v496_v19, %v2751_v5  ;;  %2563 = vtanh.f32 %v395_v15 }
  0xcd   : > { %v2554_v24 = vpop.eup %2553  ;;  %v454_v26 = vrot.slane %v440_v20, %v2751_v5  ;;  %v455_v35 = vcombine.high %v447_v22, %v447_v22  ;;  %v2774_v43 = vrot.slane %v447_v22, %v2751_v5  ;;  %2565 = vtanh.f32 %v408_v37 }
  0xce   : > { %v2556_v28 = vpop.eup %2555  ;;  %v587_v36 = vcombine.high %v2554_v24, %v2554_v24  ;;  %v505_v39 = vcombine.high %v503_v25, %v503_v25  ;;  %v594_v41 = vrot.slane %v2554_v24, %v2751_v5  ;;  %v2771_v42 = vrot.slane %v503_v25, %v2751_v5  ;;  %v263_v21 = vpop.xlane.xlu1 %262 }
  0xcf   : > { %v456_v40 = vcombine.high %v454_v26, %v454_v26  ;;  %v538_v45 = vcombine.high %v2556_v28, %v2556_v28  ;;  %v2778_v46 = vrot.slane %v504_v29, %v2751_v5  ;;  %v545_v47 = vrot.slane %v2556_v28, %v2751_v5  ;;  %v2826_v12 = vpop.xlane.xlu0 %259 }
  0xd0   : > { %v601_v44 = vrot.slane %v587_v36, %v2751_v5  ;;  %v2784_v50 = vrot.slane %v454_v26, %v2751_v5  ;;  %v2787_v51 = vrot.slane %v455_v35, %v2751_v5  ;;  %v602_v52 = vcombine.high %v594_v41, %v594_v41 }
  0xd1   : > { %v2558_v38 = vpop.eup %2557  ;;  %v2790_v53 = vrot.slane %v505_v39, %v2751_v5  ;;  %v2795_v55 = vrot.slane %v456_v40, %v2751_v5  ;;  %v552_v56 = vrot.slane %v538_v45, %v2751_v5  ;;  %v485_v58 = vcombine.high %v2774_v43, %v2774_v43 }
  0xd2   : > { %v685_v48 = vcombine.high %v2558_v38, %v2558_v38  ;;  %v603_v59 = vcombine.high %v601_v44, %v601_v44  ;;  %v692_v60 = vrot.slane %v2558_v38, %v2751_v5  ;;  %v2560_v61 = vpop.eup %2559  ;;  %v2806_v63 = vrot.slane %v594_v41, %v2751_v5 }
  0xd3   : > { %v553_v0 = vcombine.high %v545_v47, %v545_v47  ;;  %v486_v2 = vcombine.high %v2784_v50, %v2784_v50  ;;  %v487_v3 = vcombine.high %v2787_v51, %v2787_v51  ;;  %v2814_v4 = vrot.slane %v601_v44, %v2751_v5 }
  0xd4   : > { %v699_v1 = vrot.slane %v685_v48, %v2751_v5  ;;  %v2817_v6 = vrot.slane %v602_v52, %v2751_v5  ;;  %v488_v10 = vcombine.high %v2795_v55, %v2795_v55  ;;  %v554_v7 = vcombine.high %v552_v56, %v552_v56  ;;  %v2873_v52 = vpop.xlane.xlu0 %265 }
  0xd5   : > { %v2824_v11 = vrot.slane %v545_v47, %v2751_v5  ;;  %v2829_v13 = vrot.slane %v603_v59, %v2751_v5  ;;  %v700_v9 = vcombine.high %v692_v60, %v692_v60  ;;  %v636_v14 = vcombine.high %v2560_v61, %v2560_v61  ;;  %v2562_v16 = vpop.eup %2561 }
  0xd6   : > { %v643_v15 = vrot.slane %v2560_v61, %v2751_v5  ;;  %v2835_v18 = vrot.slane %v552_v56, %v2751_v5  ;;  %v2838_v19 = vrot.slane %v553_v0, %v2751_v5  ;;  %v701_v20 = vcombine.high %v699_v1, %v699_v1  ;;  %v2845_v27 = vpop.eup %2563 }
  0xd7   : > { %v650_v25 = vrot.slane %v636_v14, %v2751_v5  ;;  %v2848_v28 = vrot.slane %v554_v7, %v2751_v5  ;;  %v583_v29 = vcombine.high %v2824_v11, %v2824_v11  ;;  %v2853_v35 = vrot.slane %v692_v60, %v2751_v5  ;;  %v2566_v37 = vpop.eup %2565  ;;  %v269_v14 = vpop.xlane.xlu1 %268 }
  0xd8   : > { %v651_v26 = vcombine.high %v643_v15, %v643_v15  ;;  %v2856_v36 = vrot.slane %v699_v1, %v2751_v5  ;;  %v2861_v39 = vrot.slane %v700_v9, %v2751_v5  ;;  %v734_v41 = vcombine.high %v2562_v16, %v2562_v16  ;;  %v272_v17 = vpop.xlane.xlu0 %271 }
  0xd9   : > { %v652_v40 = vcombine.high %v650_v25, %v650_v25  ;;  %v584_v44 = vcombine.high %v2835_v18, %v2835_v18  ;;  %v585_v45 = vcombine.high %v2838_v19, %v2838_v19  ;;  %v2868_v47 = vrot.slane %v701_v20, %v2751_v5 }
  0xda   : > { %v2871_v48 = vrot.slane %v643_v15, %v2751_v5  ;;  %v2876_v56 = vrot.slane %v650_v25, %v2751_v5  ;;  %v2879_v59 = vrot.slane %v651_v26, %v2751_v5  ;;  %v741_v61 = vrot.slane %v2562_v16, %v2751_v5 }
  0xdb   : > { %v2882_v60 = vrot.slane %v652_v40, %v2751_v5  ;;  %v748_v20 = vrot.slane %v734_v41, %v2751_v5  ;;  %v1018_v7 = vcombine.high %v2566_v37, %v2566_v37  ;;  %v1025_v1 = vrot.slane %v2566_v37, %v2751_v5  ;;  %v275_v57 = vpop.xlane.xlu1 %274 }
  0xdc   : > { %v749_v25 = vcombine.high %v741_v61, %v741_v61  ;;  %v2897_v16 = vrot.slane %v741_v61, %v2751_v5  ;;  %v380_v24 = vadd.f32 %v2726_v32, %v2781_v49  ;;  %v410_v41 = vadd.f32 %v2722_v23, %v263_v21 }
  0xdd   : > { %v750_v61 = vcombine.high %v748_v20, %v748_v20  ;;  %v1032_v38 = vrot.slane %v1018_v7, %v2751_v5  ;;  %v1033_v22 = vcombine.high %v1025_v1, %v1025_v1  ;;  %v1041_v26 = vrot.slane %v1025_v1, %v2751_v5 }
  0xde   : > { %v2915_v37 = vrot.slane %v748_v20, %v2751_v5  ;;  %v2918_v9 = vrot.slane %v749_v25, %v2751_v5  ;;  %v396_v20 = vadd.f32 %v2722_v23, %v380_v24  ;;  %2567 = vtanh.f32 %v410_v41 }
  0xdf   : > { %v1034_v40 = vcombine.high %v1032_v38, %v1032_v38  ;;  %v1048_v7 = vrot.slane %v1032_v38, %v2751_v5  ;;  %v1055_v1 = vrot.slane %v1033_v22, %v2751_v5  ;;  %v1063_v8 = vcombine.high %v1041_v26, %v1041_v26 }
  0xe0   : > { %v2926_v32 = vrot.slane %v750_v61, %v2751_v5  ;;  %v1510_v49 = vrot.slane %v1041_v26, %v2761_v30  ;;  %v780_v22 = vcombine.high %v2915_v37, %v2915_v37  ;;  %2569 = vtanh.f32 %v396_v20 }
  0xe1   : > { %v1062_v25 = vrot.slane %v1034_v40, %v2751_v5  ;;  %v1064_v15 = vcombine.high %v1048_v7, %v1048_v7  ;;  %v1065_v21 = vcombine.high %v1055_v1, %v1055_v1  ;;  %v1514_v62 = vrot.slane %v1055_v1, %v2761_v30  ;;  %v278_v40 = vpop.xlane.xlu0 %277 }
  0xe2   : > { %v1518_v38 = vrot.slane %v1063_v8, %v2761_v30  ;;  %v1526_v61 = vrot.slane %v1048_v7, %v2761_v30  ;;  %v1902_v0 = vsel %vm341_vm2, %v2774_v43, %v1510_v49  ;;  %v409_v7 = vadd.f32 %v2722_v23, %v2826_v12 }
  0xe3   : > { %v1066_v54 = vcombine.high %v1062_v25, %v1062_v25  ;;  %v1522_v26 = vrot.slane %v1065_v21, %v2761_v30  ;;  %v1530_v24 = vrot.slane %v1062_v25, %v2761_v30  ;;  %v1534_v41 = vrot.slane %v1064_v15, %v2761_v30  ;;  %v281_v25 = vpop.xlane.xlu1 %280 }
  0xe4   : > { %v1903_v1 = vsel %vm341_vm2, %v2787_v51, %v1514_v62  ;;  %v1904_v8 = vsel %vm341_vm2, %v485_v58, %v1518_v38  ;;  %v1906_v49 = vsel %vm341_vm2, %v2784_v50, %v1526_v61  ;;  %v411_v21 = vadd.f32 %v2722_v23, %v2873_v52 }
  0xe5   : > { %v1538_v20 = vrot.slane %v1066_v54, %v2761_v30  ;;  %v1905_v15 = vsel %vm341_vm2, %v487_v3, %v1522_v26  ;;  %v1907_v62 = vsel %vm341_vm2, %v2795_v55, %v1530_v24  ;;  %v1908_v43 = vsel %vm341_vm2, %v486_v2, %v1534_v41 }
  0xe6   : > { %v2060_v58 = vcombine.low %v1902_v0, %v1903_v1  ;;  %v2061_v12 = vcombine.low %v1904_v8, %v1905_v15  ;;  %v2077_v54 = vcombine.low %v1906_v49, %v1907_v62  ;;  %v412_v3 = vadd.f32 %v2722_v23, %v269_v14  ;;  %v239_v14 = vpop.xlane.xlu0 %238 }
  0xe7   : > { %v1909_v51 = vsel %vm341_vm2, %v488_v10, %v1538_v20  ;;  %v414_v38 = vadd.f32 %v2722_v23, %v275_v57  ;;  %2571 = vtanh.f32 %v409_v7  ;;  %v781_v0 = vcombine.high %v2918_v9, %v2918_v9  ;;  %v284_v7 = vpop.xlane.xlu1 %283 }
  0xe8   : > { %v2068_v61 = vrot.slane %v2060_v58, %v2763_v31  ;;  %v2075_v50 = vrot.slane %v2061_v12, %v2763_v31  ;;  %v2078_v2 = vcombine.low %v1908_v43, %v1909_v51  ;;  %v2085_v55 = vrot.slane %v2077_v54, %v2763_v31  ;;  %v2568_v26 = vpop.eup %2567 }
  0xe9   : > { %2573 = vtanh.f32 %v412_v3  ;;  %v413_v10 = vadd.f32 %v2722_v23, %v272_v17  ;;  %v416_v24 = vadd.f32 %v2722_v23, %v281_v25  ;;  %v782_v41 = vcombine.high %v2926_v32, %v2926_v32 }
  0xea   : > { %v2076_v52 = vcombine.low %v2068_v61, %v2075_v50  ;;  %v2092_v57 = vrot.slane %v2078_v2, %v2763_v31  ;;  %2575 = vtanh.f32 %v411_v21  ;;  %v1116_v1 = vcombine.high %v2568_v26, %v2568_v26  ;;  %v2570_v20 = vpop.eup %2569 }
  0xeb   : > { %v1123_v8 = vrot.slane %v2568_v26, %v2751_v5  ;;  %2577 = vtanh.f32 %v414_v38  ;;  %v2984_v17 = vadd.f32 %v2722_v23, %v278_v40  ;;  %v381_v49 = vadd.f32 %v2729_v33, %v239_v14 }
  0xec   : > { %v2093_v15 = vcombine.low %v2085_v55, %v2092_v57  ;;  %2420 = vst.msk [vmem:[%s2742_s28] sm:$0xff] %vm2419_vm4, %v2076_v52  ;;  %2579 = vtanh.f32 %v413_v10  ;;  %v832_v62 = vcombine.high %v2570_v20, %v2570_v20  ;;  %v839_v25 = vrot.slane %v2570_v20, %v2751_v5 }
  0xed   : > { %v1130_v43 = vrot.slane %v1116_v1, %v2751_v5  ;;  %v1131_v58 = vcombine.high %v1123_v8, %v1123_v8  ;;  %v1139_v12 = vrot.slane %v1123_v8, %v2751_v5  ;;  %2581 = vtanh.f32 %v416_v24 }
  0xee   : > { %2421 = vst.msk [vmem:[%s2742_s28 + $0x8] sm:$0xff] %vm2419_vm4, %v2093_v15  ;;  %v2993_v54 = vadd.f32 %v2722_v23, %v284_v7  ;;  %v2996_v51 = vadd.f32 %v2722_v23, %v381_v49  ;;  %v846_v40 = vrot.slane %v832_v62, %v2751_v5  ;;  %v847_v33 = vcombine.high %v839_v25, %v839_v25 }
  0xef   : > { %v3000_v3 = vrot.slane %v839_v25, %v2751_v5  ;;  %v1132_v21 = vcombine.high %v1130_v43, %v1130_v43  ;;  %v1146_v38 = vrot.slane %v1130_v43, %v2751_v5  ;;  %v1153_v61 = vrot.slane %v1131_v58, %v2751_v5 }
  0xf0   : > { %v1161_v50 = vcombine.high %v1139_v12, %v1139_v12  ;;  %v1574_v2 = vrot.slane %v1139_v12, %v2761_v30  ;;  %v848_v55 = vcombine.high %v846_v40, %v846_v40  ;;  %v3006_v10 = vrot.slane %v846_v40, %v2751_v5 }
  0xf1   : > { %v3009_v23 = vrot.slane %v847_v33, %v2751_v5  ;;  %v877_v14 = vcombine.high %v3000_v3, %v3000_v3  ;;  %v2572_v26 = vpop.eup %2571  ;;  %v1160_v52 = vrot.slane %v1132_v21, %v2751_v5  ;;  %v1162_v57 = vcombine.high %v1146_v38, %v1146_v38 }
  0xf2   : > { %v1163_v24 = vcombine.high %v1153_v61, %v1153_v61  ;;  %v1578_v1 = vrot.slane %v1153_v61, %v2761_v30  ;;  %v3016_v7 = vrot.slane %v848_v55, %v2751_v5  ;;  %v878_v20 = vcombine.high %v3006_v10, %v3006_v10 }
  0xf3   : > { %v2574_v8 = vpop.eup %2573  ;;  %v879_v15 = vcombine.high %v3009_v23, %v3009_v23  ;;  %v1582_v49 = vrot.slane %v1161_v50, %v2761_v30  ;;  %v1164_v25 = vcombine.high %v1160_v52, %v1160_v52  ;;  %v1590_v58 = vrot.slane %v1146_v38, %v2761_v30 }
  0xf4   : > { %v3023_v62 = vpop.eup %2575  ;;  %v1586_v43 = vrot.slane %v1163_v24, %v2761_v30  ;;  %v1594_v12 = vrot.slane %v1160_v52, %v2761_v30  ;;  %v1598_v21 = vrot.slane %v1162_v57, %v2761_v30  ;;  %v1918_v61 = vsel %vm341_vm2, %v2824_v11, %v1574_v2 }
  0xf5   : > { %v3028_v40 = vpop.eup %2577  ;;  %v1919_v50 = vsel %vm341_vm2, %v2838_v19, %v1578_v1  ;;  %v1602_v24 = vrot.slane %v1164_v25, %v2761_v30  ;;  %v1920_v38 = vsel %vm341_vm2, %v583_v29, %v1582_v49  ;;  %v1922_v2 = vsel %vm341_vm2, %v2835_v18, %v1590_v58 }
  0xf6   : > { %v3037_v55 = vpop.eup %2579  ;;  %v1921_v52 = vsel %vm341_vm2, %v585_v45, %v1586_v43  ;;  %v1923_v57 = vsel %vm341_vm2, %v2848_v28, %v1594_v12  ;;  %v1924_v1 = vsel %vm341_vm2, %v584_v44, %v1598_v21  ;;  %v2128_v25 = vcombine.low %v1918_v61, %v1919_v50 }
  0xf7   : > { %v2129_v11 = vcombine.low %v1920_v38, %v1921_v52  ;;  %v3056_v33 = vpop.eup %2581  ;;  %v3441_v19 = vcombine.high %v2848_v28, %v2848_v28  ;;  %v2145_v45 = vcombine.low %v1922_v2, %v1923_v57  ;;  %v1067_v49 = vcombine.high %v2572_v26, %v2572_v26 }
  0xf8   : > { %v1074_v43 = vrot.slane %v2572_v26, %v2751_v5  ;;  %v2136_v58 = vrot.slane %v2128_v25, %v2763_v31  ;;  %v1214_v44 = vcombine.high %v2574_v8, %v2574_v8  ;;  %v1221_v26 = vrot.slane %v2574_v8, %v2751_v5 }
  0xf9   : > { %v1925_v29 = vsel %vm341_vm2, %v3441_v19, %v1602_v24  ;;  %v2143_v12 = vrot.slane %v2129_v11, %v2763_v31  ;;  %v2153_v21 = vrot.slane %v2145_v45, %v2763_v31  ;;  %v1081_v61 = vrot.slane %v1067_v49, %v2751_v5 }
  0xfa   : > { %v2146_v18 = vcombine.low %v1924_v1, %v1925_v29  ;;  %v1082_v50 = vcombine.high %v1074_v43, %v1074_v43  ;;  %v1090_v28 = vrot.slane %v1074_v43, %v2751_v5  ;;  %v1228_v52 = vrot.slane %v1214_v44, %v2751_v5 }
  0xfb   : > { %v2144_v38 = vcombine.low %v2136_v58, %v2143_v12  ;;  %v1083_v2 = vcombine.high %v1081_v61, %v1081_v61  ;;  %v1097_v57 = vrot.slane %v1081_v61, %v2751_v5  ;;  %v1229_v29 = vcombine.high %v1221_v26, %v1221_v26 }
  0xfc   : > { %v2160_v24 = vrot.slane %v2146_v18, %v2763_v31  ;;  %v1104_v1 = vrot.slane %v1082_v50, %v2751_v5  ;;  %v1112_v25 = vcombine.high %v1090_v28, %v1090_v28  ;;  %v1542_v19 = vrot.slane %v1090_v28, %v2761_v30 }
  0xfd   : > { %2424 = vst.msk [vmem:[%s2742_s28 + $0x20] sm:$0xff] %vm2419_vm4, %v2144_v38  ;;  %v1230_v45 = vcombine.high %v1228_v52, %v1228_v52  ;;  %v1111_v49 = vrot.slane %v1083_v2, %v2751_v5  ;;  %v1113_v43 = vcombine.high %v1097_v57, %v1097_v57  ;;  %v1558_v18 = vrot.slane %v1097_v57, %v2761_v30 }
  0xfe   : > { %v2161_v11 = vcombine.low %v2153_v21, %v2160_v24  ;;  %v1114_v58 = vcombine.high %v1104_v1, %v1104_v1  ;;  %v1546_v8 = vrot.slane %v1104_v1, %v2761_v30  ;;  %v1550_v12 = vrot.slane %v1112_v25, %v2761_v30 }
  0xff   : > { %v1910_v44 = vsel %vm341_vm2, %v2766_v34, %v1542_v19  ;;  %v1237_v21 = vrot.slane %v1221_v26, %v2751_v5  ;;  %v1115_v61 = vcombine.high %v1111_v49, %v1111_v49  ;;  %v1562_v28 = vrot.slane %v1111_v49, %v2761_v30 }
 0x100   : > { %2425 = vst.msk [vmem:[%s2742_s28 + $0x28] sm:$0xff] %vm2419_vm4, %v2161_v11  ;;  %v1554_v50 = vrot.slane %v1114_v58, %v2761_v30  ;;  %v1566_v38 = vrot.slane %v1113_v43, %v2761_v30  ;;  %v1911_v24 = vsel %vm341_vm2, %v2778_v46, %v1546_v8  ;;  %v3442_v2 = vcombine.high %v2766_v34, %v2766_v34 }
 0x101   : > { %v1914_v1 = vsel %vm341_vm2, %v2771_v42, %v1558_v18  ;;  %v1244_v26 = vrot.slane %v1228_v52, %v2751_v5  ;;  %v1570_v25 = vrot.slane %v1115_v61, %v2761_v30  ;;  %v3443_v11 = vcombine.high %v2778_v46, %v2778_v46 }
 0x102   : > { %v1912_v57 = vsel %vm341_vm2, %v3442_v2, %v1550_v12  ;;  %v1915_v49 = vsel %vm341_vm2, %v2790_v53, %v1562_v28  ;;  %v3444_v34 = vcombine.high %v2771_v42, %v2771_v42  ;;  %v2094_v58 = vcombine.low %v1910_v44, %v1911_v24 }
 0x103   : > { %v1913_v19 = vsel %vm341_vm2, %v3443_v11, %v1554_v50  ;;  %v2111_v12 = vcombine.low %v1914_v1, %v1915_v49  ;;  %v1251_v52 = vrot.slane %v1229_v29, %v2751_v5  ;;  %v3445_v18 = vcombine.high %v2790_v53, %v2790_v53 }
 0x104   : > { %v1916_v43 = vsel %vm341_vm2, %v3444_v34, %v1566_v38  ;;  %v2095_v8 = vcombine.low %v1912_v57, %v1913_v19  ;;  %v1258_v61 = vrot.slane %v1230_v45, %v2751_v5  ;;  %v1259_v50 = vcombine.high %v1237_v21, %v1237_v21 }
 0x105   : > { %v1917_v46 = vsel %vm341_vm2, %v3445_v18, %v1570_v25  ;;  %v1260_v2 = vcombine.high %v1244_v26, %v1244_v26  ;;  %v2102_v28 = vrot.slane %v2094_v58, %v2763_v31  ;;  %v2119_v44 = vrot.slane %v2111_v12, %v2763_v31 }
 0x106   : > { %v2109_v42 = vrot.slane %v2095_v8, %v2763_v31  ;;  %v2112_v38 = vcombine.low %v1916_v43, %v1917_v46  ;;  %v1261_v24 = vcombine.high %v1251_v52, %v1251_v52  ;;  %v1262_v57 = vcombine.high %v1258_v61, %v1258_v61 }
 0x107   : > { %v1638_v29 = vrot.slane %v1237_v21, %v2761_v30  ;;  %v1642_v53 = vrot.slane %v1251_v52, %v2761_v30  ;;  %v1646_v45 = vrot.slane %v1259_v50, %v2761_v30  ;;  %v1654_v11 = vrot.slane %v1244_v26, %v2761_v30 }
 0x108   : > { %v2110_v1 = vcombine.low %v2102_v28, %v2109_v42  ;;  %v2126_v25 = vrot.slane %v2112_v38, %v2763_v31  ;;  %v1650_v19 = vrot.slane %v1261_v24, %v2761_v30  ;;  %v1658_v49 = vrot.slane %v1258_v61, %v2761_v30 }
 0x109   : > { %v1662_v34 = vrot.slane %v1260_v2, %v2761_v30  ;;  %v1666_v43 = vrot.slane %v1262_v57, %v2761_v30  ;;  %v1934_v21 = vsel %vm341_vm2, %v2871_v48, %v1638_v29  ;;  %v1935_v8 = vsel %vm341_vm2, %v2879_v59, %v1642_v53 }
 0x10a   : > { %v2127_v58 = vcombine.low %v2119_v44, %v2126_v25  ;;  %2422 = vst.msk [vmem:[%s2742_s28 + $0x10] sm:$0xff] %vm2419_vm4, %v2110_v1  ;;  %v3446_v26 = vcombine.high %v2871_v48, %v2871_v48  ;;  %v3447_v52 = vcombine.high %v2879_v59, %v2879_v59  ;;  %v1938_v46 = vsel %vm341_vm2, %v2876_v56, %v1654_v11 }
 0x10b   : > { %v1939_v61 = vsel %vm341_vm2, %v2882_v60, %v1658_v49  ;;  %v3448_v50 = vcombine.high %v2876_v56, %v2876_v56  ;;  %v3449_v48 = vcombine.high %v2882_v60, %v2882_v60  ;;  %v2196_v28 = vcombine.low %v1934_v21, %v1935_v8 }
 0x10c   : > { %v1936_v12 = vsel %vm341_vm2, %v3446_v26, %v1646_v45  ;;  %v1937_v18 = vsel %vm341_vm2, %v3447_v52, %v1650_v19  ;;  %2423 = vst.msk [vmem:[%s2742_s28 + $0x18] sm:$0xff] %vm2419_vm4, %v2127_v58  ;;  %v2213_v38 = vcombine.low %v1938_v46, %v1939_v61  ;;  %v1165_v24 = vcombine.high %v3023_v62, %v3023_v62 }
 0x10d   : > { %v1940_v2 = vsel %vm341_vm2, %v3448_v50, %v1662_v34  ;;  %v1941_v59 = vsel %vm341_vm2, %v3449_v48, %v1666_v43  ;;  %v2197_v42 = vcombine.low %v1936_v12, %v1937_v18  ;;  %v1172_v57 = vrot.slane %v3023_v62, %v2751_v5 }
 0x10e   : > { %v2214_v44 = vcombine.low %v1940_v2, %v1941_v59  ;;  %v1312_v56 = vcombine.high %v3028_v40, %v3028_v40  ;;  %v2204_v29 = vrot.slane %v2196_v28, %v2763_v31  ;;  %v2221_v53 = vrot.slane %v2213_v38, %v2763_v31 }
 0x10f   : > { %v2211_v60 = vrot.slane %v2197_v42, %v2763_v31  ;;  %v1319_v1 = vrot.slane %v3028_v40, %v2751_v5  ;;  %v1179_v45 = vrot.slane %v1165_v24, %v2751_v5  ;;  %v1180_v11 = vcombine.high %v1172_v57, %v1172_v57 }
 0x110   : > { %v2228_v25 = vrot.slane %v2214_v44, %v2763_v31  ;;  %v1188_v62 = vrot.slane %v1172_v57, %v2751_v5  ;;  %v1326_v49 = vrot.slane %v1312_v56, %v2751_v5  ;;  %2583 = vtanh.f32 %v2984_v17 }
 0x111   : > { %v2212_v19 = vcombine.low %v2204_v29, %v2211_v60  ;;  %v1327_v34 = vcombine.high %v1319_v1, %v1319_v1  ;;  %v1335_v43 = vrot.slane %v1319_v1, %v2751_v5  ;;  %v1181_v21 = vcombine.high %v1179_v45, %v1179_v45 }
 0x112   : > { %v2229_v58 = vcombine.low %v2221_v53, %v2228_v25  ;;  %v1195_v8 = vrot.slane %v1179_v45, %v2751_v5  ;;  %v1202_v40 = vrot.slane %v1180_v11, %v2751_v5  ;;  %v1210_v26 = vcombine.high %v1188_v62, %v1188_v62 }
 0x113   : > { %2428 = vst.msk [vmem:[%s2742_s28 + $0x40] sm:$0xff] %vm2419_vm4, %v2212_v19  ;;  %v1606_v12 = vrot.slane %v1188_v62, %v2761_v30  ;;  %v1328_v52 = vcombine.high %v1326_v49, %v1326_v49  ;;  %v1342_v18 = vrot.slane %v1326_v49, %v2751_v5  ;;  %v1209_v46 = vrot.slane %v1181_v21, %v2751_v5 }
 0x114   : > { %2429 = vst.msk [vmem:[%s2742_s28 + $0x48] sm:$0xff] %vm2419_vm4, %v2229_v58  ;;  %v1211_v61 = vcombine.high %v1195_v8, %v1195_v8  ;;  %v1212_v50 = vcombine.high %v1202_v40, %v1202_v40  ;;  %v1610_v2 = vrot.slane %v1202_v40, %v2761_v30  ;;  %v1614_v48 = vrot.slane %v1210_v26, %v2761_v30 }
 0x115   : > { %v1622_v59 = vrot.slane %v1195_v8, %v2761_v30  ;;  %v1926_v28 = vsel %vm341_vm2, %v2806_v63, %v1606_v12  ;;  %v1349_v42 = vrot.slane %v1327_v34, %v2751_v5  ;;  %v1213_v38 = vcombine.high %v1209_v46, %v1209_v46 }
 0x116   : > { %v1618_v44 = vrot.slane %v1212_v50, %v2761_v30  ;;  %v1626_v24 = vrot.slane %v1209_v46, %v2761_v30  ;;  %v1630_v57 = vrot.slane %v1211_v61, %v2761_v30  ;;  %v1927_v56 = vsel %vm341_vm2, %v2817_v6, %v1610_v2 }
 0x117   : > { %v3450_v29 = vcombine.high %v2806_v63, %v2806_v63  ;;  %v1930_v53 = vsel %vm341_vm2, %v2814_v4, %v1622_v59  ;;  %v1356_v1 = vrot.slane %v1328_v52, %v2751_v5  ;;  %v1634_v25 = vrot.slane %v1213_v38, %v2761_v30 }
 0x118   : > { %v3451_v45 = vcombine.high %v2817_v6, %v2817_v6  ;;  %v1931_v62 = vsel %vm341_vm2, %v2829_v13, %v1626_v24  ;;  %v3452_v63 = vcombine.high %v2814_v4, %v2814_v4  ;;  %v2162_v49 = vcombine.low %v1926_v28, %v1927_v56 }
 0x119   : > { %v1928_v60 = vsel %vm341_vm2, %v3450_v29, %v1614_v48  ;;  %v2179_v58 = vcombine.low %v1930_v53, %v1931_v62  ;;  %v1357_v21 = vcombine.high %v1335_v43, %v1335_v43  ;;  %v3453_v8 = vcombine.high %v2829_v13, %v2829_v13 }
 0x11a   : > { %v1929_v11 = vsel %vm341_vm2, %v3451_v45, %v1618_v44  ;;  %v1932_v19 = vsel %vm341_vm2, %v3452_v63, %v1630_v57  ;;  %v1358_v6 = vcombine.high %v1342_v18, %v1342_v18  ;;  %v1359_v26 = vcombine.high %v1349_v42, %v1349_v42 }
 0x11b   : > { %v2163_v34 = vcombine.low %v1928_v60, %v1929_v11  ;;  %v1933_v40 = vsel %vm341_vm2, %v3453_v8, %v1634_v25  ;;  %v1360_v12 = vcombine.high %v1356_v1, %v1356_v1  ;;  %v2170_v52 = vrot.slane %v2162_v49, %v2763_v31 }
 0x11c   : > { %v2180_v4 = vcombine.low %v1932_v19, %v1933_v40  ;;  %v2187_v61 = vrot.slane %v2179_v58, %v2763_v31  ;;  %v1702_v50 = vrot.slane %v1335_v43, %v2761_v30  ;;  %v1706_v2 = vrot.slane %v1349_v42, %v2761_v30 }
 0x11d   : > { %v2177_v46 = vrot.slane %v2163_v34, %v2763_v31  ;;  %v1710_v48 = vrot.slane %v1357_v21, %v2761_v30  ;;  %v1714_v13 = vrot.slane %v1359_v26, %v2761_v30  ;;  %v1718_v38 = vrot.slane %v1342_v18, %v2761_v30 }
 0x11e   : > { %v2194_v28 = vrot.slane %v2180_v4, %v2763_v31  ;;  %v1722_v44 = vrot.slane %v1356_v1, %v2761_v30  ;;  %v1726_v24 = vrot.slane %v1358_v6, %v2761_v30  ;;  %v1730_v57 = vrot.slane %v1360_v12, %v2761_v30 }
 0x11f   : > { %v2178_v59 = vcombine.low %v2170_v52, %v2177_v46  ;;  %v1950_v43 = vsel %vm341_vm2, %v2897_v16, %v1702_v50  ;;  %v1951_v42 = vsel %vm341_vm2, %v2918_v9, %v1706_v2  ;;  %v3454_v29 = vcombine.high %v2897_v16, %v2897_v16 }
 0x120   : > { %v2195_v56 = vcombine.low %v2187_v61, %v2194_v28  ;;  %v1953_v60 = vsel %vm341_vm2, %v781_v0, %v1714_v13  ;;  %v1954_v53 = vsel %vm341_vm2, %v2915_v37, %v1718_v38  ;;  %v1955_v1 = vsel %vm341_vm2, %v2926_v32, %v1722_v44 }
 0x121   : > { %2426 = vst.msk [vmem:[%s2742_s28 + $0x30] sm:$0xff] %vm2419_vm4, %v2178_v59  ;;  %v1952_v18 = vsel %vm341_vm2, %v3454_v29, %v1710_v48  ;;  %v1956_v25 = vsel %vm341_vm2, %v780_v22, %v1726_v24  ;;  %v1957_v16 = vsel %vm341_vm2, %v782_v41, %v1730_v57  ;;  %v2264_v45 = vcombine.low %v1950_v43, %v1951_v42 }
 0x122   : > { %2427 = vst.msk [vmem:[%s2742_s28 + $0x38] sm:$0xff] %vm2419_vm4, %v2195_v56  ;;  %v2265_v9 = vcombine.low %v1952_v18, %v1953_v60  ;;  %v2281_v0 = vcombine.low %v1954_v53, %v1955_v1  ;;  %v2282_v11 = vcombine.low %v1956_v25, %v1957_v16  ;;  %v1263_v62 = vcombine.high %v3037_v55, %v3037_v55 }
 0x123   : > { %v2272_v63 = vrot.slane %v2264_v45, %v2763_v31  ;;  %v1270_v37 = vrot.slane %v3037_v55, %v2751_v5  ;;  %v1410_v22 = vcombine.high %v3056_v33, %v3056_v33  ;;  %v1417_v32 = vrot.slane %v3056_v33, %v2751_v5 }
 0x124   : > { %v2279_v41 = vrot.slane %v2265_v9, %v2763_v31  ;;  %v2289_v19 = vrot.slane %v2281_v0, %v2763_v31  ;;  %v2296_v49 = vrot.slane %v2282_v11, %v2763_v31  ;;  %v1277_v34 = vrot.slane %v1263_v62, %v2751_v5 }
 0x125   : > { %v1278_v58 = vcombine.high %v1270_v37, %v1270_v37  ;;  %v1286_v21 = vrot.slane %v1270_v37, %v2751_v5  ;;  %v1424_v55 = vrot.slane %v1410_v22, %v2751_v5  ;;  %v1425_v8 = vcombine.high %v1417_v32, %v1417_v32 }
 0x126   : > { %v2280_v40 = vcombine.low %v2272_v63, %v2279_v41  ;;  %v2297_v6 = vcombine.low %v2289_v19, %v2296_v49  ;;  %v1279_v26 = vcombine.high %v1277_v34, %v1277_v34  ;;  %v1293_v33 = vrot.slane %v1277_v34, %v2751_v5 }
 0x127   : > { %v1300_v12 = vrot.slane %v1278_v58, %v2751_v5  ;;  %v1308_v52 = vcombine.high %v1286_v21, %v1286_v21  ;;  %v1670_v46 = vrot.slane %v1286_v21, %v2761_v30  ;;  %v1426_v4 = vcombine.high %v1424_v55, %v1424_v55 }
 0x128   : > { %2432 = vst.msk [vmem:[%s2742_s28 + $0x60] sm:$0xff] %vm2419_vm4, %v2280_v40  ;;  %2433 = vst.msk [vmem:[%s2742_s28 + $0x68] sm:$0xff] %vm2419_vm4, %v2297_v6  ;;  %v1307_v61 = vrot.slane %v1279_v26, %v2751_v5  ;;  %v1309_v50 = vcombine.high %v1293_v33, %v1293_v33  ;;  %v1686_v2 = vrot.slane %v1293_v33, %v2761_v30  ;;  %2585 = vtanh.f32 %v2993_v54 }
 0x129   : > { %v1433_v48 = vrot.slane %v1417_v32, %v2751_v5  ;;  %v1310_v13 = vcombine.high %v1300_v12, %v1300_v12  ;;  %v1674_v59 = vrot.slane %v1300_v12, %v2761_v30  ;;  %v1678_v28 = vrot.slane %v1308_v52, %v2761_v30 }
 0x12a   : > { %v1942_v38 = vsel %vm341_vm2, %v2853_v35, %v1670_v46  ;;  %v1311_v44 = vcombine.high %v1307_v61, %v1307_v61  ;;  %v1690_v24 = vrot.slane %v1307_v61, %v2761_v30  ;;  %v1694_v57 = vrot.slane %v1309_v50, %v2761_v30 }
 0x12b   : > { %v1946_v43 = vsel %vm341_vm2, %v2856_v36, %v1686_v2  ;;  %v1682_v42 = vrot.slane %v1310_v13, %v2761_v30  ;;  %v1943_v56 = vsel %vm341_vm2, %v2861_v39, %v1674_v59  ;;  %v3455_v29 = vcombine.high %v2853_v35, %v2853_v35 }
 0x12c   : > { %v1440_v60 = vrot.slane %v1424_v55, %v2751_v5  ;;  %v1698_v53 = vrot.slane %v1311_v44, %v2761_v30  ;;  %v1947_v1 = vsel %vm341_vm2, %v2868_v47, %v1690_v24  ;;  %v3456_v25 = vcombine.high %v2856_v36, %v2856_v36 }
 0x12d   : > { %v1944_v18 = vsel %vm341_vm2, %v3455_v29, %v1678_v28  ;;  %v2230_v45 = vcombine.low %v1942_v38, %v1943_v56  ;;  %v3457_v9 = vcombine.high %v2861_v39, %v2861_v39  ;;  %v2247_v0 = vcombine.low %v1946_v43, %v1947_v1 }
 0x12e   : > { %v1948_v16 = vsel %vm341_vm2, %v3456_v25, %v1694_v57  ;;  %v1447_v11 = vrot.slane %v1425_v8, %v2751_v5  ;;  %v1454_v62 = vrot.slane %v1426_v4, %v2751_v5  ;;  %v3458_v63 = vcombine.high %v2868_v47, %v2868_v47 }
 0x12f   : > { %v1945_v35 = vsel %vm341_vm2, %v3457_v9, %v1682_v42  ;;  %v2238_v36 = vrot.slane %v2230_v45, %v2763_v31  ;;  %v1455_v32 = vcombine.high %v1433_v48, %v1433_v48  ;;  %v2255_v19 = vrot.slane %v2247_v0, %v2763_v31 }
 0x130   : > { %v1949_v37 = vsel %vm341_vm2, %v3458_v63, %v1698_v53  ;;  %v2231_v22 = vcombine.low %v1944_v18, %v1945_v35  ;;  %v1456_v39 = vcombine.high %v1440_v60, %v1440_v60  ;;  %v1457_v49 = vcombine.high %v1447_v11, %v1447_v11  ;;  %v2584_v18 = vpop.eup %2583 }
 0x131   : > { %v2248_v41 = vcombine.low %v1948_v16, %v1949_v37  ;;  %v1458_v58 = vcombine.high %v1454_v62, %v1454_v62  ;;  %v1766_v21 = vrot.slane %v1433_v48, %v2761_v30  ;;  %v1770_v55 = vrot.slane %v1447_v11, %v2761_v30 }
 0x132   : > { %v2245_v34 = vrot.slane %v2231_v22, %v2763_v31  ;;  %v1774_v8 = vrot.slane %v1455_v32, %v2761_v30  ;;  %v1778_v40 = vrot.slane %v1457_v49, %v2761_v30  ;;  %v1782_v6 = vrot.slane %v1440_v60, %v2761_v30  ;;  %v2586_v1 = vpop.eup %2585 }
 0x133   : > { %v2262_v47 = vrot.slane %v2248_v41, %v2763_v31  ;;  %v1786_v33 = vrot.slane %v1454_v62, %v2761_v30  ;;  %v1790_v12 = vrot.slane %v1456_v39, %v2761_v30  ;;  %v1794_v52 = vrot.slane %v1458_v58, %v2761_v30 }
 0x134   : > { %v2246_v26 = vcombine.low %v2238_v36, %v2245_v34  ;;  %v1966_v4 = vsel %vm341_vm2, %v3000_v3, %v1766_v21  ;;  %v1967_v61 = vsel %vm341_vm2, %v3009_v23, %v1770_v55  ;;  %v1968_v50 = vsel %vm341_vm2, %v877_v14, %v1774_v8 }
 0x135   : > { %v2263_v46 = vcombine.low %v2255_v19, %v2262_v47  ;;  %v1969_v2 = vsel %vm341_vm2, %v879_v15, %v1778_v40  ;;  %v1970_v48 = vsel %vm341_vm2, %v3006_v10, %v1782_v6  ;;  %v1971_v13 = vsel %vm341_vm2, %v3016_v7, %v1786_v33 }
 0x136   : > { %2430 = vst.msk [vmem:[%s2742_s28 + $0x50] sm:$0xff] %vm2419_vm4, %v2246_v26  ;;  %v1972_v3 = vsel %vm341_vm2, %v878_v20, %v1790_v12  ;;  %v3459_v14 = vcombine.high %v3016_v7, %v3016_v7  ;;  %v2332_v15 = vcombine.low %v1966_v4, %v1967_v61  ;;  %v2333_v59 = vcombine.low %v1968_v50, %v1969_v2 }
 0x137   : > { %2431 = vst.msk [vmem:[%s2742_s28 + $0x58] sm:$0xff] %vm2419_vm4, %v2263_v46  ;;  %v2349_v28 = vcombine.low %v1970_v48, %v1971_v13  ;;  %v790_v20 = vrot.slane %v2845_v27, %v2751_v5  ;;  %v3460_v7 = vcombine.high %v2845_v27, %v2845_v27  ;;  %2587 = vtanh.f32 %v2996_v51 }
 0x138   : > { %v1973_v23 = vsel %vm341_vm2, %v3459_v14, %v1794_v52  ;;  %v2340_v44 = vrot.slane %v2332_v15, %v2763_v31  ;;  %v2347_v10 = vrot.slane %v2333_v59, %v2763_v31  ;;  %v1361_v25 = vcombine.high %v2584_v18, %v2584_v18 }
 0x139   : > { %v2350_v38 = vcombine.low %v1972_v3, %v1973_v23  ;;  %v797_v24 = vrot.slane %v3460_v7, %v2751_v5  ;;  %v2357_v57 = vrot.slane %v2349_v28, %v2763_v31  ;;  %v798_v56 = vcombine.high %v790_v20, %v790_v20 }
 0x13a   : > { %v2348_v42 = vcombine.low %v2340_v44, %v2347_v10  ;;  %v806_v54 = vrot.slane %v790_v20, %v2751_v5  ;;  %v1368_v16 = vrot.slane %v2584_v18, %v2751_v5  ;;  %v1459_v45 = vcombine.high %v2586_v1, %v2586_v1 }
 0x13b   : > { %v2364_v43 = vrot.slane %v2350_v38, %v2763_v31  ;;  %v799_v29 = vcombine.high %v797_v24, %v797_v24  ;;  %v813_v27 = vrot.slane %v797_v24, %v2751_v5  ;;  %v820_v60 = vrot.slane %v798_v56, %v2751_v5 }
 0x13c   : > { %2436 = vst.msk [vmem:[%s2742_s28 + $0x80] sm:$0xff] %vm2419_vm4, %v2348_v42  ;;  %v1466_v9 = vrot.slane %v2586_v1, %v2751_v5  ;;  %v828_v35 = vcombine.high %v806_v54, %v806_v54  ;;  %v1375_v0 = vrot.slane %v1361_v25, %v2751_v5  ;;  %v1376_v11 = vcombine.high %v1368_v16, %v1368_v16 }
 0x13d   : > { %v2365_v17 = vcombine.low %v2357_v57, %v2364_v43  ;;  %v827_v53 = vrot.slane %v799_v29, %v2751_v5  ;;  %v1384_v51 = vrot.slane %v1368_v16, %v2751_v5  ;;  %v829_v62 = vcombine.high %v813_v27, %v813_v27 }
 0x13e   : > { %v830_v63 = vcombine.high %v820_v60, %v820_v60  ;;  %v1473_v22 = vrot.slane %v1459_v45, %v2751_v5  ;;  %v1377_v36 = vcombine.high %v1375_v0, %v1375_v0  ;;  %v1391_v32 = vrot.slane %v1375_v0, %v2751_v5 }
 0x13f   : > { %2437 = vst.msk [vmem:[%s2742_s28 + $0x88] sm:$0xff] %vm2419_vm4, %v2365_v17  ;;  %v831_v37 = vcombine.high %v827_v53, %v827_v53  ;;  %v1398_v41 = vrot.slane %v1376_v11, %v2751_v5  ;;  %v1406_v19 = vcombine.high %v1384_v51, %v1384_v51  ;;  %v1734_v39 = vrot.slane %v1384_v51, %v2761_v30 }
 0x140   : > { %v1474_v49 = vcombine.high %v1466_v9, %v1466_v9  ;;  %v1475_v34 = vcombine.high %v1473_v22, %v1473_v22  ;;  %v1482_v58 = vrot.slane %v1466_v9, %v2751_v5  ;;  %v1405_v21 = vrot.slane %v1377_v36, %v2751_v5 }
 0x141   : > { %v1407_v55 = vcombine.high %v1391_v32, %v1391_v32  ;;  %v1408_v47 = vcombine.high %v1398_v41, %v1398_v41  ;;  %v1738_v8 = vrot.slane %v1398_v41, %v2761_v30  ;;  %v1742_v40 = vrot.slane %v1406_v19, %v2761_v30  ;;  %v2588_v12 = vpop.eup %2587 }
 0x142   : > { %v1750_v6 = vrot.slane %v1391_v32, %v2761_v30  ;;  %v1958_v26 = vsel %vm341_vm2, %v806_v54, %v1734_v39  ;;  %v1489_v33 = vrot.slane %v1473_v22, %v2751_v5  ;;  %v1409_v52 = vcombine.high %v1405_v21, %v1405_v21 }
 0x143   : > { %v1746_v46 = vrot.slane %v1408_v47, %v2761_v30  ;;  %v1754_v4 = vrot.slane %v1405_v21, %v2761_v30  ;;  %v1758_v61 = vrot.slane %v1407_v55, %v2761_v30  ;;  %v1959_v50 = vsel %vm341_vm2, %v820_v60, %v1738_v8 }
 0x144   : > { %v1960_v2 = vsel %vm341_vm2, %v828_v35, %v1742_v40  ;;  %v1962_v48 = vsel %vm341_vm2, %v813_v27, %v1750_v6  ;;  %v1496_v13 = vrot.slane %v1474_v49, %v2751_v5  ;;  %v1762_v3 = vrot.slane %v1409_v52, %v2761_v30 }
 0x145   : > { %v1961_v14 = vsel %vm341_vm2, %v830_v63, %v1746_v46  ;;  %v1963_v23 = vsel %vm341_vm2, %v827_v53, %v1754_v4  ;;  %v1964_v15 = vsel %vm341_vm2, %v829_v62, %v1758_v61  ;;  %v2298_v59 = vcombine.low %v1958_v26, %v1959_v50 }
 0x146   : > { %v2299_v28 = vcombine.low %v1960_v2, %v1961_v14  ;;  %v2315_v38 = vcombine.low %v1962_v48, %v1963_v23  ;;  %v881_v44 = vcombine.high %v2588_v12, %v2588_v12  ;;  %v1965_v10 = vsel %vm341_vm2, %v831_v37, %v1762_v3 }
 0x147   : > { %v1503_v20 = vrot.slane %v1475_v34, %v2751_v5  ;;  %v1504_v7 = vcombine.high %v1482_v58, %v1482_v58  ;;  %v888_v24 = vrot.slane %v2588_v12, %v2751_v5  ;;  %v2306_v57 = vrot.slane %v2298_v59, %v2763_v31 }
 0x148   : > { %v2313_v43 = vrot.slane %v2299_v28, %v2763_v31  ;;  %v2316_v42 = vcombine.low %v1964_v15, %v1965_v10  ;;  %v1505_v17 = vcombine.high %v1489_v33, %v1489_v33  ;;  %v2323_v56 = vrot.slane %v2315_v38, %v2763_v31 }
 0x149   : > { %v1506_v29 = vcombine.high %v1496_v13, %v1496_v13  ;;  %v1798_v54 = vrot.slane %v1482_v58, %v2761_v30  ;;  %v1802_v18 = vrot.slane %v1496_v13, %v2761_v30  ;;  %v1814_v53 = vrot.slane %v1489_v33, %v2761_v30 }
 0x14a   : > { %v2314_v27 = vcombine.low %v2306_v57, %v2313_v43  ;;  %v2330_v60 = vrot.slane %v2316_v42, %v2763_v31  ;;  %v895_v1 = vrot.slane %v881_v44, %v2751_v5  ;;  %v1806_v25 = vrot.slane %v1504_v7, %v2761_v30 }
 0x14b   : > { %v1818_v16 = vrot.slane %v1503_v20, %v2761_v30  ;;  %v896_v45 = vcombine.high %v888_v24, %v888_v24  ;;  %v904_v9 = vrot.slane %v888_v24, %v2751_v5  ;;  %v1822_v0 = vrot.slane %v1505_v17, %v2761_v30 }
 0x14c   : > { %v2331_v35 = vcombine.low %v2323_v56, %v2330_v60  ;;  %2434 = vst.msk [vmem:[%s2742_s28 + $0x70] sm:$0xff] %vm2419_vm4, %v2314_v27  ;;  %v897_v11 = vcombine.high %v895_v1, %v895_v1  ;;  %v911_v51 = vrot.slane %v895_v1, %v2751_v5  ;;  %v1810_v62 = vrot.slane %v1506_v29, %v2761_v30 }
 0x14d   : > { %v918_v63 = vrot.slane %v896_v45, %v2751_v5  ;;  %v926_v37 = vcombine.high %v904_v9, %v904_v9  ;;  %v1974_v22 = vsel %vm341_vm2, %v904_v9, %v1798_v54 }
 0x14e   : > { %2435 = vst.msk [vmem:[%s2742_s28 + $0x78] sm:$0xff] %vm2419_vm4, %v2331_v35  ;;  %v925_v36 = vrot.slane %v897_v11, %v2751_v5  ;;  %v927_v32 = vcombine.high %v911_v51, %v911_v51  ;;  %v1978_v41 = vsel %vm341_vm2, %v911_v51, %v1814_v53 }
 0x14f   : > { %v928_v19 = vcombine.high %v918_v63, %v918_v63  ;;  %v1975_v39 = vsel %vm341_vm2, %v918_v63, %v1802_v18  ;;  %v1976_v49 = vsel %vm341_vm2, %v926_v37, %v1806_v25 }
 0x150   : > { %v1979_v30 = vsel %vm341_vm2, %v925_v36, %v1818_v16  ;;  %v1980_v34 = vsel %vm341_vm2, %v927_v32, %v1822_v0  ;;  %v2366_v58 = vcombine.low %v1974_v22, %v1975_v39 }
 0x151   : > { %v1977_v21 = vsel %vm341_vm2, %v928_v19, %v1810_v62  ;;  %v2383_v55 = vcombine.low %v1978_v41, %v1979_v30  ;;  %v2397_v8 = vrot.slane %v1980_v34, %v2763_v31 }
 0x152   : > { %v2367_v47 = vcombine.low %v1976_v49, %v1977_v21  ;;  %v2374_v40 = vrot.slane %v2366_v58, %v2763_v31 }
 0x153   : > { %v2390_v5 = vrot.slane %v2383_v55, %v2763_v31 }
 0x154   : > { %v2381_v6 = vrot.slane %v2367_v47, %v2763_v31 }
 0x155   : > { %v2398_v26 = vcombine.low %v2390_v5, %v2397_v8 }
 0x156   : > { %v2382_v33 = vcombine.low %v2374_v40, %v2381_v6 }
 0x157   : > { %2440 = vst.msk [vmem:[%s2742_s28 + $0x98] sm:$0x3f] %vm2439_vm5, %v2398_v26 }
 0x158   : > { %2438 = vst.msk [vmem:[%s2742_s28 + $0x90] sm:$0xff] %vm2419_vm4, %v2382_v33 }
 0x159 PF: > { %s15_s14 = sadd.s32 1, %s2595_s14  }
 0x15a   : > { %p12_p4 = scmp.ge.s32.totalorder %s15_s14, 4  }
 0x15c   :  { %14 = sbr.rel (!%p12_p4) target bundleno = 3 (0x3), region = 62 }

</bundles_post_ra>
